<compile_context>
chip_gen: v5e
topology: v5e:2x2
jax: 0.10.0
libtpu: 0.0.40
codegen_flags: <defaults>
</compile_context>

<pallas_src>
import jax
import jax.numpy as jnp
from jax.experimental import pallas as pl
from jax.experimental.pallas import tpu as pltpu


def _round_up(n, m):
    return ((n + m - 1) // m) * m


def _full_spec(shape):
    nd = len(shape)

    def idx_map(i, _nd=nd):
        return (0,) * _nd

    return pl.BlockSpec(tuple(shape), idx_map)


# ----------------------------------------------------------------------------
# Static plan + hoisted parameter preparation.
# ----------------------------------------------------------------------------
def build_plan(raw, x_shape):
    B, C0, H0, W0 = (int(d) for d in x_shape)

    # fc weights: torch [out, in] -> [in, out], bias -> [1, out]
    fc = []
    feat = W0
    for (w, b) in raw["fc"]:
        out_f, in_f = int(w.shape[0]), int(w.shape[1])
        assert in_f == feat, "fc chain feature mismatch"
        fc.append((jnp.transpose(jnp.asarray(w)), jnp.asarray(b).reshape(1, -1)))
        feat = out_f

    convs = []
    H_in, W_in, C_in = H0, feat, C0
    for li, (wt, b, K, s, p) in enumerate(raw["convs"]):
        Cin, Cout = int(wt.shape[0]), int(wt.shape[1])
        assert Cin == C_in, "conv chain channel mismatch"
        Cin_p, Cout_p = _round_up(Cin, 8), _round_up(Cout, 8)
        pad = K - 1 - p
        assert pad >= 0, "padding > kernel_size - 1 not supported"

        Hd, Wd = (H_in - 1) * s + 1, (W_in - 1) * s + 1   # zero-dilated size
        Wp = Wd + 2 * pad                                 # padded width per row
        Ho = Hd + 2 * pad - (K - 1)                       # output height
        Wo = Wd + 2 * pad - (K - 1)                       # output width
        BW = B * Wp                                       # lanes per slab row
        M = Ho * BW                                       # valid output lanes
        Mp = _round_up(M, 128)                            # lane-dense width
        off_max = (K - 1) * BW + (K - 1)
        L = _round_up(off_max + Mp, BW)                   # slab length (lanes)

        # Review correctness concern: the slack / junk-column arguments are
        # load-bearing -- assert them statically.
        assert off_max + Mp <= L, "tap slice would read out of the slab"
        assert Wp - Wo >= K - 1, "kw wrap would leak into valid output columns"

        offsets = tuple(kh * BW + kw for kh in range(K) for kw in range(K))

        # Flipped per-tap weight matrices [K*K, Cout_p, Cin_p], bias column.
        wf = jnp.asarray(wt)[:, :, ::-1, ::-1]
        w_taps = jnp.transpose(wf, (2, 3, 1, 0)).reshape(K * K, Cout, Cin)
        w_taps = jnp.pad(w_taps, ((0, 0), (0, Cout_p - Cout), (0, Cin_p - Cin)))
        b_col = jnp.pad(jnp.asarray(b), (0, Cout_p - Cout)).reshape(Cout_p, 1)

        # One-hot placement matrix doing W-dilation + edge-pad offset
        # (+ junk-column crop for layers after the first).
        if li == 0:
            r = jnp.arange(W_in)[:, None]
            c = jnp.arange(Wp)[None, :]
            dil = (c == pad + s * r).astype(jnp.float32)              # [W_in, Wp]
        else:
            pv = convs[-1]
            r = jnp.arange(B * pv["Wp"])
            b_idx, wo_idx = r // pv["Wp"], r % pv["Wp"]
            tgt = b_idx * Wp + pad + s * wo_idx
            valid = wo_idx < pv["Wo"]
            c = jnp.arange(BW)[None, :]
            dil = ((c == tgt[:, None]) & valid[:, None]).astype(jnp.float32)

        convs.append(dict(K=K, s=s, p=p, pad=pad, Cin=Cin, Cin_p=Cin_p,
                          Cout=Cout, Cout_p=Cout_p, Wp=Wp, Ho=Ho, Wo=Wo,
                          BW=BW, M=M, Mp=Mp, L=L, offsets=offsets,
                          H_in=H_in, W_in=W_in,
                          w_taps=w_taps, b_col=b_col, dil=dil))
        H_in, W_in, C_in = Ho, Wo, Cout

    out_shape = (B, convs[-1]["Cout"], convs[-1]["Ho"], convs[-1]["Wo"])
    return dict(B=B, C0=C0, H0=H0, W0=W0, fc=fc, convs=convs,
                out_shape=out_shape)


# ----------------------------------------------------------------------------
# The single fused kernel (fc stack + all ConvTranspose2d layers + layout).
# ----------------------------------------------------------------------------
def _make_kernel(plan):
    B, C0, H0, W0 = plan["B"], plan["C0"], plan["H0"], plan["W0"]
    fc_n = len(plan["fc"])
    static_keys = ("K", "s", "pad", "Wp", "Wo", "Ho", "BW", "Mp", "L",
                   "Cin", "Cin_p", "Cout", "Cout_p", "offsets")
    statics = [{k: cv[k] for k in static_keys} for cv in plan["convs"]]
    n_conv = len(statics)
    CHUNK = 640          # lane chunk (multiple of 128): bounds live vregs.

    def kernel(*refs):
        pos = 0
        x_ref = refs[pos]; pos += 1
        fc_refs = [(refs[pos + 2 * i], refs[pos + 2 * i + 1]) for i in range(fc_n)]
        pos += 2 * fc_n
        cv_refs = [(refs[pos + 3 * i], refs[pos + 3 * i + 1], refs[pos + 3 * i + 2])
                   for i in range(n_conv)]
        pos += 3 * n_conv
        out_ref = refs[pos]; pos += 1
        yd_ref = refs[pos]; pos += 1
        slab_refs = [refs[pos + 2 * i] for i in range(n_conv)]
        oscr_refs = [refs[pos + 2 * i + 1] for i in range(n_conv)]

        # ---- fc stack: rows=(b,c,h), features on lanes; never stored to HBM.
        h = x_ref[...].reshape(B * C0 * H0, W0)
        for (w_ref, b_ref) in fc_refs:
            h = jnp.maximum(
                jnp.dot(h, w_ref[...], preferred_element_type=jnp.float32)
                + b_ref[...], 0.0)

        # ---- transposed-conv chain, everything VMEM-resident.
        for li in range(n_conv):
            cv = statics[li]
            wt_ref, bc_ref, dil_ref = cv_refs[li]
            slab_ref, out_scr = slab_refs[li], oscr_refs[li]
            K, s, pad = cv["K"], cv["s"], cv["pad"]
            Wp, BW, Mp = cv["Wp"], cv["BW"], cv["Mp"]

            # Zero slab: supplies edge padding, dilation zeros, channel pad.
            slab_ref[...] = jnp.zeros_like(slab_ref)

            if li == 0:
                # fc output -> slab: W-dilation via one one-hot GEMM, then
                # per-(h, b) row stores.  This also folds the NCHW -> internal
                # (channel-major) layout change into the kernel.
                yd = jnp.dot(h, dil_ref[...], preferred_element_type=jnp.float32)
                yd_ref[...] = yd.reshape(B, C0, H0, Wp)
                for hh in range(H0):
                    base = (pad + s * hh) * BW
                    for b in range(B):
                        slab_ref[0:C0, pl.ds(base + b * Wp, Wp)] = \
                            yd_ref[b, :, hh, :]
            else:
                # Previous conv output (lane-flat [Cp, (ho, b, wp)]) -> slab:
                # one one-hot GEMM per row does W-dilation + junk-column crop
                # + edge padding; row store does the H-dilation placement.
                pv = statics[li - 1]
                prev_out = oscr_refs[li - 1]
                dil = dil_ref[...]
                for ho in range(pv["Ho"]):
                    grp = prev_out[:, pl.ds(ho * pv["BW"], pv["BW"])]
                    row = jnp.dot(grp, dil, preferred_element_type=jnp.float32)
                    slab_ref[:, pl.ds((pad + s * ho) * BW, BW)] = row

            # Conv GEMM: K*K tap dots per lane chunk, fused bias (+ReLU).
            relu = li < n_conv - 1
            for c0 in range(0, Mp, CHUNK):
                cw = min(CHUNK, Mp - c0)
                acc = jnp.dot(wt_ref[0],
                              slab_ref[:, pl.ds(cv["offsets"][0] + c0, cw)],
                              preferred_element_type=jnp.float32)
                for t in range(1, K * K):
                    acc = acc + jnp.dot(
                        wt_ref[t],
                        slab_ref[:, pl.ds(cv["offsets"][t] + c0, cw)],
                        preferred_element_type=jnp.float32)
                acc = acc + bc_ref[...]
                if relu:
                    acc = jnp.maximum(acc, 0.0)
                out_scr[:, pl.ds(c0, cw)] = acc

        # ---- final store: crop + internal->NCHW fold-in (no XLA epilogue).
        lv = statics[-1]
        out_scr = oscr_refs[-1]
        for ho in range(lv["Ho"]):
            for b in range(B):
                out_ref[b, :, ho, :] = out_scr[
                    0:lv["Cout"],
                    pl.ds(ho * lv["BW"] + b * lv["Wp"], lv["Wo"])]

    return kernel


# ----------------------------------------------------------------------------
# Wrapper: one pallas_call for the whole forward.
# ----------------------------------------------------------------------------
def make_forward(raw, x_shape):
    plan = build_plan(raw, x_shape)
    B, C0, H0 = plan["B"], plan["C0"], plan["H0"]
    convs = plan["convs"]

    args = []
    for (w, b) in plan["fc"]:
        args += [w, b]
    for cv in convs:
        args += [cv["w_taps"], cv["b_col"], cv["dil"]]

    in_specs = [_full_spec(x_shape)] + [_full_spec(a.shape) for a in args]

    scratch_shapes = [pltpu.VMEM((B, C0, H0, convs[0]["Wp"]), jnp.float32)]
    for cv in convs:
        scratch_shapes.append(pltpu.VMEM((cv["Cin_p"], cv["L"]), jnp.float32))
        scratch_shapes.append(pltpu.VMEM((cv["Cout_p"], cv["Mp"]), jnp.float32))

    call = pl.pallas_call(
        _make_kernel(plan),
        out_shape=jax.ShapeDtypeStruct(plan["out_shape"], jnp.float32),
        grid=(1,),
        in_specs=in_specs,
        out_specs=_full_spec(plan["out_shape"]),
        scratch_shapes=scratch_shapes,
        compiler_params=pltpu.CompilerParams(
            dimension_semantics=("arbitrary",)),
    )

    def forward(x):
        return call(x, *args)

    return jax.jit(forward)


# ----------------------------------------------------------------------------
# Synthetic parameters (PyTorch layouts) and a pure-JAX reference.
# ----------------------------------------------------------------------------
def make_params(key):
    ks = jax.random.split(key, 8)
    sc = 0.1
    # fc: Linear(8->16), Linear(16->8); torch layout weight [out, in], bias [out]
    fc = [
        (sc * jax.random.normal(ks[0], (16, 8), jnp.float32),
         sc * jax.random.normal(ks[1], (16,), jnp.float32)),
        (sc * jax.random.normal(ks[2], (8, 16), jnp.float32),
         sc * jax.random.normal(ks[3], (8,), jnp.float32)),
    ]
    # convs: (weight [Cin, Cout, K, K], bias [Cout], K, stride, padding)
    convs = [
        (sc * jax.random.normal(ks[4], (4, 8, 3, 3), jnp.float32),
         sc * jax.random.normal(ks[5], (8,), jnp.float32), 3, 2, 1),
        (sc * jax.random.normal(ks[6], (8, 3, 3, 3), jnp.float32),
         sc * jax.random.normal(ks[7], (3,), jnp.float32), 3, 2, 1),
    ]
    return {"fc": fc, "convs": convs}


def _conv_transpose_ref(x, wt, b, s, p):
    K = wt.shape[-1]
    w_conv = jnp.transpose(wt[:, :, ::-1, ::-1], (1, 0, 2, 3))   # [Cout,Cin,K,K]
    y = jax.lax.conv_general_dilated(
        x, w_conv, window_strides=(1, 1),
        padding=[(K - 1 - p, K - 1 - p)] * 2,
        lhs_dilation=(s, s), rhs_dilation=(1, 1),
        dimension_numbers=("NCHW", "OIHW", "NCHW"),
        precision=jax.lax.Precision.HIGHEST)
    return y + b.reshape(1, -1, 1, 1)


def inv_conv_net_reference(x, raw):
    for (w, b) in raw["fc"]:
        x = jax.nn.relu(
            jnp.matmul(x, w.T, precision=jax.lax.Precision.HIGHEST) + b)
    n = len(raw["convs"])
    for idx, (wt, b, _K, s, p) in enumerate(raw["convs"]):
        x = _conv_transpose_ref(x, wt, b, s, p)
        if idx < n - 1:
            x = jax.nn.relu(x)
    return x


if __name__ == "__main__":
    key = jax.random.PRNGKey(0)
    k_x, k_p = jax.random.split(key)
    # input: [B=2, C=n_channels[0]=4, H=8, W=input_size=8]  (NCHW)
    x = jax.random.normal(k_x, (2, 4, 8, 8), jnp.float32)
    raw = make_params(k_p)

    fwd = make_forward(raw, x.shape)       # all weight prep hoisted, 1 kernel
    y = jax.block_until_ready(fwd(x))

    # fc keeps [2,4,8,8]; ConvT1 -> [2,8,15,15]; ConvT2 -> [2,3,29,29]
    assert y.shape == (2, 3, 29, 29), y.shape
    assert y.dtype == jnp.float32
    assert bool(jnp.all(jnp.isfinite(y)))

    y_ref = jax.block_until_ready(
        jax.jit(lambda inp: inv_conv_net_reference(inp, raw))(x))
    assert bool(jnp.allclose(y, y_ref, rtol=5e-3, atol=5e-3)), \
        "mismatch vs reference"

    print("KERNEL_OK")
</pallas_src>

<mosaic_0001>
module attributes {stable_mosaic.version = 11 : i64} {
  func.func @kernel(%arg0: i32, %arg1: memref<2x4x8x8xf32, #tpu.memory_space<vmem>>, %arg2: memref<8x16xf32, #tpu.memory_space<vmem>>, %arg3: memref<1x16xf32, #tpu.memory_space<vmem>>, %arg4: memref<16x8xf32, #tpu.memory_space<vmem>>, %arg5: memref<1x8xf32, #tpu.memory_space<vmem>>, %arg6: memref<9x8x8xf32, #tpu.memory_space<vmem>>, %arg7: memref<8x1xf32, #tpu.memory_space<vmem>>, %arg8: memref<8x17xf32, #tpu.memory_space<vmem>>, %arg9: memref<9x8x8xf32, #tpu.memory_space<vmem>>, %arg10: memref<8x1xf32, #tpu.memory_space<vmem>>, %arg11: memref<34x62xf32, #tpu.memory_space<vmem>>, %arg12: memref<2x3x29x29xf32, #tpu.memory_space<vmem>>, %arg13: memref<2x4x8x17xf32, #tpu.memory_space<vmem>>, %arg14: memref<8x612xf32, #tpu.memory_space<vmem>>, %arg15: memref<8x512xf32, #tpu.memory_space<vmem>>, %arg16: memref<8x2046xf32, #tpu.memory_space<vmem>>, %arg17: memref<8x1920xf32, #tpu.memory_space<vmem>>) attributes {dimension_semantics = [#tpu.dimension_semantics<arbitrary>], iteration_bounds = array<i64: 1>, scalar_prefetch = 0 : i64, scratch_operands = 5 : i64, tpu.core_type = #tpu.core_type<tc>, window_params = [{pipeline_mode = #tpu.pipeline_mode<synchronous>, transform_indices = @transform_0, window_bounds = array<i64: 2, 4, 8, 8>}, {pipeline_mode = #tpu.pipeline_mode<synchronous>, transform_indices = @transform_1, window_bounds = array<i64: 8, 16>}, {pipeline_mode = #tpu.pipeline_mode<synchronous>, transform_indices = @transform_2, window_bounds = array<i64: 1, 16>}, {pipeline_mode = #tpu.pipeline_mode<synchronous>, transform_indices = @transform_3, window_bounds = array<i64: 16, 8>}, {pipeline_mode = #tpu.pipeline_mode<synchronous>, transform_indices = @transform_4, window_bounds = array<i64: 1, 8>}, {pipeline_mode = #tpu.pipeline_mode<synchronous>, transform_indices = @transform_5, window_bounds = array<i64: 9, 8, 8>}, {pipeline_mode = #tpu.pipeline_mode<synchronous>, transform_indices = @transform_6, window_bounds = array<i64: 8, 1>}, {pipeline_mode = #tpu.pipeline_mode<synchronous>, transform_indices = @transform_7, window_bounds = array<i64: 8, 17>}, {pipeline_mode = #tpu.pipeline_mode<synchronous>, transform_indices = @transform_8, window_bounds = array<i64: 9, 8, 8>}, {pipeline_mode = #tpu.pipeline_mode<synchronous>, transform_indices = @transform_9, window_bounds = array<i64: 8, 1>}, {pipeline_mode = #tpu.pipeline_mode<synchronous>, transform_indices = @transform_10, window_bounds = array<i64: 34, 62>}, {pipeline_mode = #tpu.pipeline_mode<synchronous>, transform_indices = @transform_11, window_bounds = array<i64: 2, 3, 29, 29>}]} {
    %c0 = arith.constant 0 : index
    %c0_0 = arith.constant 0 : index
    %c0_1 = arith.constant 0 : index
    %c0_2 = arith.constant 0 : index
    %0 = vector.load %arg1[%c0, %c0_0, %c0_1, %c0_2] : memref<2x4x8x8xf32, #tpu.memory_space<vmem>>, vector<2x4x8x8xf32>
    %1 = vector.shape_cast %0 : vector<2x4x8x8xf32> to vector<64x8xf32>
    %c0_3 = arith.constant 0 : index
    %c0_4 = arith.constant 0 : index
    %2 = vector.load %arg2[%c0_3, %c0_4] : memref<8x16xf32, #tpu.memory_space<vmem>>, vector<8x16xf32>
    %cst = arith.constant dense<0.000000e+00> : vector<64x16xf32>
    %3 = tpu.matmul %1, %2, %cst {dimension_numbers = #tpu.dot_dimension_numbers<[1], [0], [0], [1], [0, 0, 1, 1], [], []>} : vector<64x8xf32>, vector<8x16xf32>, vector<64x16xf32> -> vector<64x16xf32>
    %c0_5 = arith.constant 0 : index
    %c0_6 = arith.constant 0 : index
    %4 = vector.load %arg3[%c0_5, %c0_6] : memref<1x16xf32, #tpu.memory_space<vmem>>, vector<1x16xf32>
    %5 = vector.broadcast %4 : vector<1x16xf32> to vector<64x16xf32>
    %6 = arith.addf %3, %5 : vector<64x16xf32>
    %cst_7 = arith.constant 0.000000e+00 : f32
    %7 = vector.broadcast %cst_7 : f32 to vector<64x16xf32>
    %8 = arith.maximumf %6, %7 : vector<64x16xf32>
    %c0_8 = arith.constant 0 : index
    %c0_9 = arith.constant 0 : index
    %9 = vector.load %arg4[%c0_8, %c0_9] : memref<16x8xf32, #tpu.memory_space<vmem>>, vector<16x8xf32>
    %cst_10 = arith.constant dense<0.000000e+00> : vector<64x8xf32>
    %10 = tpu.matmul %8, %9, %cst_10 {dimension_numbers = #tpu.dot_dimension_numbers<[1], [0], [0], [1], [0, 0, 1, 1], [], []>} : vector<64x16xf32>, vector<16x8xf32>, vector<64x8xf32> -> vector<64x8xf32>
    %c0_11 = arith.constant 0 : index
    %c0_12 = arith.constant 0 : index
    %11 = vector.load %arg5[%c0_11, %c0_12] : memref<1x8xf32, #tpu.memory_space<vmem>>, vector<1x8xf32>
    %12 = vector.broadcast %11 : vector<1x8xf32> to vector<64x8xf32>
    %13 = arith.addf %10, %12 : vector<64x8xf32>
    %cst_13 = arith.constant 0.000000e+00 : f32
    %14 = vector.broadcast %cst_13 : f32 to vector<64x8xf32>
    %15 = arith.maximumf %13, %14 : vector<64x8xf32>
    %cst_14 = arith.constant 0.000000e+00 : f32
    %16 = vector.broadcast %cst_14 : f32 to vector<8x612xf32>
    %c0_15 = arith.constant 0 : index
    %c0_16 = arith.constant 0 : index
    %17 = vector.load %arg14[%c0_15, %c0_16] : memref<8x612xf32, #tpu.memory_space<vmem>>, vector<8x612xf32>
    tpu.vector_store %arg14[%c0_15, %c0_16], %16 {strides = array<i32>} : memref<8x612xf32, #tpu.memory_space<vmem>>, vector<8x612xf32>,
    %c0_17 = arith.constant 0 : index
    %c0_18 = arith.constant 0 : index
    %18 = vector.load %arg8[%c0_17, %c0_18] : memref<8x17xf32, #tpu.memory_space<vmem>>, vector<8x17xf32>
    %cst_19 = arith.constant dense<0.000000e+00> : vector<64x17xf32>
    %19 = tpu.matmul %15, %18, %cst_19 {dimension_numbers = #tpu.dot_dimension_numbers<[1], [0], [0], [1], [0, 0, 1, 1], [], []>} : vector<64x8xf32>, vector<8x17xf32>, vector<64x17xf32> -> vector<64x17xf32>
    %20 = vector.shape_cast %19 : vector<64x17xf32> to vector<2x4x8x17xf32>
    %c0_20 = arith.constant 0 : index
    %c0_21 = arith.constant 0 : index
    %c0_22 = arith.constant 0 : index
    %c0_23 = arith.constant 0 : index
    %21 = vector.load %arg13[%c0_20, %c0_21, %c0_22, %c0_23] : memref<2x4x8x17xf32, #tpu.memory_space<vmem>>, vector<2x4x8x17xf32>
    tpu.vector_store %arg13[%c0_20, %c0_21, %c0_22, %c0_23], %20 {strides = array<i32>} : memref<2x4x8x17xf32, #tpu.memory_space<vmem>>, vector<2x4x8x17xf32>,
    %c0_24 = arith.constant 0 : index
    %c0_25 = arith.constant 0 : index
    %c0_26 = arith.constant 0 : index
    %c0_27 = arith.constant 0 : index
    %22 = vector.load %arg13[%c0_24, %c0_25, %c0_26, %c0_27] : memref<2x4x8x17xf32, #tpu.memory_space<vmem>>, vector<1x4x1x17xf32>
    %23 = vector.shape_cast %22 : vector<1x4x1x17xf32> to vector<4x17xf32>
    %c0_28 = arith.constant 0 : index
    %c34 = arith.constant 34 : index
    %24 = vector.load %arg14[%c0_28, %c34] : memref<8x612xf32, #tpu.memory_space<vmem>>, vector<4x17xf32>
    tpu.vector_store %arg14[%c0_28, %c34], %23 {strides = array<i32>} : memref<8x612xf32, #tpu.memory_space<vmem>>, vector<4x17xf32>,
    %c1 = arith.constant 1 : index
    %c0_29 = arith.constant 0 : index
    %c0_30 = arith.constant 0 : index
    %c0_31 = arith.constant 0 : index
    %25 = vector.load %arg13[%c1, %c0_29, %c0_30, %c0_31] : memref<2x4x8x17xf32, #tpu.memory_space<vmem>>, vector<1x4x1x17xf32>
    %26 = vector.shape_cast %25 : vector<1x4x1x17xf32> to vector<4x17xf32>
    %c0_32 = arith.constant 0 : index
    %c51 = arith.constant 51 : index
    %27 = vector.load %arg14[%c0_32, %c51] : memref<8x612xf32, #tpu.memory_space<vmem>>, vector<4x17xf32>
    tpu.vector_store %arg14[%c0_32, %c51], %26 {strides = array<i32>} : memref<8x612xf32, #tpu.memory_space<vmem>>, vector<4x17xf32>,
    %c0_33 = arith.constant 0 : index
    %c0_34 = arith.constant 0 : index
    %c1_35 = arith.constant 1 : index
    %c0_36 = arith.constant 0 : index
    %28 = vector.load %arg13[%c0_33, %c0_34, %c1_35, %c0_36] : memref<2x4x8x17xf32, #tpu.memory_space<vmem>>, vector<1x4x1x17xf32>
    %29 = vector.shape_cast %28 : vector<1x4x1x17xf32> to vector<4x17xf32>
    %c0_37 = arith.constant 0 : index
    %c102 = arith.constant 102 : index
    %30 = vector.load %arg14[%c0_37, %c102] : memref<8x612xf32, #tpu.memory_space<vmem>>, vector<4x17xf32>
    tpu.vector_store %arg14[%c0_37, %c102], %29 {strides = array<i32>} : memref<8x612xf32, #tpu.memory_space<vmem>>, vector<4x17xf32>,
    %c1_38 = arith.constant 1 : index
    %c0_39 = arith.constant 0 : index
    %c1_40 = arith.constant 1 : index
    %c0_41 = arith.constant 0 : index
    %31 = vector.load %arg13[%c1_38, %c0_39, %c1_40, %c0_41] : memref<2x4x8x17xf32, #tpu.memory_space<vmem>>, vector<1x4x1x17xf32>
    %32 = vector.shape_cast %31 : vector<1x4x1x17xf32> to vector<4x17xf32>
    %c0_42 = arith.constant 0 : index
    %c119 = arith.constant 119 : index
    %33 = vector.load %arg14[%c0_42, %c119] : memref<8x612xf32, #tpu.memory_space<vmem>>, vector<4x17xf32>
    tpu.vector_store %arg14[%c0_42, %c119], %32 {strides = array<i32>} : memref<8x612xf32, #tpu.memory_space<vmem>>, vector<4x17xf32>,
    %c0_43 = arith.constant 0 : index
    %c0_44 = arith.constant 0 : index
    %c2 = arith.constant 2 : index
    %c0_45 = arith.constant 0 : index
    %34 = vector.load %arg13[%c0_43, %c0_44, %c2, %c0_45] : memref<2x4x8x17xf32, #tpu.memory_space<vmem>>, vector<1x4x1x17xf32>
    %35 = vector.shape_cast %34 : vector<1x4x1x17xf32> to vector<4x17xf32>
    %c0_46 = arith.constant 0 : index
    %c170 = arith.constant 170 : index
    %36 = vector.load %arg14[%c0_46, %c170] : memref<8x612xf32, #tpu.memory_space<vmem>>, vector<4x17xf32>
    tpu.vector_store %arg14[%c0_46, %c170], %35 {strides = array<i32>} : memref<8x612xf32, #tpu.memory_space<vmem>>, vector<4x17xf32>,
    %c1_47 = arith.constant 1 : index
    %c0_48 = arith.constant 0 : index
    %c2_49 = arith.constant 2 : index
    %c0_50 = arith.constant 0 : index
    %37 = vector.load %arg13[%c1_47, %c0_48, %c2_49, %c0_50] : memref<2x4x8x17xf32, #tpu.memory_space<vmem>>, vector<1x4x1x17xf32>
    %38 = vector.shape_cast %37 : vector<1x4x1x17xf32> to vector<4x17xf32>
    %c0_51 = arith.constant 0 : index
    %c187 = arith.constant 187 : index
    %39 = vector.load %arg14[%c0_51, %c187] : memref<8x612xf32, #tpu.memory_space<vmem>>, vector<4x17xf32>
    tpu.vector_store %arg14[%c0_51, %c187], %38 {strides = array<i32>} : memref<8x612xf32, #tpu.memory_space<vmem>>, vector<4x17xf32>,
    %c0_52 = arith.constant 0 : index
    %c0_53 = arith.constant 0 : index
    %c3 = arith.constant 3 : index
    %c0_54 = arith.constant 0 : index
    %40 = vector.load %arg13[%c0_52, %c0_53, %c3, %c0_54] : memref<2x4x8x17xf32, #tpu.memory_space<vmem>>, vector<1x4x1x17xf32>
    %41 = vector.shape_cast %40 : vector<1x4x1x17xf32> to vector<4x17xf32>
    %c0_55 = arith.constant 0 : index
    %c238 = arith.constant 238 : index
    %42 = vector.load %arg14[%c0_55, %c238] : memref<8x612xf32, #tpu.memory_space<vmem>>, vector<4x17xf32>
    tpu.vector_store %arg14[%c0_55, %c238], %41 {strides = array<i32>} : memref<8x612xf32, #tpu.memory_space<vmem>>, vector<4x17xf32>,
    %c1_56 = arith.constant 1 : index
    %c0_57 = arith.constant 0 : index
    %c3_58 = arith.constant 3 : index
    %c0_59 = arith.constant 0 : index
    %43 = vector.load %arg13[%c1_56, %c0_57, %c3_58, %c0_59] : memref<2x4x8x17xf32, #tpu.memory_space<vmem>>, vector<1x4x1x17xf32>
    %44 = vector.shape_cast %43 : vector<1x4x1x17xf32> to vector<4x17xf32>
    %c0_60 = arith.constant 0 : index
    %c255 = arith.constant 255 : index
    %45 = vector.load %arg14[%c0_60, %c255] : memref<8x612xf32, #tpu.memory_space<vmem>>, vector<4x17xf32>
    tpu.vector_store %arg14[%c0_60, %c255], %44 {strides = array<i32>} : memref<8x612xf32, #tpu.memory_space<vmem>>, vector<4x17xf32>,
    %c0_61 = arith.constant 0 : index
    %c0_62 = arith.constant 0 : index
    %c4 = arith.constant 4 : index
    %c0_63 = arith.constant 0 : index
    %46 = vector.load %arg13[%c0_61, %c0_62, %c4, %c0_63] : memref<2x4x8x17xf32, #tpu.memory_space<vmem>>, vector<1x4x1x17xf32>
    %47 = vector.shape_cast %46 : vector<1x4x1x17xf32> to vector<4x17xf32>
    %c0_64 = arith.constant 0 : index
    %c306 = arith.constant 306 : index
    %48 = vector.load %arg14[%c0_64, %c306] : memref<8x612xf32, #tpu.memory_space<vmem>>, vector<4x17xf32>
    tpu.vector_store %arg14[%c0_64, %c306], %47 {strides = array<i32>} : memref<8x612xf32, #tpu.memory_space<vmem>>, vector<4x17xf32>,
    %c1_65 = arith.constant 1 : index
    %c0_66 = arith.constant 0 : index
    %c4_67 = arith.constant 4 : index
    %c0_68 = arith.constant 0 : index
    %49 = vector.load %arg13[%c1_65, %c0_66, %c4_67, %c0_68] : memref<2x4x8x17xf32, #tpu.memory_space<vmem>>, vector<1x4x1x17xf32>
    %50 = vector.shape_cast %49 : vector<1x4x1x17xf32> to vector<4x17xf32>
    %c0_69 = arith.constant 0 : index
    %c323 = arith.constant 323 : index
    %51 = vector.load %arg14[%c0_69, %c323] : memref<8x612xf32, #tpu.memory_space<vmem>>, vector<4x17xf32>
    tpu.vector_store %arg14[%c0_69, %c323], %50 {strides = array<i32>} : memref<8x612xf32, #tpu.memory_space<vmem>>, vector<4x17xf32>,
    %c0_70 = arith.constant 0 : index
    %c0_71 = arith.constant 0 : index
    %c5 = arith.constant 5 : index
    %c0_72 = arith.constant 0 : index
    %52 = vector.load %arg13[%c0_70, %c0_71, %c5, %c0_72] : memref<2x4x8x17xf32, #tpu.memory_space<vmem>>, vector<1x4x1x17xf32>
    %53 = vector.shape_cast %52 : vector<1x4x1x17xf32> to vector<4x17xf32>
    %c0_73 = arith.constant 0 : index
    %c374 = arith.constant 374 : index
    %54 = vector.load %arg14[%c0_73, %c374] : memref<8x612xf32, #tpu.memory_space<vmem>>, vector<4x17xf32>
    tpu.vector_store %arg14[%c0_73, %c374], %53 {strides = array<i32>} : memref<8x612xf32, #tpu.memory_space<vmem>>, vector<4x17xf32>,
    %c1_74 = arith.constant 1 : index
    %c0_75 = arith.constant 0 : index
    %c5_76 = arith.constant 5 : index
    %c0_77 = arith.constant 0 : index
    %55 = vector.load %arg13[%c1_74, %c0_75, %c5_76, %c0_77] : memref<2x4x8x17xf32, #tpu.memory_space<vmem>>, vector<1x4x1x17xf32>
    %56 = vector.shape_cast %55 : vector<1x4x1x17xf32> to vector<4x17xf32>
    %c0_78 = arith.constant 0 : index
    %c391 = arith.constant 391 : index
    %57 = vector.load %arg14[%c0_78, %c391] : memref<8x612xf32, #tpu.memory_space<vmem>>, vector<4x17xf32>
    tpu.vector_store %arg14[%c0_78, %c391], %56 {strides = array<i32>} : memref<8x612xf32, #tpu.memory_space<vmem>>, vector<4x17xf32>,
    %c0_79 = arith.constant 0 : index
    %c0_80 = arith.constant 0 : index
    %c6 = arith.constant 6 : index
    %c0_81 = arith.constant 0 : index
    %58 = vector.load %arg13[%c0_79, %c0_80, %c6, %c0_81] : memref<2x4x8x17xf32, #tpu.memory_space<vmem>>, vector<1x4x1x17xf32>
    %59 = vector.shape_cast %58 : vector<1x4x1x17xf32> to vector<4x17xf32>
    %c0_82 = arith.constant 0 : index
    %c442 = arith.constant 442 : index
    %60 = vector.load %arg14[%c0_82, %c442] : memref<8x612xf32, #tpu.memory_space<vmem>>, vector<4x17xf32>
    tpu.vector_store %arg14[%c0_82, %c442], %59 {strides = array<i32>} : memref<8x612xf32, #tpu.memory_space<vmem>>, vector<4x17xf32>,
    %c1_83 = arith.constant 1 : index
    %c0_84 = arith.constant 0 : index
    %c6_85 = arith.constant 6 : index
    %c0_86 = arith.constant 0 : index
    %61 = vector.load %arg13[%c1_83, %c0_84, %c6_85, %c0_86] : memref<2x4x8x17xf32, #tpu.memory_space<vmem>>, vector<1x4x1x17xf32>
    %62 = vector.shape_cast %61 : vector<1x4x1x17xf32> to vector<4x17xf32>
    %c0_87 = arith.constant 0 : index
    %c459 = arith.constant 459 : index
    %63 = vector.load %arg14[%c0_87, %c459] : memref<8x612xf32, #tpu.memory_space<vmem>>, vector<4x17xf32>
    tpu.vector_store %arg14[%c0_87, %c459], %62 {strides = array<i32>} : memref<8x612xf32, #tpu.memory_space<vmem>>, vector<4x17xf32>,
    %c0_88 = arith.constant 0 : index
    %c0_89 = arith.constant 0 : index
    %c7 = arith.constant 7 : index
    %c0_90 = arith.constant 0 : index
    %64 = vector.load %arg13[%c0_88, %c0_89, %c7, %c0_90] : memref<2x4x8x17xf32, #tpu.memory_space<vmem>>, vector<1x4x1x17xf32>
    %65 = vector.shape_cast %64 : vector<1x4x1x17xf32> to vector<4x17xf32>
    %c0_91 = arith.constant 0 : index
    %c510 = arith.constant 510 : index
    %66 = vector.load %arg14[%c0_91, %c510] : memref<8x612xf32, #tpu.memory_space<vmem>>, vector<4x17xf32>
    tpu.vector_store %arg14[%c0_91, %c510], %65 {strides = array<i32>} : memref<8x612xf32, #tpu.memory_space<vmem>>, vector<4x17xf32>,
    %c1_92 = arith.constant 1 : index
    %c0_93 = arith.constant 0 : index
    %c7_94 = arith.constant 7 : index
    %c0_95 = arith.constant 0 : index
    %67 = vector.load %arg13[%c1_92, %c0_93, %c7_94, %c0_95] : memref<2x4x8x17xf32, #tpu.memory_space<vmem>>, vector<1x4x1x17xf32>
    %68 = vector.shape_cast %67 : vector<1x4x1x17xf32> to vector<4x17xf32>
    %c0_96 = arith.constant 0 : index
    %c527 = arith.constant 527 : index
    %69 = vector.load %arg14[%c0_96, %c527] : memref<8x612xf32, #tpu.memory_space<vmem>>, vector<4x17xf32>
    tpu.vector_store %arg14[%c0_96, %c527], %68 {strides = array<i32>} : memref<8x612xf32, #tpu.memory_space<vmem>>, vector<4x17xf32>,
    %c0_97 = arith.constant 0 : index
    %c0_98 = arith.constant 0 : index
    %c0_99 = arith.constant 0 : index
    %70 = vector.load %arg6[%c0_97, %c0_98, %c0_99] : memref<9x8x8xf32, #tpu.memory_space<vmem>>, vector<1x8x8xf32>
    %71 = vector.shape_cast %70 : vector<1x8x8xf32> to vector<8x8xf32>
    %c0_100 = arith.constant 0 : index
    %c0_101 = arith.constant 0 : index
    %72 = vector.load %arg14[%c0_100, %c0_101] : memref<8x612xf32, #tpu.memory_space<vmem>>, vector<8x512xf32>
    %cst_102 = arith.constant dense<0.000000e+00> : vector<8x512xf32>
    %73 = tpu.matmul %71, %72, %cst_102 {dimension_numbers = #tpu.dot_dimension_numbers<[1], [0], [0], [1], [0, 0, 1, 1], [], []>} : vector<8x8xf32>, vector<8x512xf32>, vector<8x512xf32> -> vector<8x512xf32>
    %c1_103 = arith.constant 1 : index
    %c0_104 = arith.constant 0 : index
    %c0_105 = arith.constant 0 : index
    %74 = vector.load %arg6[%c1_103, %c0_104, %c0_105] : memref<9x8x8xf32, #tpu.memory_space<vmem>>, vector<1x8x8xf32>
    %75 = vector.shape_cast %74 : vector<1x8x8xf32> to vector<8x8xf32>
    %c0_106 = arith.constant 0 : index
    %c1_107 = arith.constant 1 : index
    %76 = vector.load %arg14[%c0_106, %c1_107] : memref<8x612xf32, #tpu.memory_space<vmem>>, vector<8x512xf32>
    %cst_108 = arith.constant dense<0.000000e+00> : vector<8x512xf32>
    %77 = tpu.matmul %75, %76, %cst_108 {dimension_numbers = #tpu.dot_dimension_numbers<[1], [0], [0], [1], [0, 0, 1, 1], [], []>} : vector<8x8xf32>, vector<8x512xf32>, vector<8x512xf32> -> vector<8x512xf32>
    %78 = arith.addf %73, %77 : vector<8x512xf32>
    %c2_109 = arith.constant 2 : index
    %c0_110 = arith.constant 0 : index
    %c0_111 = arith.constant 0 : index
    %79 = vector.load %arg6[%c2_109, %c0_110, %c0_111] : memref<9x8x8xf32, #tpu.memory_space<vmem>>, vector<1x8x8xf32>
    %80 = vector.shape_cast %79 : vector<1x8x8xf32> to vector<8x8xf32>
    %c0_112 = arith.constant 0 : index
    %c2_113 = arith.constant 2 : index
    %81 = vector.load %arg14[%c0_112, %c2_113] : memref<8x612xf32, #tpu.memory_space<vmem>>, vector<8x512xf32>
    %cst_114 = arith.constant dense<0.000000e+00> : vector<8x512xf32>
    %82 = tpu.matmul %80, %81, %cst_114 {dimension_numbers = #tpu.dot_dimension_numbers<[1], [0], [0], [1], [0, 0, 1, 1], [], []>} : vector<8x8xf32>, vector<8x512xf32>, vector<8x512xf32> -> vector<8x512xf32>
    %83 = arith.addf %78, %82 : vector<8x512xf32>
    %c3_115 = arith.constant 3 : index
    %c0_116 = arith.constant 0 : index
    %c0_117 = arith.constant 0 : index
    %84 = vector.load %arg6[%c3_115, %c0_116, %c0_117] : memref<9x8x8xf32, #tpu.memory_space<vmem>>, vector<1x8x8xf32>
    %85 = vector.shape_cast %84 : vector<1x8x8xf32> to vector<8x8xf32>
    %c0_118 = arith.constant 0 : index
    %c34_119 = arith.constant 34 : index
    %86 = vector.load %arg14[%c0_118, %c34_119] : memref<8x612xf32, #tpu.memory_space<vmem>>, vector<8x512xf32>
    %cst_120 = arith.constant dense<0.000000e+00> : vector<8x512xf32>
    %87 = tpu.matmul %85, %86, %cst_120 {dimension_numbers = #tpu.dot_dimension_numbers<[1], [0], [0], [1], [0, 0, 1, 1], [], []>} : vector<8x8xf32>, vector<8x512xf32>, vector<8x512xf32> -> vector<8x512xf32>
    %88 = arith.addf %83, %87 : vector<8x512xf32>
    %c4_121 = arith.constant 4 : index
    %c0_122 = arith.constant 0 : index
    %c0_123 = arith.constant 0 : index
    %89 = vector.load %arg6[%c4_121, %c0_122, %c0_123] : memref<9x8x8xf32, #tpu.memory_space<vmem>>, vector<1x8x8xf32>
    %90 = vector.shape_cast %89 : vector<1x8x8xf32> to vector<8x8xf32>
    %c0_124 = arith.constant 0 : index
    %c35 = arith.constant 35 : index
    %91 = vector.load %arg14[%c0_124, %c35] : memref<8x612xf32, #tpu.memory_space<vmem>>, vector<8x512xf32>
    %cst_125 = arith.constant dense<0.000000e+00> : vector<8x512xf32>
    %92 = tpu.matmul %90, %91, %cst_125 {dimension_numbers = #tpu.dot_dimension_numbers<[1], [0], [0], [1], [0, 0, 1, 1], [], []>} : vector<8x8xf32>, vector<8x512xf32>, vector<8x512xf32> -> vector<8x512xf32>
    %93 = arith.addf %88, %92 : vector<8x512xf32>
    %c5_126 = arith.constant 5 : index
    %c0_127 = arith.constant 0 : index
    %c0_128 = arith.constant 0 : index
    %94 = vector.load %arg6[%c5_126, %c0_127, %c0_128] : memref<9x8x8xf32, #tpu.memory_space<vmem>>, vector<1x8x8xf32>
    %95 = vector.shape_cast %94 : vector<1x8x8xf32> to vector<8x8xf32>
    %c0_129 = arith.constant 0 : index
    %c36 = arith.constant 36 : index
    %96 = vector.load %arg14[%c0_129, %c36] : memref<8x612xf32, #tpu.memory_space<vmem>>, vector<8x512xf32>
    %cst_130 = arith.constant dense<0.000000e+00> : vector<8x512xf32>
    %97 = tpu.matmul %95, %96, %cst_130 {dimension_numbers = #tpu.dot_dimension_numbers<[1], [0], [0], [1], [0, 0, 1, 1], [], []>} : vector<8x8xf32>, vector<8x512xf32>, vector<8x512xf32> -> vector<8x512xf32>
    %98 = arith.addf %93, %97 : vector<8x512xf32>
    %c6_131 = arith.constant 6 : index
    %c0_132 = arith.constant 0 : index
    %c0_133 = arith.constant 0 : index
    %99 = vector.load %arg6[%c6_131, %c0_132, %c0_133] : memref<9x8x8xf32, #tpu.memory_space<vmem>>, vector<1x8x8xf32>
    %100 = vector.shape_cast %99 : vector<1x8x8xf32> to vector<8x8xf32>
    %c0_134 = arith.constant 0 : index
    %c68 = arith.constant 68 : index
    %101 = vector.load %arg14[%c0_134, %c68] : memref<8x612xf32, #tpu.memory_space<vmem>>, vector<8x512xf32>
    %cst_135 = arith.constant dense<0.000000e+00> : vector<8x512xf32>
    %102 = tpu.matmul %100, %101, %cst_135 {dimension_numbers = #tpu.dot_dimension_numbers<[1], [0], [0], [1], [0, 0, 1, 1], [], []>} : vector<8x8xf32>, vector<8x512xf32>, vector<8x512xf32> -> vector<8x512xf32>
    %103 = arith.addf %98, %102 : vector<8x512xf32>
    %c7_136 = arith.constant 7 : index
    %c0_137 = arith.constant 0 : index
    %c0_138 = arith.constant 0 : index
    %104 = vector.load %arg6[%c7_136, %c0_137, %c0_138] : memref<9x8x8xf32, #tpu.memory_space<vmem>>, vector<1x8x8xf32>
    %105 = vector.shape_cast %104 : vector<1x8x8xf32> to vector<8x8xf32>
    %c0_139 = arith.constant 0 : index
    %c69 = arith.constant 69 : index
    %106 = vector.load %arg14[%c0_139, %c69] : memref<8x612xf32, #tpu.memory_space<vmem>>, vector<8x512xf32>
    %cst_140 = arith.constant dense<0.000000e+00> : vector<8x512xf32>
    %107 = tpu.matmul %105, %106, %cst_140 {dimension_numbers = #tpu.dot_dimension_numbers<[1], [0], [0], [1], [0, 0, 1, 1], [], []>} : vector<8x8xf32>, vector<8x512xf32>, vector<8x512xf32> -> vector<8x512xf32>
    %108 = arith.addf %103, %107 : vector<8x512xf32>
    %c8 = arith.constant 8 : index
    %c0_141 = arith.constant 0 : index
    %c0_142 = arith.constant 0 : index
    %109 = vector.load %arg6[%c8, %c0_141, %c0_142] : memref<9x8x8xf32, #tpu.memory_space<vmem>>, vector<1x8x8xf32>
    %110 = vector.shape_cast %109 : vector<1x8x8xf32> to vector<8x8xf32>
    %c0_143 = arith.constant 0 : index
    %c70 = arith.constant 70 : index
    %111 = vector.load %arg14[%c0_143, %c70] : memref<8x612xf32, #tpu.memory_space<vmem>>, vector<8x512xf32>
    %cst_144 = arith.constant dense<0.000000e+00> : vector<8x512xf32>
    %112 = tpu.matmul %110, %111, %cst_144 {dimension_numbers = #tpu.dot_dimension_numbers<[1], [0], [0], [1], [0, 0, 1, 1], [], []>} : vector<8x8xf32>, vector<8x512xf32>, vector<8x512xf32> -> vector<8x512xf32>
    %113 = arith.addf %108, %112 : vector<8x512xf32>
    %c0_145 = arith.constant 0 : index
    %c0_146 = arith.constant 0 : index
    %114 = vector.load %arg7[%c0_145, %c0_146] : memref<8x1xf32, #tpu.memory_space<vmem>>, vector<8x1xf32>
    %115 = vector.broadcast %114 : vector<8x1xf32> to vector<8x512xf32>
    %116 = arith.addf %113, %115 : vector<8x512xf32>
    %cst_147 = arith.constant 0.000000e+00 : f32
    %117 = vector.broadcast %cst_147 : f32 to vector<8x512xf32>
    %118 = arith.maximumf %116, %117 : vector<8x512xf32>
    %c0_148 = arith.constant 0 : index
    %c0_149 = arith.constant 0 : index
    %119 = vector.load %arg15[%c0_148, %c0_149] : memref<8x512xf32, #tpu.memory_space<vmem>>, vector<8x512xf32>
    tpu.vector_store %arg15[%c0_148, %c0_149], %118 {strides = array<i32>} : memref<8x512xf32, #tpu.memory_space<vmem>>, vector<8x512xf32>,
    %cst_150 = arith.constant 0.000000e+00 : f32
    %120 = vector.broadcast %cst_150 : f32 to vector<8x2046xf32>
    %c0_151 = arith.constant 0 : index
    %c0_152 = arith.constant 0 : index
    %121 = vector.load %arg16[%c0_151, %c0_152] : memref<8x2046xf32, #tpu.memory_space<vmem>>, vector<8x2046xf32>
    tpu.vector_store %arg16[%c0_151, %c0_152], %120 {strides = array<i32>} : memref<8x2046xf32, #tpu.memory_space<vmem>>, vector<8x2046xf32>,
    %c0_153 = arith.constant 0 : index
    %c0_154 = arith.constant 0 : index
    %122 = vector.load %arg11[%c0_153, %c0_154] : memref<34x62xf32, #tpu.memory_space<vmem>>, vector<34x62xf32>
    %c0_155 = arith.constant 0 : index
    %c0_156 = arith.constant 0 : index
    %123 = vector.load %arg15[%c0_155, %c0_156] : memref<8x512xf32, #tpu.memory_space<vmem>>, vector<8x34xf32>
    %cst_157 = arith.constant dense<0.000000e+00> : vector<8x62xf32>
    %124 = tpu.matmul %123, %122, %cst_157 {dimension_numbers = #tpu.dot_dimension_numbers<[1], [0], [0], [1], [0, 0, 1, 1], [], []>} : vector<8x34xf32>, vector<34x62xf32>, vector<8x62xf32> -> vector<8x62xf32>
    %c0_158 = arith.constant 0 : index
    %c62 = arith.constant 62 : index
    %125 = vector.load %arg16[%c0_158, %c62] : memref<8x2046xf32, #tpu.memory_space<vmem>>, vector<8x62xf32>
    tpu.vector_store %arg16[%c0_158, %c62], %124 {strides = array<i32>} : memref<8x2046xf32, #tpu.memory_space<vmem>>, vector<8x62xf32>,
    %c0_159 = arith.constant 0 : index
    %c34_160 = arith.constant 34 : index
    %126 = vector.load %arg15[%c0_159, %c34_160] : memref<8x512xf32, #tpu.memory_space<vmem>>, vector<8x34xf32>
    %cst_161 = arith.constant dense<0.000000e+00> : vector<8x62xf32>
    %127 = tpu.matmul %126, %122, %cst_161 {dimension_numbers = #tpu.dot_dimension_numbers<[1], [0], [0], [1], [0, 0, 1, 1], [], []>} : vector<8x34xf32>, vector<34x62xf32>, vector<8x62xf32> -> vector<8x62xf32>
    %c0_162 = arith.constant 0 : index
    %c186 = arith.constant 186 : index
    %128 = vector.load %arg16[%c0_162, %c186] : memref<8x2046xf32, #tpu.memory_space<vmem>>, vector<8x62xf32>
    tpu.vector_store %arg16[%c0_162, %c186], %127 {strides = array<i32>} : memref<8x2046xf32, #tpu.memory_space<vmem>>, vector<8x62xf32>,
    %c0_163 = arith.constant 0 : index
    %c68_164 = arith.constant 68 : index
    %129 = vector.load %arg15[%c0_163, %c68_164] : memref<8x512xf32, #tpu.memory_space<vmem>>, vector<8x34xf32>
    %cst_165 = arith.constant dense<0.000000e+00> : vector<8x62xf32>
    %130 = tpu.matmul %129, %122, %cst_165 {dimension_numbers = #tpu.dot_dimension_numbers<[1], [0], [0], [1], [0, 0, 1, 1], [], []>} : vector<8x34xf32>, vector<34x62xf32>, vector<8x62xf32> -> vector<8x62xf32>
    %c0_166 = arith.constant 0 : index
    %c310 = arith.constant 310 : index
    %131 = vector.load %arg16[%c0_166, %c310] : memref<8x2046xf32, #tpu.memory_space<vmem>>, vector<8x62xf32>
    tpu.vector_store %arg16[%c0_166, %c310], %130 {strides = array<i32>} : memref<8x2046xf32, #tpu.memory_space<vmem>>, vector<8x62xf32>,
    %c0_167 = arith.constant 0 : index
    %c102_168 = arith.constant 102 : index
    %132 = vector.load %arg15[%c0_167, %c102_168] : memref<8x512xf32, #tpu.memory_space<vmem>>, vector<8x34xf32>
    %cst_169 = arith.constant dense<0.000000e+00> : vector<8x62xf32>
    %133 = tpu.matmul %132, %122, %cst_169 {dimension_numbers = #tpu.dot_dimension_numbers<[1], [0], [0], [1], [0, 0, 1, 1], [], []>} : vector<8x34xf32>, vector<34x62xf32>, vector<8x62xf32> -> vector<8x62xf32>
    %c0_170 = arith.constant 0 : index
    %c434 = arith.constant 434 : index
    %134 = vector.load %arg16[%c0_170, %c434] : memref<8x2046xf32, #tpu.memory_space<vmem>>, vector<8x62xf32>
    tpu.vector_store %arg16[%c0_170, %c434], %133 {strides = array<i32>} : memref<8x2046xf32, #tpu.memory_space<vmem>>, vector<8x62xf32>,
    %c0_171 = arith.constant 0 : index
    %c136 = arith.constant 136 : index
    %135 = vector.load %arg15[%c0_171, %c136] : memref<8x512xf32, #tpu.memory_space<vmem>>, vector<8x34xf32>
    %cst_172 = arith.constant dense<0.000000e+00> : vector<8x62xf32>
    %136 = tpu.matmul %135, %122, %cst_172 {dimension_numbers = #tpu.dot_dimension_numbers<[1], [0], [0], [1], [0, 0, 1, 1], [], []>} : vector<8x34xf32>, vector<34x62xf32>, vector<8x62xf32> -> vector<8x62xf32>
    %c0_173 = arith.constant 0 : index
    %c558 = arith.constant 558 : index
    %137 = vector.load %arg16[%c0_173, %c558] : memref<8x2046xf32, #tpu.memory_space<vmem>>, vector<8x62xf32>
    tpu.vector_store %arg16[%c0_173, %c558], %136 {strides = array<i32>} : memref<8x2046xf32, #tpu.memory_space<vmem>>, vector<8x62xf32>,
    %c0_174 = arith.constant 0 : index
    %c170_175 = arith.constant 170 : index
    %138 = vector.load %arg15[%c0_174, %c170_175] : memref<8x512xf32, #tpu.memory_space<vmem>>, vector<8x34xf32>
    %cst_176 = arith.constant dense<0.000000e+00> : vector<8x62xf32>
    %139 = tpu.matmul %138, %122, %cst_176 {dimension_numbers = #tpu.dot_dimension_numbers<[1], [0], [0], [1], [0, 0, 1, 1], [], []>} : vector<8x34xf32>, vector<34x62xf32>, vector<8x62xf32> -> vector<8x62xf32>
    %c0_177 = arith.constant 0 : index
    %c682 = arith.constant 682 : index
    %140 = vector.load %arg16[%c0_177, %c682] : memref<8x2046xf32, #tpu.memory_space<vmem>>, vector<8x62xf32>
    tpu.vector_store %arg16[%c0_177, %c682], %139 {strides = array<i32>} : memref<8x2046xf32, #tpu.memory_space<vmem>>, vector<8x62xf32>,
    %c0_178 = arith.constant 0 : index
    %c204 = arith.constant 204 : index
    %141 = vector.load %arg15[%c0_178, %c204] : memref<8x512xf32, #tpu.memory_space<vmem>>, vector<8x34xf32>
    %cst_179 = arith.constant dense<0.000000e+00> : vector<8x62xf32>
    %142 = tpu.matmul %141, %122, %cst_179 {dimension_numbers = #tpu.dot_dimension_numbers<[1], [0], [0], [1], [0, 0, 1, 1], [], []>} : vector<8x34xf32>, vector<34x62xf32>, vector<8x62xf32> -> vector<8x62xf32>
    %c0_180 = arith.constant 0 : index
    %c806 = arith.constant 806 : index
    %143 = vector.load %arg16[%c0_180, %c806] : memref<8x2046xf32, #tpu.memory_space<vmem>>, vector<8x62xf32>
    tpu.vector_store %arg16[%c0_180, %c806], %142 {strides = array<i32>} : memref<8x2046xf32, #tpu.memory_space<vmem>>, vector<8x62xf32>,
    %c0_181 = arith.constant 0 : index
    %c238_182 = arith.constant 238 : index
    %144 = vector.load %arg15[%c0_181, %c238_182] : memref<8x512xf32, #tpu.memory_space<vmem>>, vector<8x34xf32>
    %cst_183 = arith.constant dense<0.000000e+00> : vector<8x62xf32>
    %145 = tpu.matmul %144, %122, %cst_183 {dimension_numbers = #tpu.dot_dimension_numbers<[1], [0], [0], [1], [0, 0, 1, 1], [], []>} : vector<8x34xf32>, vector<34x62xf32>, vector<8x62xf32> -> vector<8x62xf32>
    %c0_184 = arith.constant 0 : index
    %c930 = arith.constant 930 : index
    %146 = vector.load %arg16[%c0_184, %c930] : memref<8x2046xf32, #tpu.memory_space<vmem>>, vector<8x62xf32>
    tpu.vector_store %arg16[%c0_184, %c930], %145 {strides = array<i32>} : memref<8x2046xf32, #tpu.memory_space<vmem>>, vector<8x62xf32>,
    %c0_185 = arith.constant 0 : index
    %c272 = arith.constant 272 : index
    %147 = vector.load %arg15[%c0_185, %c272] : memref<8x512xf32, #tpu.memory_space<vmem>>, vector<8x34xf32>
    %cst_186 = arith.constant dense<0.000000e+00> : vector<8x62xf32>
    %148 = tpu.matmul %147, %122, %cst_186 {dimension_numbers = #tpu.dot_dimension_numbers<[1], [0], [0], [1], [0, 0, 1, 1], [], []>} : vector<8x34xf32>, vector<34x62xf32>, vector<8x62xf32> -> vector<8x62xf32>
    %c0_187 = arith.constant 0 : index
    %c1054 = arith.constant 1054 : index
    %149 = vector.load %arg16[%c0_187, %c1054] : memref<8x2046xf32, #tpu.memory_space<vmem>>, vector<8x62xf32>
    tpu.vector_store %arg16[%c0_187, %c1054], %148 {strides = array<i32>} : memref<8x2046xf32, #tpu.memory_space<vmem>>, vector<8x62xf32>,
    %c0_188 = arith.constant 0 : index
    %c306_189 = arith.constant 306 : index
    %150 = vector.load %arg15[%c0_188, %c306_189] : memref<8x512xf32, #tpu.memory_space<vmem>>, vector<8x34xf32>
    %cst_190 = arith.constant dense<0.000000e+00> : vector<8x62xf32>
    %151 = tpu.matmul %150, %122, %cst_190 {dimension_numbers = #tpu.dot_dimension_numbers<[1], [0], [0], [1], [0, 0, 1, 1], [], []>} : vector<8x34xf32>, vector<34x62xf32>, vector<8x62xf32> -> vector<8x62xf32>
    %c0_191 = arith.constant 0 : index
    %c1178 = arith.constant 1178 : index
    %152 = vector.load %arg16[%c0_191, %c1178] : memref<8x2046xf32, #tpu.memory_space<vmem>>, vector<8x62xf32>
    tpu.vector_store %arg16[%c0_191, %c1178], %151 {strides = array<i32>} : memref<8x2046xf32, #tpu.memory_space<vmem>>, vector<8x62xf32>,
    %c0_192 = arith.constant 0 : index
    %c340 = arith.constant 340 : index
    %153 = vector.load %arg15[%c0_192, %c340] : memref<8x512xf32, #tpu.memory_space<vmem>>, vector<8x34xf32>
    %cst_193 = arith.constant dense<0.000000e+00> : vector<8x62xf32>
    %154 = tpu.matmul %153, %122, %cst_193 {dimension_numbers = #tpu.dot_dimension_numbers<[1], [0], [0], [1], [0, 0, 1, 1], [], []>} : vector<8x34xf32>, vector<34x62xf32>, vector<8x62xf32> -> vector<8x62xf32>
    %c0_194 = arith.constant 0 : index
    %c1302 = arith.constant 1302 : index
    %155 = vector.load %arg16[%c0_194, %c1302] : memref<8x2046xf32, #tpu.memory_space<vmem>>, vector<8x62xf32>
    tpu.vector_store %arg16[%c0_194, %c1302], %154 {strides = array<i32>} : memref<8x2046xf32, #tpu.memory_space<vmem>>, vector<8x62xf32>,
    %c0_195 = arith.constant 0 : index
    %c374_196 = arith.constant 374 : index
    %156 = vector.load %arg15[%c0_195, %c374_196] : memref<8x512xf32, #tpu.memory_space<vmem>>, vector<8x34xf32>
    %cst_197 = arith.constant dense<0.000000e+00> : vector<8x62xf32>
    %157 = tpu.matmul %156, %122, %cst_197 {dimension_numbers = #tpu.dot_dimension_numbers<[1], [0], [0], [1], [0, 0, 1, 1], [], []>} : vector<8x34xf32>, vector<34x62xf32>, vector<8x62xf32> -> vector<8x62xf32>
    %c0_198 = arith.constant 0 : index
    %c1426 = arith.constant 1426 : index
    %158 = vector.load %arg16[%c0_198, %c1426] : memref<8x2046xf32, #tpu.memory_space<vmem>>, vector<8x62xf32>
    tpu.vector_store %arg16[%c0_198, %c1426], %157 {strides = array<i32>} : memref<8x2046xf32, #tpu.memory_space<vmem>>, vector<8x62xf32>,
    %c0_199 = arith.constant 0 : index
    %c408 = arith.constant 408 : index
    %159 = vector.load %arg15[%c0_199, %c408] : memref<8x512xf32, #tpu.memory_space<vmem>>, vector<8x34xf32>
    %cst_200 = arith.constant dense<0.000000e+00> : vector<8x62xf32>
    %160 = tpu.matmul %159, %122, %cst_200 {dimension_numbers = #tpu.dot_dimension_numbers<[1], [0], [0], [1], [0, 0, 1, 1], [], []>} : vector<8x34xf32>, vector<34x62xf32>, vector<8x62xf32> -> vector<8x62xf32>
    %c0_201 = arith.constant 0 : index
    %c1550 = arith.constant 1550 : index
    %161 = vector.load %arg16[%c0_201, %c1550] : memref<8x2046xf32, #tpu.memory_space<vmem>>, vector<8x62xf32>
    tpu.vector_store %arg16[%c0_201, %c1550], %160 {strides = array<i32>} : memref<8x2046xf32, #tpu.memory_space<vmem>>, vector<8x62xf32>,
    %c0_202 = arith.constant 0 : index
    %c442_203 = arith.constant 442 : index
    %162 = vector.load %arg15[%c0_202, %c442_203] : memref<8x512xf32, #tpu.memory_space<vmem>>, vector<8x34xf32>
    %cst_204 = arith.constant dense<0.000000e+00> : vector<8x62xf32>
    %163 = tpu.matmul %162, %122, %cst_204 {dimension_numbers = #tpu.dot_dimension_numbers<[1], [0], [0], [1], [0, 0, 1, 1], [], []>} : vector<8x34xf32>, vector<34x62xf32>, vector<8x62xf32> -> vector<8x62xf32>
    %c0_205 = arith.constant 0 : index
    %c1674 = arith.constant 1674 : index
    %164 = vector.load %arg16[%c0_205, %c1674] : memref<8x2046xf32, #tpu.memory_space<vmem>>, vector<8x62xf32>
    tpu.vector_store %arg16[%c0_205, %c1674], %163 {strides = array<i32>} : memref<8x2046xf32, #tpu.memory_space<vmem>>, vector<8x62xf32>,
    %c0_206 = arith.constant 0 : index
    %c476 = arith.constant 476 : index
    %165 = vector.load %arg15[%c0_206, %c476] : memref<8x512xf32, #tpu.memory_space<vmem>>, vector<8x34xf32>
    %cst_207 = arith.constant dense<0.000000e+00> : vector<8x62xf32>
    %166 = tpu.matmul %165, %122, %cst_207 {dimension_numbers = #tpu.dot_dimension_numbers<[1], [0], [0], [1], [0, 0, 1, 1], [], []>} : vector<8x34xf32>, vector<34x62xf32>, vector<8x62xf32> -> vector<8x62xf32>
    %c0_208 = arith.constant 0 : index
    %c1798 = arith.constant 1798 : index
    %167 = vector.load %arg16[%c0_208, %c1798] : memref<8x2046xf32, #tpu.memory_space<vmem>>, vector<8x62xf32>
    tpu.vector_store %arg16[%c0_208, %c1798], %166 {strides = array<i32>} : memref<8x2046xf32, #tpu.memory_space<vmem>>, vector<8x62xf32>,
    %c0_209 = arith.constant 0 : index
    %c0_210 = arith.constant 0 : index
    %c0_211 = arith.constant 0 : index
    %168 = vector.load %arg9[%c0_209, %c0_210, %c0_211] : memref<9x8x8xf32, #tpu.memory_space<vmem>>, vector<1x8x8xf32>
    %169 = vector.shape_cast %168 : vector<1x8x8xf32> to vector<8x8xf32>
    %c0_212 = arith.constant 0 : index
    %c0_213 = arith.constant 0 : index
    %170 = vector.load %arg16[%c0_212, %c0_213] : memref<8x2046xf32, #tpu.memory_space<vmem>>, vector<8x640xf32>
    %cst_214 = arith.constant dense<0.000000e+00> : vector<8x640xf32>
    %171 = tpu.matmul %169, %170, %cst_214 {dimension_numbers = #tpu.dot_dimension_numbers<[1], [0], [0], [1], [0, 0, 1, 1], [], []>} : vector<8x8xf32>, vector<8x640xf32>, vector<8x640xf32> -> vector<8x640xf32>
    %c1_215 = arith.constant 1 : index
    %c0_216 = arith.constant 0 : index
    %c0_217 = arith.constant 0 : index
    %172 = vector.load %arg9[%c1_215, %c0_216, %c0_217] : memref<9x8x8xf32, #tpu.memory_space<vmem>>, vector<1x8x8xf32>
    %173 = vector.shape_cast %172 : vector<1x8x8xf32> to vector<8x8xf32>
    %c0_218 = arith.constant 0 : index
    %c1_219 = arith.constant 1 : index
    %174 = vector.load %arg16[%c0_218, %c1_219] : memref<8x2046xf32, #tpu.memory_space<vmem>>, vector<8x640xf32>
    %cst_220 = arith.constant dense<0.000000e+00> : vector<8x640xf32>
    %175 = tpu.matmul %173, %174, %cst_220 {dimension_numbers = #tpu.dot_dimension_numbers<[1], [0], [0], [1], [0, 0, 1, 1], [], []>} : vector<8x8xf32>, vector<8x640xf32>, vector<8x640xf32> -> vector<8x640xf32>
    %176 = arith.addf %171, %175 : vector<8x640xf32>
    %c2_221 = arith.constant 2 : index
    %c0_222 = arith.constant 0 : index
    %c0_223 = arith.constant 0 : index
    %177 = vector.load %arg9[%c2_221, %c0_222, %c0_223] : memref<9x8x8xf32, #tpu.memory_space<vmem>>, vector<1x8x8xf32>
    %178 = vector.shape_cast %177 : vector<1x8x8xf32> to vector<8x8xf32>
    %c0_224 = arith.constant 0 : index
    %c2_225 = arith.constant 2 : index
    %179 = vector.load %arg16[%c0_224, %c2_225] : memref<8x2046xf32, #tpu.memory_space<vmem>>, vector<8x640xf32>
    %cst_226 = arith.constant dense<0.000000e+00> : vector<8x640xf32>
    %180 = tpu.matmul %178, %179, %cst_226 {dimension_numbers = #tpu.dot_dimension_numbers<[1], [0], [0], [1], [0, 0, 1, 1], [], []>} : vector<8x8xf32>, vector<8x640xf32>, vector<8x640xf32> -> vector<8x640xf32>
    %181 = arith.addf %176, %180 : vector<8x640xf32>
    %c3_227 = arith.constant 3 : index
    %c0_228 = arith.constant 0 : index
    %c0_229 = arith.constant 0 : index
    %182 = vector.load %arg9[%c3_227, %c0_228, %c0_229] : memref<9x8x8xf32, #tpu.memory_space<vmem>>, vector<1x8x8xf32>
    %183 = vector.shape_cast %182 : vector<1x8x8xf32> to vector<8x8xf32>
    %c0_230 = arith.constant 0 : index
    %c62_231 = arith.constant 62 : index
    %184 = vector.load %arg16[%c0_230, %c62_231] : memref<8x2046xf32, #tpu.memory_space<vmem>>, vector<8x640xf32>
    %cst_232 = arith.constant dense<0.000000e+00> : vector<8x640xf32>
    %185 = tpu.matmul %183, %184, %cst_232 {dimension_numbers = #tpu.dot_dimension_numbers<[1], [0], [0], [1], [0, 0, 1, 1], [], []>} : vector<8x8xf32>, vector<8x640xf32>, vector<8x640xf32> -> vector<8x640xf32>
    %186 = arith.addf %181, %185 : vector<8x640xf32>
    %c4_233 = arith.constant 4 : index
    %c0_234 = arith.constant 0 : index
    %c0_235 = arith.constant 0 : index
    %187 = vector.load %arg9[%c4_233, %c0_234, %c0_235] : memref<9x8x8xf32, #tpu.memory_space<vmem>>, vector<1x8x8xf32>
    %188 = vector.shape_cast %187 : vector<1x8x8xf32> to vector<8x8xf32>
    %c0_236 = arith.constant 0 : index
    %c63 = arith.constant 63 : index
    %189 = vector.load %arg16[%c0_236, %c63] : memref<8x2046xf32, #tpu.memory_space<vmem>>, vector<8x640xf32>
    %cst_237 = arith.constant dense<0.000000e+00> : vector<8x640xf32>
    %190 = tpu.matmul %188, %189, %cst_237 {dimension_numbers = #tpu.dot_dimension_numbers<[1], [0], [0], [1], [0, 0, 1, 1], [], []>} : vector<8x8xf32>, vector<8x640xf32>, vector<8x640xf32> -> vector<8x640xf32>
    %191 = arith.addf %186, %190 : vector<8x640xf32>
    %c5_238 = arith.constant 5 : index
    %c0_239 = arith.constant 0 : index
    %c0_240 = arith.constant 0 : index
    %192 = vector.load %arg9[%c5_238, %c0_239, %c0_240] : memref<9x8x8xf32, #tpu.memory_space<vmem>>, vector<1x8x8xf32>
    %193 = vector.shape_cast %192 : vector<1x8x8xf32> to vector<8x8xf32>
    %c0_241 = arith.constant 0 : index
    %c64 = arith.constant 64 : index
    %194 = vector.load %arg16[%c0_241, %c64] : memref<8x2046xf32, #tpu.memory_space<vmem>>, vector<8x640xf32>
    %cst_242 = arith.constant dense<0.000000e+00> : vector<8x640xf32>
    %195 = tpu.matmul %193, %194, %cst_242 {dimension_numbers = #tpu.dot_dimension_numbers<[1], [0], [0], [1], [0, 0, 1, 1], [], []>} : vector<8x8xf32>, vector<8x640xf32>, vector<8x640xf32> -> vector<8x640xf32>
    %196 = arith.addf %191, %195 : vector<8x640xf32>
    %c6_243 = arith.constant 6 : index
    %c0_244 = arith.constant 0 : index
    %c0_245 = arith.constant 0 : index
    %197 = vector.load %arg9[%c6_243, %c0_244, %c0_245] : memref<9x8x8xf32, #tpu.memory_space<vmem>>, vector<1x8x8xf32>
    %198 = vector.shape_cast %197 : vector<1x8x8xf32> to vector<8x8xf32>
    %c0_246 = arith.constant 0 : index
    %c124 = arith.constant 124 : index
    %199 = vector.load %arg16[%c0_246, %c124] : memref<8x2046xf32, #tpu.memory_space<vmem>>, vector<8x640xf32>
    %cst_247 = arith.constant dense<0.000000e+00> : vector<8x640xf32>
    %200 = tpu.matmul %198, %199, %cst_247 {dimension_numbers = #tpu.dot_dimension_numbers<[1], [0], [0], [1], [0, 0, 1, 1], [], []>} : vector<8x8xf32>, vector<8x640xf32>, vector<8x640xf32> -> vector<8x640xf32>
    %201 = arith.addf %196, %200 : vector<8x640xf32>
    %c7_248 = arith.constant 7 : index
    %c0_249 = arith.constant 0 : index
    %c0_250 = arith.constant 0 : index
    %202 = vector.load %arg9[%c7_248, %c0_249, %c0_250] : memref<9x8x8xf32, #tpu.memory_space<vmem>>, vector<1x8x8xf32>
    %203 = vector.shape_cast %202 : vector<1x8x8xf32> to vector<8x8xf32>
    %c0_251 = arith.constant 0 : index
    %c125 = arith.constant 125 : index
    %204 = vector.load %arg16[%c0_251, %c125] : memref<8x2046xf32, #tpu.memory_space<vmem>>, vector<8x640xf32>
    %cst_252 = arith.constant dense<0.000000e+00> : vector<8x640xf32>
    %205 = tpu.matmul %203, %204, %cst_252 {dimension_numbers = #tpu.dot_dimension_numbers<[1], [0], [0], [1], [0, 0, 1, 1], [], []>} : vector<8x8xf32>, vector<8x640xf32>, vector<8x640xf32> -> vector<8x640xf32>
    %206 = arith.addf %201, %205 : vector<8x640xf32>
    %c8_253 = arith.constant 8 : index
    %c0_254 = arith.constant 0 : index
    %c0_255 = arith.constant 0 : index
    %207 = vector.load %arg9[%c8_253, %c0_254, %c0_255] : memref<9x8x8xf32, #tpu.memory_space<vmem>>, vector<1x8x8xf32>
    %208 = vector.shape_cast %207 : vector<1x8x8xf32> to vector<8x8xf32>
    %c0_256 = arith.constant 0 : index
    %c126 = arith.constant 126 : index
    %209 = vector.load %arg16[%c0_256, %c126] : memref<8x2046xf32, #tpu.memory_space<vmem>>, vector<8x640xf32>
    %cst_257 = arith.constant dense<0.000000e+00> : vector<8x640xf32>
    %210 = tpu.matmul %208, %209, %cst_257 {dimension_numbers = #tpu.dot_dimension_numbers<[1], [0], [0], [1], [0, 0, 1, 1], [], []>} : vector<8x8xf32>, vector<8x640xf32>, vector<8x640xf32> -> vector<8x640xf32>
    %211 = arith.addf %206, %210 : vector<8x640xf32>
    %c0_258 = arith.constant 0 : index
    %c0_259 = arith.constant 0 : index
    %212 = vector.load %arg10[%c0_258, %c0_259] : memref<8x1xf32, #tpu.memory_space<vmem>>, vector<8x1xf32>
    %213 = vector.broadcast %212 : vector<8x1xf32> to vector<8x640xf32>
    %214 = arith.addf %211, %213 : vector<8x640xf32>
    %c0_260 = arith.constant 0 : index
    %c0_261 = arith.constant 0 : index
    %215 = vector.load %arg17[%c0_260, %c0_261] : memref<8x1920xf32, #tpu.memory_space<vmem>>, vector<8x640xf32>
    tpu.vector_store %arg17[%c0_260, %c0_261], %214 {strides = array<i32>} : memref<8x1920xf32, #tpu.memory_space<vmem>>, vector<8x640xf32>,
    %c0_262 = arith.constant 0 : index
    %c0_263 = arith.constant 0 : index
    %c0_264 = arith.constant 0 : index
    %216 = vector.load %arg9[%c0_262, %c0_263, %c0_264] : memref<9x8x8xf32, #tpu.memory_space<vmem>>, vector<1x8x8xf32>
    %217 = vector.shape_cast %216 : vector<1x8x8xf32> to vector<8x8xf32>
    %c0_265 = arith.constant 0 : index
    %c640 = arith.constant 640 : index
    %218 = vector.load %arg16[%c0_265, %c640] : memref<8x2046xf32, #tpu.memory_space<vmem>>, vector<8x640xf32>
    %cst_266 = arith.constant dense<0.000000e+00> : vector<8x640xf32>
    %219 = tpu.matmul %217, %218, %cst_266 {dimension_numbers = #tpu.dot_dimension_numbers<[1], [0], [0], [1], [0, 0, 1, 1], [], []>} : vector<8x8xf32>, vector<8x640xf32>, vector<8x640xf32> -> vector<8x640xf32>
    %c1_267 = arith.constant 1 : index
    %c0_268 = arith.constant 0 : index
    %c0_269 = arith.constant 0 : index
    %220 = vector.load %arg9[%c1_267, %c0_268, %c0_269] : memref<9x8x8xf32, #tpu.memory_space<vmem>>, vector<1x8x8xf32>
    %221 = vector.shape_cast %220 : vector<1x8x8xf32> to vector<8x8xf32>
    %c0_270 = arith.constant 0 : index
    %c641 = arith.constant 641 : index
    %222 = vector.load %arg16[%c0_270, %c641] : memref<8x2046xf32, #tpu.memory_space<vmem>>, vector<8x640xf32>
    %cst_271 = arith.constant dense<0.000000e+00> : vector<8x640xf32>
    %223 = tpu.matmul %221, %222, %cst_271 {dimension_numbers = #tpu.dot_dimension_numbers<[1], [0], [0], [1], [0, 0, 1, 1], [], []>} : vector<8x8xf32>, vector<8x640xf32>, vector<8x640xf32> -> vector<8x640xf32>
    %224 = arith.addf %219, %223 : vector<8x640xf32>
    %c2_272 = arith.constant 2 : index
    %c0_273 = arith.constant 0 : index
    %c0_274 = arith.constant 0 : index
    %225 = vector.load %arg9[%c2_272, %c0_273, %c0_274] : memref<9x8x8xf32, #tpu.memory_space<vmem>>, vector<1x8x8xf32>
    %226 = vector.shape_cast %225 : vector<1x8x8xf32> to vector<8x8xf32>
    %c0_275 = arith.constant 0 : index
    %c642 = arith.constant 642 : index
    %227 = vector.load %arg16[%c0_275, %c642] : memref<8x2046xf32, #tpu.memory_space<vmem>>, vector<8x640xf32>
    %cst_276 = arith.constant dense<0.000000e+00> : vector<8x640xf32>
    %228 = tpu.matmul %226, %227, %cst_276 {dimension_numbers = #tpu.dot_dimension_numbers<[1], [0], [0], [1], [0, 0, 1, 1], [], []>} : vector<8x8xf32>, vector<8x640xf32>, vector<8x640xf32> -> vector<8x640xf32>
    %229 = arith.addf %224, %228 : vector<8x640xf32>
    %c3_277 = arith.constant 3 : index
    %c0_278 = arith.constant 0 : index
    %c0_279 = arith.constant 0 : index
    %230 = vector.load %arg9[%c3_277, %c0_278, %c0_279] : memref<9x8x8xf32, #tpu.memory_space<vmem>>, vector<1x8x8xf32>
    %231 = vector.shape_cast %230 : vector<1x8x8xf32> to vector<8x8xf32>
    %c0_280 = arith.constant 0 : index
    %c702 = arith.constant 702 : index
    %232 = vector.load %arg16[%c0_280, %c702] : memref<8x2046xf32, #tpu.memory_space<vmem>>, vector<8x640xf32>
    %cst_281 = arith.constant dense<0.000000e+00> : vector<8x640xf32>
    %233 = tpu.matmul %231, %232, %cst_281 {dimension_numbers = #tpu.dot_dimension_numbers<[1], [0], [0], [1], [0, 0, 1, 1], [], []>} : vector<8x8xf32>, vector<8x640xf32>, vector<8x640xf32> -> vector<8x640xf32>
    %234 = arith.addf %229, %233 : vector<8x640xf32>
    %c4_282 = arith.constant 4 : index
    %c0_283 = arith.constant 0 : index
    %c0_284 = arith.constant 0 : index
    %235 = vector.load %arg9[%c4_282, %c0_283, %c0_284] : memref<9x8x8xf32, #tpu.memory_space<vmem>>, vector<1x8x8xf32>
    %236 = vector.shape_cast %235 : vector<1x8x8xf32> to vector<8x8xf32>
    %c0_285 = arith.constant 0 : index
    %c703 = arith.constant 703 : index
    %237 = vector.load %arg16[%c0_285, %c703] : memref<8x2046xf32, #tpu.memory_space<vmem>>, vector<8x640xf32>
    %cst_286 = arith.constant dense<0.000000e+00> : vector<8x640xf32>
    %238 = tpu.matmul %236, %237, %cst_286 {dimension_numbers = #tpu.dot_dimension_numbers<[1], [0], [0], [1], [0, 0, 1, 1], [], []>} : vector<8x8xf32>, vector<8x640xf32>, vector<8x640xf32> -> vector<8x640xf32>
    %239 = arith.addf %234, %238 : vector<8x640xf32>
    %c5_287 = arith.constant 5 : index
    %c0_288 = arith.constant 0 : index
    %c0_289 = arith.constant 0 : index
    %240 = vector.load %arg9[%c5_287, %c0_288, %c0_289] : memref<9x8x8xf32, #tpu.memory_space<vmem>>, vector<1x8x8xf32>
    %241 = vector.shape_cast %240 : vector<1x8x8xf32> to vector<8x8xf32>
    %c0_290 = arith.constant 0 : index
    %c704 = arith.constant 704 : index
    %242 = vector.load %arg16[%c0_290, %c704] : memref<8x2046xf32, #tpu.memory_space<vmem>>, vector<8x640xf32>
    %cst_291 = arith.constant dense<0.000000e+00> : vector<8x640xf32>
    %243 = tpu.matmul %241, %242, %cst_291 {dimension_numbers = #tpu.dot_dimension_numbers<[1], [0], [0], [1], [0, 0, 1, 1], [], []>} : vector<8x8xf32>, vector<8x640xf32>, vector<8x640xf32> -> vector<8x640xf32>
    %244 = arith.addf %239, %243 : vector<8x640xf32>
    %c6_292 = arith.constant 6 : index
    %c0_293 = arith.constant 0 : index
    %c0_294 = arith.constant 0 : index
    %245 = vector.load %arg9[%c6_292, %c0_293, %c0_294] : memref<9x8x8xf32, #tpu.memory_space<vmem>>, vector<1x8x8xf32>
    %246 = vector.shape_cast %245 : vector<1x8x8xf32> to vector<8x8xf32>
    %c0_295 = arith.constant 0 : index
    %c764 = arith.constant 764 : index
    %247 = vector.load %arg16[%c0_295, %c764] : memref<8x2046xf32, #tpu.memory_space<vmem>>, vector<8x640xf32>
    %cst_296 = arith.constant dense<0.000000e+00> : vector<8x640xf32>
    %248 = tpu.matmul %246, %247, %cst_296 {dimension_numbers = #tpu.dot_dimension_numbers<[1], [0], [0], [1], [0, 0, 1, 1], [], []>} : vector<8x8xf32>, vector<8x640xf32>, vector<8x640xf32> -> vector<8x640xf32>
    %249 = arith.addf %244, %248 : vector<8x640xf32>
    %c7_297 = arith.constant 7 : index
    %c0_298 = arith.constant 0 : index
    %c0_299 = arith.constant 0 : index
    %250 = vector.load %arg9[%c7_297, %c0_298, %c0_299] : memref<9x8x8xf32, #tpu.memory_space<vmem>>, vector<1x8x8xf32>
    %251 = vector.shape_cast %250 : vector<1x8x8xf32> to vector<8x8xf32>
    %c0_300 = arith.constant 0 : index
    %c765 = arith.constant 765 : index
    %252 = vector.load %arg16[%c0_300, %c765] : memref<8x2046xf32, #tpu.memory_space<vmem>>, vector<8x640xf32>
    %cst_301 = arith.constant dense<0.000000e+00> : vector<8x640xf32>
    %253 = tpu.matmul %251, %252, %cst_301 {dimension_numbers = #tpu.dot_dimension_numbers<[1], [0], [0], [1], [0, 0, 1, 1], [], []>} : vector<8x8xf32>, vector<8x640xf32>, vector<8x640xf32> -> vector<8x640xf32>
    %254 = arith.addf %249, %253 : vector<8x640xf32>
    %c8_302 = arith.constant 8 : index
    %c0_303 = arith.constant 0 : index
    %c0_304 = arith.constant 0 : index
    %255 = vector.load %arg9[%c8_302, %c0_303, %c0_304] : memref<9x8x8xf32, #tpu.memory_space<vmem>>, vector<1x8x8xf32>
    %256 = vector.shape_cast %255 : vector<1x8x8xf32> to vector<8x8xf32>
    %c0_305 = arith.constant 0 : index
    %c766 = arith.constant 766 : index
    %257 = vector.load %arg16[%c0_305, %c766] : memref<8x2046xf32, #tpu.memory_space<vmem>>, vector<8x640xf32>
    %cst_306 = arith.constant dense<0.000000e+00> : vector<8x640xf32>
    %258 = tpu.matmul %256, %257, %cst_306 {dimension_numbers = #tpu.dot_dimension_numbers<[1], [0], [0], [1], [0, 0, 1, 1], [], []>} : vector<8x8xf32>, vector<8x640xf32>, vector<8x640xf32> -> vector<8x640xf32>
    %259 = arith.addf %254, %258 : vector<8x640xf32>
    %c0_307 = arith.constant 0 : index
    %c0_308 = arith.constant 0 : index
    %260 = vector.load %arg10[%c0_307, %c0_308] : memref<8x1xf32, #tpu.memory_space<vmem>>, vector<8x1xf32>
    %261 = vector.broadcast %260 : vector<8x1xf32> to vector<8x640xf32>
    %262 = arith.addf %259, %261 : vector<8x640xf32>
    %c0_309 = arith.constant 0 : index
    %c640_310 = arith.constant 640 : index
    %263 = vector.load %arg17[%c0_309, %c640_310] : memref<8x1920xf32, #tpu.memory_space<vmem>>, vector<8x640xf32>
    tpu.vector_store %arg17[%c0_309, %c640_310], %262 {strides = array<i32>} : memref<8x1920xf32, #tpu.memory_space<vmem>>, vector<8x640xf32>,
    %c0_311 = arith.constant 0 : index
    %c0_312 = arith.constant 0 : index
    %c0_313 = arith.constant 0 : index
    %264 = vector.load %arg9[%c0_311, %c0_312, %c0_313] : memref<9x8x8xf32, #tpu.memory_space<vmem>>, vector<1x8x8xf32>
    %265 = vector.shape_cast %264 : vector<1x8x8xf32> to vector<8x8xf32>
    %c0_314 = arith.constant 0 : index
    %c1280 = arith.constant 1280 : index
    %266 = vector.load %arg16[%c0_314, %c1280] : memref<8x2046xf32, #tpu.memory_space<vmem>>, vector<8x640xf32>
    %cst_315 = arith.constant dense<0.000000e+00> : vector<8x640xf32>
    %267 = tpu.matmul %265, %266, %cst_315 {dimension_numbers = #tpu.dot_dimension_numbers<[1], [0], [0], [1], [0, 0, 1, 1], [], []>} : vector<8x8xf32>, vector<8x640xf32>, vector<8x640xf32> -> vector<8x640xf32>
    %c1_316 = arith.constant 1 : index
    %c0_317 = arith.constant 0 : index
    %c0_318 = arith.constant 0 : index
    %268 = vector.load %arg9[%c1_316, %c0_317, %c0_318] : memref<9x8x8xf32, #tpu.memory_space<vmem>>, vector<1x8x8xf32>
    %269 = vector.shape_cast %268 : vector<1x8x8xf32> to vector<8x8xf32>
    %c0_319 = arith.constant 0 : index
    %c1281 = arith.constant 1281 : index
    %270 = vector.load %arg16[%c0_319, %c1281] : memref<8x2046xf32, #tpu.memory_space<vmem>>, vector<8x640xf32>
    %cst_320 = arith.constant dense<0.000000e+00> : vector<8x640xf32>
    %271 = tpu.matmul %269, %270, %cst_320 {dimension_numbers = #tpu.dot_dimension_numbers<[1], [0], [0], [1], [0, 0, 1, 1], [], []>} : vector<8x8xf32>, vector<8x640xf32>, vector<8x640xf32> -> vector<8x640xf32>
    %272 = arith.addf %267, %271 : vector<8x640xf32>
    %c2_321 = arith.constant 2 : index
    %c0_322 = arith.constant 0 : index
    %c0_323 = arith.constant 0 : index
    %273 = vector.load %arg9[%c2_321, %c0_322, %c0_323] : memref<9x8x8xf32, #tpu.memory_space<vmem>>, vector<1x8x8xf32>
    %274 = vector.shape_cast %273 : vector<1x8x8xf32> to vector<8x8xf32>
    %c0_324 = arith.constant 0 : index
    %c1282 = arith.constant 1282 : index
    %275 = vector.load %arg16[%c0_324, %c1282] : memref<8x2046xf32, #tpu.memory_space<vmem>>, vector<8x640xf32>
    %cst_325 = arith.constant dense<0.000000e+00> : vector<8x640xf32>
    %276 = tpu.matmul %274, %275, %cst_325 {dimension_numbers = #tpu.dot_dimension_numbers<[1], [0], [0], [1], [0, 0, 1, 1], [], []>} : vector<8x8xf32>, vector<8x640xf32>, vector<8x640xf32> -> vector<8x640xf32>
    %277 = arith.addf %272, %276 : vector<8x640xf32>
    %c3_326 = arith.constant 3 : index
    %c0_327 = arith.constant 0 : index
    %c0_328 = arith.constant 0 : index
    %278 = vector.load %arg9[%c3_326, %c0_327, %c0_328] : memref<9x8x8xf32, #tpu.memory_space<vmem>>, vector<1x8x8xf32>
    %279 = vector.shape_cast %278 : vector<1x8x8xf32> to vector<8x8xf32>
    %c0_329 = arith.constant 0 : index
    %c1342 = arith.constant 1342 : index
    %280 = vector.load %arg16[%c0_329, %c1342] : memref<8x2046xf32, #tpu.memory_space<vmem>>, vector<8x640xf32>
    %cst_330 = arith.constant dense<0.000000e+00> : vector<8x640xf32>
    %281 = tpu.matmul %279, %280, %cst_330 {dimension_numbers = #tpu.dot_dimension_numbers<[1], [0], [0], [1], [0, 0, 1, 1], [], []>} : vector<8x8xf32>, vector<8x640xf32>, vector<8x640xf32> -> vector<8x640xf32>
    %282 = arith.addf %277, %281 : vector<8x640xf32>
    %c4_331 = arith.constant 4 : index
    %c0_332 = arith.constant 0 : index
    %c0_333 = arith.constant 0 : index
    %283 = vector.load %arg9[%c4_331, %c0_332, %c0_333] : memref<9x8x8xf32, #tpu.memory_space<vmem>>, vector<1x8x8xf32>
    %284 = vector.shape_cast %283 : vector<1x8x8xf32> to vector<8x8xf32>
    %c0_334 = arith.constant 0 : index
    %c1343 = arith.constant 1343 : index
    %285 = vector.load %arg16[%c0_334, %c1343] : memref<8x2046xf32, #tpu.memory_space<vmem>>, vector<8x640xf32>
    %cst_335 = arith.constant dense<0.000000e+00> : vector<8x640xf32>
    %286 = tpu.matmul %284, %285, %cst_335 {dimension_numbers = #tpu.dot_dimension_numbers<[1], [0], [0], [1], [0, 0, 1, 1], [], []>} : vector<8x8xf32>, vector<8x640xf32>, vector<8x640xf32> -> vector<8x640xf32>
    %287 = arith.addf %282, %286 : vector<8x640xf32>
    %c5_336 = arith.constant 5 : index
    %c0_337 = arith.constant 0 : index
    %c0_338 = arith.constant 0 : index
    %288 = vector.load %arg9[%c5_336, %c0_337, %c0_338] : memref<9x8x8xf32, #tpu.memory_space<vmem>>, vector<1x8x8xf32>
    %289 = vector.shape_cast %288 : vector<1x8x8xf32> to vector<8x8xf32>
    %c0_339 = arith.constant 0 : index
    %c1344 = arith.constant 1344 : index
    %290 = vector.load %arg16[%c0_339, %c1344] : memref<8x2046xf32, #tpu.memory_space<vmem>>, vector<8x640xf32>
    %cst_340 = arith.constant dense<0.000000e+00> : vector<8x640xf32>
    %291 = tpu.matmul %289, %290, %cst_340 {dimension_numbers = #tpu.dot_dimension_numbers<[1], [0], [0], [1], [0, 0, 1, 1], [], []>} : vector<8x8xf32>, vector<8x640xf32>, vector<8x640xf32> -> vector<8x640xf32>
    %292 = arith.addf %287, %291 : vector<8x640xf32>
    %c6_341 = arith.constant 6 : index
    %c0_342 = arith.constant 0 : index
    %c0_343 = arith.constant 0 : index
    %293 = vector.load %arg9[%c6_341, %c0_342, %c0_343] : memref<9x8x8xf32, #tpu.memory_space<vmem>>, vector<1x8x8xf32>
    %294 = vector.shape_cast %293 : vector<1x8x8xf32> to vector<8x8xf32>
    %c0_344 = arith.constant 0 : index
    %c1404 = arith.constant 1404 : index
    %295 = vector.load %arg16[%c0_344, %c1404] : memref<8x2046xf32, #tpu.memory_space<vmem>>, vector<8x640xf32>
    %cst_345 = arith.constant dense<0.000000e+00> : vector<8x640xf32>
    %296 = tpu.matmul %294, %295, %cst_345 {dimension_numbers = #tpu.dot_dimension_numbers<[1], [0], [0], [1], [0, 0, 1, 1], [], []>} : vector<8x8xf32>, vector<8x640xf32>, vector<8x640xf32> -> vector<8x640xf32>
    %297 = arith.addf %292, %296 : vector<8x640xf32>
    %c7_346 = arith.constant 7 : index
    %c0_347 = arith.constant 0 : index
    %c0_348 = arith.constant 0 : index
    %298 = vector.load %arg9[%c7_346, %c0_347, %c0_348] : memref<9x8x8xf32, #tpu.memory_space<vmem>>, vector<1x8x8xf32>
    %299 = vector.shape_cast %298 : vector<1x8x8xf32> to vector<8x8xf32>
    %c0_349 = arith.constant 0 : index
    %c1405 = arith.constant 1405 : index
    %300 = vector.load %arg16[%c0_349, %c1405] : memref<8x2046xf32, #tpu.memory_space<vmem>>, vector<8x640xf32>
    %cst_350 = arith.constant dense<0.000000e+00> : vector<8x640xf32>
    %301 = tpu.matmul %299, %300, %cst_350 {dimension_numbers = #tpu.dot_dimension_numbers<[1], [0], [0], [1], [0, 0, 1, 1], [], []>} : vector<8x8xf32>, vector<8x640xf32>, vector<8x640xf32> -> vector<8x640xf32>
    %302 = arith.addf %297, %301 : vector<8x640xf32>
    %c8_351 = arith.constant 8 : index
    %c0_352 = arith.constant 0 : index
    %c0_353 = arith.constant 0 : index
    %303 = vector.load %arg9[%c8_351, %c0_352, %c0_353] : memref<9x8x8xf32, #tpu.memory_space<vmem>>, vector<1x8x8xf32>
    %304 = vector.shape_cast %303 : vector<1x8x8xf32> to vector<8x8xf32>
    %c0_354 = arith.constant 0 : index
    %c1406 = arith.constant 1406 : index
    %305 = vector.load %arg16[%c0_354, %c1406] : memref<8x2046xf32, #tpu.memory_space<vmem>>, vector<8x640xf32>
    %cst_355 = arith.constant dense<0.000000e+00> : vector<8x640xf32>
    %306 = tpu.matmul %304, %305, %cst_355 {dimension_numbers = #tpu.dot_dimension_numbers<[1], [0], [0], [1], [0, 0, 1, 1], [], []>} : vector<8x8xf32>, vector<8x640xf32>, vector<8x640xf32> -> vector<8x640xf32>
    %307 = arith.addf %302, %306 : vector<8x640xf32>
    %c0_356 = arith.constant 0 : index
    %c0_357 = arith.constant 0 : index
    %308 = vector.load %arg10[%c0_356, %c0_357] : memref<8x1xf32, #tpu.memory_space<vmem>>, vector<8x1xf32>
    %309 = vector.broadcast %308 : vector<8x1xf32> to vector<8x640xf32>
    %310 = arith.addf %307, %309 : vector<8x640xf32>
    %c0_358 = arith.constant 0 : index
    %c1280_359 = arith.constant 1280 : index
    %311 = vector.load %arg17[%c0_358, %c1280_359] : memref<8x1920xf32, #tpu.memory_space<vmem>>, vector<8x640xf32>
    tpu.vector_store %arg17[%c0_358, %c1280_359], %310 {strides = array<i32>} : memref<8x1920xf32, #tpu.memory_space<vmem>>, vector<8x640xf32>,
    %c0_360 = arith.constant 0 : index
    %c0_361 = arith.constant 0 : index
    %312 = vector.load %arg17[%c0_360, %c0_361] : memref<8x1920xf32, #tpu.memory_space<vmem>>, vector<3x29xf32>
    %c0_362 = arith.constant 0 : index
    %c0_363 = arith.constant 0 : index
    %c0_364 = arith.constant 0 : index
    %c0_365 = arith.constant 0 : index
    %313 = vector.load %arg12[%c0_362, %c0_363, %c0_364, %c0_365] : memref<2x3x29x29xf32, #tpu.memory_space<vmem>>, vector<1x3x1x29xf32>
    %314 = vector.shape_cast %313 : vector<1x3x1x29xf32> to vector<3x29xf32>
    %315 = vector.shape_cast %312 : vector<3x29xf32> to vector<1x3x1x29xf32>
    tpu.vector_store %arg12[%c0_362, %c0_363, %c0_364, %c0_365], %315 {strides = array<i32>} : memref<2x3x29x29xf32, #tpu.memory_space<vmem>>, vector<1x3x1x29xf32>,
    %c0_366 = arith.constant 0 : index
    %c31 = arith.constant 31 : index
    %316 = vector.load %arg17[%c0_366, %c31] : memref<8x1920xf32, #tpu.memory_space<vmem>>, vector<3x29xf32>
    %c1_367 = arith.constant 1 : index
    %c0_368 = arith.constant 0 : index
    %c0_369 = arith.constant 0 : index
    %c0_370 = arith.constant 0 : index
    %317 = vector.load %arg12[%c1_367, %c0_368, %c0_369, %c0_370] : memref<2x3x29x29xf32, #tpu.memory_space<vmem>>, vector<1x3x1x29xf32>
    %318 = vector.shape_cast %317 : vector<1x3x1x29xf32> to vector<3x29xf32>
    %319 = vector.shape_cast %316 : vector<3x29xf32> to vector<1x3x1x29xf32>
    tpu.vector_store %arg12[%c1_367, %c0_368, %c0_369, %c0_370], %319 {strides = array<i32>} : memref<2x3x29x29xf32, #tpu.memory_space<vmem>>, vector<1x3x1x29xf32>,
    %c0_371 = arith.constant 0 : index
    %c62_372 = arith.constant 62 : index
    %320 = vector.load %arg17[%c0_371, %c62_372] : memref<8x1920xf32, #tpu.memory_space<vmem>>, vector<3x29xf32>
    %c0_373 = arith.constant 0 : index
    %c0_374 = arith.constant 0 : index
    %c1_375 = arith.constant 1 : index
    %c0_376 = arith.constant 0 : index
    %321 = vector.load %arg12[%c0_373, %c0_374, %c1_375, %c0_376] : memref<2x3x29x29xf32, #tpu.memory_space<vmem>>, vector<1x3x1x29xf32>
    %322 = vector.shape_cast %321 : vector<1x3x1x29xf32> to vector<3x29xf32>
    %323 = vector.shape_cast %320 : vector<3x29xf32> to vector<1x3x1x29xf32>
    tpu.vector_store %arg12[%c0_373, %c0_374, %c1_375, %c0_376], %323 {strides = array<i32>} : memref<2x3x29x29xf32, #tpu.memory_space<vmem>>, vector<1x3x1x29xf32>,
    %c0_377 = arith.constant 0 : index
    %c93 = arith.constant 93 : index
    %324 = vector.load %arg17[%c0_377, %c93] : memref<8x1920xf32, #tpu.memory_space<vmem>>, vector<3x29xf32>
    %c1_378 = arith.constant 1 : index
    %c0_379 = arith.constant 0 : index
    %c1_380 = arith.constant 1 : index
    %c0_381 = arith.constant 0 : index
    %325 = vector.load %arg12[%c1_378, %c0_379, %c1_380, %c0_381] : memref<2x3x29x29xf32, #tpu.memory_space<vmem>>, vector<1x3x1x29xf32>
    %326 = vector.shape_cast %325 : vector<1x3x1x29xf32> to vector<3x29xf32>
    %327 = vector.shape_cast %324 : vector<3x29xf32> to vector<1x3x1x29xf32>
    tpu.vector_store %arg12[%c1_378, %c0_379, %c1_380, %c0_381], %327 {strides = array<i32>} : memref<2x3x29x29xf32, #tpu.memory_space<vmem>>, vector<1x3x1x29xf32>,
    %c0_382 = arith.constant 0 : index
    %c124_383 = arith.constant 124 : index
    %328 = vector.load %arg17[%c0_382, %c124_383] : memref<8x1920xf32, #tpu.memory_space<vmem>>, vector<3x29xf32>
    %c0_384 = arith.constant 0 : index
    %c0_385 = arith.constant 0 : index
    %c2_386 = arith.constant 2 : index
    %c0_387 = arith.constant 0 : index
    %329 = vector.load %arg12[%c0_384, %c0_385, %c2_386, %c0_387] : memref<2x3x29x29xf32, #tpu.memory_space<vmem>>, vector<1x3x1x29xf32>
    %330 = vector.shape_cast %329 : vector<1x3x1x29xf32> to vector<3x29xf32>
    %331 = vector.shape_cast %328 : vector<3x29xf32> to vector<1x3x1x29xf32>
    tpu.vector_store %arg12[%c0_384, %c0_385, %c2_386, %c0_387], %331 {strides = array<i32>} : memref<2x3x29x29xf32, #tpu.memory_space<vmem>>, vector<1x3x1x29xf32>,
    %c0_388 = arith.constant 0 : index
    %c155 = arith.constant 155 : index
    %332 = vector.load %arg17[%c0_388, %c155] : memref<8x1920xf32, #tpu.memory_space<vmem>>, vector<3x29xf32>
    %c1_389 = arith.constant 1 : index
    %c0_390 = arith.constant 0 : index
    %c2_391 = arith.constant 2 : index
    %c0_392 = arith.constant 0 : index
    %333 = vector.load %arg12[%c1_389, %c0_390, %c2_391, %c0_392] : memref<2x3x29x29xf32, #tpu.memory_space<vmem>>, vector<1x3x1x29xf32>
    %334 = vector.shape_cast %333 : vector<1x3x1x29xf32> to vector<3x29xf32>
    %335 = vector.shape_cast %332 : vector<3x29xf32> to vector<1x3x1x29xf32>
    tpu.vector_store %arg12[%c1_389, %c0_390, %c2_391, %c0_392], %335 {strides = array<i32>} : memref<2x3x29x29xf32, #tpu.memory_space<vmem>>, vector<1x3x1x29xf32>,
    %c0_393 = arith.constant 0 : index
    %c186_394 = arith.constant 186 : index
    %336 = vector.load %arg17[%c0_393, %c186_394] : memref<8x1920xf32, #tpu.memory_space<vmem>>, vector<3x29xf32>
    %c0_395 = arith.constant 0 : index
    %c0_396 = arith.constant 0 : index
    %c3_397 = arith.constant 3 : index
    %c0_398 = arith.constant 0 : index
    %337 = vector.load %arg12[%c0_395, %c0_396, %c3_397, %c0_398] : memref<2x3x29x29xf32, #tpu.memory_space<vmem>>, vector<1x3x1x29xf32>
    %338 = vector.shape_cast %337 : vector<1x3x1x29xf32> to vector<3x29xf32>
    %339 = vector.shape_cast %336 : vector<3x29xf32> to vector<1x3x1x29xf32>
    tpu.vector_store %arg12[%c0_395, %c0_396, %c3_397, %c0_398], %339 {strides = array<i32>} : memref<2x3x29x29xf32, #tpu.memory_space<vmem>>, vector<1x3x1x29xf32>,
    %c0_399 = arith.constant 0 : index
    %c217 = arith.constant 217 : index
    %340 = vector.load %arg17[%c0_399, %c217] : memref<8x1920xf32, #tpu.memory_space<vmem>>, vector<3x29xf32>
    %c1_400 = arith.constant 1 : index
    %c0_401 = arith.constant 0 : index
    %c3_402 = arith.constant 3 : index
    %c0_403 = arith.constant 0 : index
    %341 = vector.load %arg12[%c1_400, %c0_401, %c3_402, %c0_403] : memref<2x3x29x29xf32, #tpu.memory_space<vmem>>, vector<1x3x1x29xf32>
    %342 = vector.shape_cast %341 : vector<1x3x1x29xf32> to vector<3x29xf32>
    %343 = vector.shape_cast %340 : vector<3x29xf32> to vector<1x3x1x29xf32>
    tpu.vector_store %arg12[%c1_400, %c0_401, %c3_402, %c0_403], %343 {strides = array<i32>} : memref<2x3x29x29xf32, #tpu.memory_space<vmem>>, vector<1x3x1x29xf32>,
    %c0_404 = arith.constant 0 : index
    %c248 = arith.constant 248 : index
    %344 = vector.load %arg17[%c0_404, %c248] : memref<8x1920xf32, #tpu.memory_space<vmem>>, vector<3x29xf32>
    %c0_405 = arith.constant 0 : index
    %c0_406 = arith.constant 0 : index
    %c4_407 = arith.constant 4 : index
    %c0_408 = arith.constant 0 : index
    %345 = vector.load %arg12[%c0_405, %c0_406, %c4_407, %c0_408] : memref<2x3x29x29xf32, #tpu.memory_space<vmem>>, vector<1x3x1x29xf32>
    %346 = vector.shape_cast %345 : vector<1x3x1x29xf32> to vector<3x29xf32>
    %347 = vector.shape_cast %344 : vector<3x29xf32> to vector<1x3x1x29xf32>
    tpu.vector_store %arg12[%c0_405, %c0_406, %c4_407, %c0_408], %347 {strides = array<i32>} : memref<2x3x29x29xf32, #tpu.memory_space<vmem>>, vector<1x3x1x29xf32>,
    %c0_409 = arith.constant 0 : index
    %c279 = arith.constant 279 : index
    %348 = vector.load %arg17[%c0_409, %c279] : memref<8x1920xf32, #tpu.memory_space<vmem>>, vector<3x29xf32>
    %c1_410 = arith.constant 1 : index
    %c0_411 = arith.constant 0 : index
    %c4_412 = arith.constant 4 : index
    %c0_413 = arith.constant 0 : index
    %349 = vector.load %arg12[%c1_410, %c0_411, %c4_412, %c0_413] : memref<2x3x29x29xf32, #tpu.memory_space<vmem>>, vector<1x3x1x29xf32>
    %350 = vector.shape_cast %349 : vector<1x3x1x29xf32> to vector<3x29xf32>
    %351 = vector.shape_cast %348 : vector<3x29xf32> to vector<1x3x1x29xf32>
    tpu.vector_store %arg12[%c1_410, %c0_411, %c4_412, %c0_413], %351 {strides = array<i32>} : memref<2x3x29x29xf32, #tpu.memory_space<vmem>>, vector<1x3x1x29xf32>,
    %c0_414 = arith.constant 0 : index
    %c310_415 = arith.constant 310 : index
    %352 = vector.load %arg17[%c0_414, %c310_415] : memref<8x1920xf32, #tpu.memory_space<vmem>>, vector<3x29xf32>
    %c0_416 = arith.constant 0 : index
    %c0_417 = arith.constant 0 : index
    %c5_418 = arith.constant 5 : index
    %c0_419 = arith.constant 0 : index
    %353 = vector.load %arg12[%c0_416, %c0_417, %c5_418, %c0_419] : memref<2x3x29x29xf32, #tpu.memory_space<vmem>>, vector<1x3x1x29xf32>
    %354 = vector.shape_cast %353 : vector<1x3x1x29xf32> to vector<3x29xf32>
    %355 = vector.shape_cast %352 : vector<3x29xf32> to vector<1x3x1x29xf32>
    tpu.vector_store %arg12[%c0_416, %c0_417, %c5_418, %c0_419], %355 {strides = array<i32>} : memref<2x3x29x29xf32, #tpu.memory_space<vmem>>, vector<1x3x1x29xf32>,
    %c0_420 = arith.constant 0 : index
    %c341 = arith.constant 341 : index
    %356 = vector.load %arg17[%c0_420, %c341] : memref<8x1920xf32, #tpu.memory_space<vmem>>, vector<3x29xf32>
    %c1_421 = arith.constant 1 : index
    %c0_422 = arith.constant 0 : index
    %c5_423 = arith.constant 5 : index
    %c0_424 = arith.constant 0 : index
    %357 = vector.load %arg12[%c1_421, %c0_422, %c5_423, %c0_424] : memref<2x3x29x29xf32, #tpu.memory_space<vmem>>, vector<1x3x1x29xf32>
    %358 = vector.shape_cast %357 : vector<1x3x1x29xf32> to vector<3x29xf32>
    %359 = vector.shape_cast %356 : vector<3x29xf32> to vector<1x3x1x29xf32>
    tpu.vector_store %arg12[%c1_421, %c0_422, %c5_423, %c0_424], %359 {strides = array<i32>} : memref<2x3x29x29xf32, #tpu.memory_space<vmem>>, vector<1x3x1x29xf32>,
    %c0_425 = arith.constant 0 : index
    %c372 = arith.constant 372 : index
    %360 = vector.load %arg17[%c0_425, %c372] : memref<8x1920xf32, #tpu.memory_space<vmem>>, vector<3x29xf32>
    %c0_426 = arith.constant 0 : index
    %c0_427 = arith.constant 0 : index
    %c6_428 = arith.constant 6 : index
    %c0_429 = arith.constant 0 : index
    %361 = vector.load %arg12[%c0_426, %c0_427, %c6_428, %c0_429] : memref<2x3x29x29xf32, #tpu.memory_space<vmem>>, vector<1x3x1x29xf32>
    %362 = vector.shape_cast %361 : vector<1x3x1x29xf32> to vector<3x29xf32>
    %363 = vector.shape_cast %360 : vector<3x29xf32> to vector<1x3x1x29xf32>
    tpu.vector_store %arg12[%c0_426, %c0_427, %c6_428, %c0_429], %363 {strides = array<i32>} : memref<2x3x29x29xf32, #tpu.memory_space<vmem>>, vector<1x3x1x29xf32>,
    %c0_430 = arith.constant 0 : index
    %c403 = arith.constant 403 : index
    %364 = vector.load %arg17[%c0_430, %c403] : memref<8x1920xf32, #tpu.memory_space<vmem>>, vector<3x29xf32>
    %c1_431 = arith.constant 1 : index
    %c0_432 = arith.constant 0 : index
    %c6_433 = arith.constant 6 : index
    %c0_434 = arith.constant 0 : index
    %365 = vector.load %arg12[%c1_431, %c0_432, %c6_433, %c0_434] : memref<2x3x29x29xf32, #tpu.memory_space<vmem>>, vector<1x3x1x29xf32>
    %366 = vector.shape_cast %365 : vector<1x3x1x29xf32> to vector<3x29xf32>
    %367 = vector.shape_cast %364 : vector<3x29xf32> to vector<1x3x1x29xf32>
    tpu.vector_store %arg12[%c1_431, %c0_432, %c6_433, %c0_434], %367 {strides = array<i32>} : memref<2x3x29x29xf32, #tpu.memory_space<vmem>>, vector<1x3x1x29xf32>,
    %c0_435 = arith.constant 0 : index
    %c434_436 = arith.constant 434 : index
    %368 = vector.load %arg17[%c0_435, %c434_436] : memref<8x1920xf32, #tpu.memory_space<vmem>>, vector<3x29xf32>
    %c0_437 = arith.constant 0 : index
    %c0_438 = arith.constant 0 : index
    %c7_439 = arith.constant 7 : index
    %c0_440 = arith.constant 0 : index
    %369 = vector.load %arg12[%c0_437, %c0_438, %c7_439, %c0_440] : memref<2x3x29x29xf32, #tpu.memory_space<vmem>>, vector<1x3x1x29xf32>
    %370 = vector.shape_cast %369 : vector<1x3x1x29xf32> to vector<3x29xf32>
    %371 = vector.shape_cast %368 : vector<3x29xf32> to vector<1x3x1x29xf32>
    tpu.vector_store %arg12[%c0_437, %c0_438, %c7_439, %c0_440], %371 {strides = array<i32>} : memref<2x3x29x29xf32, #tpu.memory_space<vmem>>, vector<1x3x1x29xf32>,
    %c0_441 = arith.constant 0 : index
    %c465 = arith.constant 465 : index
    %372 = vector.load %arg17[%c0_441, %c465] : memref<8x1920xf32, #tpu.memory_space<vmem>>, vector<3x29xf32>
    %c1_442 = arith.constant 1 : index
    %c0_443 = arith.constant 0 : index
    %c7_444 = arith.constant 7 : index
    %c0_445 = arith.constant 0 : index
    %373 = vector.load %arg12[%c1_442, %c0_443, %c7_444, %c0_445] : memref<2x3x29x29xf32, #tpu.memory_space<vmem>>, vector<1x3x1x29xf32>
    %374 = vector.shape_cast %373 : vector<1x3x1x29xf32> to vector<3x29xf32>
    %375 = vector.shape_cast %372 : vector<3x29xf32> to vector<1x3x1x29xf32>
    tpu.vector_store %arg12[%c1_442, %c0_443, %c7_444, %c0_445], %375 {strides = array<i32>} : memref<2x3x29x29xf32, #tpu.memory_space<vmem>>, vector<1x3x1x29xf32>,
    %c0_446 = arith.constant 0 : index
    %c496 = arith.constant 496 : index
    %376 = vector.load %arg17[%c0_446, %c496] : memref<8x1920xf32, #tpu.memory_space<vmem>>, vector<3x29xf32>
    %c0_447 = arith.constant 0 : index
    %c0_448 = arith.constant 0 : index
    %c8_449 = arith.constant 8 : index
    %c0_450 = arith.constant 0 : index
    %377 = vector.load %arg12[%c0_447, %c0_448, %c8_449, %c0_450] : memref<2x3x29x29xf32, #tpu.memory_space<vmem>>, vector<1x3x1x29xf32>
    %378 = vector.shape_cast %377 : vector<1x3x1x29xf32> to vector<3x29xf32>
    %379 = vector.shape_cast %376 : vector<3x29xf32> to vector<1x3x1x29xf32>
    tpu.vector_store %arg12[%c0_447, %c0_448, %c8_449, %c0_450], %379 {strides = array<i32>} : memref<2x3x29x29xf32, #tpu.memory_space<vmem>>, vector<1x3x1x29xf32>,
    %c0_451 = arith.constant 0 : index
    %c527_452 = arith.constant 527 : index
    %380 = vector.load %arg17[%c0_451, %c527_452] : memref<8x1920xf32, #tpu.memory_space<vmem>>, vector<3x29xf32>
    %c1_453 = arith.constant 1 : index
    %c0_454 = arith.constant 0 : index
    %c8_455 = arith.constant 8 : index
    %c0_456 = arith.constant 0 : index
    %381 = vector.load %arg12[%c1_453, %c0_454, %c8_455, %c0_456] : memref<2x3x29x29xf32, #tpu.memory_space<vmem>>, vector<1x3x1x29xf32>
    %382 = vector.shape_cast %381 : vector<1x3x1x29xf32> to vector<3x29xf32>
    %383 = vector.shape_cast %380 : vector<3x29xf32> to vector<1x3x1x29xf32>
    tpu.vector_store %arg12[%c1_453, %c0_454, %c8_455, %c0_456], %383 {strides = array<i32>} : memref<2x3x29x29xf32, #tpu.memory_space<vmem>>, vector<1x3x1x29xf32>,
    %c0_457 = arith.constant 0 : index
    %c558_458 = arith.constant 558 : index
    %384 = vector.load %arg17[%c0_457, %c558_458] : memref<8x1920xf32, #tpu.memory_space<vmem>>, vector<3x29xf32>
    %c0_459 = arith.constant 0 : index
    %c0_460 = arith.constant 0 : index
    %c9 = arith.constant 9 : index
    %c0_461 = arith.constant 0 : index
    %385 = vector.load %arg12[%c0_459, %c0_460, %c9, %c0_461] : memref<2x3x29x29xf32, #tpu.memory_space<vmem>>, vector<1x3x1x29xf32>
    %386 = vector.shape_cast %385 : vector<1x3x1x29xf32> to vector<3x29xf32>
    %387 = vector.shape_cast %384 : vector<3x29xf32> to vector<1x3x1x29xf32>
    tpu.vector_store %arg12[%c0_459, %c0_460, %c9, %c0_461], %387 {strides = array<i32>} : memref<2x3x29x29xf32, #tpu.memory_space<vmem>>, vector<1x3x1x29xf32>,
    %c0_462 = arith.constant 0 : index
    %c589 = arith.constant 589 : index
    %388 = vector.load %arg17[%c0_462, %c589] : memref<8x1920xf32, #tpu.memory_space<vmem>>, vector<3x29xf32>
    %c1_463 = arith.constant 1 : index
    %c0_464 = arith.constant 0 : index
    %c9_465 = arith.constant 9 : index
    %c0_466 = arith.constant 0 : index
    %389 = vector.load %arg12[%c1_463, %c0_464, %c9_465, %c0_466] : memref<2x3x29x29xf32, #tpu.memory_space<vmem>>, vector<1x3x1x29xf32>
    %390 = vector.shape_cast %389 : vector<1x3x1x29xf32> to vector<3x29xf32>
    %391 = vector.shape_cast %388 : vector<3x29xf32> to vector<1x3x1x29xf32>
    tpu.vector_store %arg12[%c1_463, %c0_464, %c9_465, %c0_466], %391 {strides = array<i32>} : memref<2x3x29x29xf32, #tpu.memory_space<vmem>>, vector<1x3x1x29xf32>,
    %c0_467 = arith.constant 0 : index
    %c620 = arith.constant 620 : index
    %392 = vector.load %arg17[%c0_467, %c620] : memref<8x1920xf32, #tpu.memory_space<vmem>>, vector<3x29xf32>
    %c0_468 = arith.constant 0 : index
    %c0_469 = arith.constant 0 : index
    %c10 = arith.constant 10 : index
    %c0_470 = arith.constant 0 : index
    %393 = vector.load %arg12[%c0_468, %c0_469, %c10, %c0_470] : memref<2x3x29x29xf32, #tpu.memory_space<vmem>>, vector<1x3x1x29xf32>
    %394 = vector.shape_cast %393 : vector<1x3x1x29xf32> to vector<3x29xf32>
    %395 = vector.shape_cast %392 : vector<3x29xf32> to vector<1x3x1x29xf32>
    tpu.vector_store %arg12[%c0_468, %c0_469, %c10, %c0_470], %395 {strides = array<i32>} : memref<2x3x29x29xf32, #tpu.memory_space<vmem>>, vector<1x3x1x29xf32>,
    %c0_471 = arith.constant 0 : index
    %c651 = arith.constant 651 : index
    %396 = vector.load %arg17[%c0_471, %c651] : memref<8x1920xf32, #tpu.memory_space<vmem>>, vector<3x29xf32>
    %c1_472 = arith.constant 1 : index
    %c0_473 = arith.constant 0 : index
    %c10_474 = arith.constant 10 : index
    %c0_475 = arith.constant 0 : index
    %397 = vector.load %arg12[%c1_472, %c0_473, %c10_474, %c0_475] : memref<2x3x29x29xf32, #tpu.memory_space<vmem>>, vector<1x3x1x29xf32>
    %398 = vector.shape_cast %397 : vector<1x3x1x29xf32> to vector<3x29xf32>
    %399 = vector.shape_cast %396 : vector<3x29xf32> to vector<1x3x1x29xf32>
    tpu.vector_store %arg12[%c1_472, %c0_473, %c10_474, %c0_475], %399 {strides = array<i32>} : memref<2x3x29x29xf32, #tpu.memory_space<vmem>>, vector<1x3x1x29xf32>,
    %c0_476 = arith.constant 0 : index
    %c682_477 = arith.constant 682 : index
    %400 = vector.load %arg17[%c0_476, %c682_477] : memref<8x1920xf32, #tpu.memory_space<vmem>>, vector<3x29xf32>
    %c0_478 = arith.constant 0 : index
    %c0_479 = arith.constant 0 : index
    %c11 = arith.constant 11 : index
    %c0_480 = arith.constant 0 : index
    %401 = vector.load %arg12[%c0_478, %c0_479, %c11, %c0_480] : memref<2x3x29x29xf32, #tpu.memory_space<vmem>>, vector<1x3x1x29xf32>
    %402 = vector.shape_cast %401 : vector<1x3x1x29xf32> to vector<3x29xf32>
    %403 = vector.shape_cast %400 : vector<3x29xf32> to vector<1x3x1x29xf32>
    tpu.vector_store %arg12[%c0_478, %c0_479, %c11, %c0_480], %403 {strides = array<i32>} : memref<2x3x29x29xf32, #tpu.memory_space<vmem>>, vector<1x3x1x29xf32>,
    %c0_481 = arith.constant 0 : index
    %c713 = arith.constant 713 : index
    %404 = vector.load %arg17[%c0_481, %c713] : memref<8x1920xf32, #tpu.memory_space<vmem>>, vector<3x29xf32>
    %c1_482 = arith.constant 1 : index
    %c0_483 = arith.constant 0 : index
    %c11_484 = arith.constant 11 : index
    %c0_485 = arith.constant 0 : index
    %405 = vector.load %arg12[%c1_482, %c0_483, %c11_484, %c0_485] : memref<2x3x29x29xf32, #tpu.memory_space<vmem>>, vector<1x3x1x29xf32>
    %406 = vector.shape_cast %405 : vector<1x3x1x29xf32> to vector<3x29xf32>
    %407 = vector.shape_cast %404 : vector<3x29xf32> to vector<1x3x1x29xf32>
    tpu.vector_store %arg12[%c1_482, %c0_483, %c11_484, %c0_485], %407 {strides = array<i32>} : memref<2x3x29x29xf32, #tpu.memory_space<vmem>>, vector<1x3x1x29xf32>,
    %c0_486 = arith.constant 0 : index
    %c744 = arith.constant 744 : index
    %408 = vector.load %arg17[%c0_486, %c744] : memref<8x1920xf32, #tpu.memory_space<vmem>>, vector<3x29xf32>
    %c0_487 = arith.constant 0 : index
    %c0_488 = arith.constant 0 : index
    %c12 = arith.constant 12 : index
    %c0_489 = arith.constant 0 : index
    %409 = vector.load %arg12[%c0_487, %c0_488, %c12, %c0_489] : memref<2x3x29x29xf32, #tpu.memory_space<vmem>>, vector<1x3x1x29xf32>
    %410 = vector.shape_cast %409 : vector<1x3x1x29xf32> to vector<3x29xf32>
    %411 = vector.shape_cast %408 : vector<3x29xf32> to vector<1x3x1x29xf32>
    tpu.vector_store %arg12[%c0_487, %c0_488, %c12, %c0_489], %411 {strides = array<i32>} : memref<2x3x29x29xf32, #tpu.memory_space<vmem>>, vector<1x3x1x29xf32>,
    %c0_490 = arith.constant 0 : index
    %c775 = arith.constant 775 : index
    %412 = vector.load %arg17[%c0_490, %c775] : memref<8x1920xf32, #tpu.memory_space<vmem>>, vector<3x29xf32>
    %c1_491 = arith.constant 1 : index
    %c0_492 = arith.constant 0 : index
    %c12_493 = arith.constant 12 : index
    %c0_494 = arith.constant 0 : index
    %413 = vector.load %arg12[%c1_491, %c0_492, %c12_493, %c0_494] : memref<2x3x29x29xf32, #tpu.memory_space<vmem>>, vector<1x3x1x29xf32>
    %414 = vector.shape_cast %413 : vector<1x3x1x29xf32> to vector<3x29xf32>
    %415 = vector.shape_cast %412 : vector<3x29xf32> to vector<1x3x1x29xf32>
    tpu.vector_store %arg12[%c1_491, %c0_492, %c12_493, %c0_494], %415 {strides = array<i32>} : memref<2x3x29x29xf32, #tpu.memory_space<vmem>>, vector<1x3x1x29xf32>,
    %c0_495 = arith.constant 0 : index
    %c806_496 = arith.constant 806 : index
    %416 = vector.load %arg17[%c0_495, %c806_496] : memref<8x1920xf32, #tpu.memory_space<vmem>>, vector<3x29xf32>
    %c0_497 = arith.constant 0 : index
    %c0_498 = arith.constant 0 : index
    %c13 = arith.constant 13 : index
    %c0_499 = arith.constant 0 : index
    %417 = vector.load %arg12[%c0_497, %c0_498, %c13, %c0_499] : memref<2x3x29x29xf32, #tpu.memory_space<vmem>>, vector<1x3x1x29xf32>
    %418 = vector.shape_cast %417 : vector<1x3x1x29xf32> to vector<3x29xf32>
    %419 = vector.shape_cast %416 : vector<3x29xf32> to vector<1x3x1x29xf32>
    tpu.vector_store %arg12[%c0_497, %c0_498, %c13, %c0_499], %419 {strides = array<i32>} : memref<2x3x29x29xf32, #tpu.memory_space<vmem>>, vector<1x3x1x29xf32>,
    %c0_500 = arith.constant 0 : index
    %c837 = arith.constant 837 : index
    %420 = vector.load %arg17[%c0_500, %c837] : memref<8x1920xf32, #tpu.memory_space<vmem>>, vector<3x29xf32>
    %c1_501 = arith.constant 1 : index
    %c0_502 = arith.constant 0 : index
    %c13_503 = arith.constant 13 : index
    %c0_504 = arith.constant 0 : index
    %421 = vector.load %arg12[%c1_501, %c0_502, %c13_503, %c0_504] : memref<2x3x29x29xf32, #tpu.memory_space<vmem>>, vector<1x3x1x29xf32>
    %422 = vector.shape_cast %421 : vector<1x3x1x29xf32> to vector<3x29xf32>
    %423 = vector.shape_cast %420 : vector<3x29xf32> to vector<1x3x1x29xf32>
    tpu.vector_store %arg12[%c1_501, %c0_502, %c13_503, %c0_504], %423 {strides = array<i32>} : memref<2x3x29x29xf32, #tpu.memory_space<vmem>>, vector<1x3x1x29xf32>,
    %c0_505 = arith.constant 0 : index
    %c868 = arith.constant 868 : index
    %424 = vector.load %arg17[%c0_505, %c868] : memref<8x1920xf32, #tpu.memory_space<vmem>>, vector<3x29xf32>
    %c0_506 = arith.constant 0 : index
    %c0_507 = arith.constant 0 : index
    %c14 = arith.constant 14 : index
    %c0_508 = arith.constant 0 : index
    %425 = vector.load %arg12[%c0_506, %c0_507, %c14, %c0_508] : memref<2x3x29x29xf32, #tpu.memory_space<vmem>>, vector<1x3x1x29xf32>
    %426 = vector.shape_cast %425 : vector<1x3x1x29xf32> to vector<3x29xf32>
    %427 = vector.shape_cast %424 : vector<3x29xf32> to vector<1x3x1x29xf32>
    tpu.vector_store %arg12[%c0_506, %c0_507, %c14, %c0_508], %427 {strides = array<i32>} : memref<2x3x29x29xf32, #tpu.memory_space<vmem>>, vector<1x3x1x29xf32>,
    %c0_509 = arith.constant 0 : index
    %c899 = arith.constant 899 : index
    %428 = vector.load %arg17[%c0_509, %c899] : memref<8x1920xf32, #tpu.memory_space<vmem>>, vector<3x29xf32>
    %c1_510 = arith.constant 1 : index
    %c0_511 = arith.constant 0 : index
    %c14_512 = arith.constant 14 : index
    %c0_513 = arith.constant 0 : index
    %429 = vector.load %arg12[%c1_510, %c0_511, %c14_512, %c0_513] : memref<2x3x29x29xf32, #tpu.memory_space<vmem>>, vector<1x3x1x29xf32>
    %430 = vector.shape_cast %429 : vector<1x3x1x29xf32> to vector<3x29xf32>
    %431 = vector.shape_cast %428 : vector<3x29xf32> to vector<1x3x1x29xf32>
    tpu.vector_store %arg12[%c1_510, %c0_511, %c14_512, %c0_513], %431 {strides = array<i32>} : memref<2x3x29x29xf32, #tpu.memory_space<vmem>>, vector<1x3x1x29xf32>,
    %c0_514 = arith.constant 0 : index
    %c930_515 = arith.constant 930 : index
    %432 = vector.load %arg17[%c0_514, %c930_515] : memref<8x1920xf32, #tpu.memory_space<vmem>>, vector<3x29xf32>
    %c0_516 = arith.constant 0 : index
    %c0_517 = arith.constant 0 : index
    %c15 = arith.constant 15 : index
    %c0_518 = arith.constant 0 : index
    %433 = vector.load %arg12[%c0_516, %c0_517, %c15, %c0_518] : memref<2x3x29x29xf32, #tpu.memory_space<vmem>>, vector<1x3x1x29xf32>
    %434 = vector.shape_cast %433 : vector<1x3x1x29xf32> to vector<3x29xf32>
    %435 = vector.shape_cast %432 : vector<3x29xf32> to vector<1x3x1x29xf32>
    tpu.vector_store %arg12[%c0_516, %c0_517, %c15, %c0_518], %435 {strides = array<i32>} : memref<2x3x29x29xf32, #tpu.memory_space<vmem>>, vector<1x3x1x29xf32>,
    %c0_519 = arith.constant 0 : index
    %c961 = arith.constant 961 : index
    %436 = vector.load %arg17[%c0_519, %c961] : memref<8x1920xf32, #tpu.memory_space<vmem>>, vector<3x29xf32>
    %c1_520 = arith.constant 1 : index
    %c0_521 = arith.constant 0 : index
    %c15_522 = arith.constant 15 : index
    %c0_523 = arith.constant 0 : index
    %437 = vector.load %arg12[%c1_520, %c0_521, %c15_522, %c0_523] : memref<2x3x29x29xf32, #tpu.memory_space<vmem>>, vector<1x3x1x29xf32>
    %438 = vector.shape_cast %437 : vector<1x3x1x29xf32> to vector<3x29xf32>
    %439 = vector.shape_cast %436 : vector<3x29xf32> to vector<1x3x1x29xf32>
    tpu.vector_store %arg12[%c1_520, %c0_521, %c15_522, %c0_523], %439 {strides = array<i32>} : memref<2x3x29x29xf32, #tpu.memory_space<vmem>>, vector<1x3x1x29xf32>,
    %c0_524 = arith.constant 0 : index
    %c992 = arith.constant 992 : index
    %440 = vector.load %arg17[%c0_524, %c992] : memref<8x1920xf32, #tpu.memory_space<vmem>>, vector<3x29xf32>
    %c0_525 = arith.constant 0 : index
    %c0_526 = arith.constant 0 : index
    %c16 = arith.constant 16 : index
    %c0_527 = arith.constant 0 : index
    %441 = vector.load %arg12[%c0_525, %c0_526, %c16, %c0_527] : memref<2x3x29x29xf32, #tpu.memory_space<vmem>>, vector<1x3x1x29xf32>
    %442 = vector.shape_cast %441 : vector<1x3x1x29xf32> to vector<3x29xf32>
    %443 = vector.shape_cast %440 : vector<3x29xf32> to vector<1x3x1x29xf32>
    tpu.vector_store %arg12[%c0_525, %c0_526, %c16, %c0_527], %443 {strides = array<i32>} : memref<2x3x29x29xf32, #tpu.memory_space<vmem>>, vector<1x3x1x29xf32>,
    %c0_528 = arith.constant 0 : index
    %c1023 = arith.constant 1023 : index
    %444 = vector.load %arg17[%c0_528, %c1023] : memref<8x1920xf32, #tpu.memory_space<vmem>>, vector<3x29xf32>
    %c1_529 = arith.constant 1 : index
    %c0_530 = arith.constant 0 : index
    %c16_531 = arith.constant 16 : index
    %c0_532 = arith.constant 0 : index
    %445 = vector.load %arg12[%c1_529, %c0_530, %c16_531, %c0_532] : memref<2x3x29x29xf32, #tpu.memory_space<vmem>>, vector<1x3x1x29xf32>
    %446 = vector.shape_cast %445 : vector<1x3x1x29xf32> to vector<3x29xf32>
    %447 = vector.shape_cast %444 : vector<3x29xf32> to vector<1x3x1x29xf32>
    tpu.vector_store %arg12[%c1_529, %c0_530, %c16_531, %c0_532], %447 {strides = array<i32>} : memref<2x3x29x29xf32, #tpu.memory_space<vmem>>, vector<1x3x1x29xf32>,
    %c0_533 = arith.constant 0 : index
    %c1054_534 = arith.constant 1054 : index
    %448 = vector.load %arg17[%c0_533, %c1054_534] : memref<8x1920xf32, #tpu.memory_space<vmem>>, vector<3x29xf32>
    %c0_535 = arith.constant 0 : index
    %c0_536 = arith.constant 0 : index
    %c17 = arith.constant 17 : index
    %c0_537 = arith.constant 0 : index
    %449 = vector.load %arg12[%c0_535, %c0_536, %c17, %c0_537] : memref<2x3x29x29xf32, #tpu.memory_space<vmem>>, vector<1x3x1x29xf32>
    %450 = vector.shape_cast %449 : vector<1x3x1x29xf32> to vector<3x29xf32>
    %451 = vector.shape_cast %448 : vector<3x29xf32> to vector<1x3x1x29xf32>
    tpu.vector_store %arg12[%c0_535, %c0_536, %c17, %c0_537], %451 {strides = array<i32>} : memref<2x3x29x29xf32, #tpu.memory_space<vmem>>, vector<1x3x1x29xf32>,
    %c0_538 = arith.constant 0 : index
    %c1085 = arith.constant 1085 : index
    %452 = vector.load %arg17[%c0_538, %c1085] : memref<8x1920xf32, #tpu.memory_space<vmem>>, vector<3x29xf32>
    %c1_539 = arith.constant 1 : index
    %c0_540 = arith.constant 0 : index
    %c17_541 = arith.constant 17 : index
    %c0_542 = arith.constant 0 : index
    %453 = vector.load %arg12[%c1_539, %c0_540, %c17_541, %c0_542] : memref<2x3x29x29xf32, #tpu.memory_space<vmem>>, vector<1x3x1x29xf32>
    %454 = vector.shape_cast %453 : vector<1x3x1x29xf32> to vector<3x29xf32>
    %455 = vector.shape_cast %452 : vector<3x29xf32> to vector<1x3x1x29xf32>
    tpu.vector_store %arg12[%c1_539, %c0_540, %c17_541, %c0_542], %455 {strides = array<i32>} : memref<2x3x29x29xf32, #tpu.memory_space<vmem>>, vector<1x3x1x29xf32>,
    %c0_543 = arith.constant 0 : index
    %c1116 = arith.constant 1116 : index
    %456 = vector.load %arg17[%c0_543, %c1116] : memref<8x1920xf32, #tpu.memory_space<vmem>>, vector<3x29xf32>
    %c0_544 = arith.constant 0 : index
    %c0_545 = arith.constant 0 : index
    %c18 = arith.constant 18 : index
    %c0_546 = arith.constant 0 : index
    %457 = vector.load %arg12[%c0_544, %c0_545, %c18, %c0_546] : memref<2x3x29x29xf32, #tpu.memory_space<vmem>>, vector<1x3x1x29xf32>
    %458 = vector.shape_cast %457 : vector<1x3x1x29xf32> to vector<3x29xf32>
    %459 = vector.shape_cast %456 : vector<3x29xf32> to vector<1x3x1x29xf32>
    tpu.vector_store %arg12[%c0_544, %c0_545, %c18, %c0_546], %459 {strides = array<i32>} : memref<2x3x29x29xf32, #tpu.memory_space<vmem>>, vector<1x3x1x29xf32>,
    %c0_547 = arith.constant 0 : index
    %c1147 = arith.constant 1147 : index
    %460 = vector.load %arg17[%c0_547, %c1147] : memref<8x1920xf32, #tpu.memory_space<vmem>>, vector<3x29xf32>
    %c1_548 = arith.constant 1 : index
    %c0_549 = arith.constant 0 : index
    %c18_550 = arith.constant 18 : index
    %c0_551 = arith.constant 0 : index
    %461 = vector.load %arg12[%c1_548, %c0_549, %c18_550, %c0_551] : memref<2x3x29x29xf32, #tpu.memory_space<vmem>>, vector<1x3x1x29xf32>
    %462 = vector.shape_cast %461 : vector<1x3x1x29xf32> to vector<3x29xf32>
    %463 = vector.shape_cast %460 : vector<3x29xf32> to vector<1x3x1x29xf32>
    tpu.vector_store %arg12[%c1_548, %c0_549, %c18_550, %c0_551], %463 {strides = array<i32>} : memref<2x3x29x29xf32, #tpu.memory_space<vmem>>, vector<1x3x1x29xf32>,
    %c0_552 = arith.constant 0 : index
    %c1178_553 = arith.constant 1178 : index
    %464 = vector.load %arg17[%c0_552, %c1178_553] : memref<8x1920xf32, #tpu.memory_space<vmem>>, vector<3x29xf32>
    %c0_554 = arith.constant 0 : index
    %c0_555 = arith.constant 0 : index
    %c19 = arith.constant 19 : index
    %c0_556 = arith.constant 0 : index
    %465 = vector.load %arg12[%c0_554, %c0_555, %c19, %c0_556] : memref<2x3x29x29xf32, #tpu.memory_space<vmem>>, vector<1x3x1x29xf32>
    %466 = vector.shape_cast %465 : vector<1x3x1x29xf32> to vector<3x29xf32>
    %467 = vector.shape_cast %464 : vector<3x29xf32> to vector<1x3x1x29xf32>
    tpu.vector_store %arg12[%c0_554, %c0_555, %c19, %c0_556], %467 {strides = array<i32>} : memref<2x3x29x29xf32, #tpu.memory_space<vmem>>, vector<1x3x1x29xf32>,
    %c0_557 = arith.constant 0 : index
    %c1209 = arith.constant 1209 : index
    %468 = vector.load %arg17[%c0_557, %c1209] : memref<8x1920xf32, #tpu.memory_space<vmem>>, vector<3x29xf32>
    %c1_558 = arith.constant 1 : index
    %c0_559 = arith.constant 0 : index
    %c19_560 = arith.constant 19 : index
    %c0_561 = arith.constant 0 : index
    %469 = vector.load %arg12[%c1_558, %c0_559, %c19_560, %c0_561] : memref<2x3x29x29xf32, #tpu.memory_space<vmem>>, vector<1x3x1x29xf32>
    %470 = vector.shape_cast %469 : vector<1x3x1x29xf32> to vector<3x29xf32>
    %471 = vector.shape_cast %468 : vector<3x29xf32> to vector<1x3x1x29xf32>
    tpu.vector_store %arg12[%c1_558, %c0_559, %c19_560, %c0_561], %471 {strides = array<i32>} : memref<2x3x29x29xf32, #tpu.memory_space<vmem>>, vector<1x3x1x29xf32>,
    %c0_562 = arith.constant 0 : index
    %c1240 = arith.constant 1240 : index
    %472 = vector.load %arg17[%c0_562, %c1240] : memref<8x1920xf32, #tpu.memory_space<vmem>>, vector<3x29xf32>
    %c0_563 = arith.constant 0 : index
    %c0_564 = arith.constant 0 : index
    %c20 = arith.constant 20 : index
    %c0_565 = arith.constant 0 : index
    %473 = vector.load %arg12[%c0_563, %c0_564, %c20, %c0_565] : memref<2x3x29x29xf32, #tpu.memory_space<vmem>>, vector<1x3x1x29xf32>
    %474 = vector.shape_cast %473 : vector<1x3x1x29xf32> to vector<3x29xf32>
    %475 = vector.shape_cast %472 : vector<3x29xf32> to vector<1x3x1x29xf32>
    tpu.vector_store %arg12[%c0_563, %c0_564, %c20, %c0_565], %475 {strides = array<i32>} : memref<2x3x29x29xf32, #tpu.memory_space<vmem>>, vector<1x3x1x29xf32>,
    %c0_566 = arith.constant 0 : index
    %c1271 = arith.constant 1271 : index
    %476 = vector.load %arg17[%c0_566, %c1271] : memref<8x1920xf32, #tpu.memory_space<vmem>>, vector<3x29xf32>
    %c1_567 = arith.constant 1 : index
    %c0_568 = arith.constant 0 : index
    %c20_569 = arith.constant 20 : index
    %c0_570 = arith.constant 0 : index
    %477 = vector.load %arg12[%c1_567, %c0_568, %c20_569, %c0_570] : memref<2x3x29x29xf32, #tpu.memory_space<vmem>>, vector<1x3x1x29xf32>
    %478 = vector.shape_cast %477 : vector<1x3x1x29xf32> to vector<3x29xf32>
    %479 = vector.shape_cast %476 : vector<3x29xf32> to vector<1x3x1x29xf32>
    tpu.vector_store %arg12[%c1_567, %c0_568, %c20_569, %c0_570], %479 {strides = array<i32>} : memref<2x3x29x29xf32, #tpu.memory_space<vmem>>, vector<1x3x1x29xf32>,
    %c0_571 = arith.constant 0 : index
    %c1302_572 = arith.constant 1302 : index
    %480 = vector.load %arg17[%c0_571, %c1302_572] : memref<8x1920xf32, #tpu.memory_space<vmem>>, vector<3x29xf32>
    %c0_573 = arith.constant 0 : index
    %c0_574 = arith.constant 0 : index
    %c21 = arith.constant 21 : index
    %c0_575 = arith.constant 0 : index
    %481 = vector.load %arg12[%c0_573, %c0_574, %c21, %c0_575] : memref<2x3x29x29xf32, #tpu.memory_space<vmem>>, vector<1x3x1x29xf32>
    %482 = vector.shape_cast %481 : vector<1x3x1x29xf32> to vector<3x29xf32>
    %483 = vector.shape_cast %480 : vector<3x29xf32> to vector<1x3x1x29xf32>
    tpu.vector_store %arg12[%c0_573, %c0_574, %c21, %c0_575], %483 {strides = array<i32>} : memref<2x3x29x29xf32, #tpu.memory_space<vmem>>, vector<1x3x1x29xf32>,
    %c0_576 = arith.constant 0 : index
    %c1333 = arith.constant 1333 : index
    %484 = vector.load %arg17[%c0_576, %c1333] : memref<8x1920xf32, #tpu.memory_space<vmem>>, vector<3x29xf32>
    %c1_577 = arith.constant 1 : index
    %c0_578 = arith.constant 0 : index
    %c21_579 = arith.constant 21 : index
    %c0_580 = arith.constant 0 : index
    %485 = vector.load %arg12[%c1_577, %c0_578, %c21_579, %c0_580] : memref<2x3x29x29xf32, #tpu.memory_space<vmem>>, vector<1x3x1x29xf32>
    %486 = vector.shape_cast %485 : vector<1x3x1x29xf32> to vector<3x29xf32>
    %487 = vector.shape_cast %484 : vector<3x29xf32> to vector<1x3x1x29xf32>
    tpu.vector_store %arg12[%c1_577, %c0_578, %c21_579, %c0_580], %487 {strides = array<i32>} : memref<2x3x29x29xf32, #tpu.memory_space<vmem>>, vector<1x3x1x29xf32>,
    %c0_581 = arith.constant 0 : index
    %c1364 = arith.constant 1364 : index
    %488 = vector.load %arg17[%c0_581, %c1364] : memref<8x1920xf32, #tpu.memory_space<vmem>>, vector<3x29xf32>
    %c0_582 = arith.constant 0 : index
    %c0_583 = arith.constant 0 : index
    %c22 = arith.constant 22 : index
    %c0_584 = arith.constant 0 : index
    %489 = vector.load %arg12[%c0_582, %c0_583, %c22, %c0_584] : memref<2x3x29x29xf32, #tpu.memory_space<vmem>>, vector<1x3x1x29xf32>
    %490 = vector.shape_cast %489 : vector<1x3x1x29xf32> to vector<3x29xf32>
    %491 = vector.shape_cast %488 : vector<3x29xf32> to vector<1x3x1x29xf32>
    tpu.vector_store %arg12[%c0_582, %c0_583, %c22, %c0_584], %491 {strides = array<i32>} : memref<2x3x29x29xf32, #tpu.memory_space<vmem>>, vector<1x3x1x29xf32>,
    %c0_585 = arith.constant 0 : index
    %c1395 = arith.constant 1395 : index
    %492 = vector.load %arg17[%c0_585, %c1395] : memref<8x1920xf32, #tpu.memory_space<vmem>>, vector<3x29xf32>
    %c1_586 = arith.constant 1 : index
    %c0_587 = arith.constant 0 : index
    %c22_588 = arith.constant 22 : index
    %c0_589 = arith.constant 0 : index
    %493 = vector.load %arg12[%c1_586, %c0_587, %c22_588, %c0_589] : memref<2x3x29x29xf32, #tpu.memory_space<vmem>>, vector<1x3x1x29xf32>
    %494 = vector.shape_cast %493 : vector<1x3x1x29xf32> to vector<3x29xf32>
    %495 = vector.shape_cast %492 : vector<3x29xf32> to vector<1x3x1x29xf32>
    tpu.vector_store %arg12[%c1_586, %c0_587, %c22_588, %c0_589], %495 {strides = array<i32>} : memref<2x3x29x29xf32, #tpu.memory_space<vmem>>, vector<1x3x1x29xf32>,
    %c0_590 = arith.constant 0 : index
    %c1426_591 = arith.constant 1426 : index
    %496 = vector.load %arg17[%c0_590, %c1426_591] : memref<8x1920xf32, #tpu.memory_space<vmem>>, vector<3x29xf32>
    %c0_592 = arith.constant 0 : index
    %c0_593 = arith.constant 0 : index
    %c23 = arith.constant 23 : index
    %c0_594 = arith.constant 0 : index
    %497 = vector.load %arg12[%c0_592, %c0_593, %c23, %c0_594] : memref<2x3x29x29xf32, #tpu.memory_space<vmem>>, vector<1x3x1x29xf32>
    %498 = vector.shape_cast %497 : vector<1x3x1x29xf32> to vector<3x29xf32>
    %499 = vector.shape_cast %496 : vector<3x29xf32> to vector<1x3x1x29xf32>
    tpu.vector_store %arg12[%c0_592, %c0_593, %c23, %c0_594], %499 {strides = array<i32>} : memref<2x3x29x29xf32, #tpu.memory_space<vmem>>, vector<1x3x1x29xf32>,
    %c0_595 = arith.constant 0 : index
    %c1457 = arith.constant 1457 : index
    %500 = vector.load %arg17[%c0_595, %c1457] : memref<8x1920xf32, #tpu.memory_space<vmem>>, vector<3x29xf32>
    %c1_596 = arith.constant 1 : index
    %c0_597 = arith.constant 0 : index
    %c23_598 = arith.constant 23 : index
    %c0_599 = arith.constant 0 : index
    %501 = vector.load %arg12[%c1_596, %c0_597, %c23_598, %c0_599] : memref<2x3x29x29xf32, #tpu.memory_space<vmem>>, vector<1x3x1x29xf32>
    %502 = vector.shape_cast %501 : vector<1x3x1x29xf32> to vector<3x29xf32>
    %503 = vector.shape_cast %500 : vector<3x29xf32> to vector<1x3x1x29xf32>
    tpu.vector_store %arg12[%c1_596, %c0_597, %c23_598, %c0_599], %503 {strides = array<i32>} : memref<2x3x29x29xf32, #tpu.memory_space<vmem>>, vector<1x3x1x29xf32>,
    %c0_600 = arith.constant 0 : index
    %c1488 = arith.constant 1488 : index
    %504 = vector.load %arg17[%c0_600, %c1488] : memref<8x1920xf32, #tpu.memory_space<vmem>>, vector<3x29xf32>
    %c0_601 = arith.constant 0 : index
    %c0_602 = arith.constant 0 : index
    %c24 = arith.constant 24 : index
    %c0_603 = arith.constant 0 : index
    %505 = vector.load %arg12[%c0_601, %c0_602, %c24, %c0_603] : memref<2x3x29x29xf32, #tpu.memory_space<vmem>>, vector<1x3x1x29xf32>
    %506 = vector.shape_cast %505 : vector<1x3x1x29xf32> to vector<3x29xf32>
    %507 = vector.shape_cast %504 : vector<3x29xf32> to vector<1x3x1x29xf32>
    tpu.vector_store %arg12[%c0_601, %c0_602, %c24, %c0_603], %507 {strides = array<i32>} : memref<2x3x29x29xf32, #tpu.memory_space<vmem>>, vector<1x3x1x29xf32>,
    %c0_604 = arith.constant 0 : index
    %c1519 = arith.constant 1519 : index
    %508 = vector.load %arg17[%c0_604, %c1519] : memref<8x1920xf32, #tpu.memory_space<vmem>>, vector<3x29xf32>
    %c1_605 = arith.constant 1 : index
    %c0_606 = arith.constant 0 : index
    %c24_607 = arith.constant 24 : index
    %c0_608 = arith.constant 0 : index
    %509 = vector.load %arg12[%c1_605, %c0_606, %c24_607, %c0_608] : memref<2x3x29x29xf32, #tpu.memory_space<vmem>>, vector<1x3x1x29xf32>
    %510 = vector.shape_cast %509 : vector<1x3x1x29xf32> to vector<3x29xf32>
    %511 = vector.shape_cast %508 : vector<3x29xf32> to vector<1x3x1x29xf32>
    tpu.vector_store %arg12[%c1_605, %c0_606, %c24_607, %c0_608], %511 {strides = array<i32>} : memref<2x3x29x29xf32, #tpu.memory_space<vmem>>, vector<1x3x1x29xf32>,
    %c0_609 = arith.constant 0 : index
    %c1550_610 = arith.constant 1550 : index
    %512 = vector.load %arg17[%c0_609, %c1550_610] : memref<8x1920xf32, #tpu.memory_space<vmem>>, vector<3x29xf32>
    %c0_611 = arith.constant 0 : index
    %c0_612 = arith.constant 0 : index
    %c25 = arith.constant 25 : index
    %c0_613 = arith.constant 0 : index
    %513 = vector.load %arg12[%c0_611, %c0_612, %c25, %c0_613] : memref<2x3x29x29xf32, #tpu.memory_space<vmem>>, vector<1x3x1x29xf32>
    %514 = vector.shape_cast %513 : vector<1x3x1x29xf32> to vector<3x29xf32>
    %515 = vector.shape_cast %512 : vector<3x29xf32> to vector<1x3x1x29xf32>
    tpu.vector_store %arg12[%c0_611, %c0_612, %c25, %c0_613], %515 {strides = array<i32>} : memref<2x3x29x29xf32, #tpu.memory_space<vmem>>, vector<1x3x1x29xf32>,
    %c0_614 = arith.constant 0 : index
    %c1581 = arith.constant 1581 : index
    %516 = vector.load %arg17[%c0_614, %c1581] : memref<8x1920xf32, #tpu.memory_space<vmem>>, vector<3x29xf32>
    %c1_615 = arith.constant 1 : index
    %c0_616 = arith.constant 0 : index
    %c25_617 = arith.constant 25 : index
    %c0_618 = arith.constant 0 : index
    %517 = vector.load %arg12[%c1_615, %c0_616, %c25_617, %c0_618] : memref<2x3x29x29xf32, #tpu.memory_space<vmem>>, vector<1x3x1x29xf32>
    %518 = vector.shape_cast %517 : vector<1x3x1x29xf32> to vector<3x29xf32>
    %519 = vector.shape_cast %516 : vector<3x29xf32> to vector<1x3x1x29xf32>
    tpu.vector_store %arg12[%c1_615, %c0_616, %c25_617, %c0_618], %519 {strides = array<i32>} : memref<2x3x29x29xf32, #tpu.memory_space<vmem>>, vector<1x3x1x29xf32>,
    %c0_619 = arith.constant 0 : index
    %c1612 = arith.constant 1612 : index
    %520 = vector.load %arg17[%c0_619, %c1612] : memref<8x1920xf32, #tpu.memory_space<vmem>>, vector<3x29xf32>
    %c0_620 = arith.constant 0 : index
    %c0_621 = arith.constant 0 : index
    %c26 = arith.constant 26 : index
    %c0_622 = arith.constant 0 : index
    %521 = vector.load %arg12[%c0_620, %c0_621, %c26, %c0_622] : memref<2x3x29x29xf32, #tpu.memory_space<vmem>>, vector<1x3x1x29xf32>
    %522 = vector.shape_cast %521 : vector<1x3x1x29xf32> to vector<3x29xf32>
    %523 = vector.shape_cast %520 : vector<3x29xf32> to vector<1x3x1x29xf32>
    tpu.vector_store %arg12[%c0_620, %c0_621, %c26, %c0_622], %523 {strides = array<i32>} : memref<2x3x29x29xf32, #tpu.memory_space<vmem>>, vector<1x3x1x29xf32>,
    %c0_623 = arith.constant 0 : index
    %c1643 = arith.constant 1643 : index
    %524 = vector.load %arg17[%c0_623, %c1643] : memref<8x1920xf32, #tpu.memory_space<vmem>>, vector<3x29xf32>
    %c1_624 = arith.constant 1 : index
    %c0_625 = arith.constant 0 : index
    %c26_626 = arith.constant 26 : index
    %c0_627 = arith.constant 0 : index
    %525 = vector.load %arg12[%c1_624, %c0_625, %c26_626, %c0_627] : memref<2x3x29x29xf32, #tpu.memory_space<vmem>>, vector<1x3x1x29xf32>
    %526 = vector.shape_cast %525 : vector<1x3x1x29xf32> to vector<3x29xf32>
    %527 = vector.shape_cast %524 : vector<3x29xf32> to vector<1x3x1x29xf32>
    tpu.vector_store %arg12[%c1_624, %c0_625, %c26_626, %c0_627], %527 {strides = array<i32>} : memref<2x3x29x29xf32, #tpu.memory_space<vmem>>, vector<1x3x1x29xf32>,
    %c0_628 = arith.constant 0 : index
    %c1674_629 = arith.constant 1674 : index
    %528 = vector.load %arg17[%c0_628, %c1674_629] : memref<8x1920xf32, #tpu.memory_space<vmem>>, vector<3x29xf32>
    %c0_630 = arith.constant 0 : index
    %c0_631 = arith.constant 0 : index
    %c27 = arith.constant 27 : index
    %c0_632 = arith.constant 0 : index
    %529 = vector.load %arg12[%c0_630, %c0_631, %c27, %c0_632] : memref<2x3x29x29xf32, #tpu.memory_space<vmem>>, vector<1x3x1x29xf32>
    %530 = vector.shape_cast %529 : vector<1x3x1x29xf32> to vector<3x29xf32>
    %531 = vector.shape_cast %528 : vector<3x29xf32> to vector<1x3x1x29xf32>
    tpu.vector_store %arg12[%c0_630, %c0_631, %c27, %c0_632], %531 {strides = array<i32>} : memref<2x3x29x29xf32, #tpu.memory_space<vmem>>, vector<1x3x1x29xf32>,
    %c0_633 = arith.constant 0 : index
    %c1705 = arith.constant 1705 : index
    %532 = vector.load %arg17[%c0_633, %c1705] : memref<8x1920xf32, #tpu.memory_space<vmem>>, vector<3x29xf32>
    %c1_634 = arith.constant 1 : index
    %c0_635 = arith.constant 0 : index
    %c27_636 = arith.constant 27 : index
    %c0_637 = arith.constant 0 : index
    %533 = vector.load %arg12[%c1_634, %c0_635, %c27_636, %c0_637] : memref<2x3x29x29xf32, #tpu.memory_space<vmem>>, vector<1x3x1x29xf32>
    %534 = vector.shape_cast %533 : vector<1x3x1x29xf32> to vector<3x29xf32>
    %535 = vector.shape_cast %532 : vector<3x29xf32> to vector<1x3x1x29xf32>
    tpu.vector_store %arg12[%c1_634, %c0_635, %c27_636, %c0_637], %535 {strides = array<i32>} : memref<2x3x29x29xf32, #tpu.memory_space<vmem>>, vector<1x3x1x29xf32>,
    %c0_638 = arith.constant 0 : index
    %c1736 = arith.constant 1736 : index
    %536 = vector.load %arg17[%c0_638, %c1736] : memref<8x1920xf32, #tpu.memory_space<vmem>>, vector<3x29xf32>
    %c0_639 = arith.constant 0 : index
    %c0_640 = arith.constant 0 : index
    %c28 = arith.constant 28 : index
    %c0_641 = arith.constant 0 : index
    %537 = vector.load %arg12[%c0_639, %c0_640, %c28, %c0_641] : memref<2x3x29x29xf32, #tpu.memory_space<vmem>>, vector<1x3x1x29xf32>
    %538 = vector.shape_cast %537 : vector<1x3x1x29xf32> to vector<3x29xf32>
    %539 = vector.shape_cast %536 : vector<3x29xf32> to vector<1x3x1x29xf32>
    tpu.vector_store %arg12[%c0_639, %c0_640, %c28, %c0_641], %539 {strides = array<i32>} : memref<2x3x29x29xf32, #tpu.memory_space<vmem>>, vector<1x3x1x29xf32>,
    %c0_642 = arith.constant 0 : index
    %c1767 = arith.constant 1767 : index
    %540 = vector.load %arg17[%c0_642, %c1767] : memref<8x1920xf32, #tpu.memory_space<vmem>>, vector<3x29xf32>
    %c1_643 = arith.constant 1 : index
    %c0_644 = arith.constant 0 : index
    %c28_645 = arith.constant 28 : index
    %c0_646 = arith.constant 0 : index
    %541 = vector.load %arg12[%c1_643, %c0_644, %c28_645, %c0_646] : memref<2x3x29x29xf32, #tpu.memory_space<vmem>>, vector<1x3x1x29xf32>
    %542 = vector.shape_cast %541 : vector<1x3x1x29xf32> to vector<3x29xf32>
    %543 = vector.shape_cast %540 : vector<3x29xf32> to vector<1x3x1x29xf32>
    tpu.vector_store %arg12[%c1_643, %c0_644, %c28_645, %c0_646], %543 {strides = array<i32>} : memref<2x3x29x29xf32, #tpu.memory_space<vmem>>, vector<1x3x1x29xf32>,
    return
  }
  func.func @transform_0(%arg0: i32) -> (i32, i32, i32, i32) {
    %c0_i32 = arith.constant 0 : i32
    %c0_i32_0 = arith.constant 0 : i32
    %c0_i32_1 = arith.constant 0 : i32
    %c0_i32_2 = arith.constant 0 : i32
    %c0_i32_3 = arith.constant 0 : i32
    return %c0_i32, %c0_i32_0, %c0_i32_1, %c0_i32_2 : i32, i32, i32, i32
  }
  func.func @transform_1(%arg0: i32) -> (i32, i32) {
    %c0_i32 = arith.constant 0 : i32
    %c0_i32_0 = arith.constant 0 : i32
    %c0_i32_1 = arith.constant 0 : i32
    return %c0_i32, %c0_i32_0 : i32, i32
  }
  func.func @transform_2(%arg0: i32) -> (i32, i32) {
    %c0_i32 = arith.constant 0 : i32
    %c0_i32_0 = arith.constant 0 : i32
    %c0_i32_1 = arith.constant 0 : i32
    return %c0_i32, %c0_i32_0 : i32, i32
  }
  func.func @transform_3(%arg0: i32) -> (i32, i32) {
    %c0_i32 = arith.constant 0 : i32
    %c0_i32_0 = arith.constant 0 : i32
    %c0_i32_1 = arith.constant 0 : i32
    return %c0_i32, %c0_i32_0 : i32, i32
  }
  func.func @transform_4(%arg0: i32) -> (i32, i32) {
    %c0_i32 = arith.constant 0 : i32
    %c0_i32_0 = arith.constant 0 : i32
    %c0_i32_1 = arith.constant 0 : i32
    return %c0_i32, %c0_i32_0 : i32, i32
  }
  func.func @transform_5(%arg0: i32) -> (i32, i32, i32) {
    %c0_i32 = arith.constant 0 : i32
    %c0_i32_0 = arith.constant 0 : i32
    %c0_i32_1 = arith.constant 0 : i32
    %c0_i32_2 = arith.constant 0 : i32
    return %c0_i32, %c0_i32_0, %c0_i32_1 : i32, i32, i32
  }
  func.func @transform_6(%arg0: i32) -> (i32, i32) {
    %c0_i32 = arith.constant 0 : i32
    %c0_i32_0 = arith.constant 0 : i32
    %c0_i32_1 = arith.constant 0 : i32
    return %c0_i32, %c0_i32_0 : i32, i32
  }
  func.func @transform_7(%arg0: i32) -> (i32, i32) {
    %c0_i32 = arith.constant 0 : i32
    %c0_i32_0 = arith.constant 0 : i32
    %c0_i32_1 = arith.constant 0 : i32
    return %c0_i32, %c0_i32_0 : i32, i32
  }
  func.func @transform_8(%arg0: i32) -> (i32, i32, i32) {
    %c0_i32 = arith.constant 0 : i32
    %c0_i32_0 = arith.constant 0 : i32
    %c0_i32_1 = arith.constant 0 : i32
    %c0_i32_2 = arith.constant 0 : i32
    return %c0_i32, %c0_i32_0, %c0_i32_1 : i32, i32, i32
  }
  func.func @transform_9(%arg0: i32) -> (i32, i32) {
    %c0_i32 = arith.constant 0 : i32
    %c0_i32_0 = arith.constant 0 : i32
    %c0_i32_1 = arith.constant 0 : i32
    return %c0_i32, %c0_i32_0 : i32, i32
  }
  func.func @transform_10(%arg0: i32) -> (i32, i32) {
    %c0_i32 = arith.constant 0 : i32
    %c0_i32_0 = arith.constant 0 : i32
    %c0_i32_1 = arith.constant 0 : i32
    return %c0_i32, %c0_i32_0 : i32, i32
  }
  func.func @transform_11(%arg0: i32) -> (i32, i32, i32, i32) {
    %c0_i32 = arith.constant 0 : i32
    %c0_i32_0 = arith.constant 0 : i32
    %c0_i32_1 = arith.constant 0 : i32
    %c0_i32_2 = arith.constant 0 : i32
    %c0_i32_3 = arith.constant 0 : i32
    return %c0_i32, %c0_i32_0, %c0_i32_1, %c0_i32_2 : i32, i32, i32, i32
  }
}

</mosaic_0001>

<bundles_post_ra>
// kernel: forward.1
= control target key start
LH: loop header
LB: loop body
LE: loop exit
PB: predicated region body
PF: predicated region fallthrough
CT: control target
= control target key end

     0   :  { %16 = vsyncpa [#allocation8], 0  ;;  %s10858_s0 = inlined_call_operand.hbm [shape: f32[2,4,8,8], index: 0, kind: input, shape index: {}]   ;;  %s10859_s1 = inlined_call_operand.hbm [shape: f32[8,16], index: 1, kind: input, shape index: {}]   ;;  %s10860_s2 = inlined_call_operand.hbm [shape: f32[1,16], index: 2, kind: input, shape index: {}]   ;;  %s10861_s3 = inlined_call_operand.hbm [shape: f32[16,8], index: 3, kind: input, shape index: {}]   ;;  %s10862_s4 = inlined_call_operand.hbm [shape: f32[1,8], index: 4, kind: input, shape index: {}]   ;;  %s10863_s5 = inlined_call_operand.hbm [shape: f32[9,8,8], index: 5, kind: input, shape index: {}]   ;;  %s10864_s6 = inlined_call_operand.hbm [shape: f32[8,1], index: 6, kind: input, shape index: {}]   ;;  %s10865_s7 = inlined_call_operand.hbm [shape: f32[8,17], index: 7, kind: input, shape index: {}]   ;;  %s10866_s8 = inlined_call_operand.hbm [shape: f32[9,8,8], index: 8, kind: input, shape index: {}]   ;;  %s10867_s9 = inlined_call_operand.vmem [shape: f32[8,1], index: 9, kind: input, shape index: {}]   ;;  %s10868_s10 = inlined_call_operand.hbm [shape: f32[34,62], index: 10, kind: input, shape index: {}]   ;;  %s10869_s11 = inlined_call_operand.vmem [shape: f32[2,3,29,29], index: 11, kind: output, shape index: {}]  }
   0x1   :  { %17 = vsyncpa [#allocation10], 0 }
   0x2   :  { %18 = vsyncpa [#allocation13], 0 }
   0x3   :  { %19 = vsyncpa [#allocation16], 0 }
   0x4   :  { %20 = vsyncpa [#allocation19], 0  ;;  %s40_s19 = sshll.u32 %s10859_s1, 4  ;;  %s41_s19 = int_to_ptr.hbm [resolvable:$true] %s40_s19 }
   0x5   :  { %21 = vsyncpa [#allocation22], 0  ;;  %s8259_s20 = smov [#allocation9]   ;;  %s61_s24 = sshll.u32 %s10861_s3, 4  ;;  %s62_s24 = int_to_ptr.hbm [resolvable:$true] %s61_s24 }
   0x6   :  { %s42_s21 = sshll.u32 %s8259_s20, 4  ;;  %s8260_s25 = smov [#allocation12]   ;;  %s43_s21 = int_to_ptr.vmem [resolvable:$true] %s42_s21 }
   0x7   :  { %45 = dma.hbm_to_vmem [thread:$0]  %s41_s19, 128, %s43_s21, [#allocation10]  }
   0x8   :  { %s63_s26 = sshll.u32 %s8260_s25, 4  ;;  %s85_s29 = sshll.u32 %s10863_s5, 4  ;;  %s64_s26 = int_to_ptr.vmem [resolvable:$true] %s63_s26  ;;  %s86_s29 = int_to_ptr.hbm [resolvable:$true] %s85_s29 }
   0x9   :  { %s8261_s1 = smov 128   ;;  %s8262_s30 = smov 8  }
   0xa   :  { %69 = dma.hbm_to_vmem [thread:$0]  %s62_s24, 256, %s64_s26, [#allocation13], %s8261_s1, %s8261_s1, %s8262_s30  }
   0xb   :  { %s110_s14 = sshll.u32 %s10865_s7, 4  ;;  %s8263_s3 = smov [#allocation15]   ;;  %s111_s14 = int_to_ptr.hbm [resolvable:$true] %s110_s14 }
   0xc   :  { %s87_s15 = sshll.u32 %s8263_s3, 4  ;;  %s8264_s5 = smov [#allocation18]   ;;  %s88_s15 = int_to_ptr.vmem [resolvable:$true] %s87_s15 }
   0xd   :  { %93 = dma.hbm_to_vmem [thread:$0]  %s86_s29, 1152, %s88_s15, [#allocation16], %s8261_s1, %s8261_s1, %s8262_s30  }
   0xe   :  { %s112_s16 = sshll.u32 %s8264_s5, 4  ;;  %s26_s19 = sshll.u32 %s10858_s0, 4  ;;  %s113_s16 = int_to_ptr.vmem [resolvable:$true] %s112_s16  ;;  %s27_s19 = int_to_ptr.hbm [resolvable:$true] %s26_s19 }
   0xf   :  { %115 = dma.hbm_to_vmem [thread:$0]  %s111_s14, 128, %s113_s16, [#allocation19]  }
  0x10   :  { %s51_s7 = sshll.u32 %s10860_s2, 4  ;;  %s8265_s22 = smov [#allocation7]   ;;  %s52_s7 = int_to_ptr.hbm [resolvable:$true] %s51_s7 }
  0x11   :  { %s28_s23 = sshll.u32 %s8265_s22, 4  ;;  %s8266_s24 = smov [#allocation11]   ;;  %s29_s23 = int_to_ptr.vmem [resolvable:$true] %s28_s23 }
  0x12   :  { %34 = dma.hbm_to_vmem [thread:$0]  %s27_s19, 1024, %s29_s23, [#allocation8], %s8261_s1, %s8261_s1, %s8262_s30  }
  0x13   :  { %s53_s25 = sshll.u32 %s8266_s24, 4  ;;  %s75_s0 = sshll.u32 %s10862_s4, 4  ;;  %s54_s25 = int_to_ptr.vmem [resolvable:$true] %s53_s25  ;;  %s76_s0 = int_to_ptr.hbm [resolvable:$true] %s75_s0 }
  0x14   :  { %56 = dma.hbm_to_vmem [thread:$0]  %s52_s7, 16, %s54_s25, [#allocation10]  }
  0x15   :  { %s99_s2 = sshll.u32 %s10864_s6, 4  ;;  %s8267_s12 = smov [#allocation14]   ;;  %s100_s2 = int_to_ptr.hbm [resolvable:$true] %s99_s2 }
  0x16   :  { %s77_s13 = sshll.u32 %s8267_s12, 4  ;;  %s8268_s14 = smov [#allocation17]   ;;  %s78_s13 = int_to_ptr.vmem [resolvable:$true] %s77_s13 }
  0x17   :  { %80 = dma.hbm_to_vmem [thread:$0]  %s76_s0, 16, %s78_s13, [#allocation13]  }
  0x18   :  { %s101_s3 = sshll.u32 %s8268_s14, 4  ;;  %s120_s16 = sshll.u32 %s10866_s8, 4  ;;  %s102_s3 = int_to_ptr.vmem [resolvable:$true] %s101_s3  ;;  %s121_s16 = int_to_ptr.hbm [resolvable:$true] %s120_s16 }
  0x19   :  { %104 = dma.hbm_to_vmem [thread:$0]  %s100_s2, 128, %s102_s3, [#allocation16]  }
  0x1a   :  { %s135_s18 = sshll.u32 %s10868_s10, 4  ;;  %s8269_s19 = smov [#allocation20]   ;;  %s136_s18 = int_to_ptr.hbm [resolvable:$true] %s135_s18 }
  0x1b   :  { %s122_s6 = sshll.u32 %s8269_s19, 4  ;;  %s8270_s20 = smov [#allocation21]   ;;  %s123_s6 = int_to_ptr.vmem [resolvable:$true] %s122_s6 }
  0x1c   :  { %128 = dma.hbm_to_vmem [thread:$0]  %s121_s16, 1152, %s123_s6, [#allocation19], %s8261_s1, %s8261_s1, %s8262_s30  }
  0x1d   :  { %s137_s21 = sshll.u32 %s8270_s20, 4  ;;  %s138_s21 = int_to_ptr.vmem [resolvable:$true] %s137_s21 }
  0x1e   :  { %143 = dma.hbm_to_vmem [thread:$0]  %s136_s18, 640, %s138_s21, [#allocation22], %s8261_s1, %s8261_s1, %s8262_s30  }
  0x1f   :  { %8247 = dma.done.wait [#allocation8], 1024  }
  0x20   :  { %8248 = vsyncadd [#allocation8], 4294966272 }
  0x21   :  { %8249 = dma.done.wait [#allocation10], 144  }
  0x22   :  { %8250 = vsyncadd [#allocation10], 4294967152 }
  0x23   :  { %8251 = dma.done.wait [#allocation13], 272  }
  0x24   :  { %8252 = vsyncadd [#allocation13], 4294967024 }
  0x25   :  { %8253 = dma.done.wait [#allocation16], 1280  }
  0x26   :  { %8254 = vsyncadd [#allocation16], 4294966016 }
  0x27   :  { %8255 = dma.done.wait [#allocation19], 1280  }
  0x28   :  { %8256 = vsyncadd [#allocation19], 4294966016 }
  0x29   :  { %8257 = dma.done.wait [#allocation22], 640  }
  0x2a   :  { %8258 = vsyncadd [#allocation22], 4294966656  ;;  %vm197_vm0 = vcmask 64512   ;;  %v192_v0 = vld [vmem:[#allocation9] sm:$0xff]  ;;  %v185_v2 = vld [vmem:[#allocation7 + $0x8] sm:$0xff]  ;;  %vm277_vm1 = vcmask 130048  }
  0x2b   :  { %v184_v1 = vld [vmem:[#allocation7] sm:$0xff]  ;;  %237 = vmatpush.msra.mxu0 %v192_v0  ;;  %v186_v3 = vld [vmem:[#allocation7 + $0x10] sm:$0xff]  ;;  %v187_v4 = vld [vmem:[#allocation7 + $0x18] sm:$0xff]  ;;  %vm10870_vm2 = vcmask 138240   ;;  %vm441_vm3 = vcmask 1041409   ;;  %vm444_vm4 = vcmask 1042434  }
  0x2c   :  { %7148 = vmatmul.msk.f32.vlgmr.msra.gmra.mxu0 %vm197_vm0, %v184_v1  ;;  %v188_v5 = vld [vmem:[#allocation7 + $0x20] sm:$0xff]  ;;  %v189_v6 = vld [vmem:[#allocation7 + $0x28] sm:$0xff]  ;;  %v190_v7 = vld [vmem:[#allocation7 + $0x30] sm:$0xff]  ;;  %vm447_vm5 = vcmask 1043459   ;;  %s8271_s8 = smov 42   ;;  %s8272_s10 = smov 102  }
  0x2d   :  { %v191_v8 = vld [vmem:[#allocation7 + $0x38] sm:$0xff]  ;;  %v271_v10 = vld [vmem:[#allocation12] sm:$0xff]  ;;  %v8003_v11 = vld [vmem:[#allocation11] ss:$0 sm:$0xff]  ;;  %s8273_s1 = smov 34   ;;  %s8274_s7 = smov 110  }
  0x2e   :  { %v272_v9 = vld [vmem:[#allocation12 + $0x8] sm:$0xff]  ;;  %v8004_v37 = vld [vmem:[#allocation14] ss:$0 sm:$0xff]  ;;  %s8275_s22 = smov 59   ;;  %s8276_s23 = smov 119   ;;  %vm355_vm6 = vcmask 818176  }
  0x2f   :  { %316 = vmatpush.msra.mxu1 %v272_v9  ;;  %v357_v36 = vld [vmem:[#allocation18] sm:$0xff]  ;;  %s8277_s24 = smov 51   ;;  %s8278_s25 = smov 50   ;;  %vm452_vm7 = vcmask 412944   ;;  %vm727_vm8 = vcmask 117760   ;;  %vm512_vm9 = vcmask 60416  }
  0x30   :  { %397 = vmatpush.msra.mxu2 %v357_v36  ;;  %s8279_s26 = smov 127   ;;  %s8280_s27 = smov 67   ;;  %vm531_vm10 = vcmask 478544   ;;  %vm472_vm11 = vcmask 552344   ;;  %vm491_vm12 = vcmask 970544   ;;  %vm510_vm13 = vcmask 1044408  }
  0x31   :  { %317 = vmatpush.msra.mxu1 %v271_v10  ;;  %s8281_s0 = smov 7   ;;  %s8282_s28 = smov 118   ;;  %vm550_vm14 = vcmask 617944   ;;  %vm569_vm15 = vcmask 1036144  }
  0x32   :  { %s8283_s29 = smov 58   ;;  %s8284_s2 = smov 126  }
  0x33   :  { %s8285_s12 = smov 75   ;;  %s8286_s13 = smov 15  }
  0x34   :  { %7149 = vmatmul.msk.f32.gmra.mxu0 %vm197_vm0, %v185_v2  ;;  %s8289_s14 = smov 94   ;;  %s8290_s3 = smov 93  }
  0x35   :  { %s8291_s15 = smov 92   ;;  %s8292_s5 = smov 60  }
  0x36   :  { %s8294_s17 = smov 120   ;;  %s8295_s18 = smov 86  }
  0x37   :  { %s8296_s19 = smov 18   ;;  %s8297_s6 = smov 52  }
  0x38   :  { %s8298_s20 = smov 70   ;;  %s8299_s21 = smov 104  }
  0x39   :  { %s8306_s16 = smov 54   ;;  %s8307_s4 = smov 46  }
  0x3c   :  { %7150 = vmatmul.msk.f32.gmra.mxu0 %vm197_vm0, %v186_v3 }
  0x44   :  { %7151 = vmatmul.msk.f32.gmra.mxu0 %vm197_vm0, %v187_v4 }
  0x4c   :  { %7152 = vmatmul.msk.f32.gmra.mxu0 %vm197_vm0, %v188_v5 }
  0x54   :  { %7153 = vmatmul.msk.f32.gmra.mxu0 %vm197_vm0, %v189_v6 }
  0x5c   :  { %7154 = vmatmul.msk.f32.gmra.mxu0 %vm197_vm0, %v190_v7 }
  0x64   :  { %7155 = vmatmul.msk.f32.gmra.mxu0 %vm197_vm0, %v191_v8 }
  0xa9   :  { %v239_v12 = vpop.f32.mrf.mxu0 }
  0xaa   :  { %v240_v13 = vadd.f32 %v8003_v11, %v239_v12 }
  0xac   :  { %v263_v14 = vmax.f32 %v240_v13, 0.0 }
  0xae   :  { %7156 = vmatmul.msk.f32.vlgmr.msra.gmra.mxu1 %vm277_vm1, %v263_v14 }
  0xb1   :  { %v242_v15 = vpop.f32.mrf.mxu0 }
  0xb2   :  { %v243_v16 = vadd.f32 %v8003_v11, %v242_v15 }
  0xb4   :  { %v264_v17 = vmax.f32 %v243_v16, 0.0 }
  0xb6   :  { %7157 = vmatmul.msk.f32.gmra.mxu1 %vm277_vm1, %v264_v17 }
  0xb9   :  { %v245_v18 = vpop.f32.mrf.mxu0 }
  0xba   :  { %v246_v19 = vadd.f32 %v8003_v11, %v245_v18 }
  0xbc   :  { %v265_v20 = vmax.f32 %v246_v19, 0.0 }
  0xbe   :  { %7158 = vmatmul.msk.f32.gmra.mxu1 %vm277_vm1, %v265_v20 }
  0xc1   :  { %v248_v21 = vpop.f32.mrf.mxu0 }
  0xc2   :  { %v249_v22 = vadd.f32 %v8003_v11, %v248_v21 }
  0xc4   :  { %v266_v23 = vmax.f32 %v249_v22, 0.0 }
  0xc6   :  { %7159 = vmatmul.msk.f32.gmra.mxu1 %vm277_vm1, %v266_v23 }
  0xc9   :  { %v251_v24 = vpop.f32.mrf.mxu0 }
  0xca   :  { %v252_v25 = vadd.f32 %v8003_v11, %v251_v24 }
  0xcc   :  { %v267_v26 = vmax.f32 %v252_v25, 0.0 }
  0xce   :  { %7160 = vmatmul.msk.f32.gmra.mxu1 %vm277_vm1, %v267_v26 }
  0xd1   :  { %v254_v27 = vpop.f32.mrf.mxu0 }
  0xd2   :  { %v255_v28 = vadd.f32 %v8003_v11, %v254_v27 }
  0xd4   :  { %v268_v29 = vmax.f32 %v255_v28, 0.0 }
  0xd6   :  { %7161 = vmatmul.msk.f32.gmra.mxu1 %vm277_vm1, %v268_v29 }
  0xd9   :  { %v257_v30 = vpop.f32.mrf.mxu0 }
  0xda   :  { %v258_v31 = vadd.f32 %v8003_v11, %v257_v30 }
  0xdc   :  { %v269_v32 = vmax.f32 %v258_v31, 0.0 }
  0xde   :  { %7162 = vmatmul.msk.f32.gmra.mxu1 %vm277_vm1, %v269_v32 }
  0xe1   :  { %v260_v33 = vpop.f32.mrf.mxu0 }
  0xe2   :  { %v261_v34 = vadd.f32 %v8003_v11, %v260_v33 }
  0xe4   :  { %v270_v35 = vmax.f32 %v261_v34, 0.0 }
  0xe6   :  { %7163 = vmatmul.msk.f32.gmra.mxu1 %vm277_vm1, %v270_v35 }
 0x12b   :  { %v319_v38 = vpop.f32.mrf.mxu1 }
 0x12c   :  { %v320_v39 = vadd.f32 %v8004_v37, %v319_v38 }
 0x12e   :  { %v343_v40 = vmax.f32 %v320_v39, 0.0 }
 0x130   :  { %7164 = vmatmul.msk.f32.vlgmr.msra.gmra.mxu2 %vm197_vm0, %v343_v40 }
 0x133   :  { %v322_v41 = vpop.f32.mrf.mxu1 }
 0x134   :  { %v323_v42 = vadd.f32 %v8004_v37, %v322_v41 }
 0x136   :  { %v344_v43 = vmax.f32 %v323_v42, 0.0 }
 0x138   :  { %7165 = vmatmul.msk.f32.gmra.mxu2 %vm197_vm0, %v344_v43 }
 0x13b   :  { %v325_v44 = vpop.f32.mrf.mxu1 }
 0x13c   :  { %v326_v45 = vadd.f32 %v8004_v37, %v325_v44 }
 0x13e   :  { %v345_v46 = vmax.f32 %v326_v45, 0.0 }
 0x140   :  { %7166 = vmatmul.msk.f32.gmra.mxu2 %vm197_vm0, %v345_v46 }
 0x143   :  { %v328_v47 = vpop.f32.mrf.mxu1 }
 0x144   :  { %v329_v48 = vadd.f32 %v8004_v37, %v328_v47 }
 0x146   :  { %v346_v49 = vmax.f32 %v329_v48, 0.0 }
 0x148   :  { %7167 = vmatmul.msk.f32.gmra.mxu2 %vm197_vm0, %v346_v49 }
 0x14b   :  { %v331_v50 = vpop.f32.mrf.mxu1 }
 0x14c   :  { %v332_v51 = vadd.f32 %v8004_v37, %v331_v50 }
 0x14e   :  { %v347_v52 = vmax.f32 %v332_v51, 0.0 }
 0x150   :  { %7168 = vmatmul.msk.f32.gmra.mxu2 %vm197_vm0, %v347_v52 }
 0x153   :  { %v334_v53 = vpop.f32.mrf.mxu1 }
 0x154   :  { %v335_v54 = vadd.f32 %v8004_v37, %v334_v53 }
 0x156   :  { %v348_v55 = vmax.f32 %v335_v54, 0.0 }
 0x158   :  { %7169 = vmatmul.msk.f32.gmra.mxu2 %vm197_vm0, %v348_v55 }
 0x15b   :  { %v337_v56 = vpop.f32.mrf.mxu1 }
 0x15c   :  { %v338_v57 = vadd.f32 %v8004_v37, %v337_v56 }
 0x15e   :  { %v349_v58 = vmax.f32 %v338_v57, 0.0 }
 0x160   :  { %7170 = vmatmul.msk.f32.gmra.mxu2 %vm197_vm0, %v349_v58 }
 0x163   :  { %v340_v59 = vpop.f32.mrf.mxu1 }
 0x164   :  { %v341_v60 = vadd.f32 %v8004_v37, %v340_v59 }
 0x166   :  { %v350_v61 = vmax.f32 %v341_v60, 0.0 }
 0x168   :  { %7171 = vmatmul.msk.f32.gmra.mxu2 %vm197_vm0, %v350_v61 }
 0x1b3   :  { %v399_v62 = vpop.f32.mrf.mxu2 }
 0x1b4   :  { %424 = vst.msk [vmem:[#allocation2] sm:$0xff] %vm10870_vm2, %v399_v62 }
 0x1bb   :  { %v402_v63 = vpop.f32.mrf.mxu2  ;;  %v514_v14 = vld [vmem:[#allocation2 + $0x2] sm:$0x1]  ;;  %v474_v15 = vld [vmem:[#allocation2 + $0x1] sm:$0x1]  ;;  %v432_v16 = vld [vmem:[#allocation2] sm:$0x1] }
 0x1bc   :  { %425 = vst.msk [vmem:[#allocation2 + $0x8] sm:$0xff] %vm10870_vm2, %v402_v63  ;;  %v552_v40 = vld [vmem:[#allocation2 + $0x3] sm:$0x1] }
 0x1c3   :  { %v405_v0 = vpop.f32.mrf.mxu2  ;;  %v515_v2 = vld [vmem:[#allocation2 + $0xa] sm:$0x1]  ;;  %v475_v3 = vld [vmem:[#allocation2 + $0x9] sm:$0x1]  ;;  %v433_v4 = vld [vmem:[#allocation2 + $0x8] sm:$0x1] }
 0x1c4   :  { %426 = vst.msk [vmem:[#allocation2 + $0x10] sm:$0xff] %vm10870_vm2, %v405_v0  ;;  %v522_v8 = vrot.slane %v515_v2, 7  ;;  %v482_v9 = vrot.slane %v475_v3, 7  ;;  %v440_v10 = vrot.slane %v433_v4, 7  ;;  %v553_v33 = vld [vmem:[#allocation2 + $0xb] sm:$0x1] }
 0x1c5   :  { %v560_v36 = vrot.slane %v553_v33, 7 }
 0x1c6   :  { %v523_v19 = vsel %vm441_vm3, %v522_v8, %v514_v14  ;;  %v483_v21 = vsel %vm441_vm3, %v482_v9, %v474_v15  ;;  %v442_v25 = vsel %vm441_vm3, %v440_v10, %v432_v16  ;;  %v593_v9 = vld [vmem:[#allocation2 + $0xc] sm:$0x1] }
 0x1c7   :  { %v561_v41 = vsel %vm441_vm3, %v560_v36, %v552_v40 }
 0x1cb   :  { %v408_v1 = vpop.f32.mrf.mxu2  ;;  %v516_v5 = vld [vmem:[#allocation2 + $0x12] sm:$0x1]  ;;  %v476_v6 = vld [vmem:[#allocation2 + $0x11] sm:$0x1]  ;;  %v434_v7 = vld [vmem:[#allocation2 + $0x10] sm:$0x1] }
 0x1cc   :  { %427 = vst.msk [vmem:[#allocation2 + $0x18] sm:$0xff] %vm10870_vm2, %v408_v1  ;;  %v524_v11 = vrot.slane %v516_v5, 6  ;;  %v484_v12 = vrot.slane %v476_v6, 6  ;;  %v443_v13 = vrot.slane %v434_v7, 6  ;;  %v554_v34 = vld [vmem:[#allocation2 + $0x13] sm:$0x1] }
 0x1cd   :  { %v562_v37 = vrot.slane %v554_v34, 6  ;;  %v594_v14 = vld [vmem:[#allocation2 + $0x14] sm:$0x1] }
 0x1ce   :  { %v525_v27 = vsel %vm444_vm4, %v524_v11, %v523_v19  ;;  %v485_v28 = vsel %vm444_vm4, %v484_v12, %v483_v21  ;;  %v445_v29 = vsel %vm444_vm4, %v443_v13, %v442_v25 }
 0x1cf   :  { %v563_v42 = vsel %vm444_vm4, %v562_v37, %v561_v41 }
 0x1d3   :  { %v411_v17 = vpop.f32.mrf.mxu2  ;;  %v517_v18 = vld [vmem:[#allocation2 + $0x1a] sm:$0x1]  ;;  %v477_v20 = vld [vmem:[#allocation2 + $0x19] sm:$0x1]  ;;  %v435_v22 = vld [vmem:[#allocation2 + $0x18] sm:$0x1] }
 0x1d4   :  { %428 = vst.msk [vmem:[#allocation2 + $0x20] sm:$0xff] %vm10870_vm2, %v411_v17  ;;  %v526_v23 = vrot.slane %v517_v18, 5  ;;  %v486_v24 = vrot.slane %v477_v20, 5  ;;  %v446_v26 = vrot.slane %v435_v22, 5  ;;  %v555_v35 = vld [vmem:[#allocation2 + $0x1b] sm:$0x1] }
 0x1d5   :  { %v564_v39 = vrot.slane %v555_v35, 5  ;;  %v595_v17 = vld [vmem:[#allocation2 + $0x1c] sm:$0x1]  ;;  %v600_v20 = vrot.slane %v593_v9, 7  ;;  %v710_v9 = vld [vmem:[#allocation2 + $0x17] sm:$0x1] }
 0x1d6   :  { %v527_v30 = vsel %vm447_vm5, %v526_v23, %v525_v27  ;;  %v487_v31 = vsel %vm447_vm5, %v486_v24, %v485_v28  ;;  %v448_v32 = vsel %vm447_vm5, %v446_v26, %v445_v29  ;;  %v602_v23 = vrot.slane %v594_v14, 6  ;;  %v592_v29 = vld [vmem:[#allocation2 + $0x4] sm:$0x1] }
 0x1d7   :  { %528 = vrot.lane.b32.xlu2 %v527_v30, %s8271_s8  ;;  %488 = vrot.lane.b32.xlu1 %v487_v31, %s8272_s10  ;;  %v565_v43 = vsel %vm447_vm5, %v564_v39, %v563_v42  ;;  %v604_v26 = vrot.slane %v595_v17, 5  ;;  %v631_v39 = vld [vmem:[#allocation2 + $0xd] sm:$0x1] }
 0x1d8   :  { %449 = vrot.lane.b32.xlu0 %v448_v32, %s8273_s1  ;;  %v601_v32 = vsel %vm441_vm3, %v600_v20, %v592_v29 }
 0x1d9   :  { %v603_v35 = vsel %vm444_vm4, %v602_v23, %v601_v32 }
 0x1da   :  { %v605_v40 = vsel %vm447_vm5, %v604_v26, %v603_v35 }
 0x1db   :  { %v414_v38 = vpop.f32.mrf.mxu2  ;;  %v533_v58 = vld [vmem:[#allocation2 + $0x22] sm:$0x1]  ;;  %v493_v59 = vld [vmem:[#allocation2 + $0x21] sm:$0x1]  ;;  %v455_v60 = vld [vmem:[#allocation2 + $0x20] sm:$0x1] }
 0x1dc   :  { %429 = vst.msk [vmem:[#allocation2 + $0x28] sm:$0xff] %vm10870_vm2, %v414_v38  ;;  %v571_v30 = vld [vmem:[#allocation2 + $0x23] sm:$0x1]  ;;  %v611_v34 = vld [vmem:[#allocation2 + $0x24] sm:$0x1] }
 0x1dd   :  { %v689_v26 = vld [vmem:[#allocation2 + $0x26] sm:$0x1] }
 0x1e0   :  { %566 = vrot.lane.b32.xlu0 %v565_v43, %s8274_s7 }
 0x1e3   :  { %v417_v44 = vpop.f32.mrf.mxu2  ;;  %v534_v46 = vld [vmem:[#allocation2 + $0x2a] sm:$0x1]  ;;  %v494_v47 = vld [vmem:[#allocation2 + $0x29] sm:$0x1]  ;;  %v456_v48 = vld [vmem:[#allocation2 + $0x28] sm:$0x1] }
 0x1e4   :  { %430 = vst.msk [vmem:[#allocation2 + $0x30] sm:$0xff] %vm10870_vm2, %v417_v44  ;;  %v541_v52 = vrot.slane %v534_v46, 7  ;;  %v501_v53 = vrot.slane %v494_v47, 7  ;;  %v463_v54 = vrot.slane %v456_v48, 7  ;;  %v572_v10 = vld [vmem:[#allocation2 + $0x2b] sm:$0x1] }
 0x1e5   :  { %v612_v16 = vld [vmem:[#allocation2 + $0x2c] sm:$0x1]  ;;  %v579_v21 = vrot.slane %v572_v10, 7  ;;  %v652_v38 = vld [vmem:[#allocation2 + $0x2d] sm:$0x1] }
 0x1e6   :  { %v542_v62 = vsel %vm441_vm3, %v541_v52, %v533_v58  ;;  %v502_v0 = vsel %vm441_vm3, %v501_v53, %v493_v59  ;;  %v464_v4 = vsel %vm441_vm3, %v463_v54, %v455_v60  ;;  %v619_v25 = vrot.slane %v612_v16, 7  ;;  %v632_v44 = vld [vmem:[#allocation2 + $0x15] sm:$0x1]  ;;  %v633_v48 = vld [vmem:[#allocation2 + $0x1d] sm:$0x1] }
 0x1e7   :  { %v580_v33 = vsel %vm441_vm3, %v579_v21, %v571_v30  ;;  %v673_v52 = vld [vmem:[#allocation2 + $0x1e] sm:$0x1]  ;;  %v640_v54 = vrot.slane %v632_v44, 6  ;;  %v651_v59 = vld [vmem:[#allocation2 + $0x25] sm:$0x1] }
 0x1e8   :  { %v620_v37 = vsel %vm441_vm3, %v619_v25, %v611_v34  ;;  %v630_v60 = vld [vmem:[#allocation2 + $0x5] sm:$0x1]  ;;  %v708_v25 = vld [vmem:[#allocation2 + $0x7] sm:$0x1] }
 0x1e9   :  { %v729_v30 = vld [vmem:[#allocation2 + $0x27] sm:$0x1] }
 0x1eb   :  { %v420_v45 = vpop.f32.mrf.mxu2  ;;  %v535_v49 = vld [vmem:[#allocation2 + $0x32] sm:$0x1]  ;;  %v495_v50 = vld [vmem:[#allocation2 + $0x31] sm:$0x1]  ;;  %v457_v51 = vld [vmem:[#allocation2 + $0x30] sm:$0x1] }
 0x1ec   :  { %431 = vst.msk [vmem:[#allocation2 + $0x38] sm:$0xff] %vm10870_vm2, %v420_v45  ;;  %v543_v55 = vrot.slane %v535_v49, 6  ;;  %v503_v56 = vrot.slane %v495_v50, 6  ;;  %v465_v57 = vrot.slane %v457_v51, 6  ;;  %v573_v15 = vld [vmem:[#allocation2 + $0x33] sm:$0x1] }
 0x1ed   :  { %v613_v19 = vld [vmem:[#allocation2 + $0x34] sm:$0x1]  ;;  %v581_v24 = vrot.slane %v573_v15, 6  ;;  %v653_v43 = vld [vmem:[#allocation2 + $0x35] sm:$0x1]  ;;  %v659_v50 = vrot.slane %v652_v38, 7 }
 0x1ee   :  { %v544_v6 = vsel %vm444_vm4, %v543_v55, %v542_v62  ;;  %v504_v7 = vsel %vm444_vm4, %v503_v56, %v502_v0  ;;  %v466_v8 = vsel %vm444_vm4, %v465_v57, %v464_v4  ;;  %v621_v28 = vrot.slane %v613_v19, 6  ;;  %v671_v45 = vld [vmem:[#allocation2 + $0xe] sm:$0x1]  ;;  %v672_v49 = vld [vmem:[#allocation2 + $0x16] sm:$0x1] }
 0x1ef   :  { %v582_v36 = vsel %vm444_vm4, %v581_v24, %v580_v33  ;;  %v638_v51 = vrot.slane %v631_v39, 7  ;;  %v661_v53 = vrot.slane %v653_v43, 6  ;;  %v678_v55 = vrot.slane %v671_v45, 7  ;;  %v670_v0 = vld [vmem:[#allocation2 + $0x6] sm:$0x1] }
 0x1f0   :  { %v622_v42 = vsel %vm444_vm4, %v621_v28, %v620_v37  ;;  %v642_v57 = vrot.slane %v633_v48, 5  ;;  %v680_v58 = vrot.slane %v672_v49, 6  ;;  %v660_v62 = vsel %vm441_vm3, %v659_v50, %v651_v59  ;;  %v709_v4 = vld [vmem:[#allocation2 + $0xf] sm:$0x1]  ;;  %v691_v10 = vld [vmem:[#allocation2 + $0x36] sm:$0x1] }
 0x1f1   :  { %v731_v15 = vld [vmem:[#allocation2 + $0x37] sm:$0x1]  ;;  %v716_v16 = vrot.slane %v709_v4, 7  ;;  %v718_v19 = vrot.slane %v710_v9, 6  ;;  %v699_v20 = vrot.slane %v691_v10, 6  ;;  %v8287_v38 = vmov 0.0  }
 0x1f2   :  { %v739_v24 = vrot.slane %v731_v15, 6  ;;  %351 = vst [vmem:[#allocation3] sm:$0xff] %v8287_v38  ;;  %v8288_v43 = vmov 0   ;;  %vm628_vm2 = vcmask 683544   ;;  %v754_v9 = vld [vmem:[#allocation15 + $0x8] sm:$0xff] }
 0x1f3   :  { %v536_v61 = vld [vmem:[#allocation2 + $0x3a] sm:$0x1]  ;;  %v496_v63 = vld [vmem:[#allocation2 + $0x39] sm:$0x1]  ;;  %v458_v1 = vld [vmem:[#allocation2 + $0x38] sm:$0x1]  ;;  %v717_v28 = vsel %vm441_vm3, %v716_v16, %v708_v25  ;;  %7560 = vset.pattern.permute.xlu1 %v8288_v43  ;;  %7642 = vset.pattern.permute.xlu0 %v8288_v43 }
 0x1f4   :  { %v545_v2 = vrot.slane %v536_v61, 5  ;;  %v505_v3 = vrot.slane %v496_v63, 5  ;;  %v467_v5 = vrot.slane %v458_v1, 5  ;;  %v574_v18 = vld [vmem:[#allocation2 + $0x3b] sm:$0x1]  ;;  %v682_v61 = vrot.slane %v673_v52, 5  ;;  %7641 = vset.pattern.permute.xlu2 %v8288_v43 }
 0x1f5   :  { %v614_v22 = vld [vmem:[#allocation2 + $0x3c] sm:$0x1]  ;;  %v583_v27 = vrot.slane %v574_v18, 5  ;;  %v654_v47 = vld [vmem:[#allocation2 + $0x3d] sm:$0x1]  ;;  %v639_v63 = vsel %vm441_vm3, %v638_v51, %v630_v60  ;;  %v662_v1 = vsel %vm444_vm4, %v661_v53, %v660_v62  ;;  %352 = vst [vmem:[#allocation3 + $0x8] sm:$0xff] %v8287_v38 }
 0x1f6   :  { %v546_v11 = vsel %vm447_vm5, %v545_v2, %v544_v6  ;;  %v506_v12 = vsel %vm447_vm5, %v505_v3, %v504_v7  ;;  %v468_v13 = vsel %vm447_vm5, %v467_v5, %v466_v8  ;;  %v623_v31 = vrot.slane %v614_v22, 5  ;;  %v690_v5 = vld [vmem:[#allocation2 + $0x2e] sm:$0x1]  ;;  %v692_v14 = vld [vmem:[#allocation2 + $0x3e] sm:$0x1]  ;;  %353 = vst [vmem:[#allocation3 + $0x10] sm:$0xff] %v8287_v38 }
 0x1f7   :  { %547 = vrot.lane.b32.xlu2 %v546_v11, %s8275_s22  ;;  %507 = vrot.lane.b32.xlu1 %v506_v12, %s8276_s23  ;;  %v584_v41 = vsel %vm447_vm5, %v583_v27, %v582_v36  ;;  %v663_v56 = vrot.slane %v654_v47, 5  ;;  %v641_v2 = vsel %vm444_vm4, %v640_v54, %v639_v63  ;;  %v679_v3 = vsel %vm441_vm3, %v678_v55, %v670_v0  ;;  %v730_v11 = vld [vmem:[#allocation2 + $0x2f] sm:$0x1]  ;;  %v732_v18 = vld [vmem:[#allocation2 + $0x3f] sm:$0x1]  ;;  %v3415_v0 = vld [vmem:[%s10867_s9] sm:$0xff] }
 0x1f8   :  { %469 = vrot.lane.b32.xlu0 %v468_v13, %s8277_s24  ;;  %v624_v46 = vsel %vm447_vm5, %v623_v31, %v622_v42  ;;  %v643_v7 = vsel %vm447_vm5, %v642_v57, %v641_v2  ;;  %v681_v8 = vsel %vm444_vm4, %v680_v58, %v679_v3  ;;  %v711_v13 = vld [vmem:[#allocation2 + $0x1f] sm:$0x1]  ;;  %v697_v17 = vrot.slane %v690_v5, 7  ;;  %354 = vst [vmem:[#allocation3 + $0x18] sm:$0xff] %v8287_v38  ;;  %v1702_v42 = vld [vmem:[#allocation17] sm:$0xff]  ;;  %s8293_s9 = smov 26  }
 0x1f9   :  { %v664_v6 = vsel %vm447_vm5, %v663_v56, %v662_v1  ;;  %v683_v12 = vsel %vm447_vm5, %v682_v61, %v681_v8  ;;  %v737_v21 = vrot.slane %v730_v11, 7  ;;  %v720_v22 = vrot.slane %v711_v13, 5  ;;  %1720 = vst [vmem:[#allocation5] sm:$0xff] %v8287_v38  ;;  %s8300_s23 = smov 10  }
 0x1fa   :  { %v701_v23 = vrot.slane %v692_v14, 5  ;;  %v741_v27 = vrot.slane %v732_v18, 5  ;;  %v698_v29 = vsel %vm441_vm3, %v697_v17, %v689_v26  ;;  %v719_v31 = vsel %vm444_vm4, %v718_v19, %v717_v28  ;;  %1721 = vst [vmem:[#allocation5 + $0x8] sm:$0xff] %v8287_v38  ;;  %v8623_v18 = vld [vmem:[#allocation15 + $0x10] sm:$0xff]  ;;  %v8638_v28 = vld [vmem:[#allocation15 + $0x18] sm:$0xff] }
 0x1fb   :  { %v700_v32 = vsel %vm444_vm4, %v699_v20, %v698_v29  ;;  %v738_v33 = vsel %vm441_vm3, %v737_v21, %v729_v30  ;;  %v721_v34 = vsel %vm447_vm5, %v720_v22, %v719_v31  ;;  %1722 = vst [vmem:[#allocation5 + $0x10] sm:$0xff] %v8287_v38 }
 0x1fc   :  { %v702_v35 = vsel %vm447_vm5, %v701_v23, %v700_v32  ;;  %v740_v36 = vsel %vm444_vm4, %v739_v24, %v738_v33  ;;  %1723 = vst [vmem:[#allocation5 + $0x18] sm:$0xff] %v8287_v38 }
 0x1fd   :  { %v742_v37 = vsel %vm447_vm5, %v741_v27, %v740_v36  ;;  %1724 = vst [vmem:[#allocation5 + $0x20] sm:$0xff] %v8287_v38  ;;  %vm588_vm5 = vcmask 1044472  }
 0x1fe   :  { %1725 = vst [vmem:[#allocation5 + $0x28] sm:$0xff] %v8287_v38 }
 0x1ff   :  { %606 = vrot.lane.b32.xlu2 %v605_v40, %s8278_s25  ;;  %585 = vrot.lane.b32.xlu1 %v584_v41, %s8279_s26  ;;  %1726 = vst [vmem:[#allocation5 + $0x30] sm:$0xff] %v8287_v38 }
 0x200   :  { %625 = vrot.lane.b32.xlu0 %v624_v46, %s8280_s27  ;;  %1727 = vst [vmem:[#allocation5 + $0x38] sm:$0xff] %v8287_v38 }
 0x201   :  { %1728 = vst [vmem:[#allocation5 + $0x40] sm:$0xff] %v8287_v38 }
 0x202   :  { %1729 = vst [vmem:[#allocation5 + $0x48] sm:$0xff] %v8287_v38 }
 0x203   :  { %1730 = vst [vmem:[#allocation5 + $0x50] sm:$0xff] %v8287_v38 }
 0x204   :  { %1731 = vst [vmem:[#allocation5 + $0x58] sm:$0xff] %v8287_v38 }
 0x205   :  { %1732 = vst [vmem:[#allocation5 + $0x60] sm:$0xff] %v8287_v38 }
 0x206   :  { %1733 = vst [vmem:[#allocation5 + $0x68] sm:$0xff] %v8287_v38 }
 0x207   :  { %665 = vrot.lane.b32.xlu2 %v664_v6, %s8281_s0  ;;  %644 = vrot.lane.b32.xlu1 %v643_v7, %s8282_s28  ;;  %1734 = vst [vmem:[#allocation5 + $0x70] sm:$0xff] %v8287_v38  ;;  %s8301_s0 = smov 36  }
 0x208   :  { %684 = vrot.lane.b32.xlu0 %v683_v12, %s8283_s29  ;;  %356 = vst.msk [vmem:[#allocation3 + $0x20] sm:$0xff] %vm355_vm6, %v8287_v38  ;;  %vm590_vm6 = vcmask 125952  }
 0x20f   :  { %722 = vrot.lane.b32.xlu2 %v721_v34, %s8284_s2  ;;  %703 = vrot.lane.b32.xlu1 %v702_v35, %s8285_s12 }
 0x210   :  { %743 = vrot.lane.b32.xlu0 %v742_v37, %s8286_s13  ;;  %s8302_s13 = smov 78  }
 0x217   :  { %1705 = vperm.xlu1 %7560, %v1702_v42  }
 0x231   :  { %v529_v39 = vpop.permute.xlu2 %528 }
 0x249   :  { %v489_v45 = vpop.permute.xlu1 %488 }
 0x24a   :  { %v450_v40 = vpop.permute.xlu0 %449 }
 0x24b   :  { %453 = vst.msk [vmem:[#allocation3] sm:$0xf] %vm452_vm7, %v450_v40  ;;  %vm609_vm7 = vcmask 544144  }
 0x251   :  { %v548_v41 = vpop.permute.xlu2 %547 }
 0x252   :  { %v567_v47 = vpop.permute.xlu0 %566 }
 0x259   :  { %v607_v44 = vpop.permute.xlu2 %606 }
 0x261   :  { %v666_v46 = vpop.permute.xlu2 %665 }
 0x269   :  { %v723_v48 = vpop.permute.xlu2 %722  ;;  %v508_v49 = vpop.permute.xlu1 %507 }
 0x26a   :  { %728 = vst.msk [vmem:[#allocation3 + $0x20] sm:$0xf] %vm727_vm8, %v723_v48  ;;  %v470_v50 = vpop.permute.xlu0 %469  ;;  %vm647_vm8 = vcmask 1044400  }
 0x26b   :  { %513 = vst.msk [vmem:[#allocation3 + $0x8] sm:$0xf] %vm512_vm9, %v508_v49  ;;  %vm649_vm9 = vcmask 52224  }
 0x26c   :  { %532 = vst.msk [vmem:[#allocation3 + $0x8] sm:$0xf] %vm531_vm10, %v529_v39  ;;  %vm668_vm10 = vcmask 191544   ;;  %v8657_v39 = vld [vmem:[#allocation15 + $0x20] sm:$0xff] }
 0x26d   :  { %473 = vst.msk [vmem:[#allocation3] sm:$0xf] %vm472_vm11, %v470_v50  ;;  %vm687_vm11 = vcmask 609744   ;;  %v8678_v50 = vld [vmem:[#allocation15] sm:$0xff] }
 0x26e   :  { %492 = vst.msk [vmem:[#allocation3] sm:$0xf] %vm491_vm12, %v489_v45  ;;  %vm725_vm12 = vcmask 1044464  }
 0x26f   :  { %511 = vst.msk [vmem:[#allocation3] sm:$0xf] %vm510_vm13, %v508_v49  ;;  %vm746_vm13 = vcmask 257144  }
 0x270   :  { %551 = vst.msk [vmem:[#allocation3 + $0x8] sm:$0xf] %vm550_vm14, %v548_v41  ;;  %vm958_vm14 = vcmask 1031168  }
 0x271   :  { %570 = vst.msk [vmem:[#allocation3 + $0x8] sm:$0xf] %vm569_vm15, %v567_v47  ;;  %v586_v51 = vpop.permute.xlu1 %585  ;;  %vm771_vm15 = vcmask 1039360  }
 0x272   :  { %589 = vst.msk [vmem:[#allocation3 + $0x8] sm:$0xf] %vm588_vm5, %v586_v51  ;;  %v626_v52 = vpop.permute.xlu0 %625  ;;  %vm1066_vm5 = vcmask 769024  }
 0x273   :  { %591 = vst.msk [vmem:[#allocation3 + $0x10] sm:$0xf] %vm590_vm6, %v586_v51  ;;  %vm1174_vm6 = vcmask 760832   ;;  %v8680_v51 = vld [vmem:[#allocation15 + $0x28] sm:$0xff] }
 0x274   :  { %610 = vst.msk [vmem:[#allocation3 + $0x10] sm:$0xf] %vm609_vm7, %v607_v44  ;;  %vm1282_vm7 = vcmask 752640  }
 0x275   :  { %629 = vst.msk [vmem:[#allocation3 + $0x10] sm:$0xf] %vm628_vm2, %v626_v52  ;;  %vm706_vm2 = vcmask 749144  }
 0x276   :  { %v8577_v54 = vld [vmem:[#allocation3] sm:$0xff]  ;;  %1735 = vst.msk [vmem:[#allocation5 + $0x78] sm:$0xff] %vm958_vm14, %v8287_v38 }
 0x279   :  { %v645_v53 = vpop.permute.xlu1 %644  ;;  %v8579_v55 = vld [vmem:[#allocation3 + $0x8] sm:$0xff] }
 0x27a   :  { %648 = vst.msk [vmem:[#allocation3 + $0x10] sm:$0xf] %vm647_vm8, %v645_v53  ;;  %v685_v56 = vpop.permute.xlu0 %684  ;;  %v7601_v57 = vpack.i.bf16 %v8579_v55, %v8577_v54  ;;  %vm1390_vm8 = vcmask 490496  }
 0x27b   :  { %650 = vst.msk [vmem:[#allocation3 + $0x18] sm:$0xf] %vm649_vm9, %v645_v53  ;;  %vm1498_vm9 = vcmask 482304  }
 0x27c   :  { %669 = vst.msk [vmem:[#allocation3 + $0x18] sm:$0xf] %vm668_vm10, %v666_v46  ;;  %7602 = vrot.lane.b32.xlu1 %v7601_v57, %s8279_s26  ;;  %vm1606_vm10 = vcmask 474112  }
 0x27d   :  { %688 = vst.msk [vmem:[#allocation3 + $0x18] sm:$0xf] %vm687_vm11, %v685_v56  ;;  %vm1746_vm11 = vcmask 1041408  }
 0x281   :  { %v704_v58 = vpop.permute.xlu1 %703  ;;  %v8585_v60 = vld [vmem:[#allocation3 + $0x10] sm:$0xff] }
 0x282   :  { %707 = vst.msk [vmem:[#allocation3 + $0x18] sm:$0xf] %vm706_vm2, %v704_v58  ;;  %v744_v59 = vpop.permute.xlu0 %743  ;;  %vm1742_vm2 = vcmask 277504  }
 0x283   :  { %726 = vst.msk [vmem:[#allocation3 + $0x18] sm:$0xf] %vm725_vm12, %v723_v48  ;;  %vm1848_vm12 = vcmask 211968  }
 0x284   :  { %747 = vst.msk [vmem:[#allocation3 + $0x20] sm:$0xf] %vm746_vm13, %v744_v59  ;;  %7607 = vrot.lane.b32.xlu1 %v7601_v57, %s8284_s2  ;;  %vm1982_vm13 = vcmask 146432  }
 0x289   :  { %v8612_v1 = vpop.permute.xlu1 %1705 }
 0x28a   :  { %v8587_v61 = vld [vmem:[#allocation3 + $0x18] sm:$0xff] }
 0x28b   :  { %v755_v62 = vld [vmem:[#allocation3 + $0x20] sm:$0xff]  ;;  %v7561_v63 = vpack.i.bf16 %v8587_v61, %v8585_v60 }
 0x28c   :  { %769 = vrot.lane.b32.xlu0 %v755_v62, %s8279_s26  ;;  %7612 = vrot.lane.b32.xlu1 %v7601_v57, %s8289_s14 }
 0x28d   :  { %7562 = vrot.lane.b32.xlu2 %v7561_v63, %s8279_s26 }
 0x294   :  { %956 = vrot.lane.b32.xlu0 %v755_v62, %s8284_s2  ;;  %7617 = vrot.lane.b32.xlu1 %v7601_v57, %s8290_s3 }
 0x295   :  { %7567 = vrot.lane.b32.xlu2 %v7561_v63, %s8284_s2 }
 0x29c   :  { %1064 = vrot.lane.b32.xlu0 %v755_v62, %s8289_s14  ;;  %7622 = vrot.lane.b32.xlu1 %v7601_v57, %s8291_s15 }
 0x29d   :  { %7572 = vrot.lane.b32.xlu2 %v7561_v63, %s8289_s14 }
 0x2a4   :  { %1172 = vrot.lane.b32.xlu0 %v755_v62, %s8290_s3  ;;  %7627 = vrot.lane.b32.xlu1 %v7601_v57, %s8292_s5 }
 0x2a5   :  { %7577 = vrot.lane.b32.xlu2 %v7561_v63, %s8290_s3  ;;  %s8303_s3 = smov 112  }
 0x2ac   :  { %1280 = vrot.lane.b32.xlu0 %v755_v62, %s8291_s15  ;;  %7632 = vrot.lane.b32.xlu1 %v7601_v57, %s8275_s22 }
 0x2ad   :  { %7582 = vrot.lane.b32.xlu2 %v7561_v63, %s8291_s15  ;;  %s8304_s15 = smov 44  }
 0x2b4   :  { %1388 = vrot.lane.b32.xlu0 %v755_v62, %s8292_s5  ;;  %7637 = vrot.lane.b32.xlu1 %v7601_v57, %s8283_s29 }
 0x2b5   :  { %7587 = vrot.lane.b32.xlu2 %v7561_v63, %s8292_s5 }
 0x2bc   :  { %1496 = vrot.lane.b32.xlu0 %v755_v62, %s8275_s22  ;;  %3418 = vperm.xlu1 %7560, %v3415_v0  }
 0x2bd   :  { %7592 = vrot.lane.b32.xlu2 %v7561_v63, %s8275_s22 }
 0x2c4   :  { %1604 = vrot.lane.b32.xlu0 %v755_v62, %s8283_s29 }
 0x2c5   :  { %7597 = vrot.lane.b32.xlu2 %v7561_v63, %s8283_s29  ;;  %v8700_v63 = vld [vmem:[#allocation15 + $0x30] sm:$0xff] }
 0x2cc   :  { %5768 = vperm.xlu0 %7642, %v3415_v0  }
 0x2cd   :  { %4593 = vperm.xlu2 %7641, %v3415_v0  }
 0x2e7   :  { %v7563_v2 = vpop.permute.xlu2 %7562 }
 0x2e8   :  { %v7564_v4 = vunpack.i.l.bf16 %v7563_v2  ;;  %v7565_v8 = vunpack.i.h.bf16 %v7563_v2 }
 0x2ea   :  { %v774_v12 = vsel %vm771_vm15, %v7564_v4, %v7565_v8 }
 0x2ee   :  { %v7603_v3 = vpop.permute.xlu1 %7602 }
 0x2ef   :  { %v7605_v5 = vunpack.i.h.bf16 %v7603_v3  ;;  %v7604_v6 = vunpack.i.l.bf16 %v7603_v3  ;;  %v8614_v7 = vpop.permute.xlu2 %7567 }
 0x2f0   :  { %v7569_v14 = vunpack.i.l.bf16 %v8614_v7  ;;  %v7570_v31 = vunpack.i.h.bf16 %v8614_v7  ;;  %v1595_v7 = vld [vmem:[#allocation15 + $0x40] sm:$0xff] }
 0x2f1   :  { %v772_v10 = vsel %vm771_vm15, %v7604_v6, %v7605_v5  ;;  %v773_v11 = vsel %vm771_vm15, %v7605_v5, %v7564_v4 }
 0x2f2   :  { %798 = vmatpush.msra.mxu3 %v772_v10 }
 0x2f3   :  { %7172 = vmatmul.msk.f32.vlgmr.msra.gmra.mxu3 %vm197_vm0, %v754_v9 }
 0x2f4   :  { %818 = vmatpush.msrb.mxu3 %v773_v11  ;;  %v1487_v11 = vld [vmem:[#allocation15 + $0x38] sm:$0xff] }
 0x2f6   :  { %838 = vmatpush.msra.mxu3 %v774_v12  ;;  %v7608_v13 = vpop.permute.xlu1 %7607 }
 0x2f7   :  { %v7610_v15 = vunpack.i.h.bf16 %v7608_v13  ;;  %v7609_v16 = vunpack.i.l.bf16 %v7608_v13  ;;  %v8621_v17 = vpop.permute.xlu2 %7572  ;;  %v961_v13 = vsel %vm958_vm14, %v7569_v14, %v7570_v31 }
 0x2f8   :  { %v7574_v23 = vunpack.i.l.bf16 %v8621_v17  ;;  %v7575_v42 = vunpack.i.h.bf16 %v8621_v17 }
 0x2f9   :  { %v959_v19 = vsel %vm958_vm14, %v7609_v16, %v7610_v15  ;;  %v960_v20 = vsel %vm958_vm14, %v7610_v15, %v7569_v14 }
 0x2fa   :  { %985 = vmatpush.msrb.mxu0 %v959_v19  ;;  %1005 = vmatpush.msrb.mxu2 %v960_v20 }
 0x2fb   :  { %7173 = vmatmul.msk.f32.vlgmr.msrb.gmra.mxu3 %vm197_vm0, %v754_v9  ;;  %7180 = vmatmul.msk.f32.vlgmr.msrb.gmra.mxu0 %vm197_vm0, %v8623_v18 }
 0x2fc   :  { %7181 = vmatmul.msk.f32.vlgmr.msrb.gmra.mxu2 %vm197_vm0, %v8623_v18 }
 0x2fe   :  { %v770_v21 = vpop.permute.xlu0 %769  ;;  %v7613_v22 = vpop.permute.xlu1 %7612 }
 0x2ff   :  { %v775_v24 = vsel %vm771_vm15, %v7565_v8, %v770_v21  ;;  %v7615_v25 = vunpack.i.h.bf16 %v7613_v22  ;;  %v7614_v26 = vunpack.i.l.bf16 %v7613_v22  ;;  %v8636_v27 = vpop.permute.xlu2 %7577 }
 0x300   :  { %858 = vmatpush.msrb.mxu3 %v775_v24  ;;  %v7579_v34 = vunpack.i.l.bf16 %v8636_v27 }
 0x301   :  { %v1067_v29 = vsel %vm1066_vm5, %v7614_v26, %v7615_v25  ;;  %v1068_v30 = vsel %vm1066_vm5, %v7615_v25, %v7574_v23 }
 0x302   :  { %1093 = vmatpush.msra.mxu0 %v1067_v29  ;;  %1113 = vmatpush.msra.mxu2 %v1068_v30  ;;  %v1069_v29 = vsel %vm1066_vm5, %v7574_v23, %v7575_v42 }
 0x303   :  { %7174 = vmatmul.msk.f32.vlgmr.msra.gmra.mxu3 %vm197_vm0, %v754_v9  ;;  %7184 = vmatmul.msk.f32.vlgmr.msra.gmra.mxu0 %vm197_vm0, %v8638_v28 }
 0x304   :  { %881 = vmatpush.msra.mxu3 %v8577_v54  ;;  %7185 = vmatmul.msk.f32.vlgmr.msra.gmra.mxu2 %vm197_vm0, %v8638_v28  ;;  %v7580_v54 = vunpack.i.h.bf16 %v8636_v27 }
 0x306   :  { %v957_v32 = vpop.permute.xlu0 %956  ;;  %v7618_v33 = vpop.permute.xlu1 %7617  ;;  %v1177_v17 = vsel %vm1174_vm6, %v7579_v34, %v7580_v54 }
 0x307   :  { %v7620_v35 = vunpack.i.h.bf16 %v7618_v33  ;;  %v7619_v36 = vunpack.i.l.bf16 %v7618_v33  ;;  %v962_v37 = vsel %vm958_vm14, %v7570_v31, %v957_v32  ;;  %v8655_v38 = vpop.permute.xlu2 %7582 }
 0x308   :  { %1045 = vmatpush.msrb.mxu1 %v962_v37  ;;  %v7584_v45 = vunpack.i.l.bf16 %v8655_v38  ;;  %v7585_v3 = vunpack.i.h.bf16 %v8655_v38 }
 0x309   :  { %v1175_v40 = vsel %vm1174_vm6, %v7619_v36, %v7620_v35  ;;  %v1176_v41 = vsel %vm1174_vm6, %v7620_v35, %v7579_v34  ;;  %7183 = vmatmul.msk.f32.vlgmr.msrb.gmra.mxu1 %vm197_vm0, %v8623_v18 }
 0x30a   :  { %1201 = vmatpush.msrb.mxu0 %v1175_v40  ;;  %1221 = vmatpush.msrb.mxu2 %v1176_v41 }
 0x30b   :  { %7175 = vmatmul.msk.f32.vlgmr.msrb.gmra.mxu3 %vm197_vm0, %v754_v9  ;;  %7188 = vmatmul.msk.f32.vlgmr.msrb.gmra.mxu0 %vm197_vm0, %v8657_v39 }
 0x30c   :  { %901 = vmatpush.msrb.mxu3 %v8579_v55  ;;  %7189 = vmatmul.msk.f32.vlgmr.msrb.gmra.mxu2 %vm197_vm0, %v8657_v39 }
 0x30e   :  { %v1065_v43 = vpop.permute.xlu0 %1064  ;;  %v7623_v44 = vpop.permute.xlu1 %7622 }
 0x30f   :  { %v1070_v46 = vsel %vm1066_vm5, %v7575_v42, %v1065_v43  ;;  %v7625_v47 = vunpack.i.h.bf16 %v7623_v44  ;;  %v7624_v48 = vunpack.i.l.bf16 %v7623_v44  ;;  %v8676_v49 = vpop.permute.xlu2 %7587  ;;  %vm2116_vm5 = vcmask 80896  }
 0x310   :  { %1153 = vmatpush.msra.mxu1 %v1070_v46  ;;  %v7589_v57 = vunpack.i.l.bf16 %v8676_v49  ;;  %v7590_v16 = vunpack.i.h.bf16 %v8676_v49  ;;  %v8794_v46 = vld [vmem:[#allocation21 + $0x18] sm:$0xff] }
 0x311   :  { %v1283_v52 = vsel %vm1282_vm7, %v7624_v48, %v7625_v47  ;;  %v1284_v53 = vsel %vm1282_vm7, %v7625_v47, %v7584_v45  ;;  %7187 = vmatmul.msk.f32.vlgmr.msra.gmra.mxu1 %vm197_vm0, %v8638_v28  ;;  %v8802_v47 = vld [vmem:[#allocation21 + $0x10] sm:$0xff]  ;;  %v8804_v48 = vld [vmem:[#allocation21 + $0x8] sm:$0xff] }
 0x312   :  { %1309 = vmatpush.msra.mxu0 %v1283_v52  ;;  %1329 = vmatpush.msra.mxu2 %v1284_v53  ;;  %v1393_v27 = vsel %vm1390_vm8, %v7589_v57, %v7590_v16  ;;  %v8818_v53 = vld [vmem:[#allocation21] sm:$0xff] }
 0x313   :  { %7176 = vmatmul.msk.f32.vlgmr.msra.gmra.mxu3 %vm197_vm0, %v8678_v50  ;;  %7192 = vmatmul.msk.f32.vlgmr.msra.gmra.mxu0 %vm197_vm0, %v8680_v51 }
 0x314   :  { %921 = vmatpush.msra.mxu3 %v8585_v60  ;;  %7193 = vmatmul.msk.f32.vlgmr.msra.gmra.mxu2 %vm197_vm0, %v8680_v51 }
 0x316   :  { %v1173_v55 = vpop.permute.xlu0 %1172  ;;  %v7628_v56 = vpop.permute.xlu1 %7627 }
 0x317   :  { %v1178_v58 = vsel %vm1174_vm6, %v7580_v54, %v1173_v55  ;;  %v7630_v59 = vunpack.i.h.bf16 %v7628_v56  ;;  %v7629_v62 = vunpack.i.l.bf16 %v7628_v56  ;;  %v8708_v2 = vpop.permute.xlu2 %7592  ;;  %vm1774_vm6 = vcmask 1015280  }
 0x318   :  { %1261 = vmatpush.msrb.mxu1 %v1178_v58  ;;  %v7594_v6 = vunpack.i.l.bf16 %v8708_v2  ;;  %v7595_v30 = vunpack.i.h.bf16 %v8708_v2 }
 0x319   :  { %v1391_v60 = vsel %vm1390_vm8, %v7629_v62, %v7630_v59  ;;  %v1392_v0 = vsel %vm1390_vm8, %v7630_v59, %v7589_v57  ;;  %7191 = vmatmul.msk.f32.vlgmr.msrb.gmra.mxu1 %vm197_vm0, %v8657_v39 }
 0x31a   :  { %1417 = vmatpush.msrb.mxu0 %v1391_v60  ;;  %1437 = vmatpush.msrb.mxu2 %v1392_v0  ;;  %v1501_v34 = vsel %vm1498_vm9, %v7594_v6, %v7595_v30 }
 0x31b   :  { %7177 = vmatmul.msk.f32.vlgmr.msrb.gmra.mxu3 %vm197_vm0, %v8678_v50  ;;  %7196 = vmatmul.msk.f32.vlgmr.msrb.gmra.mxu0 %vm197_vm0, %v8700_v63 }
 0x31c   :  { %941 = vmatpush.msrb.mxu3 %v8587_v61  ;;  %7197 = vmatmul.msk.f32.vlgmr.msrb.gmra.mxu2 %vm197_vm0, %v8700_v63 }
 0x31e   :  { %v1281_v4 = vpop.permute.xlu0 %1280  ;;  %v7633_v5 = vpop.permute.xlu1 %7632 }
 0x31f   :  { %v1286_v8 = vsel %vm1282_vm7, %v7585_v3, %v1281_v4  ;;  %v7635_v9 = vunpack.i.h.bf16 %v7633_v5  ;;  %v7634_v10 = vunpack.i.l.bf16 %v7633_v5  ;;  %v7598_v15 = vpop.permute.xlu2 %7597 }
 0x320   :  { %1369 = vmatpush.msra.mxu1 %v1286_v8  ;;  %v7599_v21 = vunpack.i.l.bf16 %v7598_v15  ;;  %v7600_v23 = vunpack.i.h.bf16 %v7598_v15 }
 0x321   :  { %v1499_v12 = vsel %vm1498_vm9, %v7634_v10, %v7635_v9  ;;  %v1500_v61 = vsel %vm1498_vm9, %v7635_v9, %v7594_v6  ;;  %7195 = vmatmul.msk.f32.vlgmr.msra.gmra.mxu1 %vm197_vm0, %v8680_v51 }
 0x322   :  { %1525 = vmatpush.msra.mxu0 %v1499_v12  ;;  %1545 = vmatpush.msra.mxu2 %v1500_v61 }
 0x323   :  { %7178 = vmatmul.msk.f32.vlgmr.msra.gmra.mxu3 %vm197_vm0, %v8678_v50  ;;  %7200 = vmatmul.msk.f32.vlgmr.msra.gmra.mxu0 %vm197_vm0, %v1487_v11 }
 0x324   :  { %1025 = vmatpush.msra.mxu3 %v961_v13  ;;  %7201 = vmatmul.msk.f32.vlgmr.msra.gmra.mxu2 %vm197_vm0, %v1487_v11 }
 0x326   :  { %v1389_v19 = vpop.permute.xlu0 %1388  ;;  %v7638_v20 = vpop.permute.xlu1 %7637 }
 0x327   :  { %v1394_v22 = vsel %vm1390_vm8, %v7590_v16, %v1389_v19  ;;  %v7640_v24 = vunpack.i.h.bf16 %v7638_v20  ;;  %v7639_v25 = vunpack.i.l.bf16 %v7638_v20  ;;  %vm1908_vm8 = vcmask 884080  }
 0x328   :  { %1477 = vmatpush.msrb.mxu1 %v1394_v22 }
 0x329   :  { %v1607_v14 = vsel %vm1606_vm10, %v7639_v25, %v7640_v24  ;;  %v1608_v26 = vsel %vm1606_vm10, %v7640_v24, %v7599_v21  ;;  %7199 = vmatmul.msk.f32.vlgmr.msrb.gmra.mxu1 %vm197_vm0, %v8700_v63 }
 0x32a   :  { %1633 = vmatpush.msrb.mxu0 %v1607_v14  ;;  %1653 = vmatpush.msrb.mxu2 %v1608_v26 }
 0x32b   :  { %7179 = vmatmul.msk.f32.vlgmr.msrb.gmra.mxu3 %vm197_vm0, %v8678_v50  ;;  %7204 = vmatmul.msk.f32.vlgmr.msrb.gmra.mxu0 %vm197_vm0, %v1595_v7 }
 0x32c   :  { %1133 = vmatpush.msrb.mxu3 %v1069_v29  ;;  %7205 = vmatmul.msk.f32.vlgmr.msrb.gmra.mxu2 %vm197_vm0, %v1595_v7 }
 0x32e   :  { %v1497_v31 = vpop.permute.xlu0 %1496 }
 0x32f   :  { %v1502_v32 = vsel %vm1498_vm9, %v7595_v30, %v1497_v31  ;;  %vm1876_vm9 = vcmask 916880  }
 0x330   :  { %1585 = vmatpush.msra.mxu1 %v1502_v32 }
 0x331   :  { %7203 = vmatmul.msk.f32.vlgmr.msra.gmra.mxu1 %vm197_vm0, %v1487_v11 }
 0x333   :  { %7182 = vmatmul.msk.f32.vlgmr.msra.gmra.mxu3 %vm197_vm0, %v8623_v18  ;;  %v1285_v18 = vsel %vm1282_vm7, %v7584_v45, %v7585_v3  ;;  %v8788_v45 = vld [vmem:[#allocation21 + $0x20] sm:$0x3]  ;;  %vm1838_vm7 = vcmask 949680  }
 0x334   :  { %1241 = vmatpush.msra.mxu3 %v1177_v17  ;;  %7208 = vmatpush.msk.msra.mxu0 %vm1746_vm11, %v8788_v45 }
 0x335   :  { %7210 = vmatpush.msk.msra.mxu2 %vm1746_vm11, %v8788_v45 }
 0x336   :  { %v1605_v33 = vpop.permute.xlu0 %1604  ;;  %1762 = vmatpush.msra.mxu0 %v8794_v46 }
 0x337   :  { %v1610_v35 = vsel %vm1606_vm10, %v7600_v23, %v1605_v33  ;;  %1794 = vmatpush.msra.mxu2 %v8794_v46 }
 0x338   :  { %1693 = vmatpush.msrb.mxu1 %v1610_v35  ;;  %1763 = vmatpush.msra.mxu0 %v8802_v47 }
 0x339   :  { %7207 = vmatmul.msk.f32.vlgmr.msrb.gmra.mxu1 %vm197_vm0, %v1595_v7  ;;  %1795 = vmatpush.msra.mxu2 %v8802_v47 }
 0x33a   :  { %7214 = vmatpush.msk.msra.mxu1 %vm1746_vm11, %v8788_v45  ;;  %1764 = vmatpush.msra.mxu0 %v8804_v48 }
 0x33b   :  { %7186 = vmatmul.msk.f32.vlgmr.msrb.gmra.mxu3 %vm197_vm0, %v8638_v28  ;;  %v1609_v28 = vsel %vm1606_vm10, %v7599_v21, %v7600_v23  ;;  %1796 = vmatpush.msra.mxu2 %v8804_v48  ;;  %vm1806_vm10 = vcmask 982480  }
 0x33c   :  { %1349 = vmatpush.msrb.mxu3 %v1285_v18  ;;  %1864 = vmatpush.msra.mxu1 %v8794_v46 }
 0x33d   :  { %1765 = vmatpush.msra.mxu0 %v8818_v53  ;;  %1797 = vmatpush.msra.mxu2 %v8818_v53 }
 0x33e   :  { %1865 = vmatpush.msra.mxu1 %v8802_v47 }
 0x33f   :  { %7216 = vmatpush.msk.msrb.mxu0 %vm1746_vm11, %v8788_v45  ;;  %7218 = vmatpush.msk.msrb.mxu2 %vm1746_vm11, %v8788_v45 }
 0x340   :  { %1866 = vmatpush.msra.mxu1 %v8804_v48 }
 0x341   :  { %1896 = vmatpush.msrb.mxu0 %v8794_v46  ;;  %1928 = vmatpush.msrb.mxu2 %v8794_v46 }
 0x342   :  { %1867 = vmatpush.msra.mxu1 %v8818_v53 }
 0x343   :  { %7190 = vmatmul.msk.f32.vlgmr.msra.gmra.mxu3 %vm197_vm0, %v8657_v39  ;;  %1897 = vmatpush.msrb.mxu0 %v8802_v47 }
 0x344   :  { %1457 = vmatpush.msra.mxu3 %v1393_v27  ;;  %7222 = vmatpush.msk.msrb.mxu1 %vm1746_vm11, %v8788_v45 }
 0x345   :  { %1929 = vmatpush.msrb.mxu2 %v8802_v47  ;;  %1898 = vmatpush.msrb.mxu0 %v8804_v48 }
 0x346   :  { %1998 = vmatpush.msrb.mxu1 %v8794_v46 }
 0x347   :  { %1930 = vmatpush.msrb.mxu2 %v8804_v48  ;;  %1899 = vmatpush.msrb.mxu0 %v8818_v53 }
 0x348   :  { %1999 = vmatpush.msrb.mxu1 %v8802_v47 }
 0x349   :  { %1931 = vmatpush.msrb.mxu2 %v8818_v53 }
 0x34a   :  { %2000 = vmatpush.msrb.mxu1 %v8804_v48 }
 0x34b   :  { %7194 = vmatmul.msk.f32.vlgmr.msrb.gmra.mxu3 %vm197_vm0, %v8680_v51 }
 0x34c   :  { %1565 = vmatpush.msrb.mxu3 %v1501_v34  ;;  %2001 = vmatpush.msrb.mxu1 %v8818_v53 }
 0x353   :  { %7198 = vmatmul.msk.f32.vlgmr.msra.gmra.mxu3 %vm197_vm0, %v8700_v63 }
 0x354   :  { %1673 = vmatpush.msra.mxu3 %v1609_v28 }
 0x35b   :  { %7202 = vmatmul.msk.f32.vlgmr.msrb.gmra.mxu3 %vm197_vm0, %v1487_v11 }
 0x35c   :  { %7212 = vmatpush.msk.msrb.mxu3 %vm1746_vm11, %v8788_v45 }
 0x35e   :  { %1826 = vmatpush.msrb.mxu3 %v8794_v46 }
 0x360   :  { %1827 = vmatpush.msrb.mxu3 %v8802_v47 }
 0x362   :  { %1828 = vmatpush.msrb.mxu3 %v8804_v48 }
 0x363   :  { %7206 = vmatmul.msk.f32.vlgmr.msra.gmra.mxu3 %vm197_vm0, %v1595_v7 }
 0x364   :  { %1829 = vmatpush.msrb.mxu3 %v8818_v53 }
 0x366   :  { %7220 = vmatpush.msk.msra.mxu3 %vm1746_vm11, %v8788_v45 }
 0x368   :  { %1960 = vmatpush.msra.mxu3 %v8794_v46 }
 0x36a   :  { %1961 = vmatpush.msra.mxu3 %v8802_v47 }
 0x36c   :  { %1962 = vmatpush.msra.mxu3 %v8804_v48 }
 0x36e   :  { %1963 = vmatpush.msra.mxu3 %v8818_v53 }
 0x376   :  { %v800_v36 = vpop.f32.mrf.mxu3 }
 0x378   :  { %v987_v37 = vpop.f32.mrf.mxu0 }
 0x37e   :  { %v8778_v38 = vpop.f32.mrf.mxu3 }
 0x37f   :  { %v8780_v39 = vpop.f32.mrf.mxu2 }
 0x380   :  { %v1095_v40 = vpop.f32.mrf.mxu0 }
 0x386   :  { %v8782_v41 = vpop.f32.mrf.mxu3  ;;  %v8784_v42 = vpop.f32.mrf.mxu1 }
 0x387   :  { %v8786_v43 = vpop.f32.mrf.mxu2 }
 0x388   :  { %v1203_v44 = vpop.f32.mrf.mxu0 }
 0x38e   :  { %v8808_v49 = vpop.f32.mrf.mxu3  ;;  %v8810_v50 = vpop.f32.mrf.mxu1 }
 0x38f   :  { %v1223_v51 = vpop.f32.mrf.mxu2 }
 0x390   :  { %v1311_v52 = vpop.f32.mrf.mxu0 }
 0x396   :  { %v883_v54 = vpop.f32.mrf.mxu3  ;;  %v1263_v55 = vpop.f32.mrf.mxu1 }
 0x397   :  { %v884_v56 = vadd.f32 %v883_v54, %v800_v36  ;;  %v1331_v57 = vpop.f32.mrf.mxu2 }
 0x398   :  { %v1419_v58 = vpop.f32.mrf.mxu0 }
 0x399   :  { %v1050_v59 = vadd.f32 %v987_v37, %v884_v56 }
 0x39b   :  { %v1158_v62 = vadd.f32 %v1095_v40, %v1050_v59 }
 0x39d   :  { %v1266_v63 = vadd.f32 %v1203_v44, %v1158_v62 }
 0x39e   :  { %v903_v60 = vpop.f32.mrf.mxu3  ;;  %v1371_v0 = vpop.f32.mrf.mxu1 }
 0x39f   :  { %v1374_v2 = vadd.f32 %v1311_v52, %v1266_v63  ;;  %v904_v3 = vadd.f32 %v903_v60, %v8778_v38  ;;  %v1439_v4 = vpop.f32.mrf.mxu2  ;;  %v8891_v63 = vpop.permute.xlu0 %5768 }
 0x3a0   :  { %v1527_v5 = vpop.f32.mrf.mxu0  ;;  %v8893_v60 = vpop.permute.xlu1 %3418 }
 0x3a1   :  { %v1051_v6 = vadd.f32 %v8780_v39, %v904_v3  ;;  %v1482_v8 = vadd.f32 %v1419_v58, %v1374_v2 }
 0x3a3   :  { %v1159_v9 = vadd.f32 %v8786_v43, %v1051_v6  ;;  %v1590_v13 = vadd.f32 %v1527_v5, %v1482_v8 }
 0x3a5   :  { %v1267_v10 = vadd.f32 %v1223_v51, %v1159_v9 }
 0x3a6   :  { %v923_v11 = vpop.f32.mrf.mxu3  ;;  %v1479_v12 = vpop.f32.mrf.mxu1 }
 0x3a7   :  { %v1375_v61 = vadd.f32 %v1331_v57, %v1267_v10  ;;  %v1547_v15 = vpop.f32.mrf.mxu2  ;;  %v924_v43 = vadd.f32 %v923_v11, %v8782_v41  ;;  %v8882_v41 = vpop.permute.xlu2 %4593 }
 0x3a8   :  { %v1635_v16 = vpop.f32.mrf.mxu0 }
 0x3a9   :  { %v1698_v19 = vadd.f32 %v1635_v16, %v1590_v13  ;;  %v1483_v20 = vadd.f32 %v1439_v4, %v1375_v61 }
 0x3ab   :  { %v1708_v21 = vadd.f32 %v8612_v1, %v1698_v19  ;;  %v1591_v24 = vadd.f32 %v1547_v15, %v1483_v20 }
 0x3ad   :  { %v1712_v22 = vmax.f32 %v1708_v21, 0.0 }
 0x3ae   :  { %v943_v25 = vpop.f32.mrf.mxu3  ;;  %v1587_v29 = vpop.f32.mrf.mxu1 }
 0x3af   :  { %v944_v7 = vadd.f32 %v943_v25, %v8808_v49  ;;  %v1655_v14 = vpop.f32.mrf.mxu2  ;;  %1844 = vrot.lane.b32.xlu1 %v1712_v22, %s8293_s9  ;;  %1810 = vrot.lane.b32.xlu2 %v1712_v22, %s8292_s5  ;;  %s8305_s5 = smov 62  }
 0x3b0   :  { %v1699_v26 = vadd.f32 %v1655_v14, %v1591_v24  ;;  %1778 = vrot.lane.b32.xlu0 %v1712_v22, %s8289_s14  ;;  %7209 = vmatmul.msk.f32.vlgmr.msra.gmra.mxu0 %vm1742_vm2, %v1712_v22 }
 0x3b1   :  { %v1053_v30 = vadd.f32 %v8784_v42, %v944_v7  ;;  %7224 = vmatpush.msk.msra.mxu0 %vm1746_vm11, %v8788_v45 }
 0x3b2   :  { %v1709_v31 = vadd.f32 %v8612_v1, %v1699_v26 }
 0x3b3   :  { %v1161_v32 = vadd.f32 %v8810_v50, %v1053_v30  ;;  %2030 = vmatpush.msra.mxu0 %v8794_v46 }
 0x3b4   :  { %v1713_v17 = vmax.f32 %v1709_v31, 0.0 }
 0x3b5   :  { %v1269_v23 = vadd.f32 %v1263_v55, %v1161_v32  ;;  %2031 = vmatpush.msra.mxu0 %v8802_v47 }
 0x3b6   :  { %v1027_v33 = vpop.f32.mrf.mxu3  ;;  %v1695_v27 = vpop.f32.mrf.mxu1 }
 0x3b7   :  { %v1377_v35 = vadd.f32 %v1371_v0, %v1269_v23  ;;  %1880 = vrot.lane.b32.xlu1 %v1713_v17, %s8294_s17  ;;  %1846 = vrot.lane.b32.xlu2 %v1713_v17, %s8293_s9  ;;  %v1052_v44 = vadd.f32 %v1027_v33, %v924_v43  ;;  %s8308_s17 = smov 38  }
 0x3b8   :  { %1912 = vrot.lane.b32.xlu0 %v1713_v17, %s8295_s18  ;;  %2032 = vmatpush.msra.mxu0 %v8804_v48 }
 0x3b9   :  { %v1485_v18 = vadd.f32 %v1479_v12, %v1377_v35 }
 0x3ba   :  { %2033 = vmatpush.msra.mxu0 %v8818_v53 }
 0x3bb   :  { %v1593_v34 = vadd.f32 %v1587_v29, %v1485_v18 }
 0x3bd   :  { %v1701_v28 = vadd.f32 %v1695_v27, %v1593_v34 }
 0x3be   :  { %v1135_v36 = vpop.f32.mrf.mxu3 }
 0x3bf   :  { %v1711_v37 = vadd.f32 %v8612_v1, %v1701_v28  ;;  %1978 = vrot.lane.b32.xlu1 %v1713_v17, %s8296_s19  ;;  %1944 = vrot.lane.b32.xlu2 %v1713_v17, %s8297_s6  ;;  %v1160_v49 = vadd.f32 %v1135_v36, %v1052_v44 }
 0x3c1   :  { %v1715_v38 = vmax.f32 %v1711_v37, 0.0 }
 0x3c3   :  { %2180 = vrot.lane.b32.xlu0 %v1715_v38, %s8298_s20 }
 0x3c6   :  { %v1243_v39 = vpop.f32.mrf.mxu3 }
 0x3c7   :  { %2148 = vrot.lane.b32.xlu1 %v1715_v38, %s8299_s21  ;;  %2114 = vrot.lane.b32.xlu2 %v1715_v38, %s8300_s23  ;;  %v1268_v51 = vadd.f32 %v1243_v39, %v1160_v49  ;;  %s8309_s21 = smov 22  }
 0x3ce   :  { %v1351_v40 = vpop.f32.mrf.mxu3 }
 0x3cf   :  { %2212 = vrot.lane.b32.xlu2 %v1715_v38, %s8301_s0  ;;  %v1376_v52 = vadd.f32 %v1351_v40, %v1268_v51 }
 0x3d6   :  { %v1459_v42 = vpop.f32.mrf.mxu3 }
 0x3d7   :  { %v1484_v54 = vadd.f32 %v1459_v42, %v1376_v52 }
 0x3de   :  { %v1567_v50 = vpop.f32.mrf.mxu3 }
 0x3df   :  { %v1592_v55 = vadd.f32 %v1567_v50, %v1484_v54 }
 0x3e6   :  { %v1675_v56 = vpop.f32.mrf.mxu3 }
 0x3e7   :  { %v1700_v57 = vadd.f32 %v1675_v56, %v1592_v55 }
 0x3e9   :  { %v1710_v58 = vadd.f32 %v8612_v1, %v1700_v57 }
 0x3eb   :  { %v1714_v59 = vmax.f32 %v1710_v58, 0.0 }
 0x3ed   :  { %2046 = vrot.lane.b32.xlu0 %v1714_v59, %s8302_s13  ;;  %2014 = vrot.lane.b32.xlu1 %v1714_v59, %s8303_s3  ;;  %s8317_s3 = smov 3  }
 0x3ee   :  { %1980 = vrot.lane.b32.xlu2 %v1714_v59, %s8296_s19 }
 0x3f5   :  { %2112 = vrot.lane.b32.xlu1 %v1714_v59, %s8300_s23 }
 0x3f6   :  { %2078 = vrot.lane.b32.xlu2 %v1714_v59, %s8304_s15 }
 0x409   :  { %v1811_v62 = vpop.permute.xlu2 %1810 }
 0x40a   :  { %7213 = vmatmul.msk.f32.vlgmr.msrb.gmra.mxu3 %vm1742_vm2, %v1811_v62 }
 0x40b   :  { %7228 = vmatpush.msk.msrb.mxu3 %vm1746_vm11, %v8788_v45 }
 0x40d   :  { %2094 = vmatpush.msrb.mxu3 %v8794_v46 }
 0x40f   :  { %2095 = vmatpush.msrb.mxu3 %v8802_v47 }
 0x411   :  { %v1847_v1 = vpop.permute.xlu2 %1846  ;;  %2096 = vmatpush.msrb.mxu3 %v8804_v48 }
 0x413   :  { %2097 = vmatpush.msrb.mxu3 %v8818_v53 }
 0x419   :  { %v1945_v0 = vpop.permute.xlu2 %1944 }
 0x41a   :  { %7221 = vmatmul.msk.f32.vlgmr.msra.gmra.mxu3 %vm1742_vm2, %v1945_v0 }
 0x41b   :  { %7236 = vmatpush.msk.msra.mxu3 %vm1746_vm11, %v8788_v45 }
 0x41d   :  { %2228 = vmatpush.msra.mxu3 %v8794_v46 }
 0x41f   :  { %2229 = vmatpush.msra.mxu3 %v8802_v47 }
 0x421   :  { %v1845_v2 = vpop.permute.xlu1 %1844  ;;  %2230 = vmatpush.msra.mxu3 %v8804_v48 }
 0x422   :  { %v1849_v3 = vsel %vm1848_vm12, %v1845_v2, %v1847_v1  ;;  %v1779_v4 = vpop.permute.xlu0 %1778  ;;  %vm2042_vm12 = vcmask 752880  }
 0x423   :  { %7211 = vmatmul.msk.f32.vlgmr.msra.gmra.mxu2 %vm1742_vm2, %v1779_v4  ;;  %7215 = vmatmul.msk.f32.vlgmr.msra.gmra.mxu1 %vm1742_vm2, %v1849_v3 }
 0x424   :  { %7226 = vmatpush.msk.msra.mxu2 %vm1746_vm11, %v8788_v45  ;;  %2231 = vmatpush.msra.mxu3 %v8818_v53 }
 0x425   :  { %7230 = vmatpush.msk.msra.mxu1 %vm1746_vm11, %v8788_v45 }
 0x426   :  { %2062 = vmatpush.msra.mxu2 %v8794_v46 }
 0x427   :  { %2132 = vmatpush.msra.mxu1 %v8794_v46 }
 0x428   :  { %2063 = vmatpush.msra.mxu2 %v8802_v47 }
 0x429   :  { %v1881_v5 = vpop.permute.xlu1 %1880  ;;  %2133 = vmatpush.msra.mxu1 %v8802_v47 }
 0x42a   :  { %v1913_v6 = vpop.permute.xlu0 %1912  ;;  %7217 = vmatmul.msk.f32.vlgmr.msrb.gmra.mxu0 %vm1742_vm2, %v1881_v5  ;;  %2064 = vmatpush.msra.mxu2 %v8804_v48 }
 0x42b   :  { %7219 = vmatmul.msk.f32.vlgmr.msrb.gmra.mxu2 %vm1742_vm2, %v1913_v6  ;;  %7232 = vmatpush.msk.msrb.mxu0 %vm1746_vm11, %v8788_v45 }
 0x42c   :  { %2065 = vmatpush.msra.mxu2 %v8818_v53  ;;  %2134 = vmatpush.msra.mxu1 %v8804_v48 }
 0x42d   :  { %v1767_v8 = vpop.f32.mrf.mxu0  ;;  %2164 = vmatpush.msrb.mxu0 %v8794_v46 }
 0x42e   :  { %7234 = vmatpush.msk.msrb.mxu2 %vm1746_vm11, %v8788_v45  ;;  %1771 = vrot.lane.b32.xlu2 %v1767_v8, %s8305_s5  ;;  %v2115_v45 = vpop.permute.xlu2 %2114  ;;  %vm1972_vm11 = vcmask 818480   ;;  %s8318_s5 = smov 2  }
 0x42f   :  { %2135 = vmatpush.msra.mxu1 %v8818_v53  ;;  %2165 = vmatpush.msrb.mxu0 %v8802_v47 }
 0x430   :  { %2196 = vmatpush.msrb.mxu2 %v8794_v46 }
 0x431   :  { %2166 = vmatpush.msrb.mxu0 %v8804_v48  ;;  %v1979_v10 = vpop.permute.xlu1 %1978 }
 0x432   :  { %2197 = vmatpush.msrb.mxu2 %v8802_v47 }
 0x433   :  { %2167 = vmatpush.msrb.mxu0 %v8818_v53 }
 0x434   :  { %2198 = vmatpush.msrb.mxu2 %v8804_v48 }
 0x435   :  { %v2181_v47 = vpop.permute.xlu0 %2180 }
 0x436   :  { %2199 = vmatpush.msrb.mxu2 %v8818_v53  ;;  %v2213_v9 = vpop.permute.xlu2 %2212 }
 0x439   :  { %v2149_v61 = vpop.permute.xlu1 %2148 }
 0x448   :  { %v1981_v11 = vpop.permute.xlu2 %1980 }
 0x449   :  { %v1983_v12 = vsel %vm1982_vm13, %v1979_v10, %v1981_v11  ;;  %vm2010_vm13 = vcmask 785680  }
 0x44a   :  { %7223 = vmatmul.msk.f32.vlgmr.msrb.gmra.mxu1 %vm1742_vm2, %v1983_v12  ;;  %v9034_v12 = vld [vmem:[#allocation20 + $0x8] sm:$0xff] }
 0x450   :  { %v2079_v46 = vpop.permute.xlu2 %2078 }
 0x451   :  { %7229 = vmatmul.msk.f32.vlgmr.msrb.gmra.mxu3 %vm1742_vm2, %v2079_v46 }
 0x459   :  { %7237 = vmatmul.msk.f32.vlgmr.msra.gmra.mxu3 %vm1742_vm2, %v2213_v9 }
 0x45f   :  { %v2015_v48 = vpop.permute.xlu1 %2014  ;;  %v2047_v13 = vpop.permute.xlu0 %2046 }
 0x460   :  { %7225 = vmatmul.msk.f32.vlgmr.msra.gmra.mxu0 %vm1742_vm2, %v2015_v48  ;;  %7227 = vmatmul.msk.f32.vlgmr.msra.gmra.mxu2 %vm1742_vm2, %v2047_v13  ;;  %v4613_v48 = vld [vmem:[#allocation5 + $0x78] sm:$0xff] }
 0x467   :  { %v2113_v53 = vpop.permute.xlu1 %2112 }
 0x468   :  { %v2117_v15 = vsel %vm2116_vm5, %v2113_v53, %v2115_v45  ;;  %7233 = vmatmul.msk.f32.vlgmr.msrb.gmra.mxu0 %vm1742_vm2, %v2149_v61  ;;  %7235 = vmatmul.msk.f32.vlgmr.msrb.gmra.mxu2 %vm1742_vm2, %v2181_v47  ;;  %vm2176_vm5 = vcmask 621680  }
 0x469   :  { %7231 = vmatmul.msk.f32.vlgmr.msra.gmra.mxu1 %vm1742_vm2, %v2117_v15  ;;  %vm1940_vm2 = vcmask 851280  }
 0x488   :  { %v1772_v16 = vpop.permute.xlu2 %1771 }
 0x489   :  { %1775 = vst.msk [vmem:[#allocation5] sm:$0xff] %vm1774_vm6, %v1772_v16  ;;  %vm2106_vm6 = vcmask 687280  }
 0x48d   :  { %v1831_v19 = vpop.f32.mrf.mxu3 }
 0x48e   :  { %1835 = vrot.lane.b32.xlu0 %v1831_v19, %s8306_s16  ;;  %s8327_s16 = smov 47  }
 0x490   :  { %v8952_v38 = vld [vmem:[#allocation5] sm:$0xff] }
 0x49d   :  { %v1965_v24 = vpop.f32.mrf.mxu3 }
 0x4a0   :  { %v1869_v20 = vpop.f32.mrf.mxu1 }
 0x4a1   :  { %1873 = vrot.lane.b32.xlu0 %v1869_v20, %s8278_s25  ;;  %s8310_s25 = smov 30  }
 0x4a6   :  { %v1799_v21 = vpop.f32.mrf.mxu2 }
 0x4a7   :  { %1803 = vrot.lane.b32.xlu1 %v1799_v21, %s8283_s29  ;;  %v1901_v22 = vpop.f32.mrf.mxu0  ;;  %s8311_s29 = smov 14  }
 0x4a8   :  { %1905 = vrot.lane.b32.xlu2 %v1901_v22, %s8307_s4 }
 0x4a9   :  { %1969 = vrot.lane.b32.xlu0 %v1965_v24, %s8308_s17  ;;  %s8337_s17 = smov 71  }
 0x4ae   :  { %v1933_v25 = vpop.f32.mrf.mxu2 }
 0x4af   :  { %1937 = vrot.lane.b32.xlu1 %v1933_v25, %s8271_s8  ;;  %s8312_s8 = smov 6  }
 0x4c7   :  { %v2003_v7 = vpop.f32.mrf.mxu1 }
 0x4c8   :  { %2007 = vrot.lane.b32.xlu0 %v2003_v7, %s8273_s1  ;;  %s8313_s1 = smov 66  }
 0x4d4   :  { %v2099_v14 = vpop.f32.mrf.mxu3 }
 0x4d5   :  { %2103 = vrot.lane.b32.xlu0 %v2099_v14, %s8309_s21  ;;  %v9057_v14 = vld [vmem:[#allocation20] sm:$0xff]  ;;  %s8335_s21 = smov 121  }
 0x4dc   :  { %v2233_v17 = vpop.f32.mrf.mxu3 }
 0x4dd   :  { %v2035_v26 = vpop.f32.mrf.mxu0 }
 0x4de   :  { %2039 = vrot.lane.b32.xlu2 %v2035_v26, %s8310_s25  ;;  %s8331_s25 = smov 16  }
 0x4e3   :  { %v2067_v29 = vpop.f32.mrf.mxu2 }
 0x4e4   :  { %2071 = vrot.lane.b32.xlu1 %v2067_v29, %s8293_s9  ;;  %s8314_s9 = smov 65  }
 0x4e5   :  { %v2169_v30 = vpop.f32.mrf.mxu0 }
 0x4e6   :  { %2173 = vrot.lane.b32.xlu2 %v2169_v30, %s8311_s29  ;;  %v2137_v31 = vpop.f32.mrf.mxu1  ;;  %s8321_s29 = smov 97  }
 0x4e7   :  { %2141 = vrot.lane.b32.xlu0 %v2137_v31, %s8296_s19  ;;  %s8315_s19 = smov 64  }
 0x4eb   :  { %v2201_v32 = vpop.f32.mrf.mxu2 }
 0x4ec   :  { %2205 = vrot.lane.b32.xlu1 %v2201_v32, %s8300_s23  ;;  %s8316_s23 = smov 4  }
 0x4ef   :  { %2237 = vrot.lane.b32.xlu0 %v2233_v17, %s8312_s8  ;;  %s8322_s8 = smov 35  }
 0x500   :  { %v1836_v23 = vpop.permute.xlu0 %1835 }
 0x501   :  { %1839 = vst.msk [vmem:[#allocation5 + $0x10] sm:$0xff] %vm1838_vm7, %v1836_v23  ;;  %vm2074_vm7 = vcmask 720080  }
 0x502   :  { %v1906_v33 = vpop.permute.xlu2 %1905 }
 0x503   :  { %1909 = vst.msk [vmem:[#allocation5 + $0x20] sm:$0xff] %vm1908_vm8, %v1906_v33  ;;  %vm2144_vm8 = vcmask 654480  }
 0x508   :  { %v8945_v34 = vld [vmem:[#allocation5 + $0x10] sm:$0xff] }
 0x50a   :  { %v8960_v42 = vld [vmem:[#allocation5 + $0x20] sm:$0xff] }
 0x513   :  { %v1874_v35 = vpop.permute.xlu0 %1873 }
 0x514   :  { %1877 = vst.msk [vmem:[#allocation5 + $0x18] sm:$0xff] %vm1876_vm9, %v1874_v35  ;;  %vm2208_vm9 = vcmask 588880  }
 0x519   :  { %v1804_v18 = vpop.permute.xlu1 %1803 }
 0x51a   :  { %1807 = vst.msk [vmem:[#allocation5 + $0x8] sm:$0xff] %vm1806_vm10, %v1804_v18  ;;  %vm2240_vm10 = vcmask 556080  }
 0x51b   :  { %v1970_v27 = vpop.permute.xlu0 %1969  ;;  %v8947_v28 = vld [vmem:[#allocation5 + $0x18] sm:$0xff] }
 0x51c   :  { %1973 = vst.msk [vmem:[#allocation5 + $0x30] sm:$0xff] %vm1972_vm11, %v1970_v27  ;;  %v7683_v36 = vpack.i.bf16 %v8947_v28, %v8945_v34  ;;  %vm2631_vm11 = vcmask 539648  }
 0x51e   :  { %7684 = vrot.lane.b32.xlu2 %v7683_v36, %s8279_s26 }
 0x521   :  { %v1938_v37 = vpop.permute.xlu1 %1937  ;;  %v8954_v39 = vld [vmem:[#allocation5 + $0x8] sm:$0xff] }
 0x522   :  { %1941 = vst.msk [vmem:[#allocation5 + $0x28] sm:$0xff] %vm1940_vm2, %v1938_v37  ;;  %v7643_v40 = vpack.i.bf16 %v8954_v39, %v8952_v38  ;;  %vm2764_vm2 = vcmask 531456  }
 0x523   :  { %v8984_v56 = vld [vmem:[#allocation5 + $0x30] sm:$0xff] }
 0x524   :  { %7644 = vrot.lane.b32.xlu1 %v7643_v40, %s8279_s26 }
 0x526   :  { %7689 = vrot.lane.b32.xlu2 %v7683_v36, %s8284_s2 }
 0x529   :  { %v8962_v43 = vld [vmem:[#allocation5 + $0x28] sm:$0xff] }
 0x52a   :  { %v7723_v44 = vpack.i.bf16 %v8962_v43, %v8960_v42  ;;  %v7763_v57 = vpack.i.bf16 %v8984_v56, %v8962_v43 }
 0x52c   :  { %7724 = vrot.lane.b32.xlu0 %v7723_v44, %s8279_s26  ;;  %7649 = vrot.lane.b32.xlu1 %v7643_v40, %s8284_s2 }
 0x52e   :  { %7694 = vrot.lane.b32.xlu2 %v7683_v36, %s8313_s1 }
 0x534   :  { %7729 = vrot.lane.b32.xlu0 %v7723_v44, %s8284_s2  ;;  %7654 = vrot.lane.b32.xlu1 %v7643_v40, %s8313_s1 }
 0x536   :  { %7699 = vrot.lane.b32.xlu2 %v7683_v36, %s8314_s9 }
 0x538   :  { %v2040_v49 = vpop.permute.xlu2 %2039 }
 0x539   :  { %2043 = vst.msk [vmem:[#allocation5 + $0x40] sm:$0xff] %vm2042_vm12, %v2040_v49  ;;  %vm2897_vm12 = vcmask 523264  }
 0x53a   :  { %v2008_v50 = vpop.permute.xlu0 %2007 }
 0x53b   :  { %2011 = vst.msk [vmem:[#allocation5 + $0x38] sm:$0xff] %vm2010_vm13, %v2008_v50  ;;  %vm3030_vm13 = vcmask 31744  }
 0x53c   :  { %7734 = vrot.lane.b32.xlu0 %v7723_v44, %s8313_s1  ;;  %7659 = vrot.lane.b32.xlu1 %v7643_v40, %s8314_s9 }
 0x53e   :  { %7704 = vrot.lane.b32.xlu2 %v7683_v36, %s8315_s19 }
 0x540   :  { %v2174_v51 = vpop.permute.xlu2 %2173  ;;  %v9002_v3 = vld [vmem:[#allocation5 + $0x40] sm:$0xff] }
 0x541   :  { %2177 = vst.msk [vmem:[#allocation5 + $0x60] sm:$0xff] %vm2176_vm5, %v2174_v51  ;;  %vm3163_vm5 = vcmask 23552  }
 0x542   :  { %v9000_v2 = vld [vmem:[#allocation5 + $0x38] sm:$0xff] }
 0x543   :  { %v9006_v4 = vpack.i.bf16 %v9002_v3, %v9000_v2 }
 0x544   :  { %7739 = vrot.lane.b32.xlu0 %v7723_v44, %s8314_s9  ;;  %7664 = vrot.lane.b32.xlu1 %v7643_v40, %s8315_s19 }
 0x546   :  { %7709 = vrot.lane.b32.xlu2 %v7683_v36, %s8316_s23 }
 0x547   :  { %v2104_v52 = vpop.permute.xlu0 %2103 }
 0x548   :  { %2107 = vst.msk [vmem:[#allocation5 + $0x50] sm:$0xff] %vm2106_vm6, %v2104_v52  ;;  %v9072_v32 = vld [vmem:[#allocation5 + $0x60] sm:$0xff]  ;;  %vm3296_vm6 = vcmask 15360  }
 0x54c   :  { %7744 = vrot.lane.b32.xlu0 %v7723_v44, %s8315_s19  ;;  %7669 = vrot.lane.b32.xlu1 %v7643_v40, %s8316_s23 }
 0x54e   :  { %7714 = vrot.lane.b32.xlu2 %v7683_v36, %s8317_s3 }
 0x54f   :  { %v8993_v1 = vld [vmem:[#allocation5 + $0x50] sm:$0xff] }
 0x554   :  { %7749 = vrot.lane.b32.xlu0 %v7723_v44, %s8316_s23  ;;  %7674 = vrot.lane.b32.xlu1 %v7643_v40, %s8317_s3 }
 0x556   :  { %v2072_v54 = vpop.permute.xlu1 %2071  ;;  %7719 = vrot.lane.b32.xlu2 %v7683_v36, %s8318_s5 }
 0x557   :  { %2075 = vst.msk [vmem:[#allocation5 + $0x48] sm:$0xff] %vm2074_vm7, %v2072_v54  ;;  %vm6066_vm7 = vcmask 97280  }
 0x559   :  { %v2142_v55 = vpop.permute.xlu0 %2141 }
 0x55a   :  { %2145 = vst.msk [vmem:[#allocation5 + $0x58] sm:$0xff] %vm2144_vm8, %v2142_v55  ;;  %vm6445_vm8 = vcmask 228352  }
 0x55c   :  { %7754 = vrot.lane.b32.xlu0 %v7723_v44, %s8317_s3  ;;  %7679 = vrot.lane.b32.xlu1 %v7643_v40, %s8318_s5 }
 0x55e   :  { %v2206_v58 = vpop.permute.xlu1 %2205  ;;  %7764 = vrot.lane.b32.xlu2 %v7763_v57, %s8279_s26  ;;  %v8991_v59 = vld [vmem:[#allocation5 + $0x48] sm:$0xff] }
 0x55f   :  { %2209 = vst.msk [vmem:[#allocation5 + $0x68] sm:$0xff] %vm2208_vm9, %v2206_v58  ;;  %v7843_v0 = vpack.i.bf16 %v8993_v1, %v8991_v59  ;;  %vm6654_vm9 = vcmask 39936  }
 0x561   :  { %v2238_v62 = vpop.permute.xlu0 %2237 }
 0x562   :  { %2241 = vst.msk [vmem:[#allocation5 + $0x70] sm:$0xff] %vm2240_vm10, %v2238_v62  ;;  %vm6559_vm10 = vcmask 7168  }
 0x564   :  { %7759 = vrot.lane.b32.xlu0 %v7723_v44, %s8318_s5  ;;  %7844 = vrot.lane.b32.xlu1 %v7843_v0, %s8279_s26  ;;  %v9093_v44 = vld [vmem:[#allocation5 + $0x58] sm:$0xff] }
 0x565   :  { %v9107_v52 = vpack.i.bf16 %v9093_v44, %v8993_v1 }
 0x566   :  { %7769 = vrot.lane.b32.xlu2 %v7763_v57, %s8284_s2  ;;  %v9061_v30 = vld [vmem:[#allocation5 + $0x68] sm:$0xff] }
 0x567   :  { %v9078_v17 = vpack.i.bf16 %v9061_v30, %v9072_v32 }
 0x569   :  { %v4611_v61 = vld [vmem:[#allocation5 + $0x70] sm:$0xff] }
 0x56a   :  { %v9046_v53 = vpack.i.bf16 %v4613_v48, %v4611_v61 }
 0x56c   :  { %7804 = vrot.lane.b32.xlu0 %v9006_v4, %s8279_s26  ;;  %7849 = vrot.lane.b32.xlu1 %v7843_v0, %s8284_s2 }
 0x56e   :  { %7774 = vrot.lane.b32.xlu2 %v7763_v57, %s8313_s1 }
 0x574   :  { %7809 = vrot.lane.b32.xlu0 %v9006_v4, %s8284_s2  ;;  %7854 = vrot.lane.b32.xlu1 %v7843_v0, %s8313_s1 }
 0x576   :  { %7779 = vrot.lane.b32.xlu2 %v7763_v57, %s8314_s9 }
 0x578   :  { %v7685_v5 = vpop.permute.xlu2 %7684 }
 0x579   :  { %v7687_v8 = vunpack.i.h.bf16 %v7685_v5  ;;  %v7686_v45 = vunpack.i.l.bf16 %v7685_v5 }
 0x57b   :  { %v2271_v13 = vsel %vm771_vm15, %v7686_v45, %v7687_v8 }
 0x57c   :  { %7814 = vrot.lane.b32.xlu0 %v9006_v4, %s8313_s1  ;;  %7859 = vrot.lane.b32.xlu1 %v7843_v0, %s8314_s9 }
 0x57e   :  { %7784 = vrot.lane.b32.xlu2 %v7763_v57, %s8315_s19 }
 0x580   :  { %v9032_v9 = vpop.permute.xlu2 %7689 }
 0x581   :  { %v7692_v26 = vunpack.i.h.bf16 %v9032_v9  ;;  %v7691_v29 = vunpack.i.l.bf16 %v9032_v9 }
 0x583   :  { %v2501_v33 = vsel %vm958_vm14, %v7691_v29, %v7692_v26 }
 0x584   :  { %7819 = vrot.lane.b32.xlu0 %v9006_v4, %s8314_s9  ;;  %7864 = vrot.lane.b32.xlu1 %v7843_v0, %s8315_s19 }
 0x586   :  { %7789 = vrot.lane.b32.xlu2 %v7763_v57, %s8316_s23 }
 0x588   :  { %v9053_v24 = vpop.permute.xlu2 %7694 }
 0x589   :  { %v7697_v37 = vunpack.i.h.bf16 %v9053_v24 }
 0x58c   :  { %7824 = vrot.lane.b32.xlu0 %v9006_v4, %s8315_s19  ;;  %7869 = vrot.lane.b32.xlu1 %v7843_v0, %s8316_s23 }
 0x58e   :  { %7794 = vrot.lane.b32.xlu2 %v7763_v57, %s8317_s3 }
 0x590   :  { %v7700_v49 = vpop.permute.xlu2 %7699 }
 0x591   :  { %v7701_v1 = vunpack.i.l.bf16 %v7700_v49 }
 0x594   :  { %7829 = vrot.lane.b32.xlu0 %v9006_v4, %s8316_s23  ;;  %7874 = vrot.lane.b32.xlu1 %v7843_v0, %s8317_s3 }
 0x596   :  { %v7645_v6 = vpop.permute.xlu1 %7644  ;;  %7799 = vrot.lane.b32.xlu2 %v7763_v57, %s8318_s5 }
 0x597   :  { %v7647_v10 = vunpack.i.h.bf16 %v7645_v6  ;;  %v7646_v11 = vunpack.i.l.bf16 %v7645_v6 }
 0x598   :  { %v7705_v9 = vpop.permute.xlu2 %7704 }
 0x599   :  { %v2269_v46 = vsel %vm771_vm15, %v7646_v11, %v7647_v10  ;;  %v2270_v47 = vsel %vm771_vm15, %v7647_v10, %v7686_v45 }
 0x59a   :  { %2297 = vmatpush.msrb.mxu1 %v2269_v46  ;;  %2317 = vmatpush.msra.mxu0 %v2270_v47 }
 0x59b   :  { %7238 = vmatmul.msk.f32.vlgmr.msrb.gmra.mxu1 %vm197_vm0, %v9034_v12  ;;  %7239 = vmatmul.msk.f32.vlgmr.msra.gmra.mxu0 %vm197_vm0, %v9034_v12 }
 0x59c   :  { %2337 = vmatpush.msra.mxu1 %v2271_v13  ;;  %2400 = vmatpush.msrb.mxu0 %v8952_v38  ;;  %v7696_v38 = vunpack.i.l.bf16 %v9053_v24  ;;  %v7702_v13 = vunpack.i.h.bf16 %v7700_v49 }
 0x59d   :  { %7834 = vrot.lane.b32.xlu0 %v9006_v4, %s8317_s3  ;;  %7879 = vrot.lane.b32.xlu1 %v7843_v0, %s8318_s5 }
 0x59e   :  { %2420 = vmatpush.msrb.mxu1 %v8954_v39  ;;  %2480 = vmatpush.msra.mxu0 %v8960_v42  ;;  %v7650_v15 = vpop.permute.xlu1 %7649  ;;  %v7725_v16 = vpop.permute.xlu0 %7724  ;;  %v2634_v51 = vsel %vm2631_vm11, %v7696_v38, %v7697_v37 }
 0x59f   :  { %v7652_v19 = vunpack.i.h.bf16 %v7650_v15  ;;  %v7651_v20 = vunpack.i.l.bf16 %v7650_v15  ;;  %v7727_v21 = vunpack.i.h.bf16 %v7725_v16  ;;  %v7726_v22 = vunpack.i.l.bf16 %v7725_v16  ;;  %7929 = vrot.lane.b32.xlu2 %v9046_v53, %s8279_s26  ;;  %v9135_v15 = vld [vmem:[#allocation20 + $0x18] sm:$0xff] }
 0x5a1   :  { %v2272_v25 = vsel %vm771_vm15, %v7687_v8, %v7726_v22  ;;  %v2273_v7 = vsel %vm771_vm15, %v7726_v22, %v7727_v21  ;;  %v2499_v31 = vsel %vm958_vm14, %v7651_v20, %v7652_v19  ;;  %v2500_v23 = vsel %vm958_vm14, %v7652_v19, %v7691_v29  ;;  %v7710_v29 = vpop.permute.xlu2 %7709 }
 0x5a2   :  { %2357 = vmatpush.msra.mxu2 %v2272_v25  ;;  %2377 = vmatpush.msrb.mxu3 %v2273_v7  ;;  %v2767_v21 = vsel %vm2764_vm2, %v7701_v1, %v7702_v13  ;;  %v7707_v7 = vunpack.i.h.bf16 %v7705_v9 }
 0x5a3   :  { %7240 = vmatmul.msk.f32.vlgmr.msra.gmra.mxu1 %vm197_vm0, %v9034_v12  ;;  %7241 = vmatmul.msk.f32.vlgmr.msra.gmra.mxu2 %vm197_vm0, %v9034_v12 }
 0x5a4   :  { %7242 = vmatmul.msk.f32.vlgmr.msrb.gmra.mxu3 %vm197_vm0, %v9034_v12  ;;  %7243 = vmatmul.msk.f32.vlgmr.msrb.gmra.mxu0 %vm197_vm0, %v9057_v14 }
 0x5a5   :  { %2440 = vmatpush.msrb.mxu2 %v8945_v34  ;;  %2460 = vmatpush.msra.mxu3 %v8947_v28 }
 0x5a6   :  { %2527 = vmatpush.msra.mxu1 %v2499_v31  ;;  %7839 = vrot.lane.b32.xlu0 %v9006_v4, %s8318_s5  ;;  %v7655_v35 = vpop.permute.xlu1 %7654  ;;  %v7730_v18 = vpop.permute.xlu0 %7729  ;;  %v9115_v4 = vld [vmem:[#allocation20 + $0x10] sm:$0xff]  ;;  %v9155_v31 = vld [vmem:[#allocation20 + $0x20] sm:$0xff] }
 0x5a7   :  { %7924 = vrot.lane.b32.xlu1 %v9078_v17, %s8279_s26  ;;  %2547 = vmatpush.msra.mxu2 %v2500_v23  ;;  %v7657_v27 = vunpack.i.h.bf16 %v7655_v35  ;;  %v7656_v34 = vunpack.i.l.bf16 %v7655_v35  ;;  %v7732_v28 = vunpack.i.h.bf16 %v7730_v18  ;;  %v7731_v36 = vunpack.i.l.bf16 %v7730_v18 }
 0x5a8   :  { %2567 = vmatpush.msrb.mxu3 %v2501_v33  ;;  %7939 = vrot.lane.b32.xlu2 %v9046_v53, %s8284_s2 }
 0x5a9   :  { %v2502_v39 = vsel %vm958_vm14, %v7692_v26, %v7731_v36  ;;  %v2503_v40 = vsel %vm958_vm14, %v7731_v36, %v7732_v28  ;;  %v2632_v42 = vsel %vm2631_vm11, %v7656_v34, %v7657_v27  ;;  %v2633_v50 = vsel %vm2631_vm11, %v7657_v27, %v7696_v38 }
 0x5aa   :  { %2587 = vmatpush.msrb.mxu0 %v2502_v39  ;;  %v7706_v26 = vunpack.i.l.bf16 %v7705_v9  ;;  %v7712_v38 = vunpack.i.h.bf16 %v7710_v29  ;;  %v7711_v39 = vunpack.i.l.bf16 %v7710_v29 }
 0x5ab   :  { %7244 = vmatmul.msk.f32.vlgmr.msrb.gmra.mxu1 %vm197_vm0, %v9057_v14  ;;  %7245 = vmatmul.msk.f32.vlgmr.msrb.gmra.mxu2 %vm197_vm0, %v9057_v14 }
 0x5ac   :  { %7246 = vmatmul.msk.f32.vlgmr.msra.gmra.mxu3 %vm197_vm0, %v9057_v14  ;;  %7247 = vmatmul.msk.f32.vlgmr.msra.gmra.mxu0 %vm197_vm0, %v9057_v14  ;;  %v2900_v27 = vsel %vm2897_vm12, %v7706_v26, %v7707_v7 }
 0x5ad   :  { %2607 = vmatpush.msrb.mxu1 %v2503_v40  ;;  %2660 = vmatpush.msrb.mxu2 %v2632_v42  ;;  %v9175_v40 = vld [vmem:[#allocation20 + $0x28] sm:$0xff]  ;;  %v7715_v42 = vpop.permute.xlu2 %7714 }
 0x5ae   :  { %2680 = vmatpush.msra.mxu3 %v2633_v50  ;;  %2700 = vmatpush.msra.mxu0 %v2634_v51  ;;  %v7660_v54 = vpop.permute.xlu1 %7659  ;;  %v7735_v55 = vpop.permute.xlu0 %7734 }
 0x5af   :  { %7934 = vrot.lane.b32.xlu1 %v9078_v17, %s8284_s2  ;;  %7884 = vrot.lane.b32.xlu0 %v9107_v52, %s8279_s26  ;;  %v7662_v57 = vunpack.i.h.bf16 %v7660_v54  ;;  %v7661_v58 = vunpack.i.l.bf16 %v7660_v54  ;;  %v7737_v62 = vunpack.i.h.bf16 %v7735_v55  ;;  %v7736_v0 = vunpack.i.l.bf16 %v7735_v55  ;;  %s8319_s26 = smov 101  }
 0x5b0   :  { %7949 = vrot.lane.b32.xlu2 %v9046_v53, %s8313_s1  ;;  %v3033_v55 = vsel %vm3030_vm13, %v7711_v39, %v7712_v38 }
 0x5b1   :  { %v2635_v5 = vsel %vm2631_vm11, %v7697_v37, %v7736_v0  ;;  %v2636_v6 = vsel %vm2631_vm11, %v7736_v0, %v7737_v62  ;;  %v2765_v8 = vsel %vm2764_vm2, %v7661_v58, %v7662_v57  ;;  %v2766_v45 = vsel %vm2764_vm2, %v7662_v57, %v7701_v1 }
 0x5b2   :  { %v7717_v0 = vunpack.i.h.bf16 %v7715_v42  ;;  %v7716_v1 = vunpack.i.l.bf16 %v7715_v42  ;;  %v9247_v42 = vld [vmem:[#allocation20 + $0x40] sm:$0xff] }
 0x5b3   :  { %7248 = vmatmul.msk.f32.vlgmr.msra.gmra.mxu1 %vm197_vm0, %v9115_v4  ;;  %7249 = vmatmul.msk.f32.vlgmr.msra.gmra.mxu2 %vm197_vm0, %v9115_v4 }
 0x5b4   :  { %7250 = vmatmul.msk.f32.vlgmr.msrb.gmra.mxu3 %vm197_vm0, %v9115_v4  ;;  %7251 = vmatmul.msk.f32.vlgmr.msrb.gmra.mxu0 %vm197_vm0, %v9115_v4 }
 0x5b5   :  { %2720 = vmatpush.msra.mxu1 %v2635_v5  ;;  %2740 = vmatpush.msra.mxu2 %v2636_v6  ;;  %v7720_v6 = vpop.permute.xlu2 %7719 }
 0x5b6   :  { %2793 = vmatpush.msrb.mxu3 %v2765_v8  ;;  %2813 = vmatpush.msrb.mxu0 %v2766_v45  ;;  %v7665_v10 = vpop.permute.xlu1 %7664  ;;  %v7740_v11 = vpop.permute.xlu0 %7739 }
 0x5b7   :  { %7944 = vrot.lane.b32.xlu1 %v9078_v17, %s8313_s1  ;;  %7889 = vrot.lane.b32.xlu0 %v9107_v52, %s8284_s2  ;;  %v7667_v46 = vunpack.i.h.bf16 %v7665_v10  ;;  %v7666_v47 = vunpack.i.l.bf16 %v7665_v10  ;;  %v7742_v61 = vunpack.i.h.bf16 %v7740_v11  ;;  %v7741_v48 = vunpack.i.l.bf16 %v7740_v11  ;;  %s8357_s2 = smov 25  }
 0x5b8   :  { %7959 = vrot.lane.b32.xlu2 %v9046_v53, %s8314_s9  ;;  %v3166_v10 = vsel %vm3163_vm5, %v7716_v1, %v7717_v0 }
 0x5b9   :  { %v2768_v16 = vsel %vm2764_vm2, %v7702_v13, %v7741_v48  ;;  %v2769_v19 = vsel %vm2764_vm2, %v7741_v48, %v7742_v61  ;;  %v2898_v20 = vsel %vm2897_vm12, %v7666_v47, %v7667_v46  ;;  %v2899_v18 = vsel %vm2897_vm12, %v7667_v46, %v7706_v26  ;;  %v9213_v61 = vld [vmem:[#allocation20 + $0x30] sm:$0xff]  ;;  %v9231_v26 = vld [vmem:[#allocation20 + $0x38] sm:$0xff] }
 0x5bb   :  { %7252 = vmatmul.msk.f32.vlgmr.msrb.gmra.mxu1 %vm197_vm0, %v9115_v4  ;;  %7253 = vmatmul.msk.f32.vlgmr.msrb.gmra.mxu2 %vm197_vm0, %v9135_v15 }
 0x5bc   :  { %7254 = vmatmul.msk.f32.vlgmr.msra.gmra.mxu3 %vm197_vm0, %v9135_v15  ;;  %7255 = vmatmul.msk.f32.vlgmr.msra.gmra.mxu0 %vm197_vm0, %v9135_v15 }
 0x5bd   :  { %2833 = vmatpush.msrb.mxu1 %v2767_v21  ;;  %2853 = vmatpush.msrb.mxu2 %v2768_v16  ;;  %v7721_v16 = vunpack.i.l.bf16 %v7720_v6 }
 0x5be   :  { %2873 = vmatpush.msra.mxu3 %v2769_v19  ;;  %2926 = vmatpush.msra.mxu0 %v2898_v20  ;;  %v7745_v22 = vpop.permute.xlu0 %7744  ;;  %v7670_v23 = vpop.permute.xlu1 %7669 }
 0x5bf   :  { %7954 = vrot.lane.b32.xlu1 %v9078_v17, %s8314_s9  ;;  %7894 = vrot.lane.b32.xlu0 %v9107_v52, %s8313_s1  ;;  %v7747_v24 = vunpack.i.h.bf16 %v7745_v22  ;;  %v7746_v25 = vunpack.i.l.bf16 %v7745_v22  ;;  %v7672_v36 = vunpack.i.h.bf16 %v7670_v23  ;;  %v7671_v37 = vunpack.i.l.bf16 %v7670_v23 }
 0x5c0   :  { %7969 = vrot.lane.b32.xlu2 %v9046_v53, %s8315_s19 }
 0x5c1   :  { %v2901_v33 = vsel %vm2897_vm12, %v7707_v7, %v7746_v25  ;;  %v2902_v35 = vsel %vm2897_vm12, %v7746_v25, %v7747_v24  ;;  %v3031_v51 = vsel %vm3030_vm13, %v7671_v37, %v7672_v36  ;;  %v3032_v54 = vsel %vm3030_vm13, %v7672_v36, %v7711_v39  ;;  %v7765_v24 = vpop.permute.xlu2 %7764 }
 0x5c2   :  { %v7722_v25 = vunpack.i.h.bf16 %v7720_v6  ;;  %v7767_v29 = vunpack.i.h.bf16 %v7765_v24  ;;  %v7766_v23 = vunpack.i.l.bf16 %v7765_v24 }
 0x5c3   :  { %7256 = vmatmul.msk.f32.vlgmr.msra.gmra.mxu1 %vm197_vm0, %v9135_v15  ;;  %7257 = vmatmul.msk.f32.vlgmr.msra.gmra.mxu2 %vm197_vm0, %v9135_v15 }
 0x5c4   :  { %7258 = vmatmul.msk.f32.vlgmr.msrb.gmra.mxu3 %vm197_vm0, %v9155_v31  ;;  %7259 = vmatmul.msk.f32.vlgmr.msrb.gmra.mxu0 %vm197_vm0, %v9155_v31 }
 0x5c5   :  { %2946 = vmatpush.msra.mxu1 %v2899_v18  ;;  %2966 = vmatpush.msra.mxu2 %v2900_v27 }
 0x5c6   :  { %2986 = vmatpush.msrb.mxu3 %v2901_v33  ;;  %3006 = vmatpush.msrb.mxu0 %v2902_v35  ;;  %v7750_v34 = vpop.permute.xlu0 %7749  ;;  %v7675_v50 = vpop.permute.xlu1 %7674 }
 0x5c7   :  { %7964 = vrot.lane.b32.xlu1 %v9078_v17, %s8315_s19  ;;  %7899 = vrot.lane.b32.xlu0 %v9107_v52, %s8314_s9  ;;  %v7751_v28 = vunpack.i.l.bf16 %v7750_v34  ;;  %v7677_v57 = vunpack.i.h.bf16 %v7675_v50  ;;  %v7676_v58 = vunpack.i.l.bf16 %v7675_v50  ;;  %v7752_v62 = vunpack.i.h.bf16 %v7750_v34  ;;  %s8324_s9 = smov 74  }
 0x5c8   :  { %7979 = vrot.lane.b32.xlu2 %v9046_v53, %s8316_s23  ;;  %v3457_v34 = vsel %vm771_vm15, %v7766_v23, %v7767_v29 }
 0x5c9   :  { %v3034_v49 = vsel %vm3030_vm13, %v7712_v38, %v7751_v28  ;;  %v3035_v8 = vsel %vm3030_vm13, %v7751_v28, %v7752_v62  ;;  %v3164_v45 = vsel %vm3163_vm5, %v7676_v58, %v7677_v57  ;;  %v3165_v9 = vsel %vm3163_vm5, %v7677_v57, %v7716_v1 }
 0x5cb   :  { %7260 = vmatmul.msk.f32.vlgmr.msrb.gmra.mxu1 %vm197_vm0, %v9155_v31  ;;  %7261 = vmatmul.msk.f32.vlgmr.msrb.gmra.mxu2 %vm197_vm0, %v9155_v31 }
 0x5cc   :  { %7262 = vmatmul.msk.f32.vlgmr.msra.gmra.mxu3 %vm197_vm0, %v9155_v31  ;;  %7263 = vmatmul.msk.f32.vlgmr.msra.gmra.mxu0 %vm197_vm0, %v9175_v40 }
 0x5cd   :  { %3059 = vmatpush.msrb.mxu1 %v3031_v51  ;;  %3079 = vmatpush.msrb.mxu2 %v3032_v54  ;;  %v7770_v54 = vpop.permute.xlu2 %7769 }
 0x5ce   :  { %3099 = vmatpush.msra.mxu3 %v3033_v55  ;;  %3119 = vmatpush.msra.mxu0 %v3034_v49  ;;  %v7755_v5 = vpop.permute.xlu0 %7754  ;;  %v7680_v11 = vpop.permute.xlu1 %7679  ;;  %v7772_v57 = vunpack.i.h.bf16 %v7770_v54  ;;  %v7771_v58 = vunpack.i.l.bf16 %v7770_v54 }
 0x5cf   :  { %7974 = vrot.lane.b32.xlu1 %v9078_v17, %s8316_s23  ;;  %7904 = vrot.lane.b32.xlu0 %v9107_v52, %s8315_s19  ;;  %v7757_v46 = vunpack.i.h.bf16 %v7755_v5  ;;  %v7756_v47 = vunpack.i.l.bf16 %v7755_v5  ;;  %v7682_v48 = vunpack.i.h.bf16 %v7680_v11  ;;  %v7681_v13 = vunpack.i.l.bf16 %v7680_v11  ;;  %s8325_s19 = smov 43  }
 0x5d0   :  { %7989 = vrot.lane.b32.xlu2 %v9046_v53, %s8317_s3 }
 0x5d1   :  { %v3168_v20 = vsel %vm3163_vm5, %v7756_v47, %v7757_v46  ;;  %v3297_v21 = vsel %vm3296_vm6, %v7681_v13, %v7682_v48  ;;  %v3298_v22 = vsel %vm3296_vm6, %v7682_v48, %v7721_v16 }
 0x5d3   :  { %7264 = vmatmul.msk.f32.vlgmr.msra.gmra.mxu1 %vm197_vm0, %v9175_v40  ;;  %7265 = vmatmul.msk.f32.vlgmr.msra.gmra.mxu2 %vm197_vm0, %v9175_v40 }
 0x5d4   :  { %7266 = vmatmul.msk.f32.vlgmr.msrb.gmra.mxu3 %vm197_vm0, %v9175_v40  ;;  %7267 = vmatmul.msk.f32.vlgmr.msrb.gmra.mxu0 %vm197_vm0, %v9175_v40 }
 0x5d5   :  { %3139 = vmatpush.msra.mxu1 %v3035_v8  ;;  %3192 = vmatpush.msra.mxu2 %v3164_v45  ;;  %v7775_v5 = vpop.permute.xlu2 %7774 }
 0x5d6   :  { %3212 = vmatpush.msrb.mxu3 %v3165_v9  ;;  %3232 = vmatpush.msrb.mxu0 %v3166_v10  ;;  %v7760_v19 = vpop.permute.xlu0 %7759  ;;  %v7845_v28 = vpop.permute.xlu1 %7844  ;;  %v7777_v45 = vunpack.i.h.bf16 %v7775_v5  ;;  %v7776_v9 = vunpack.i.l.bf16 %v7775_v5 }
 0x5d7   :  { %7984 = vrot.lane.b32.xlu1 %v9078_v17, %s8317_s3  ;;  %7909 = vrot.lane.b32.xlu0 %v9107_v52, %s8316_s23  ;;  %v7761_v7 = vunpack.i.l.bf16 %v7760_v19  ;;  %v7762_v33 = vunpack.i.h.bf16 %v7760_v19  ;;  %v7847_v38 = vunpack.i.h.bf16 %v7845_v28  ;;  %v7846_v39 = vunpack.i.l.bf16 %v7845_v28 }
 0x5d8   :  { %7999 = vrot.lane.b32.xlu2 %v9046_v53, %s8318_s5  ;;  %v3167_v53 = vsel %vm3163_vm5, %v7717_v0, %v7756_v47  ;;  %v3817_v46 = vsel %vm2631_vm11, %v7776_v9, %v7777_v45 }
 0x5d9   :  { %v3300_v35 = vsel %vm3296_vm6, %v7722_v25, %v7761_v7  ;;  %v3301_v27 = vsel %vm3296_vm6, %v7761_v7, %v7762_v33  ;;  %v3461_v51 = vsel %vm771_vm15, %v7846_v39, %v7847_v38 }
 0x5db   :  { %7268 = vmatmul.msk.f32.vlgmr.msrb.gmra.mxu1 %vm197_vm0, %v9213_v61  ;;  %7269 = vmatmul.msk.f32.vlgmr.msrb.gmra.mxu2 %vm197_vm0, %v9213_v61 }
 0x5dc   :  { %7270 = vmatmul.msk.f32.vlgmr.msra.gmra.mxu3 %vm197_vm0, %v9213_v61  ;;  %7271 = vmatmul.msk.f32.vlgmr.msra.gmra.mxu0 %vm197_vm0, %v9213_v61 }
 0x5dd   :  { %3252 = vmatpush.msrb.mxu1 %v3167_v53  ;;  %3272 = vmatpush.msrb.mxu2 %v3168_v20  ;;  %v7780_v48 = vpop.permute.xlu2 %7779 }
 0x5de   :  { %3325 = vmatpush.msra.mxu3 %v3297_v21  ;;  %3345 = vmatpush.msra.mxu0 %v3298_v22  ;;  %v7805_v18 = vpop.permute.xlu0 %7804  ;;  %v7850_v62 = vpop.permute.xlu1 %7849  ;;  %v7782_v19 = vunpack.i.h.bf16 %v7780_v48  ;;  %v7781_v53 = vunpack.i.l.bf16 %v7780_v48 }
 0x5df   :  { %7994 = vrot.lane.b32.xlu1 %v9078_v17, %s8318_s5  ;;  %7914 = vrot.lane.b32.xlu0 %v9107_v52, %s8317_s3  ;;  %v3299_v17 = vsel %vm3296_vm6, %v7721_v16, %v7722_v25  ;;  %v7807_v36 = vunpack.i.h.bf16 %v7805_v18  ;;  %v7806_v37 = vunpack.i.l.bf16 %v7805_v18  ;;  %v7852_v6 = vunpack.i.h.bf16 %v7850_v62 }
 0x5e0   :  { %v7851_v8 = vunpack.i.l.bf16 %v7850_v62 }
 0x5e1   :  { %v3459_v49 = vsel %vm771_vm15, %v7806_v37, %v7807_v36  ;;  %v3460_v50 = vsel %vm771_vm15, %v7807_v36, %v7846_v39 }
 0x5e3   :  { %7272 = vmatmul.msk.f32.vlgmr.msra.gmra.mxu1 %vm197_vm0, %v9213_v61  ;;  %7273 = vmatmul.msk.f32.vlgmr.msra.gmra.mxu2 %vm197_vm0, %v9231_v26 }
 0x5e4   :  { %7274 = vmatmul.msk.f32.vlgmr.msrb.gmra.mxu3 %vm197_vm0, %v9231_v26  ;;  %7275 = vmatmul.msk.f32.vlgmr.msrb.gmra.mxu0 %vm197_vm0, %v9231_v26 }
 0x5e5   :  { %3365 = vmatpush.msra.mxu1 %v3299_v17  ;;  %3385 = vmatpush.msra.mxu2 %v3300_v35 }
 0x5e6   :  { %3405 = vmatpush.msrb.mxu3 %v3301_v27  ;;  %3485 = vmatpush.msrb.mxu0 %v3457_v34  ;;  %v7810_v55 = vpop.permute.xlu0 %7809  ;;  %v7855_v11 = vpop.permute.xlu1 %7854 }
 0x5e7   :  { %7919 = vrot.lane.b32.xlu0 %v9107_v52, %s8318_s5  ;;  %v3458_v52 = vsel %vm771_vm15, %v7767_v29, %v7806_v37  ;;  %v7812_v0 = vunpack.i.h.bf16 %v7810_v55  ;;  %v7811_v1 = vunpack.i.l.bf16 %v7810_v55  ;;  %v7857_v20 = vunpack.i.h.bf16 %v7855_v11  ;;  %v7785_v29 = vpop.permute.xlu2 %7784 }
 0x5e8   :  { %v7856_v21 = vunpack.i.l.bf16 %v7855_v11  ;;  %v7786_v38 = vunpack.i.l.bf16 %v7785_v29 }
 0x5ea   :  { %v3821_v7 = vsel %vm2631_vm11, %v7856_v21, %v7857_v20 }
 0x5eb   :  { %7276 = vmatmul.msk.f32.vlgmr.msrb.gmra.mxu1 %vm197_vm0, %v9231_v26  ;;  %7277 = vmatmul.msk.f32.vlgmr.msrb.gmra.mxu2 %vm197_vm0, %v9231_v26 }
 0x5ec   :  { %7278 = vmatmul.msk.f32.vlgmr.msra.gmra.mxu3 %vm197_vm0, %v9247_v42  ;;  %7279 = vmatmul.msk.f32.vlgmr.msra.gmra.mxu0 %vm197_vm0, %v9247_v42 }
 0x5ed   :  { %3505 = vmatpush.msrb.mxu1 %v3458_v52  ;;  %3525 = vmatpush.msrb.mxu2 %v3459_v49 }
 0x5ee   :  { %3545 = vmatpush.msra.mxu3 %v3460_v50  ;;  %3565 = vmatpush.msra.mxu0 %v3461_v51  ;;  %v7860_v22 = vpop.permute.xlu1 %7859 }
 0x5ef   :  { %v7862_v17 = vunpack.i.h.bf16 %v7860_v22  ;;  %v7861_v35 = vunpack.i.l.bf16 %v7860_v22  ;;  %v7790_v51 = vpop.permute.xlu2 %7789 }
 0x5f0   :  { %v7791_v5 = vunpack.i.l.bf16 %v7790_v51 }
 0x5f1   :  { %v3952_v36 = vsel %vm2764_vm2, %v7861_v35, %v7862_v17 }
 0x5f3   :  { %7280 = vmatmul.msk.f32.vlgmr.msra.gmra.mxu1 %vm197_vm0, %v9247_v42  ;;  %7281 = vmatmul.msk.f32.vlgmr.msra.gmra.mxu2 %vm197_vm0, %v9247_v42 }
 0x5f4   :  { %7282 = vmatmul.msk.f32.vlgmr.msrb.gmra.mxu3 %vm197_vm0, %v9247_v42  ;;  %7283 = vmatmul.msk.f32.vlgmr.msrb.gmra.mxu0 %vm197_vm0, %v9034_v12 }
 0x5f5   :  { %3588 = vmatpush.msra.mxu1 %v8962_v43  ;;  %3608 = vmatpush.msra.mxu2 %v8984_v56  ;;  %v3686_v43 = vsel %vm958_vm14, %v7771_v58, %v7772_v57  ;;  %v3687_v56 = vsel %vm958_vm14, %v7772_v57, %v7811_v1 }
 0x5f6   :  { %3628 = vmatpush.msrb.mxu3 %v9000_v2  ;;  %3648 = vmatpush.msrb.mxu0 %v9002_v3  ;;  %v3688_v2 = vsel %vm958_vm14, %v7811_v1, %v7812_v0  ;;  %v7815_v3 = vpop.permute.xlu0 %7814  ;;  %v7865_v37 = vpop.permute.xlu1 %7864  ;;  %v7792_v1 = vunpack.i.h.bf16 %v7790_v51 }
 0x5f7   :  { %v7816_v10 = vunpack.i.l.bf16 %v7815_v3  ;;  %v7817_v13 = vunpack.i.h.bf16 %v7815_v3  ;;  %v7866_v54 = vunpack.i.l.bf16 %v7865_v37 }
 0x5f8   :  { %v4210_v9 = vsel %vm3030_vm13, %v7791_v5, %v7792_v1 }
 0x5f9   :  { %v3818_v47 = vsel %vm2631_vm11, %v7777_v45, %v7816_v10  ;;  %v3819_v24 = vsel %vm2631_vm11, %v7816_v10, %v7817_v13  ;;  %v3820_v25 = vsel %vm2631_vm11, %v7817_v13, %v7856_v21 }
 0x5fb   :  { %7284 = vmatmul.msk.f32.vlgmr.msrb.gmra.mxu1 %vm197_vm0, %v9034_v12  ;;  %7285 = vmatmul.msk.f32.vlgmr.msrb.gmra.mxu2 %vm197_vm0, %v9034_v12 }
 0x5fc   :  { %7286 = vmatmul.msk.f32.vlgmr.msra.gmra.mxu3 %vm197_vm0, %v9034_v12  ;;  %7287 = vmatmul.msk.f32.vlgmr.msra.gmra.mxu0 %vm197_vm0, %v9034_v12  ;;  %v3690_v12 = vsel %vm958_vm14, %v7851_v8, %v7852_v6 }
 0x5fd   :  { %3668 = vmatpush.msrb.mxu1 %v8991_v59  ;;  %3714 = vmatpush.msrb.mxu2 %v3686_v43  ;;  %v3689_v59 = vsel %vm958_vm14, %v7812_v0, %v7851_v8  ;;  %v7867_v43 = vunpack.i.h.bf16 %v7865_v37  ;;  %v7795_v8 = vpop.permute.xlu2 %7794 }
 0x5fe   :  { %3734 = vmatpush.msra.mxu3 %v3687_v56  ;;  %3754 = vmatpush.msra.mxu0 %v3688_v2  ;;  %v7820_v16 = vpop.permute.xlu0 %7819  ;;  %v7870_v56 = vpop.permute.xlu1 %7869 }
 0x5ff   :  { %v7822_v23 = vunpack.i.h.bf16 %v7820_v16  ;;  %v7821_v33 = vunpack.i.l.bf16 %v7820_v16  ;;  %v4083_v45 = vsel %vm2897_vm12, %v7866_v54, %v7867_v43  ;;  %v7871_v48 = vunpack.i.l.bf16 %v7870_v56 }
 0x600   :  { %v7796_v16 = vunpack.i.l.bf16 %v7795_v8 }
 0x601   :  { %v3949_v27 = vsel %vm2764_vm2, %v7782_v19, %v7821_v33  ;;  %v3950_v34 = vsel %vm2764_vm2, %v7821_v33, %v7822_v23  ;;  %v3951_v28 = vsel %vm2764_vm2, %v7822_v23, %v7861_v35 }
 0x603   :  { %7288 = vmatmul.msk.f32.vlgmr.msra.gmra.mxu1 %vm197_vm0, %v9057_v14  ;;  %7289 = vmatmul.msk.f32.vlgmr.msra.gmra.mxu2 %vm197_vm0, %v9057_v14 }
 0x604   :  { %7290 = vmatmul.msk.f32.vlgmr.msrb.gmra.mxu3 %vm197_vm0, %v9057_v14  ;;  %7291 = vmatmul.msk.f32.vlgmr.msrb.gmra.mxu0 %vm197_vm0, %v9057_v14 }
 0x605   :  { %3774 = vmatpush.msra.mxu1 %v3689_v59  ;;  %3794 = vmatpush.msra.mxu2 %v3690_v12 }
 0x606   :  { %3845 = vmatpush.msrb.mxu3 %v3817_v46  ;;  %3865 = vmatpush.msrb.mxu0 %v3818_v47  ;;  %v7825_v18 = vpop.permute.xlu0 %7824  ;;  %v7872_v47 = vunpack.i.h.bf16 %v7870_v56 }
 0x607   :  { %v7826_v39 = vunpack.i.l.bf16 %v7825_v18  ;;  %v7827_v49 = vunpack.i.h.bf16 %v7825_v18 }
 0x609   :  { %v4081_v62 = vsel %vm2897_vm12, %v7826_v39, %v7827_v49  ;;  %v4082_v0 = vsel %vm2897_vm12, %v7827_v49, %v7866_v54 }
 0x60b   :  { %7292 = vmatmul.msk.f32.vlgmr.msrb.gmra.mxu1 %vm197_vm0, %v9057_v14  ;;  %7293 = vmatmul.msk.f32.vlgmr.msrb.gmra.mxu2 %vm197_vm0, %v9115_v4  ;;  %v3948_v14 = vsel %vm2764_vm2, %v7781_v53, %v7782_v19  ;;  %v7875_v53 = vpop.permute.xlu1 %7874 }
 0x60c   :  { %7294 = vmatmul.msk.f32.vlgmr.msra.gmra.mxu3 %vm197_vm0, %v9115_v4  ;;  %7295 = vmatmul.msk.f32.vlgmr.msra.gmra.mxu0 %vm197_vm0, %v9115_v4 }
 0x60d   :  { %3885 = vmatpush.msrb.mxu1 %v3819_v24  ;;  %3905 = vmatpush.msrb.mxu2 %v3820_v25  ;;  %v4214_v24 = vsel %vm3030_vm13, %v7871_v48, %v7872_v47 }
 0x60e   :  { %3925 = vmatpush.msra.mxu3 %v3821_v7  ;;  %3976 = vmatpush.msra.mxu0 %v3948_v14  ;;  %v7830_v55 = vpop.permute.xlu0 %7829  ;;  %v7800_v14 = vpop.permute.xlu2 %7799 }
 0x60f   :  { %v7832_v2 = vunpack.i.h.bf16 %v7830_v55  ;;  %v7831_v3 = vunpack.i.l.bf16 %v7830_v55  ;;  %v7802_v35 = vunpack.i.h.bf16 %v7800_v14  ;;  %v7801_v18 = vunpack.i.l.bf16 %v7800_v14 }
 0x611   :  { %v4211_v10 = vsel %vm3030_vm13, %v7792_v1, %v7831_v3  ;;  %v4212_v11 = vsel %vm3030_vm13, %v7831_v3, %v7832_v2  ;;  %v4213_v22 = vsel %vm3030_vm13, %v7832_v2, %v7871_v48 }
 0x613   :  { %7296 = vmatmul.msk.f32.vlgmr.msra.gmra.mxu1 %vm197_vm0, %v9115_v4  ;;  %7297 = vmatmul.msk.f32.vlgmr.msra.gmra.mxu2 %vm197_vm0, %v9115_v4  ;;  %v7787_v4 = vunpack.i.h.bf16 %v7785_v29  ;;  %v7880_v37 = vpop.permute.xlu1 %7879 }
 0x614   :  { %7298 = vmatmul.msk.f32.vlgmr.msrb.gmra.mxu3 %vm197_vm0, %v9135_v15  ;;  %7299 = vmatmul.msk.f32.vlgmr.msrb.gmra.mxu0 %vm197_vm0, %v9135_v15 }
 0x615   :  { %3996 = vmatpush.msra.mxu1 %v3949_v27  ;;  %4016 = vmatpush.msra.mxu2 %v3950_v34  ;;  %v4079_v57 = vsel %vm2897_vm12, %v7786_v38, %v7787_v4  ;;  %v4080_v58 = vsel %vm2897_vm12, %v7787_v4, %v7826_v39  ;;  %v7877_v27 = vunpack.i.h.bf16 %v7875_v53  ;;  %v7876_v34 = vunpack.i.l.bf16 %v7875_v53 }
 0x616   :  { %4036 = vmatpush.msrb.mxu3 %v3951_v28  ;;  %4056 = vmatpush.msrb.mxu0 %v3952_v36  ;;  %v7835_v59 = vpop.permute.xlu0 %7834 }
 0x617   :  { %v7836_v19 = vunpack.i.l.bf16 %v7835_v59  ;;  %v7837_v33 = vunpack.i.h.bf16 %v7835_v59  ;;  %v4345_v39 = vsel %vm3163_vm5, %v7876_v34, %v7877_v27 }
 0x618   :  { %v9321_v52 = vpop.f32.mrf.mxu1  ;;  %v9323_v50 = vpop.f32.mrf.mxu0 }
 0x619   :  { %v4343_v4 = vsel %vm3163_vm5, %v7836_v19, %v7837_v33  ;;  %v4344_v38 = vsel %vm3163_vm5, %v7837_v33, %v7876_v34  ;;  %v8005_v33 = vld [vmem:[#allocation5 + $0x50] sm:$0xff] }
 0x61b   :  { %7300 = vmatmul.msk.f32.vlgmr.msrb.gmra.mxu1 %vm197_vm0, %v9135_v15  ;;  %7301 = vmatmul.msk.f32.vlgmr.msrb.gmra.mxu2 %vm197_vm0, %v9135_v15  ;;  %v7925_v3 = vpop.permute.xlu1 %7924 }
 0x61c   :  { %7302 = vmatmul.msk.f32.vlgmr.msra.gmra.mxu3 %vm197_vm0, %v9135_v15  ;;  %7303 = vmatmul.msk.f32.vlgmr.msra.gmra.mxu0 %vm197_vm0, %v9155_v31  ;;  %v7927_v59 = vunpack.i.h.bf16 %v7925_v3 }
 0x61d   :  { %4107 = vmatpush.msrb.mxu1 %v4079_v57  ;;  %4127 = vmatpush.msrb.mxu2 %v4080_v58  ;;  %v7882_v58 = vunpack.i.h.bf16 %v7880_v37 }
 0x61e   :  { %4147 = vmatpush.msra.mxu3 %v4081_v62  ;;  %4167 = vmatpush.msra.mxu0 %v4082_v0  ;;  %v7840_v36 = vpop.permute.xlu0 %7839  ;;  %v7881_v62 = vunpack.i.l.bf16 %v7880_v37 }
 0x61f   :  { %v7842_v54 = vunpack.i.h.bf16 %v7840_v36  ;;  %v7841_v55 = vunpack.i.l.bf16 %v7840_v36  ;;  %v4612_v36 = vld [vmem:[#allocation20 + $0x8] sm:$0xff] }
 0x620   :  { %v9337_v15 = vpop.f32.mrf.mxu1  ;;  %v4476_v2 = vsel %vm3296_vm6, %v7881_v62, %v7882_v58 }
 0x621   :  { %v9339_v6 = vpop.f32.mrf.mxu0  ;;  %v4473_v1 = vsel %vm3296_vm6, %v7802_v35, %v7841_v55  ;;  %v4474_v5 = vsel %vm3296_vm6, %v7841_v55, %v7842_v54  ;;  %v4475_v56 = vsel %vm3296_vm6, %v7842_v54, %v7881_v62 }
 0x623   :  { %7304 = vmatmul.msk.f32.vlgmr.msra.gmra.mxu1 %vm197_vm0, %v9155_v31  ;;  %7305 = vmatmul.msk.f32.vlgmr.msra.gmra.mxu2 %vm197_vm0, %v9155_v31 }
 0x624   :  { %7306 = vmatmul.msk.f32.vlgmr.msrb.gmra.mxu3 %vm197_vm0, %v9155_v31  ;;  %7307 = vmatmul.msk.f32.vlgmr.msrb.gmra.mxu0 %vm197_vm0, %v9155_v31  ;;  %v7797_v31 = vunpack.i.h.bf16 %v7795_v8 }
 0x625   :  { %4187 = vmatpush.msra.mxu1 %v4083_v45  ;;  %4238 = vmatpush.msra.mxu2 %v4210_v9  ;;  %v7930_v45 = vpop.permute.xlu2 %7929 }
 0x626   :  { %4258 = vmatpush.msrb.mxu3 %v4211_v10  ;;  %4278 = vmatpush.msrb.mxu0 %v4212_v11  ;;  %v9353_v12 = vpop.f32.mrf.mxu2  ;;  %v4341_v25 = vsel %vm3163_vm5, %v7796_v16, %v7797_v31  ;;  %v4342_v7 = vsel %vm3163_vm5, %v7797_v31, %v7836_v19  ;;  %v7885_v43 = vpop.permute.xlu0 %7884  ;;  %v7931_v48 = vunpack.i.l.bf16 %v7930_v45 }
 0x627   :  { %v2379_v46 = vpop.f32.mrf.mxu3  ;;  %v7887_v9 = vunpack.i.h.bf16 %v7885_v43  ;;  %v7886_v10 = vunpack.i.l.bf16 %v7885_v43  ;;  %v4606_v43 = vld [vmem:[#allocation20] sm:$0xff] }
 0x628   :  { %v9355_v13 = vpop.f32.mrf.mxu1  ;;  %v4635_v53 = vsel %vm771_vm15, %v7927_v59, %v7931_v48 }
 0x629   :  { %v2482_v20 = vpop.f32.mrf.mxu0  ;;  %v4632_v31 = vsel %vm771_vm15, %v7886_v10, %v7887_v9 }
 0x62a   :  { %v9357_v21 = vadd.f32 %v2482_v20, %v2379_v46  ;;  %v7926_v46 = vunpack.i.l.bf16 %v7925_v3 }
 0x62b   :  { %7308 = vmatmul.msk.f32.vlgmr.msrb.gmra.mxu1 %vm197_vm0, %v9175_v40  ;;  %7309 = vmatmul.msk.f32.vlgmr.msrb.gmra.mxu2 %vm197_vm0, %v9175_v40 }
 0x62c   :  { %7310 = vmatmul.msk.f32.vlgmr.msra.gmra.mxu3 %vm197_vm0, %v9175_v40  ;;  %7311 = vmatmul.msk.f32.vlgmr.msra.gmra.mxu0 %vm197_vm0, %v9175_v40  ;;  %v4633_v16 = vsel %vm771_vm15, %v7887_v9, %v7926_v46  ;;  %v4634_v19 = vsel %vm771_vm15, %v7926_v46, %v7927_v59 }
 0x62d   :  { %4298 = vmatpush.msrb.mxu1 %v4213_v22  ;;  %4318 = vmatpush.msrb.mxu2 %v4214_v24  ;;  %v7940_v37 = vpop.permute.xlu2 %7939 }
 0x62e   :  { %4369 = vmatpush.msra.mxu3 %v4341_v25  ;;  %4389 = vmatpush.msra.mxu0 %v4342_v7  ;;  %v9371_v29 = vpop.f32.mrf.mxu2  ;;  %v7890_v7 = vpop.permute.xlu0 %7889 }
 0x62f   :  { %v9373_v23 = vpop.f32.mrf.mxu3 }
 0x630   :  { %v9375_v17 = vpop.f32.mrf.mxu1 }
 0x631   :  { %v9377_v28 = vpop.f32.mrf.mxu0 }
 0x633   :  { %7312 = vmatmul.msk.f32.vlgmr.msra.gmra.mxu1 %vm197_vm0, %v9175_v40  ;;  %7313 = vmatmul.msk.f32.vlgmr.msra.gmra.mxu2 %vm197_vm0, %v9213_v61  ;;  %v4472_v40 = vsel %vm3296_vm6, %v7801_v18, %v7802_v35  ;;  %v7935_v35 = vpop.permute.xlu1 %7934 }
 0x634   :  { %7314 = vmatmul.msk.f32.vlgmr.msrb.gmra.mxu3 %vm197_vm0, %v9213_v61  ;;  %7315 = vmatmul.msk.f32.vlgmr.msrb.gmra.mxu0 %vm197_vm0, %v9213_v61  ;;  %v7937_v62 = vunpack.i.h.bf16 %v7935_v35 }
 0x635   :  { %4409 = vmatpush.msra.mxu1 %v4343_v4  ;;  %4429 = vmatpush.msra.mxu2 %v4344_v38  ;;  %v7892_v4 = vunpack.i.h.bf16 %v7890_v7  ;;  %v7950_v10 = vpop.permute.xlu2 %7949 }
 0x636   :  { %4449 = vmatpush.msrb.mxu3 %v4345_v39  ;;  %4500 = vmatpush.msrb.mxu0 %v4472_v40  ;;  %v9391_v49 = vpop.f32.mrf.mxu2  ;;  %v7936_v39 = vunpack.i.l.bf16 %v7935_v35  ;;  %v7895_v54 = vpop.permute.xlu0 %7894 }
 0x637   :  { %v9393_v51 = vpop.f32.mrf.mxu3  ;;  %v7896_v3 = vunpack.i.l.bf16 %v7895_v54 }
 0x638   :  { %v9395_v57 = vpop.f32.mrf.mxu1  ;;  %v4862_v40 = vsel %vm958_vm14, %v7892_v4, %v7936_v39  ;;  %v4863_v46 = vsel %vm958_vm14, %v7936_v39, %v7937_v62 }
 0x639   :  { %v9397_v0 = vpop.f32.mrf.mxu0 }
 0x63b   :  { %7316 = vmatmul.msk.f32.vlgmr.msrb.gmra.mxu1 %vm197_vm0, %v9213_v61  ;;  %7317 = vmatmul.msk.f32.vlgmr.msrb.gmra.mxu2 %vm197_vm0, %v9213_v61 }
 0x63c   :  { %7318 = vmatmul.msk.f32.vlgmr.msra.gmra.mxu3 %vm197_vm0, %v9231_v26  ;;  %7319 = vmatmul.msk.f32.vlgmr.msra.gmra.mxu0 %vm197_vm0, %v9231_v26 }
 0x63d   :  { %4520 = vmatpush.msrb.mxu1 %v4473_v1  ;;  %4540 = vmatpush.msrb.mxu2 %v4474_v5  ;;  %v7945_v1 = vpop.permute.xlu1 %7944 }
 0x63e   :  { %4560 = vmatpush.msra.mxu3 %v4475_v56  ;;  %4580 = vmatpush.msra.mxu0 %v4476_v2  ;;  %v9411_v61 = vpop.f32.mrf.mxu2  ;;  %v7942_v56 = vunpack.i.h.bf16 %v7940_v37  ;;  %v7897_v2 = vunpack.i.h.bf16 %v7895_v54 }
 0x63f   :  { %v9413_v8 = vpop.f32.mrf.mxu3 }
 0x640   :  { %v9415_v11 = vpop.f32.mrf.mxu1 }
 0x641   :  { %v9417_v47 = vpop.f32.mrf.mxu0 }
 0x643   :  { %7320 = vmatmul.msk.f32.vlgmr.msra.gmra.mxu1 %vm197_vm0, %v9231_v26  ;;  %7321 = vmatmul.msk.f32.vlgmr.msra.gmra.mxu2 %vm197_vm0, %v9231_v26 }
 0x644   :  { %7322 = vmatmul.msk.f32.vlgmr.msrb.gmra.mxu3 %vm197_vm0, %v9231_v26  ;;  %7323 = vmatmul.msk.f32.vlgmr.msrb.gmra.mxu0 %vm197_vm0, %v9247_v42  ;;  %v7932_v26 = vunpack.i.h.bf16 %v7930_v45  ;;  %v2423_v45 = vadd.f32 %v9355_v13, %v9323_v50  ;;  %v4992_v13 = vsel %vm2631_vm11, %v7896_v3, %v7897_v2 }
 0x645   :  { %4660 = vmatpush.msra.mxu1 %v4632_v31  ;;  %4680 = vmatpush.msra.mxu2 %v4633_v16  ;;  %v7952_v31 = vunpack.i.h.bf16 %v7950_v10 }
 0x646   :  { %4700 = vmatpush.msrb.mxu3 %v4634_v19  ;;  %4720 = vmatpush.msrb.mxu0 %v4635_v53  ;;  %v9431_v20 = vpop.f32.mrf.mxu2  ;;  %v4636_v14 = vsel %vm771_vm15, %v7931_v48, %v7932_v26  ;;  %v2613_v59 = vadd.f32 %v9391_v49, %v2423_v45  ;;  %v7951_v19 = vunpack.i.l.bf16 %v7950_v10  ;;  %v7947_v53 = vunpack.i.h.bf16 %v7945_v1 }
 0x647   :  { %v9433_v22 = vpop.f32.mrf.mxu3  ;;  %v7946_v26 = vunpack.i.l.bf16 %v7945_v1  ;;  %v2616_v10 = vadd.f32 %v9395_v57, %v9357_v21  ;;  %vm5854_vm15 = vcmask 1040384  }
 0x648   :  { %v9435_v24 = vpop.f32.mrf.mxu1  ;;  %v2746_v16 = vadd.f32 %v9413_v8, %v2613_v59  ;;  %v7955_v8 = vpop.permute.xlu1 %7954 }
 0x649   :  { %v9437_v25 = vpop.f32.mrf.mxu0 }
 0x64a   :  { %v2879_v39 = vadd.f32 %v9417_v47, %v2746_v16  ;;  %v7957_v47 = vunpack.i.h.bf16 %v7955_v8 }
 0x64b   :  { %7324 = vmatmul.msk.f32.vlgmr.msrb.gmra.mxu1 %vm197_vm0, %v9247_v42  ;;  %7325 = vmatmul.msk.f32.vlgmr.msrb.gmra.mxu2 %vm197_vm0, %v9247_v42 }
 0x64c   :  { %7326 = vmatmul.msk.f32.vlgmr.msra.gmra.mxu3 %vm197_vm0, %v9247_v42  ;;  %7327 = vmatmul.msk.f32.vlgmr.msra.gmra.mxu0 %vm197_vm0, %v9247_v42  ;;  %v7891_v42 = vunpack.i.l.bf16 %v7890_v7  ;;  %v2443_v7 = vadd.f32 %v9371_v29, %v9337_v15  ;;  %v4994_v15 = vsel %vm2631_vm11, %v7946_v26, %v7947_v53 }
 0x64d   :  { %4740 = vmatpush.msrb.mxu1 %v4636_v14  ;;  %4763 = vmatpush.msrb.mxu2 %v8005_v33  ;;  %v2403_v33 = vadd.f32 %v9339_v6, %v9321_v52  ;;  %v4995_v52 = vsel %vm2631_vm11, %v7947_v53, %v7951_v19  ;;  %v4996_v6 = vsel %vm2631_vm11, %v7951_v19, %v7952_v31 }
 0x64e   :  { %4783 = vmatpush.msra.mxu3 %v9093_v44  ;;  %4803 = vmatpush.msra.mxu0 %v9072_v32  ;;  %v9450_v18 = vpop.f32.mrf.mxu2  ;;  %v8006_v32 = vld [vmem:[#allocation5 + $0x70] sm:$0xff]  ;;  %v4861_v44 = vsel %vm958_vm14, %v7891_v42, %v7892_v4  ;;  %v4848_v4 = vld [vmem:[#allocation20 + $0x10] sm:$0xff] }
 0x64f   :  { %v9452_v27 = vpop.f32.mrf.mxu3  ;;  %v2612_v42 = vadd.f32 %v9375_v17, %v2403_v33  ;;  %v4993_v17 = vsel %vm2631_vm11, %v7897_v2, %v7946_v26  ;;  %v7960_v2 = vpop.permute.xlu2 %7959  ;;  %vm7033_vm11 = vcmask 171008  }
 0x650   :  { %v9454_v34 = vpop.f32.mrf.mxu1 }
 0x651   :  { %v9456_v38 = vpop.f32.mrf.mxu0  ;;  %v2745_v29 = vadd.f32 %v9411_v61, %v2612_v42 }
 0x653   :  { %7328 = vmatmul.msk.f32.vlgmr.msra.gmra.mxu1 %vm197_vm0, %v4612_v36  ;;  %7329 = vmatmul.msk.f32.vlgmr.msra.gmra.mxu2 %vm197_vm0, %v4612_v36  ;;  %v2878_v61 = vadd.f32 %v9433_v22, %v2745_v29 }
 0x654   :  { %7330 = vmatmul.msk.f32.vlgmr.msrb.gmra.mxu3 %vm197_vm0, %v4612_v36  ;;  %7331 = vmatmul.msk.f32.vlgmr.msrb.gmra.mxu0 %vm197_vm0, %v4612_v36 }
 0x655   :  { %4823 = vmatpush.msra.mxu1 %v9061_v30  ;;  %4843 = vmatpush.msra.mxu2 %v8006_v32  ;;  %v7941_v30 = vunpack.i.l.bf16 %v7940_v37  ;;  %v2614_v37 = vadd.f32 %v9393_v51, %v2443_v7  ;;  %v3012_v51 = vadd.f32 %v9454_v34, %v2879_v39  ;;  %v3011_v22 = vadd.f32 %v9437_v25, %v2878_v61 }
 0x656   :  { %4889 = vmatpush.msrb.mxu3 %v4861_v44  ;;  %4909 = vmatpush.msrb.mxu0 %v4862_v40  ;;  %v9465_v55 = vpop.f32.mrf.mxu2  ;;  %v7956_v44 = vunpack.i.l.bf16 %v7955_v8  ;;  %v2463_v40 = vadd.f32 %v9373_v23, %v9353_v12 }
 0x657   :  { %v9467_v58 = vpop.f32.mrf.mxu3  ;;  %v4864_v48 = vsel %vm958_vm14, %v7937_v62, %v7941_v30  ;;  %v4865_v50 = vsel %vm958_vm14, %v7941_v30, %v7942_v56  ;;  %v2747_v54 = vadd.f32 %v9397_v0, %v2614_v37  ;;  %v4979_v0 = vld [vmem:[#allocation20 + $0x18] sm:$0xff]  ;;  %vm5787_vm14 = vcmask 229376  }
 0x658   :  { %v9469_v5 = vpop.f32.mrf.mxu1  ;;  %v2615_v12 = vadd.f32 %v9377_v28, %v2463_v40  ;;  %v2749_v28 = vadd.f32 %v9431_v20, %v2616_v10 }
 0x659   :  { %v9473_v9 = vpop.f32.mrf.mxu0  ;;  %v2880_v56 = vadd.f32 %v9435_v24, %v2747_v54  ;;  %v7961_v24 = vunpack.i.l.bf16 %v7960_v2  ;;  %v3144_v21 = vadd.f32 %v9469_v5, %v3011_v22 }
 0x65a   :  { %v2882_v20 = vadd.f32 %v9452_v27, %v2749_v28 }
 0x65b   :  { %7332 = vmatmul.msk.f32.vlgmr.msrb.gmra.mxu1 %vm197_vm0, %v4612_v36  ;;  %7333 = vmatmul.msk.f32.vlgmr.msrb.gmra.mxu2 %vm197_vm0, %v4606_v43  ;;  %v7900_v36 = vpop.permute.xlu0 %7899  ;;  %v3013_v23 = vadd.f32 %v9465_v55, %v2880_v56  ;;  %v5126_v55 = vsel %vm2764_vm2, %v7957_v47, %v7961_v24 }
 0x65c   :  { %7334 = vmatmul.msk.f32.vlgmr.msra.gmra.mxu3 %vm197_vm0, %v4606_v43  ;;  %7335 = vmatmul.msk.f32.vlgmr.msra.gmra.mxu0 %vm197_vm0, %v4606_v43  ;;  %v7902_v62 = vunpack.i.h.bf16 %v7900_v36  ;;  %v7901_v1 = vunpack.i.l.bf16 %v7900_v36  ;;  %v3015_v27 = vadd.f32 %v9456_v38, %v2882_v20 }
 0x65d   :  { %4929 = vmatpush.msrb.mxu1 %v4863_v46  ;;  %4949 = vmatpush.msrb.mxu2 %v4864_v48  ;;  %v5125_v48 = vsel %vm2764_vm2, %v7956_v44, %v7957_v47 }
 0x65e   :  { %4969 = vmatpush.msra.mxu3 %v4865_v50  ;;  %5020 = vmatpush.msra.mxu0 %v4992_v13  ;;  %v3081_v49 = vpop.f32.mrf.mxu2  ;;  %v5123_v46 = vsel %vm2764_vm2, %v7901_v1, %v7902_v62  ;;  %v2748_v13 = vadd.f32 %v9415_v11, %v2615_v12  ;;  %v5124_v57 = vsel %vm2764_vm2, %v7902_v62, %v7956_v44 }
 0x65f   :  { %v3101_v14 = vpop.f32.mrf.mxu3  ;;  %v3145_v34 = vadd.f32 %v3081_v49, %v3012_v51  ;;  %v9527_v49 = vpop.permute.xlu1 %7964 }
 0x660   :  { %v9489_v35 = vpop.f32.mrf.mxu1  ;;  %v3146_v31 = vadd.f32 %v3101_v14, %v3013_v23  ;;  %v2881_v25 = vadd.f32 %v9450_v18, %v2748_v13  ;;  %v7962_v18 = vunpack.i.h.bf16 %v7960_v2  ;;  %v7966_v8 = vunpack.i.l.bf16 %v9527_v49 }
 0x661   :  { %v3234_v32 = vpop.f32.mrf.mxu0 }
 0x662   :  { %v3014_v53 = vadd.f32 %v9467_v58, %v2881_v25  ;;  %v3279_v26 = vadd.f32 %v3234_v32, %v3146_v31  ;;  %v7970_v58 = vpop.permute.xlu2 %7969  ;;  %v5127_v38 = vsel %vm2764_vm2, %v7961_v24, %v7962_v18  ;;  %v5241_v18 = vld [vmem:[#allocation20 + $0x28] sm:$0xff]  ;;  %vm10871_vm2 = vcmask 138240  }
 0x663   :  { %7336 = vmatmul.msk.f32.vlgmr.msra.gmra.mxu1 %vm197_vm0, %v4606_v43  ;;  %7337 = vmatmul.msk.f32.vlgmr.msra.gmra.mxu2 %vm197_vm0, %v4606_v43  ;;  %v7905_v50 = vpop.permute.xlu0 %7904  ;;  %v7971_v56 = vunpack.i.l.bf16 %v7970_v58 }
 0x664   :  { %7338 = vmatmul.msk.f32.vlgmr.msrb.gmra.mxu3 %vm197_vm0, %v4848_v4  ;;  %7339 = vmatmul.msk.f32.vlgmr.msrb.gmra.mxu0 %vm197_vm0, %v4848_v4  ;;  %v7907_v14 = vunpack.i.h.bf16 %v7905_v50  ;;  %v7906_v33 = vunpack.i.l.bf16 %v7905_v50  ;;  %v3147_v32 = vadd.f32 %v9473_v9, %v3014_v53 }
 0x665   :  { %5040 = vmatpush.msra.mxu1 %v4993_v17  ;;  %5060 = vmatpush.msra.mxu2 %v4994_v15 }
 0x666   :  { %5080 = vmatpush.msrb.mxu3 %v4995_v52  ;;  %5100 = vmatpush.msrb.mxu0 %v4996_v6  ;;  %v3194_v43 = vpop.f32.mrf.mxu2  ;;  %v3148_v6 = vadd.f32 %v9489_v35, %v3015_v27  ;;  %v5254_v29 = vsel %vm2897_vm12, %v7906_v33, %v7907_v14  ;;  %v5255_v9 = vsel %vm2897_vm12, %v7907_v14, %v7966_v8 }
 0x667   :  { %v3214_v30 = vpop.f32.mrf.mxu3  ;;  %v3277_v19 = vadd.f32 %v3194_v43, %v3144_v21  ;;  %v7972_v43 = vunpack.i.h.bf16 %v7970_v58 }
 0x668   :  { %v3278_v3 = vadd.f32 %v3214_v30, %v3145_v34  ;;  %v3254_v45 = vpop.f32.mrf.mxu1 }
 0x669   :  { %v3347_v59 = vpop.f32.mrf.mxu0  ;;  %v3280_v17 = vadd.f32 %v3254_v45, %v3147_v32  ;;  %v5258_v28 = vsel %vm2897_vm12, %v7971_v56, %v7972_v43 }
 0x66a   :  { %v3411_v16 = vadd.f32 %v3347_v59, %v3278_v3  ;;  %v9552_v3 = vpop.permute.xlu1 %7974 }
 0x66b   :  { %7340 = vmatmul.msk.f32.vlgmr.msrb.gmra.mxu1 %vm197_vm0, %v4848_v4  ;;  %7341 = vmatmul.msk.f32.vlgmr.msrb.gmra.mxu2 %vm197_vm0, %v4848_v4  ;;  %v7910_v51 = vpop.permute.xlu0 %7909  ;;  %v7976_v50 = vunpack.i.l.bf16 %v9552_v3  ;;  %v7977_v53 = vunpack.i.h.bf16 %v9552_v3 }
 0x66c   :  { %7342 = vmatmul.msk.f32.vlgmr.msra.gmra.mxu3 %vm197_vm0, %v4848_v4  ;;  %7343 = vmatmul.msk.f32.vlgmr.msra.gmra.mxu0 %vm197_vm0, %v4979_v0  ;;  %v3422_v11 = vadd.f32 %v8893_v60, %v3411_v16  ;;  %v7967_v4 = vunpack.i.h.bf16 %v9527_v49  ;;  %v7912_v10 = vunpack.i.h.bf16 %v7910_v51  ;;  %v7911_v22 = vunpack.i.l.bf16 %v7910_v51 }
 0x66d   :  { %5151 = vmatpush.msrb.mxu1 %v5123_v46  ;;  %5171 = vmatpush.msrb.mxu2 %v5124_v57  ;;  %v5387_v27 = vsel %vm3030_vm13, %v7976_v50, %v7977_v53 }
 0x66e   :  { %5191 = vmatpush.msra.mxu3 %v5125_v48  ;;  %5211 = vmatpush.msra.mxu0 %v5126_v55  ;;  %v3274_v5 = vpop.f32.mrf.mxu2  ;;  %3427 = vst [vmem:[#allocation6] sm:$0xff] %v3422_v11  ;;  %v5256_v35 = vsel %vm2897_vm12, %v7966_v8, %v7967_v4  ;;  %v5257_v16 = vsel %vm2897_vm12, %v7967_v4, %v7971_v56  ;;  %vm10872_vm12 = vmmov %vm10871_vm2 }
 0x66f   :  { %v3327_v7 = vpop.f32.mrf.mxu3  ;;  %v3281_v47 = vadd.f32 %v3274_v5, %v3148_v6  ;;  %v5385_v25 = vsel %vm3030_vm13, %v7911_v22, %v7912_v10  ;;  %v5386_v11 = vsel %vm3030_vm13, %v7912_v10, %v7976_v50 }
 0x670   :  { %v3410_v36 = vadd.f32 %v3327_v7, %v3277_v19  ;;  %v3367_v37 = vpop.f32.mrf.mxu1 }
 0x671   :  { %v3412_v42 = vadd.f32 %v3367_v37, %v3279_v26  ;;  %v9535_v15 = vpop.f32.mrf.mxu0 }
 0x672   :  { %v3421_v39 = vadd.f32 %v8893_v60, %v3410_v36 }
 0x673   :  { %v3423_v52 = vadd.f32 %v8893_v60, %v3412_v42  ;;  %7344 = vmatmul.msk.f32.vlgmr.msra.gmra.mxu1 %vm197_vm0, %v4979_v0  ;;  %7345 = vmatmul.msk.f32.vlgmr.msra.gmra.mxu2 %vm197_vm0, %v4979_v0  ;;  %v9579_v49 = vpop.permute.xlu0 %7914  ;;  %v7985_v42 = vpop.permute.xlu1 %7984 }
 0x674   :  { %3426 = vst [vmem:[#allocation6 + $0x30] sm:$0xff] %v3421_v39  ;;  %7346 = vmatmul.msk.f32.vlgmr.msrb.gmra.mxu3 %vm197_vm0, %v4979_v0  ;;  %7347 = vmatmul.msk.f32.vlgmr.msrb.gmra.mxu0 %vm197_vm0, %v4979_v0  ;;  %v5110_v0 = vld [vmem:[#allocation20 + $0x20] sm:$0xff]  ;;  %v7917_v36 = vunpack.i.h.bf16 %v9579_v49  ;;  %v7916_v37 = vunpack.i.l.bf16 %v9579_v49  ;;  %v5503_v49 = vld [vmem:[#allocation20 + $0x38] sm:$0xff] }
 0x675   :  { %3428 = vst [vmem:[#allocation6 + $0x58] sm:$0xff] %v3423_v52  ;;  %5231 = vmatpush.msra.mxu1 %v5127_v38  ;;  %5282 = vmatpush.msra.mxu2 %v5254_v29  ;;  %v5887_v40 = vld [vmem:[#allocation6] sm:$0x7] }
 0x676   :  { %5302 = vmatpush.msrb.mxu3 %v5255_v9  ;;  %5322 = vmatpush.msrb.mxu0 %v5256_v35  ;;  %v3387_v44 = vpop.f32.mrf.mxu2  ;;  %v5891_v1 = vperm.slane %v5887_v40, 0  ;;  %v5890_v61 = vrot.slane %v5887_v40, 2  ;;  %v5889_v34 = vrot.slane %v5887_v40, 1  ;;  %v5906_v48 = vld [vmem:[#allocation6] sm:$0x7]  ;;  %v5516_v6 = vsel %vm3163_vm5, %v7916_v37, %v7917_v36 }
 0x677   :  { %v3413_v54 = vadd.f32 %v3387_v44, %v3280_v17  ;;  %v3407_v62 = vpop.f32.mrf.mxu3  ;;  %v5909_v21 = vrot.slane %v5906_v48, 2  ;;  %v5908_v57 = vrot.slane %v5906_v48, 1  ;;  %v5910_v19 = vperm.slane %v5906_v48, 0  ;;  %v5925_v8 = vld [vmem:[#allocation6] sm:$0x7] }
 0x678   :  { %v3414_v30 = vadd.f32 %v3407_v62, %v3281_v47  ;;  %v9550_v2 = vpop.f32.mrf.mxu1  ;;  %5894 = vrot.lane.b32.xlu2 %v5891_v1, %s8319_s26  ;;  %v5893_v12 = vperm.slane %v5890_v61, 0  ;;  %v5892_v23 = vperm.slane %v5889_v34, 0  ;;  %v5928_v58 = vrot.slane %v5925_v8, 2  ;;  %v5372_v34 = vld [vmem:[#allocation20 + $0x30] sm:$0xff] }
 0x679   :  { %v3424_v45 = vadd.f32 %v8893_v60, %v3413_v54  ;;  %v9556_v46 = vpop.f32.mrf.mxu0  ;;  %v5912_v26 = vperm.slane %v5909_v21, 0  ;;  %v5911_v7 = vperm.slane %v5908_v57, 0  ;;  %v5927_v32 = vrot.slane %v5925_v8, 1  ;;  %v5850_v54 = vld [vmem:[#allocation6] sm:$0x7] }
 0x67a   :  { %v3425_v59 = vadd.f32 %v8893_v60, %v3414_v30  ;;  %5898 = vrot.lane.b32.xlu1 %v5893_v12, %s8319_s26  ;;  %5896 = vrot.lane.b32.xlu0 %v5892_v23, %s8319_s26  ;;  %v7980_v60 = vpop.permute.xlu2 %7979  ;;  %v5929_v17 = vperm.slane %v5925_v8, 0  ;;  %v7987_v35 = vunpack.i.h.bf16 %v7985_v42  ;;  %v7986_v47 = vunpack.i.l.bf16 %v7985_v42  ;;  %s8340_s26 = smov 125  }
 0x67b   :  { %v5781_v24 = vld [vmem:[#allocation6 + $0x30] sm:$0x7]  ;;  %3429 = vst [vmem:[#allocation6 + $0x18] sm:$0xff] %v3424_v45  ;;  %7348 = vmatmul.msk.f32.vlgmr.msrb.gmra.mxu1 %vm197_vm0, %v5110_v0  ;;  %7349 = vmatmul.msk.f32.vlgmr.msrb.gmra.mxu2 %vm197_vm0, %v5110_v0  ;;  %v7982_v14 = vunpack.i.h.bf16 %v7980_v60  ;;  %v7981_v33 = vunpack.i.l.bf16 %v7980_v60  ;;  %v5931_v44 = vperm.slane %v5928_v58, 0  ;;  %v5930_v40 = vperm.slane %v5927_v32, 0  ;;  %v7920_v12 = vpop.permute.xlu0 %7919  ;;  %v7995_v48 = vpop.permute.xlu1 %7994 }
 0x67c   :  { %v5783_v13 = vrot.slane %v5781_v24, 1  ;;  %v5784_v31 = vrot.slane %v5781_v24, 2  ;;  %5788 = vst.msk [vmem:[%s10869_s11] sm:$0x1] %vm5787_vm14, %v5781_v24  ;;  %7350 = vmatmul.msk.f32.vlgmr.msra.gmra.mxu3 %vm197_vm0, %v5110_v0  ;;  %7351 = vmatmul.msk.f32.vlgmr.msra.gmra.mxu0 %vm197_vm0, %v5110_v0  ;;  %v9613_v43 = vld [vmem:[#allocation6 + $0x30] sm:$0x7]  ;;  %v5517_v3 = vsel %vm3163_vm5, %v7917_v36, %v7986_v47  ;;  %v5518_v45 = vsel %vm3163_vm5, %v7986_v47, %v7987_v35 }
 0x67d   :  { %3430 = vst [vmem:[#allocation6 + $0x50] sm:$0xff] %v3425_v59  ;;  %5342 = vmatpush.msrb.mxu1 %v5257_v16  ;;  %5362 = vmatpush.msrb.mxu2 %v5258_v28  ;;  %v5388_v39 = vsel %vm3030_vm13, %v7977_v53, %v7981_v33  ;;  %v5389_v52 = vsel %vm3030_vm13, %v7981_v33, %v7982_v14  ;;  %v9617_v56 = vld [vmem:[#allocation6 + $0x30] sm:$0x7]  ;;  %v9619_v30 = vrot.slane %v5850_v54, 7  ;;  %v7922_v60 = vunpack.i.h.bf16 %v7920_v12 }
 0x67e   :  { %5789 = vst.msk [vmem:[%s10869_s11 + $0x20] sm:$0x1] %vm5787_vm14, %v5783_v13  ;;  %v9577_v55 = vpop.f32.mrf.mxu2  ;;  %5413 = vmatpush.msra.mxu3 %v5385_v25  ;;  %5433 = vmatpush.msra.mxu0 %v5386_v11  ;;  %v9629_v22 = vld [vmem:[#allocation6 + $0x30] sm:$0x7]  ;;  %v5815_v50 = vperm.slane %v9617_v56, 0  ;;  %v7921_v16 = vunpack.i.l.bf16 %v7920_v12  ;;  %v7997_v57 = vunpack.i.h.bf16 %v7995_v48  ;;  %v7996_v25 = vunpack.i.l.bf16 %v7995_v48 }
 0x67f   :  { %5790 = vst.msk [vmem:[%s10869_s11 + $0x40] sm:$0x1] %vm5787_vm14, %v5784_v31  ;;  %v9585_v20 = vpop.f32.mrf.mxu3  ;;  %v5855_v59 = vsel %vm5854_vm15, %v9613_v43, %v9619_v30  ;;  %v5795_v28 = vperm.slane %v9629_v22, 0  ;;  %v5830_v53 = vld [vmem:[#allocation6 + $0x30] sm:$0x7]  ;;  %v5813_v14 = vrot.slane %v9617_v56, 1 }
 0x680   :  { %v9587_v5 = vpop.f32.mrf.mxu1  ;;  %5913 = vrot.lane.b32.xlu2 %v5910_v19, %s8298_s20  ;;  %v5861_v21 = vperm.slane %v5855_v59, 1  ;;  %v5649_v33 = vsel %vm3296_vm6, %v7996_v25, %v7997_v57  ;;  %v5834_v42 = vperm.slane %v5830_v53, 0 }
 0x681   :  { %v9593_v4 = vpop.f32.mrf.mxu0  ;;  %v5816_v32 = vperm.slane %v5813_v14, 0  ;;  %v3591_v48 = vadd.f32 %v9587_v5, %v9535_v15 }
 0x682   :  { %5917 = vrot.lane.b32.xlu1 %v5912_v26, %s8298_s20  ;;  %5915 = vrot.lane.b32.xlu0 %v5911_v7, %s8298_s20  ;;  %v7990_v29 = vpop.permute.xlu2 %7989  ;;  %s8320_s20 = smov 39   ;;  %v5647_v26 = vsel %vm3296_vm6, %v7921_v16, %v7922_v60  ;;  %v5648_v7 = vsel %vm3296_vm6, %v7922_v60, %v7996_v25  ;;  %v9696_v16 = vld [vmem:[#allocation6 + $0x58] sm:$0x7] }
 0x683   :  { %7352 = vmatmul.msk.f32.vlgmr.msra.gmra.mxu1 %vm197_vm0, %v5110_v0  ;;  %7353 = vmatmul.msk.f32.vlgmr.msra.gmra.mxu2 %vm197_vm0, %v5241_v18  ;;  %v7992_v62 = vunpack.i.h.bf16 %v7990_v29  ;;  %v7991_v1 = vunpack.i.l.bf16 %v7990_v29  ;;  %v5814_v29 = vrot.slane %v9617_v56, 2  ;;  %v5793_v56 = vrot.slane %v9629_v22, 1 }
 0x684   :  { %7354 = vmatmul.msk.f32.vlgmr.msrb.gmra.mxu3 %vm197_vm0, %v5241_v18  ;;  %7355 = vmatmul.msk.f32.vlgmr.msrb.gmra.mxu0 %vm197_vm0, %v5241_v18 }
 0x685   :  { %5453 = vmatpush.msra.mxu1 %v5387_v27  ;;  %5473 = vmatpush.msra.mxu2 %v5388_v39  ;;  %v5519_v23 = vsel %vm3163_vm5, %v7987_v35, %v7991_v1  ;;  %v5520_v0 = vsel %vm3163_vm5, %v7991_v1, %v7992_v62  ;;  %v5817_v54 = vperm.slane %v5814_v29, 0  ;;  %v5634_v1 = vld [vmem:[#allocation20 + $0x40] sm:$0xff]  ;;  %vm10873_vm5 = vmmov %vm10871_vm2 }
 0x686   :  { %v9605_v38 = vpop.f32.mrf.mxu2  ;;  %5493 = vmatpush.msrb.mxu3 %v5389_v52  ;;  %5544 = vmatpush.msrb.mxu0 %v5516_v6 }
 0x687   :  { %v9607_v51 = vpop.f32.mrf.mxu3  ;;  %v3611_v5 = vadd.f32 %v9605_v38, %v9550_v2 }
 0x688   :  { %v9609_v9 = vpop.f32.mrf.mxu1  ;;  %5932 = vrot.lane.b32.xlu2 %v5929_v17, %s8320_s20  ;;  %v5832_v17 = vrot.slane %v5830_v53, 1 }
 0x689   :  { %v9611_v61 = vpop.f32.mrf.mxu0 }
 0x68a   :  { %5936 = vrot.lane.b32.xlu1 %v5931_v44, %s8320_s20  ;;  %5934 = vrot.lane.b32.xlu0 %v5930_v40, %s8320_s20  ;;  %v8000_v31 = vpop.permute.xlu2 %7999  ;;  %v5860_v44 = vperm.slane %v5855_v59, 0  ;;  %v5835_v62 = vperm.slane %v5832_v17, 0  ;;  %v5796_v59 = vperm.slane %v5793_v56, 0 }
 0x68b   :  { %7356 = vmatmul.msk.f32.vlgmr.msrb.gmra.mxu1 %vm197_vm0, %v5241_v18  ;;  %7357 = vmatmul.msk.f32.vlgmr.msrb.gmra.mxu2 %vm197_vm0, %v5241_v18  ;;  %v8001_v19 = vunpack.i.l.bf16 %v8000_v31  ;;  %v5794_v18 = vrot.slane %v9629_v22, 2  ;;  %v8002_v39 = vunpack.i.h.bf16 %v8000_v31 }
 0x68c   :  { %7358 = vmatmul.msk.f32.vlgmr.msra.gmra.mxu3 %vm197_vm0, %v5372_v34  ;;  %7359 = vmatmul.msk.f32.vlgmr.msra.gmra.mxu0 %vm197_vm0, %v5372_v34 }
 0x68d   :  { %5564 = vmatpush.msrb.mxu1 %v5517_v3  ;;  %5584 = vmatpush.msrb.mxu2 %v5518_v45  ;;  %v5650_v36 = vsel %vm3296_vm6, %v7997_v57, %v8001_v19  ;;  %v5797_v58 = vperm.slane %v5794_v18, 0  ;;  %v5651_v6 = vsel %vm3296_vm6, %v8001_v19, %v8002_v39  ;;  %v5858_v3 = vsel %vm444_vm4, %v9613_v43, %v9619_v30 }
 0x68e   :  { %v9627_v10 = vpop.f32.mrf.mxu2  ;;  %5604 = vmatpush.msra.mxu3 %v5519_v23  ;;  %5624 = vmatpush.msra.mxu0 %v5520_v0  ;;  %v5833_v45 = vrot.slane %v5830_v53, 2  ;;  %v5859_v12 = vrot.slane %v5858_v3, 2  ;;  %v5983_v57 = vrot.slane %v9696_v16, 1  ;;  %v3631_v18 = vadd.f32 %v9607_v51, %v9577_v55 }
 0x68f   :  { %v9634_v24 = vpop.f32.mrf.mxu3  ;;  %v3799_v15 = vadd.f32 %v9627_v10, %v3591_v48 }
 0x690   :  { %v9637_v13 = vpop.f32.mrf.mxu1  ;;  %5818 = vrot.lane.b32.xlu2 %v5815_v50, %s8313_s1  ;;  %v5836_v22 = vperm.slane %v5833_v45, 0  ;;  %v5864_v31 = vperm.slane %v5859_v12, 0  ;;  %v3800_v10 = vadd.f32 %v9634_v24, %v3611_v5  ;;  %v5986_v38 = vperm.slane %v5983_v57, 0  ;;  %v9757_v57 = vld [vmem:[#allocation6] sm:$0x7] }
 0x691   :  { %v9641_v11 = vpop.f32.mrf.mxu0 }
 0x692   :  { %5798 = vrot.lane.b32.xlu1 %v5795_v28, %s8321_s29  ;;  %5868 = vrot.lane.b32.xlu0 %v5861_v21, %s8316_s23  ;;  %v9701_v28 = vsel %vm441_vm3, %v9613_v43, %v9619_v30  ;;  %v5985_v43 = vperm.slane %v9696_v16, 0  ;;  %v3671_v30 = vadd.f32 %v9609_v9, %v9556_v46  ;;  %v3651_v46 = vadd.f32 %v9593_v4, %v9585_v20 }
 0x693   :  { %7360 = vmatmul.msk.f32.vlgmr.msra.gmra.mxu1 %vm197_vm0, %v5372_v34  ;;  %7361 = vmatmul.msk.f32.vlgmr.msra.gmra.mxu2 %vm197_vm0, %v5372_v34  ;;  %v5857_v21 = vrot.slane %v9701_v28, 1  ;;  %v3931_v14 = vadd.f32 %v9641_v11, %v3800_v10  ;;  %v5865_v4 = vperm.slane %v5859_v12, 1 }
 0x694   :  { %7362 = vmatmul.msk.f32.vlgmr.msrb.gmra.mxu3 %vm197_vm0, %v5372_v34  ;;  %7363 = vmatmul.msk.f32.vlgmr.msrb.gmra.mxu0 %vm197_vm0, %v5503_v49  ;;  %v3802_v51 = vadd.f32 %v9637_v13, %v3651_v46  ;;  %v6076_v46 = vld [vmem:[#allocation6 + $0x18] sm:$0x7] }
 0x695   :  { %5675 = vmatpush.msra.mxu1 %v5647_v26  ;;  %5695 = vmatpush.msra.mxu2 %v5648_v7  ;;  %v5862_v2 = vperm.slane %v5857_v21, 0  ;;  %v9720_v7 = vld [vmem:[#allocation6 + $0x58] sm:$0x7] }
 0x696   :  { %v9655_v37 = vpop.f32.mrf.mxu2  ;;  %5715 = vmatpush.msrb.mxu3 %v5649_v33  ;;  %5735 = vmatpush.msrb.mxu0 %v5650_v36  ;;  %v6002_v33 = vrot.slane %v9720_v7, 1  ;;  %v6004_v55 = vperm.slane %v9720_v7, 0  ;;  %v6003_v5 = vrot.slane %v9720_v7, 2 }
 0x697   :  { %v3847_v8 = vpop.f32.mrf.mxu3  ;;  %v3803_v9 = vadd.f32 %v9655_v37, %v3671_v30 }
 0x698   :  { %v9657_v27 = vpop.f32.mrf.mxu1  ;;  %5837 = vrot.lane.b32.xlu2 %v5834_v42, %s8322_s8  ;;  %v3930_v19 = vadd.f32 %v3847_v8, %v3799_v15  ;;  %v3801_v8 = vadd.f32 %v9611_v61, %v3631_v18  ;;  %v6005_v11 = vperm.slane %v6002_v33, 0  ;;  %v6078_v33 = vrot.slane %v6076_v46, 1 }
 0x699   :  { %v9660_v52 = vpop.f32.mrf.mxu0 }
 0x69a   :  { %5802 = vrot.lane.b32.xlu1 %v5797_v58, %s8321_s29  ;;  %5820 = vrot.lane.b32.xlu0 %v5816_v32, %s8313_s1  ;;  %v4061_v24 = vadd.f32 %v9660_v52, %v3930_v19  ;;  %v9737_v52 = vld [vmem:[#allocation6 + $0x58] sm:$0x7]  ;;  %v3932_v61 = vadd.f32 %v9657_v27, %v3801_v8 }
 0x69b   :  { %7364 = vmatmul.msk.f32.vlgmr.msrb.gmra.mxu1 %vm197_vm0, %v5503_v49  ;;  %7365 = vmatmul.msk.f32.vlgmr.msrb.gmra.mxu2 %vm197_vm0, %v5503_v49  ;;  %v6023_v27 = vperm.slane %v9737_v52, 0 }
 0x69c   :  { %7366 = vmatmul.msk.f32.vlgmr.msra.gmra.mxu3 %vm197_vm0, %v5503_v49  ;;  %7367 = vmatmul.msk.f32.vlgmr.msra.gmra.mxu0 %vm197_vm0, %v5503_v49 }
 0x69d   :  { %5755 = vmatpush.msrb.mxu1 %v5651_v6 }
 0x69e   :  { %v9670_v35 = vpop.f32.mrf.mxu2 }
 0x69f   :  { %v3927_v47 = vpop.f32.mrf.mxu3  ;;  %v3933_v13 = vadd.f32 %v9670_v35, %v3802_v51 }
 0x6a0   :  { %v9672_v40 = vpop.f32.mrf.mxu1  ;;  %5866 = vrot.lane.b32.xlu2 %v5860_v44, %s8316_s23  ;;  %v3934_v39 = vadd.f32 %v3927_v47, %v3803_v9  ;;  %v5984_v47 = vrot.slane %v9696_v16, 2  ;;  %v6021_v44 = vrot.slane %v9737_v52, 1 }
 0x6a1   :  { %v9675_v34 = vpop.f32.mrf.mxu0  ;;  %v4062_v20 = vadd.f32 %v9672_v40, %v3931_v14  ;;  %v6022_v14 = vrot.slane %v9737_v52, 2 }
 0x6a2   :  { %5822 = vrot.lane.b32.xlu1 %v5817_v54, %s8313_s1  ;;  %5839 = vrot.lane.b32.xlu0 %v5835_v62, %s8322_s8  ;;  %s8323_s1 = smov 105   ;;  %v4065_v6 = vadd.f32 %v9675_v34, %v3934_v39  ;;  %v5987_v34 = vperm.slane %v5984_v47, 0 }
 0x6a3   :  { %7368 = vmatmul.msk.f32.vlgmr.msra.gmra.mxu1 %vm197_vm0, %v5634_v1  ;;  %7369 = vmatmul.msk.f32.vlgmr.msra.gmra.mxu2 %vm197_vm0, %v5634_v1 }
 0x6a4   :  { %7370 = vmatmul.msk.f32.vlgmr.msrb.gmra.mxu3 %vm197_vm0, %v5634_v1  ;;  %7371 = vmatmul.msk.f32.vlgmr.msrb.gmra.mxu0 %vm197_vm0, %v5634_v1 }
 0x6a6   :  { %v9687_v23 = vpop.f32.mrf.mxu2 }
 0x6a7   :  { %v9689_v0 = vpop.f32.mrf.mxu3  ;;  %v4063_v54 = vadd.f32 %v9687_v23, %v3932_v61  ;;  %v6079_v61 = vrot.slane %v6076_v46, 2 }
 0x6a8   :  { %v4109_v50 = vpop.f32.mrf.mxu1  ;;  %5800 = vrot.lane.b32.xlu2 %v5796_v59, %s8321_s29  ;;  %v4064_v3 = vadd.f32 %v9689_v0, %v3933_v13  ;;  %v6024_v59 = vperm.slane %v6021_v44, 0 }
 0x6a9   :  { %v9694_v60 = vpop.f32.mrf.mxu0  ;;  %v4192_v58 = vadd.f32 %v4109_v50, %v4061_v24  ;;  %v6082_v47 = vperm.slane %v6079_v61, 0  ;;  %v9874_v61 = vld [vmem:[#allocation6 + $0x50] sm:$0x7] }
 0x6aa   :  { %5841 = vrot.lane.b32.xlu1 %v5836_v22, %s8322_s8  ;;  %5874 = vrot.lane.b32.xlu0 %v5864_v31, %s8316_s23  ;;  %v4195_v0 = vadd.f32 %v9694_v60, %v4064_v3  ;;  %v5863_v60 = vperm.slane %v5857_v21, 1  ;;  %s8333_s8 = smov 55  }
 0x6ab   :  { %7372 = vmatmul.msk.f32.vlgmr.msrb.gmra.mxu1 %vm197_vm0, %v5634_v1  ;;  %v5945_v1 = vld [vmem:[#allocation6 + $0x58] sm:$0x7] }
 0x6ac   :  { %v9750_v50 = vrot.slane %v5945_v1, 7 }
 0x6ae   :  { %v4129_v25 = vpop.f32.mrf.mxu2 }
 0x6af   :  { %v4149_v49 = vpop.f32.mrf.mxu3  ;;  %v4193_v17 = vadd.f32 %v4129_v25, %v4062_v20  ;;  %v6081_v20 = vperm.slane %v6078_v33, 0 }
 0x6b0   :  { %v4189_v53 = vpop.f32.mrf.mxu1  ;;  %5988 = vrot.lane.b32.xlu2 %v5985_v43, %s8323_s1  ;;  %v4194_v22 = vadd.f32 %v4149_v49, %v4063_v54  ;;  %v9762_v49 = vsel %vm5854_vm15, %v9757_v57, %v9750_v50  ;;  %v6114_v54 = vld [vmem:[#allocation6 + $0x18] sm:$0x7] }
 0x6b1   :  { %v9718_v26 = vpop.f32.mrf.mxu0  ;;  %v4196_v56 = vadd.f32 %v4189_v53, %v4065_v6  ;;  %v5955_v7 = vperm.slane %v9762_v49, 1  ;;  %v6116_v3 = vrot.slane %v6114_v54, 1 }
 0x6b2   :  { %5870 = vrot.lane.b32.xlu1 %v5862_v2, %s8316_s23  ;;  %5990 = vrot.lane.b32.xlu0 %v5986_v38, %s8323_s1  ;;  %v4325_v43 = vadd.f32 %v9718_v26, %v4194_v22  ;;  %v6006_v38 = vperm.slane %v6003_v5, 0 }
 0x6b6   :  { %v4240_v36 = vpop.f32.mrf.mxu2 }
 0x6b7   :  { %v4260_v42 = vpop.f32.mrf.mxu3  ;;  %v4323_v29 = vadd.f32 %v4240_v36, %v4192_v58 }
 0x6b8   :  { %v4300_v32 = vpop.f32.mrf.mxu1  ;;  %6007 = vrot.lane.b32.xlu2 %v6004_v55, %s8324_s9  ;;  %v4324_v12 = vadd.f32 %v4260_v42, %v4193_v17  ;;  %v6080_v55 = vperm.slane %v6076_v46, 0 }
 0x6b9   :  { %v4391_v37 = vpop.f32.mrf.mxu0  ;;  %v4326_v19 = vadd.f32 %v4300_v32, %v4195_v0  ;;  %v6025_v32 = vperm.slane %v6022_v14, 0 }
 0x6ba   :  { %5876 = vrot.lane.b32.xlu1 %v5865_v4, %s8316_s23  ;;  %6009 = vrot.lane.b32.xlu0 %v6005_v11, %s8324_s9  ;;  %v4455_v16 = vadd.f32 %v4391_v37, %v4324_v12  ;;  %v6095_v37 = vld [vmem:[#allocation6 + $0x18] sm:$0x7] }
 0x6bb   :  { %v6097_v13 = vrot.slane %v6095_v37, 1  ;;  %v6098_v1 = vrot.slane %v6095_v37, 2  ;;  %v6039_v12 = vld [vmem:[#allocation6 + $0x18] sm:$0x7] }
 0x6bd   :  { %v6100_v44 = vperm.slane %v6097_v13, 0 }
 0x6be   :  { %v4320_v40 = vpop.f32.mrf.mxu2 }
 0x6bf   :  { %v4371_v62 = vpop.f32.mrf.mxu3  ;;  %v4327_v31 = vadd.f32 %v4320_v40, %v4196_v56 }
 0x6c0   :  { %v4454_v45 = vadd.f32 %v4371_v62, %v4323_v29  ;;  %v4411_v35 = vpop.f32.mrf.mxu1  ;;  %6026 = vrot.lane.b32.xlu2 %v6023_v27, %s8325_s19 }
 0x6c1   :  { %v4502_v48 = vpop.f32.mrf.mxu0  ;;  %v4456_v9 = vadd.f32 %v4411_v35, %v4325_v43  ;;  %v6118_v35 = vperm.slane %v6114_v54, 0  ;;  %v5954_v43 = vperm.slane %v9762_v49, 0 }
 0x6c2   :  { %v4585_v23 = vadd.f32 %v4502_v48, %v4454_v45  ;;  %5992 = vrot.lane.b32.xlu1 %v5987_v34, %s8323_s1  ;;  %6028 = vrot.lane.b32.xlu0 %v6024_v59, %s8325_s19  ;;  %v6101_v59 = vperm.slane %v6098_v1, 0  ;;  %v6119_v48 = vperm.slane %v6116_v3, 0  ;;  %s8336_s1 = smov 90  }
 0x6c4   :  { %v4596_v15 = vadd.f32 %v8882_v41, %v4585_v23  ;;  %v6042_v23 = vrot.slane %v6039_v12, 7 }
 0x6c6   :  { %v4431_v25 = vpop.f32.mrf.mxu2  ;;  %4601 = vst [vmem:[#allocation6 + $0x68] sm:$0xff] %v4596_v15 }
 0x6c7   :  { %v4451_v30 = vpop.f32.mrf.mxu3  ;;  %v4457_v28 = vadd.f32 %v4431_v25, %v4326_v19 }
 0x6c8   :  { %v4458_v53 = vadd.f32 %v4451_v30, %v4327_v31  ;;  %v4522_v10 = vpop.f32.mrf.mxu1  ;;  %5872 = vrot.lane.b32.xlu2 %v5863_v60, %s8316_s23  ;;  %s8326_s23 = smov 109   ;;  %v6117_v31 = vrot.slane %v6114_v54, 2 }
 0x6c9   :  { %v4586_v2 = vadd.f32 %v4522_v10, %v4455_v16  ;;  %v4582_v18 = vpop.f32.mrf.mxu0  ;;  %v6038_v16 = vld [vmem:[#allocation6 + $0x58] sm:$0x7]  ;;  %v5950_v10 = vsel %vm441_vm3, %v9757_v57, %v9750_v50 }
 0x6ca   :  { %v4589_v26 = vadd.f32 %v4582_v18, %v4458_v53  ;;  %6011 = vrot.lane.b32.xlu1 %v6006_v38, %s8324_s9  ;;  %5962 = vrot.lane.b32.xlu0 %v5955_v7, %s8262_s30  ;;  %v6043_v5 = vsel %vm5854_vm15, %v6038_v16, %v6042_v23  ;;  %v6120_v60 = vperm.slane %v6117_v31, 0  ;;  %v5951_v18 = vrot.slane %v5950_v10, 1  ;;  %s8330_s9 = smov 82  }
 0x6cb   :  { %v4597_v24 = vadd.f32 %v8882_v41, %v4586_v2  ;;  %v6049_v19 = vperm.slane %v6043_v5, 1  ;;  %v5952_v2 = vsel %vm444_vm4, %v9757_v57, %v9750_v50  ;;  %v6046_v14 = vsel %vm444_vm4, %v6038_v16, %v6042_v23 }
 0x6cc   :  { %v4600_v21 = vadd.f32 %v8882_v41, %v4589_v26  ;;  %v5953_v46 = vrot.slane %v5952_v2, 2  ;;  %v5956_v26 = vperm.slane %v5951_v18, 0 }
 0x6cd   :  { %4602 = vst [vmem:[#allocation6 + $0x8] sm:$0xff] %v4597_v24 }
 0x6ce   :  { %v4542_v36 = vpop.f32.mrf.mxu2  ;;  %4605 = vst [vmem:[#allocation6 + $0x20] sm:$0xff] %v4600_v21 }
 0x6cf   :  { %v4587_v8 = vadd.f32 %v4542_v36, %v4456_v9  ;;  %v4562_v42 = vpop.f32.mrf.mxu3  ;;  %v6048_v9 = vperm.slane %v6043_v5, 0 }
 0x6d0   :  { %v4588_v51 = vadd.f32 %v4562_v42, %v4457_v28  ;;  %v9774_v39 = vpop.f32.mrf.mxu1  ;;  %6083 = vrot.lane.b32.xlu2 %v6080_v55, %s8326_s23  ;;  %v5958_v28 = vperm.slane %v5953_v46, 0  ;;  %v6047_v42 = vrot.slane %v6046_v14, 2 }
 0x6d1   :  { %v4598_v58 = vadd.f32 %v8882_v41, %v4587_v8  ;;  %v9778_v11 = vpop.f32.mrf.mxu0 }
 0x6d2   :  { %v4599_v4 = vadd.f32 %v8882_v41, %v4588_v51  ;;  %v5895_v52 = vpop.permute.xlu2 %5894  ;;  %6030 = vrot.lane.b32.xlu1 %v6025_v32, %s8325_s19  ;;  %6085 = vrot.lane.b32.xlu0 %v6081_v20, %s8326_s23  ;;  %v6099_v41 = vperm.slane %v6095_v37, 0  ;;  %v6044_v32 = vsel %vm441_vm3, %v6038_v16, %v6042_v23  ;;  %v6052_v37 = vperm.slane %v6047_v42, 0  ;;  %s8339_s19 = smov 24  }
 0x6d3   :  { %4603 = vst [vmem:[#allocation6 + $0x48] sm:$0xff] %v4598_v58  ;;  %v5957_v58 = vperm.slane %v5951_v18, 1  ;;  %v6053_v10 = vperm.slane %v6047_v42, 1 }
 0x6d4   :  { %4604 = vst [vmem:[#allocation6 + $0x40] sm:$0xff] %v4599_v4  ;;  %v5959_v4 = vperm.slane %v5953_v46, 1 }
 0x6d5   :  { %7379 = vst.msk [vmem:[%s10869_s11 + $0x62] sm:$0x1] %vm5787_vm14, %v5895_v52 }
 0x6d6   :  { %v9785_v6 = vpop.f32.mrf.mxu2 }
 0x6d7   :  { %v4702_v29 = vpop.f32.mrf.mxu3 }
 0x6d8   :  { %v9787_v17 = vpop.f32.mrf.mxu1  ;;  %6102 = vrot.lane.b32.xlu2 %v6099_v41, %s8302_s13 }
 0x6d9   :  { %v4805_v40 = vpop.f32.mrf.mxu0 }
 0x6da   :  { %v9790_v62 = vadd.f32 %v4805_v40, %v4702_v29  ;;  %v5914_v27 = vpop.permute.xlu2 %5913  ;;  %6087 = vrot.lane.b32.xlu1 %v6082_v47, %s8326_s23  ;;  %6104 = vrot.lane.b32.xlu0 %v6100_v44, %s8302_s13  ;;  %v6045_v29 = vrot.slane %v6044_v32, 1  ;;  %v6172_v44 = vrot.slane %v9874_v61, 1  ;;  %s8334_s23 = smov 20  }
 0x6db   :  { %5922 = vst.msk [vmem:[%s10869_s11 + $0x3] sm:$0x1] %vm5787_vm14, %v5914_v27 }
 0x6dc   :  { %v6051_v54 = vperm.slane %v6045_v29, 1  ;;  %v6050_v3 = vperm.slane %v6045_v29, 0 }
 0x6de   :  { %v9797_v56 = vpop.f32.mrf.mxu2 }
 0x6df   :  { %v9799_v45 = vpop.f32.mrf.mxu3  ;;  %v4766_v16 = vadd.f32 %v9797_v56, %v9774_v39 }
 0x6e0   :  { %v9801_v34 = vpop.f32.mrf.mxu1  ;;  %6121 = vrot.lane.b32.xlu2 %v6118_v35, %s8327_s16  ;;  %v6175_v35 = vperm.slane %v6172_v44, 0 }
 0x6e1   :  { %v9803_v22 = vpop.f32.mrf.mxu0  ;;  %v4826_v39 = vadd.f32 %v9801_v34, %v9778_v11  ;;  %v4786_v11 = vadd.f32 %v9799_v45, %v9785_v6 }
 0x6e2   :  { %v5933_v0 = vpop.permute.xlu2 %5932  ;;  %6106 = vrot.lane.b32.xlu1 %v6101_v59, %s8302_s13  ;;  %6123 = vrot.lane.b32.xlu0 %v6119_v48, %s8327_s16  ;;  %s8328_s13 = smov 12   ;;  %v9896_v59 = vld [vmem:[#allocation6 + $0x50] sm:$0x7] }
 0x6e3   :  { %7382 = vst.msk [vmem:[%s10869_s11 + $0x63] sm:$0x1] %vm5787_vm14, %v5933_v0  ;;  %v6191_v31 = vrot.slane %v9896_v59, 1  ;;  %v6193_v45 = vperm.slane %v9896_v59, 0 }
 0x6e5   :  { %v6194_v2 = vperm.slane %v6191_v31, 0 }
 0x6e6   :  { %v9810_v15 = vpop.f32.mrf.mxu2 }
 0x6e7   :  { %v9813_v25 = vpop.f32.mrf.mxu3 }
 0x6e8   :  { %v9816_v30 = vpop.f32.mrf.mxu1  ;;  %5960 = vrot.lane.b32.xlu2 %v5954_v43, %s8262_s30 }
 0x6e9   :  { %v9819_v53 = vpop.f32.mrf.mxu0 }
 0x6ea   :  { %v5819_v38 = vpop.permute.xlu2 %5818  ;;  %6125 = vrot.lane.b32.xlu1 %v6120_v60, %s8327_s16  ;;  %6056 = vrot.lane.b32.xlu0 %v6049_v19, %s8328_s13  ;;  %v6174_v60 = vperm.slane %v9874_v61, 0 }
 0x6eb   :  { %5827 = vst.msk [vmem:[%s10869_s11 + $0x1] sm:$0x1] %vm5787_vm14, %v5819_v38  ;;  %v4974_v38 = vadd.f32 %v9813_v25, %v4766_v16 }
 0x6ec   :  { %v5899_v49 = vpop.permute.xlu1 %5898  ;;  %v5897_v7 = vpop.permute.xlu0 %5896 }
 0x6ed   :  { %7381 = vst.msk [vmem:[%s10869_s11 + $0xa2] sm:$0x1] %vm5787_vm14, %v5899_v49  ;;  %v5105_v14 = vadd.f32 %v9819_v53, %v4974_v38 }
 0x6ee   :  { %v9836_v50 = vpop.f32.mrf.mxu2  ;;  %7380 = vst.msk [vmem:[%s10869_s11 + $0x82] sm:$0x1] %vm5787_vm14, %v5897_v7  ;;  %v9925_v7 = vld [vmem:[#allocation6 + $0x50] sm:$0x7] }
 0x6ef   :  { %v9842_v57 = vpop.f32.mrf.mxu3  ;;  %v4977_v34 = vadd.f32 %v9836_v50, %v4826_v39  ;;  %v6134_v50 = vld [vmem:[#allocation6 + $0x50] sm:$0x7] }
 0x6f0   :  { %v9844_v24 = vpop.f32.mrf.mxu1  ;;  %6054 = vrot.lane.b32.xlu2 %v6048_v9, %s8328_s13  ;;  %v6173_v9 = vrot.slane %v9874_v61, 2 }
 0x6f1   :  { %v9847_v21 = vpop.f32.mrf.mxu0 }
 0x6f2   :  { %v5838_v33 = vpop.permute.xlu2 %5837  ;;  %5964 = vrot.lane.b32.xlu1 %v5956_v26, %s8262_s30  ;;  %5968 = vrot.lane.b32.xlu0 %v5958_v28, %s8262_s30  ;;  %v6210_v26 = vrot.slane %v9925_v7, 1  ;;  %v4846_v28 = vadd.f32 %v9810_v15, %v9787_v17  ;;  %v4976_v17 = vadd.f32 %v9816_v30, %v9790_v62 }
 0x6f3   :  { %7376 = vst.msk [vmem:[%s10869_s11 + $0x61] sm:$0x1] %vm5787_vm14, %v5838_v33  ;;  %v4975_v33 = vadd.f32 %v9803_v22, %v4786_v11 }
 0x6f4   :  { %v5918_v36 = vpop.permute.xlu1 %5917  ;;  %v5916_v8 = vpop.permute.xlu0 %5915  ;;  %v6213_v42 = vperm.slane %v6210_v26, 0 }
 0x6f5   :  { %5924 = vst.msk [vmem:[%s10869_s11 + $0x43] sm:$0x1] %vm5787_vm14, %v5918_v36  ;;  %v5106_v62 = vadd.f32 %v9844_v24, %v4975_v33 }
 0x6f6   :  { %v9860_v55 = vpop.f32.mrf.mxu2  ;;  %5923 = vst.msk [vmem:[%s10869_s11 + $0x23] sm:$0x1] %vm5787_vm14, %v5916_v8  ;;  %v6176_v8 = vperm.slane %v6173_v9, 0 }
 0x6f7   :  { %v9866_v51 = vpop.f32.mrf.mxu3  ;;  %v5107_v22 = vadd.f32 %v9860_v55, %v4976_v17 }
 0x6f8   :  { %5966 = vrot.lane.b32.xlu2 %v5957_v58, %s8262_s30  ;;  %v9870_v20 = vpop.f32.mrf.mxu1  ;;  %v5108_v15 = vadd.f32 %v9866_v51, %v4977_v34  ;;  %v4978_v58 = vadd.f32 %v9842_v57, %v4846_v28 }
 0x6f9   :  { %v9872_v52 = vpop.f32.mrf.mxu0  ;;  %v5236_v32 = vadd.f32 %v9870_v20, %v5105_v14  ;;  %v6192_v20 = vrot.slane %v9896_v59, 2  ;;  %v10006_v14 = vld [vmem:[#allocation6 + $0x68] sm:$0x7] }
 0x6fa   :  { %v5867_v13 = vpop.permute.xlu2 %5866  ;;  %5970 = vrot.lane.b32.xlu1 %v5959_v4, %s8262_s30  ;;  %6062 = vrot.lane.b32.xlu0 %v6052_v37, %s8328_s13  ;;  %s8329_s30 = smov 113   ;;  %v6137_v37 = vrot.slane %v6134_v50, 7  ;;  %v5239_v30 = vadd.f32 %v9872_v52, %v5108_v15  ;;  %v5109_v29 = vadd.f32 %v9847_v21, %v4978_v58  ;;  %v6212_v52 = vperm.slane %v9925_v7, 0 }
 0x6fc   :  { %v5937_v41 = vpop.permute.xlu1 %5936  ;;  %v5935_v47 = vpop.permute.xlu0 %5934 }
 0x6fd   :  { %7384 = vst.msk [vmem:[%s10869_s11 + $0xa3] sm:$0x1] %vm5787_vm14, %v5937_v41 }
 0x6fe   :  { %7383 = vst.msk [vmem:[%s10869_s11 + $0x83] sm:$0x1] %vm5787_vm14, %v5935_v47  ;;  %v9887_v40 = vpop.f32.mrf.mxu2 }
 0x6ff   :  { %v9889_v27 = vpop.f32.mrf.mxu3  ;;  %v5237_v47 = vadd.f32 %v9887_v40, %v5106_v62 }
 0x700   :  { %6060 = vrot.lane.b32.xlu2 %v6051_v54, %s8328_s13  ;;  %v9892_v1 = vpop.f32.mrf.mxu1  ;;  %v5238_v21 = vadd.f32 %v9889_v27, %v5107_v22 }
 0x701   :  { %v9894_v12 = vpop.f32.mrf.mxu0 }
 0x702   :  { %v5801_v48 = vpop.permute.xlu2 %5800  ;;  %6058 = vrot.lane.b32.xlu1 %v6050_v3, %s8328_s13  ;;  %6179 = vrot.lane.b32.xlu0 %v6175_v35, %s8329_s30  ;;  %v6195_v35 = vperm.slane %v6192_v20, 0  ;;  %v5369_v27 = vadd.f32 %v9894_v12, %v5238_v21  ;;  %v6269_v21 = vperm.slane %v10006_v14, 0 }
 0x703   :  { %7374 = vst.msk [vmem:[%s10869_s11 + $0x80] sm:$0x1] %vm5787_vm14, %v5801_v48  ;;  %v5240_v48 = vadd.f32 %v9892_v1, %v5109_v29 }
 0x704   :  { %v5799_v23 = vpop.permute.xlu1 %5798  ;;  %v5869_v0 = vpop.permute.xlu0 %5868 }
 0x705   :  { %7373 = vst.msk [vmem:[%s10869_s11 + $0x60] sm:$0x1] %vm5787_vm14, %v5799_v23  ;;  %v5878_v5 = vsel %vm3030_vm13, %v5867_v13, %v5869_v0  ;;  %v6133_v13 = vld [vmem:[#allocation6 + $0x18] sm:$0x7] }
 0x706   :  { %5884 = vst.msk [vmem:[%s10869_s11 + $0x2] sm:$0x1] %vm5787_vm14, %v5878_v5  ;;  %v5284_v43 = vpop.f32.mrf.mxu2  ;;  %v6138_v24 = vsel %vm5854_vm15, %v6133_v13, %v6137_v37  ;;  %v9983_v31 = vsel %vm444_vm4, %v6133_v13, %v6137_v37 }
 0x707   :  { %v9917_v19 = vpop.f32.mrf.mxu3  ;;  %v5367_v41 = vadd.f32 %v5284_v43, %v5236_v32  ;;  %v6144_v59 = vperm.slane %v6138_v24, 1  ;;  %v6142_v39 = vrot.slane %v9983_v31, 2 }
 0x708   :  { %6177 = vrot.lane.b32.xlu2 %v6174_v60, %s8329_s30  ;;  %v5344_v56 = vpop.f32.mrf.mxu1  ;;  %v5368_v40 = vadd.f32 %v9917_v19, %v5237_v47  ;;  %v6211_v60 = vrot.slane %v9925_v7, 2 }
 0x709   :  { %v9923_v49 = vpop.f32.mrf.mxu0  ;;  %v5370_v54 = vadd.f32 %v5344_v56, %v5239_v30 }
 0x70a   :  { %v5989_v18 = vpop.permute.xlu2 %5988  ;;  %6064 = vrot.lane.b32.xlu1 %v6053_v10, %s8328_s13  ;;  %6198 = vrot.lane.b32.xlu0 %v6194_v2, %s8330_s9  ;;  %v6143_v2 = vperm.slane %v6138_v24, 0  ;;  %v5499_v38 = vadd.f32 %v9923_v49, %v5368_v40  ;;  %s8332_s13 = smov 117  }
 0x70b   :  { %7385 = vst.msk [vmem:[%s10869_s11 + $0x64] sm:$0x1] %vm5787_vm14, %v5989_v18  ;;  %v6139_v18 = vsel %vm441_vm3, %v6133_v13, %v6137_v37  ;;  %v6284_v13 = vld [vmem:[#allocation6 + $0x68] sm:$0x7] }
 0x70c   :  { %v5803_v25 = vpop.permute.xlu1 %5802  ;;  %v5821_v46 = vpop.permute.xlu0 %5820  ;;  %v6140_v49 = vrot.slane %v6139_v18, 1  ;;  %v6286_v47 = vrot.slane %v6284_v13, 1  ;;  %v6288_v31 = vperm.slane %v6284_v13, 0 }
 0x70d   :  { %7375 = vst.msk [vmem:[%s10869_s11 + $0xa0] sm:$0x1] %vm5787_vm14, %v5803_v25  ;;  %v6214_v25 = vperm.slane %v6211_v60, 0 }
 0x70e   :  { %5828 = vst.msk [vmem:[%s10869_s11 + $0x21] sm:$0x1] %vm5787_vm14, %v5821_v46  ;;  %v5364_v6 = vpop.f32.mrf.mxu2  ;;  %v6147_v46 = vperm.slane %v6142_v39, 0  ;;  %v6145_v30 = vperm.slane %v6140_v49, 0 }
 0x70f   :  { %v5415_v36 = vpop.f32.mrf.mxu3  ;;  %v5371_v56 = vadd.f32 %v5364_v6, %v5240_v48 }
 0x710   :  { %6196 = vrot.lane.b32.xlu2 %v6193_v45, %s8330_s9  ;;  %v5455_v53 = vpop.f32.mrf.mxu1  ;;  %v5498_v23 = vadd.f32 %v5415_v36, %v5367_v41 }
 0x711   :  { %v5546_v4 = vpop.f32.mrf.mxu0  ;;  %v5500_v11 = vadd.f32 %v5455_v53, %v5369_v27 }
 0x712   :  { %v6008_v61 = vpop.permute.xlu2 %6007  ;;  %6181 = vrot.lane.b32.xlu1 %v6176_v8, %s8329_s30  ;;  %6217 = vrot.lane.b32.xlu0 %v6213_v42, %s8277_s24  ;;  %v5629_v10 = vadd.f32 %v5546_v4, %v5498_v23  ;;  %v6267_v8 = vrot.slane %v10006_v14, 1  ;;  %v6146_v4 = vperm.slane %v6140_v49, 1  ;;  %v6268_v23 = vrot.slane %v10006_v14, 2 }
 0x713   :  { %6016 = vst.msk [vmem:[%s10869_s11 + $0x5] sm:$0x1] %vm5787_vm14, %v6008_v61 }
 0x714   :  { %v5823_v57 = vpop.permute.xlu1 %5822  ;;  %v5840_v51 = vpop.permute.xlu0 %5839  ;;  %v6271_v40 = vperm.slane %v6268_v23, 0  ;;  %v6683_v23 = vld [vmem:[#allocation6 + $0x20] sm:$0x7] }
 0x715   :  { %5829 = vst.msk [vmem:[%s10869_s11 + $0x41] sm:$0x1] %vm5787_vm14, %v5823_v57  ;;  %v6270_v57 = vperm.slane %v6267_v8, 0  ;;  %v6379_v8 = vld [vmem:[#allocation6 + $0x8] sm:$0x7] }
 0x716   :  { %7377 = vst.msk [vmem:[%s10869_s11 + $0x81] sm:$0x1] %vm5787_vm14, %v5840_v51  ;;  %v5475_v55 = vpop.f32.mrf.mxu2 }
 0x717   :  { %v5495_v44 = vpop.f32.mrf.mxu3  ;;  %v5501_v1 = vadd.f32 %v5475_v55, %v5370_v54  ;;  %v6289_v54 = vperm.slane %v6286_v47, 0 }
 0x718   :  { %6215 = vrot.lane.b32.xlu2 %v6212_v52, %s8277_s24  ;;  %v5566_v3 = vpop.f32.mrf.mxu1  ;;  %v5502_v9 = vadd.f32 %v5495_v44, %v5371_v56  ;;  %v6227_v56 = vld [vmem:[#allocation6 + $0x50] sm:$0x7] }
 0x719   :  { %v5626_v0 = vpop.f32.mrf.mxu0  ;;  %v5630_v50 = vadd.f32 %v5566_v3, %v5499_v38  ;;  %v6303_v3 = vld [vmem:[#allocation6 + $0x68] sm:$0x7] }
 0x71a   :  { %v6027_v16 = vpop.permute.xlu2 %6026  ;;  %6200 = vrot.lane.b32.xlu1 %v6195_v35, %s8330_s9  ;;  %6151 = vrot.lane.b32.xlu0 %v6144_v59, %s8331_s25  ;;  %v5633_v42 = vadd.f32 %v5626_v0, %v5502_v9  ;;  %v6305_v0 = vrot.slane %v6303_v3, 1  ;;  %s8350_s9 = smov 79  }
 0x71b   :  { %7388 = vst.msk [vmem:[%s10869_s11 + $0x65] sm:$0x1] %vm5787_vm14, %v6027_v16  ;;  %v6228_v16 = vld [vmem:[#allocation6 + $0x68] sm:$0x7] }
 0x71c   :  { %v5842_v5 = vpop.permute.xlu1 %5841  ;;  %v9993_v43 = vpop.permute.xlu0 %5874  ;;  %v6308_v27 = vperm.slane %v6305_v0, 0 }
 0x71d   :  { %7378 = vst.msk [vmem:[%s10869_s11 + $0xa1] sm:$0x1] %vm5787_vm14, %v5842_v5 }
 0x71e   :  { %v5586_v19 = vpop.f32.mrf.mxu2 }
 0x71f   :  { %v5606_v12 = vpop.f32.mrf.mxu3  ;;  %v5631_v36 = vadd.f32 %v5586_v19, %v5500_v11  ;;  %v6307_v19 = vperm.slane %v6303_v3, 0 }
 0x720   :  { %v5632_v34 = vadd.f32 %v5606_v12, %v5501_v1  ;;  %6149 = vrot.lane.b32.xlu2 %v6143_v2, %s8331_s25  ;;  %v5677_v7 = vpop.f32.mrf.mxu1  ;;  %v6231_v1 = vrot.slane %v6228_v16, 7 }
 0x721   :  { %v5760_v26 = vadd.f32 %v5677_v7, %v5629_v10  ;;  %v5737_v28 = vpop.f32.mrf.mxu0 }
 0x722   :  { %v5763_v6 = vadd.f32 %v5737_v28, %v5632_v34  ;;  %v5873_v45 = vpop.permute.xlu2 %5872  ;;  %6219 = vrot.lane.b32.xlu1 %v6214_v25, %s8277_s24  ;;  %6157 = vrot.lane.b32.xlu0 %v6147_v46, %s8331_s25  ;;  %v6232_v10 = vsel %vm5854_vm15, %v6227_v56, %v6231_v1  ;;  %v6235_v12 = vsel %vm444_vm4, %v6227_v56, %v6231_v1  ;;  %v6306_v25 = vrot.slane %v6303_v3, 2 }
 0x723   :  { %v5771_v33 = vadd.f32 %v8891_v63, %v5760_v26  ;;  %v6238_v38 = vperm.slane %v6232_v10, 1  ;;  %v6236_v46 = vrot.slane %v6235_v12, 2  ;;  %v6237_v9 = vperm.slane %v6232_v10, 0 }
 0x724   :  { %v5774_v17 = vadd.f32 %v8891_v63, %v5763_v6  ;;  %v5871_v15 = vpop.permute.xlu1 %5870  ;;  %v5991_v53 = vpop.permute.xlu0 %5990  ;;  %v6233_v26 = vsel %vm441_vm3, %v6227_v56, %v6231_v1  ;;  %v6309_v28 = vperm.slane %v6306_v25, 0  ;;  %v6360_v6 = vld [vmem:[#allocation6 + $0x8] sm:$0x7] }
 0x725   :  { %5776 = vst [vmem:[#allocation6 + $0x10] sm:$0xff] %v5771_v33  ;;  %v5879_v58 = vsel %vm3030_vm13, %v5871_v15, %v5873_v45  ;;  %v6241_v14 = vperm.slane %v6236_v46, 0  ;;  %v6234_v49 = vrot.slane %v6233_v26, 1 }
 0x726   :  { %5779 = vst [vmem:[#allocation6 + $0x70] sm:$0xff] %v5774_v17  ;;  %v5697_v32 = vpop.f32.mrf.mxu2 }
 0x727   :  { %5885 = vst.msk [vmem:[%s10869_s11 + $0x22] sm:$0x1] %vm5787_vm14, %v5879_v58  ;;  %v5761_v37 = vadd.f32 %v5697_v32, %v5630_v50  ;;  %v5717_v61 = vpop.f32.mrf.mxu3  ;;  %v6240_v17 = vperm.slane %v6234_v49, 1  ;;  %v6239_v15 = vperm.slane %v6234_v49, 0 }
 0x728   :  { %7386 = vst.msk [vmem:[%s10869_s11 + $0x84] sm:$0x1] %vm5787_vm14, %v5991_v53  ;;  %v5762_v62 = vadd.f32 %v5717_v61, %v5631_v36  ;;  %6155 = vrot.lane.b32.xlu2 %v6146_v4, %s8331_s25  ;;  %v5757_v22 = vpop.f32.mrf.mxu1  ;;  %v6362_v36 = vrot.slane %v6360_v6, 1  ;;  %v6381_v4 = vrot.slane %v6379_v8, 1  ;;  %v6242_v61 = vperm.slane %v6236_v46, 1 }
 0x729   :  { %v5772_v51 = vadd.f32 %v8891_v63, %v5761_v37  ;;  %v5764_v20 = vadd.f32 %v5757_v22, %v5633_v42  ;;  %v6364_v37 = vperm.slane %v6360_v6, 0  ;;  %v6398_v22 = vld [vmem:[#allocation6 + $0x8] sm:$0x7] }
 0x72a   :  { %v5773_v29 = vadd.f32 %v8891_v63, %v5762_v62  ;;  %v6084_v41 = vpop.permute.xlu2 %6083  ;;  %6153 = vrot.lane.b32.xlu1 %v6145_v30, %s8331_s25  ;;  %6274 = vrot.lane.b32.xlu0 %v6270_v57, %s8332_s13  ;;  %v6365_v53 = vperm.slane %v6362_v36, 0  ;;  %v6384_v62 = vperm.slane %v6381_v4, 0  ;;  %v6455_v36 = vld [vmem:[#allocation6 + $0x48] sm:$0x7] }
 0x72b   :  { %5777 = vst [vmem:[#allocation6 + $0x38] sm:$0xff] %v5772_v51  ;;  %v5775_v24 = vadd.f32 %v8891_v63, %v5764_v20  ;;  %v6148_v63 = vperm.slane %v6142_v39, 1  ;;  %v6287_v39 = vrot.slane %v6284_v13, 2  ;;  %v6363_v20 = vrot.slane %v6360_v6, 2 }
 0x72c   :  { %5778 = vst [vmem:[#allocation6 + $0x60] sm:$0xff] %v5773_v29  ;;  %v5877_v55 = vpop.permute.xlu1 %5876  ;;  %v6010_v52 = vpop.permute.xlu0 %6009  ;;  %v6400_v13 = vrot.slane %v6398_v22, 1 }
 0x72d   :  { %5780 = vst [vmem:[#allocation6 + $0x28] sm:$0xff] %v5775_v24  ;;  %v5880_v44 = vsel %vm3030_vm13, %v9993_v43, %v5877_v55  ;;  %v6290_v2 = vperm.slane %v6287_v39, 0  ;;  %v6366_v24 = vperm.slane %v6363_v20, 0  ;;  %v6702_v39 = vld [vmem:[#allocation6 + $0x20] sm:$0x7]  ;;  %vm7128_vm13 = vcmask 203776  }
 0x72e   :  { %7391 = vst.msk [vmem:[%s10869_s11 + $0x66] sm:$0x1] %vm5787_vm14, %v6084_v41  ;;  %v6383_v41 = vperm.slane %v6379_v8, 0  ;;  %v6403_v55 = vperm.slane %v6400_v13, 0  ;;  %v6706_v49 = vperm.slane %v6702_v39, 0 }
 0x72f   :  { %5886 = vst.msk [vmem:[%s10869_s11 + $0x42] sm:$0x1] %vm5787_vm14, %v5880_v44 }
 0x730   :  { %6017 = vst.msk [vmem:[%s10869_s11 + $0x25] sm:$0x1] %vm5787_vm14, %v6010_v52  ;;  %6272 = vrot.lane.b32.xlu2 %v6269_v21, %s8332_s13  ;;  %v6664_v52 = vld [vmem:[#allocation6 + $0x20] sm:$0x7] }
 0x732   :  { %v6103_v35 = vpop.permute.xlu2 %6102  ;;  %6159 = vrot.lane.b32.xlu1 %v6148_v63, %s8331_s25  ;;  %6293 = vrot.lane.b32.xlu0 %v6289_v54, %s8295_s18  ;;  %v6382_v63 = vrot.slane %v6379_v8, 2  ;;  %v6666_v54 = vrot.slane %v6664_v52, 1  ;;  %v6705_v8 = vrot.slane %v6702_v39, 2  ;;  %s8341_s25 = smov 63  }
 0x733   :  { %6111 = vst.msk [vmem:[%s10869_s11 + $0x7] sm:$0x1] %vm5787_vm14, %v6103_v35  ;;  %v6402_v35 = vperm.slane %v6398_v22, 0 }
 0x734   :  { %v5993_v59 = vpop.permute.xlu1 %5992  ;;  %v6029_v48 = vpop.permute.xlu0 %6028 }
 0x735   :  { %7387 = vst.msk [vmem:[%s10869_s11 + $0xa4] sm:$0x1] %vm5787_vm14, %v5993_v59  ;;  %v6385_v59 = vperm.slane %v6382_v63, 0 }
 0x736   :  { %7389 = vst.msk [vmem:[%s10869_s11 + $0x85] sm:$0x1] %vm5787_vm14, %v6029_v48  ;;  %v6669_v48 = vperm.slane %v6666_v54, 0 }
 0x738   :  { %6291 = vrot.lane.b32.xlu2 %v6288_v31, %s8295_s18 }
 0x73a   :  { %v6122_v5 = vpop.permute.xlu2 %6121  ;;  %6276 = vrot.lane.b32.xlu1 %v6271_v40, %s8332_s13  ;;  %6312 = vrot.lane.b32.xlu0 %v6308_v27, %s8333_s8  ;;  %v6401_v40 = vrot.slane %v6398_v22, 2  ;;  %v6685_v27 = vrot.slane %v6683_v23, 1  ;;  %s8342_s13 = smov 32  }
 0x73b   :  { %7394 = vst.msk [vmem:[%s10869_s11 + $0x67] sm:$0x1] %vm5787_vm14, %v6122_v5  ;;  %v6668_v5 = vperm.slane %v6664_v52, 0 }
 0x73c   :  { %v6012_v43 = vpop.permute.xlu1 %6011  ;;  %v5963_v60 = vpop.permute.xlu0 %5962 }
 0x73d   :  { %6018 = vst.msk [vmem:[%s10869_s11 + $0x45] sm:$0x1] %vm5787_vm14, %v6012_v43  ;;  %v6404_v43 = vperm.slane %v6401_v40, 0  ;;  %v6418_v40 = vld [vmem:[#allocation6 + $0x48] sm:$0x7] }
 0x740   :  { %6310 = vrot.lane.b32.xlu2 %v6307_v19, %s8333_s8 }
 0x742   :  { %6295 = vrot.lane.b32.xlu1 %v6290_v2, %s8295_s18  ;;  %6245 = vrot.lane.b32.xlu0 %v6238_v38, %s8334_s23  ;;  %v5961_v18 = vpop.permute.xlu2 %5960  ;;  %v6667_v2 = vrot.slane %v6664_v52, 2  ;;  %v6704_v38 = vrot.slane %v6702_v39, 1  ;;  %s8343_s18 = smov 28  }
 0x743   :  { %v5972_v11 = vsel %vm197_vm0, %v5961_v18, %v5963_v60  ;;  %v6688_v60 = vperm.slane %v6685_v27, 0  ;;  %v6687_v18 = vperm.slane %v6683_v23, 0 }
 0x744   :  { %5978 = vst.msk [vmem:[%s10869_s11 + $0x4] sm:$0x1] %vm5787_vm14, %v5972_v11  ;;  %v6031_v34 = vpop.permute.xlu1 %6030  ;;  %v6086_v7 = vpop.permute.xlu0 %6085  ;;  %v6323_v11 = vld [vmem:[#allocation6 + $0x8] sm:$0x7] }
 0x745   :  { %7390 = vst.msk [vmem:[%s10869_s11 + $0xa5] sm:$0x1] %vm5787_vm14, %v6031_v34  ;;  %v6670_v34 = vperm.slane %v6667_v2, 0  ;;  %v10163_v25 = vrot.slane %v6323_v11, 7 }
 0x746   :  { %7392 = vst.msk [vmem:[%s10869_s11 + $0x86] sm:$0x1] %vm5787_vm14, %v6086_v7  ;;  %v6707_v7 = vperm.slane %v6704_v38, 0 }
 0x748   :  { %6243 = vrot.lane.b32.xlu2 %v6237_v9, %s8334_s23 }
 0x74a   :  { %6314 = vrot.lane.b32.xlu1 %v6309_v28, %s8333_s8  ;;  %6251 = vrot.lane.b32.xlu0 %v6241_v14, %s8334_s23  ;;  %v6055_v45 = vpop.permute.xlu2 %6054  ;;  %s8338_s8 = smov 40   ;;  %v6686_v28 = vrot.slane %v6683_v23, 2  ;;  %v10167_v14 = vld [vmem:[#allocation6 + $0x68] sm:$0x7] }
 0x74b   :  { %v6328_v11 = vsel %vm441_vm3, %v10167_v14, %v10163_v25 }
 0x74c   :  { %v6088_v50 = vpop.permute.xlu1 %6087  ;;  %v6105_v33 = vpop.permute.xlu0 %6104 }
 0x74d   :  { %7393 = vst.msk [vmem:[%s10869_s11 + $0xa6] sm:$0x1] %vm5787_vm14, %v6088_v50  ;;  %v6689_v50 = vperm.slane %v6686_v28, 0 }
 0x74e   :  { %6112 = vst.msk [vmem:[%s10869_s11 + $0x27] sm:$0x1] %vm5787_vm14, %v6105_v33 }
 0x750   :  { %6249 = vrot.lane.b32.xlu2 %v6240_v17, %s8334_s23 }
 0x752   :  { %6247 = vrot.lane.b32.xlu1 %v6239_v15, %s8334_s23  ;;  %6369 = vrot.lane.b32.xlu0 %v6365_v53, %s8335_s21  ;;  %v5967_v42 = vpop.permute.xlu2 %5966 }
 0x754   :  { %v6107_v58 = vpop.permute.xlu1 %6106  ;;  %v6124_v32 = vpop.permute.xlu0 %6123 }
 0x755   :  { %6113 = vst.msk [vmem:[%s10869_s11 + $0x47] sm:$0x1] %vm5787_vm14, %v6107_v58  ;;  %v6459_v58 = vperm.slane %v6455_v36, 0 }
 0x756   :  { %7395 = vst.msk [vmem:[%s10869_s11 + $0x87] sm:$0x1] %vm5787_vm14, %v6124_v32  ;;  %v6708_v32 = vperm.slane %v6705_v8, 0 }
 0x758   :  { %6367 = vrot.lane.b32.xlu2 %v6364_v37, %s8335_s21  ;;  %v6474_v37 = vld [vmem:[#allocation6 + $0x48] sm:$0x7] }
 0x759   :  { %v6478_v20 = vperm.slane %v6474_v37, 0 }
 0x75a   :  { %6253 = vrot.lane.b32.xlu1 %v6242_v61, %s8334_s23  ;;  %6388 = vrot.lane.b32.xlu0 %v6384_v62, %s8336_s1  ;;  %v6061_v30 = vpop.permute.xlu2 %6060  ;;  %s8354_s23 = smov 114  }
 0x75c   :  { %v6126_v57 = vpop.permute.xlu1 %6125  ;;  %v6057_v51 = vpop.permute.xlu0 %6056 }
 0x75d   :  { %7396 = vst.msk [vmem:[%s10869_s11 + $0xa7] sm:$0x1] %vm5787_vm14, %v6126_v57  ;;  %v6067_v29 = vsel %vm6066_vm7, %v6055_v45, %v6057_v51  ;;  %v10177_v45 = vsel %vm5854_vm15, %v10167_v14, %v10163_v25  ;;  %v6476_v57 = vrot.slane %v6474_v37, 1 }
 0x75e   :  { %6073 = vst.msk [vmem:[%s10869_s11 + $0x6] sm:$0x1] %vm5787_vm14, %v6067_v29  ;;  %v6333_v33 = vperm.slane %v10177_v45, 1  ;;  %v6332_v38 = vperm.slane %v10177_v45, 0 }
 0x75f   :  { %v6479_v29 = vperm.slane %v6476_v57, 0 }
 0x760   :  { %6386 = vrot.lane.b32.xlu2 %v6383_v41, %s8336_s1  ;;  %v6493_v41 = vld [vmem:[#allocation6 + $0x48] sm:$0x7] }
 0x761   :  { %v6496_v23 = vrot.slane %v6493_v41, 2 }
 0x762   :  { %6371 = vrot.lane.b32.xlu1 %v6366_v24, %s8335_s21  ;;  %6407 = vrot.lane.b32.xlu0 %v6403_v55, %s8275_s22  ;;  %v6178_v47 = vpop.permute.xlu2 %6177 }
 0x763   :  { %7397 = vst.msk [vmem:[%s10869_s11 + $0x68] sm:$0x1] %vm5787_vm14, %v6178_v47  ;;  %v6477_v47 = vrot.slane %v6474_v37, 2  ;;  %v6499_v27 = vperm.slane %v6496_v23, 0  ;;  %v10281_v37 = vld [vmem:[#allocation6 + $0x40] sm:$0x7] }
 0x764   :  { %v5965_v44 = vpop.permute.xlu1 %5964  ;;  %v5969_v21 = vpop.permute.xlu0 %5968 }
 0x765   :  { %v5973_v3 = vsel %vm197_vm0, %v5965_v44, %v5967_v42  ;;  %v6457_v42 = vrot.slane %v6455_v36, 1  ;;  %v6495_v44 = vrot.slane %v6493_v41, 1  ;;  %v6480_v63 = vperm.slane %v6477_v47, 0 }
 0x766   :  { %5979 = vst.msk [vmem:[%s10869_s11 + $0x24] sm:$0x1] %vm5787_vm14, %v5973_v3  ;;  %v6512_v3 = vld [vmem:[#allocation6 + $0x48] sm:$0x7] }
 0x767   :  { %v6460_v4 = vperm.slane %v6457_v42, 0  ;;  %v6498_v54 = vperm.slane %v6495_v44, 0 }
 0x768   :  { %6405 = vrot.lane.b32.xlu2 %v6402_v35, %s8275_s22 }
 0x76a   :  { %6390 = vrot.lane.b32.xlu1 %v6385_v59, %s8336_s1  ;;  %6673 = vrot.lane.b32.xlu0 %v6669_v48, %s8272_s10  ;;  %v6197_v0 = vpop.permute.xlu2 %6196 }
 0x76b   :  { %6205 = vst.msk [vmem:[%s10869_s11 + $0x9] sm:$0x1] %vm5787_vm14, %v6197_v0  ;;  %v6514_v0 = vrot.slane %v6512_v3, 1 }
 0x76c   :  { %v5971_v31 = vpop.permute.xlu1 %5970  ;;  %v6063_v16 = vpop.permute.xlu0 %6062 }
 0x76d   :  { %v5974_v1 = vsel %vm197_vm0, %v5969_v21, %v5971_v31  ;;  %v6497_v21 = vperm.slane %v6493_v41, 0  ;;  %vm6255_vm0 = vcmask 162816  }
 0x76e   :  { %5980 = vst.msk [vmem:[%s10869_s11 + $0x44] sm:$0x1] %vm5787_vm14, %v5974_v1  ;;  %v6517_v1 = vperm.slane %v6514_v0, 0 }
 0x770   :  { %6671 = vrot.lane.b32.xlu2 %v6668_v5, %s8272_s10  ;;  %v6421_v5 = vrot.slane %v6418_v40, 7  ;;  %v6607_v40 = vld [vmem:[#allocation6 + $0x40] sm:$0x7] }
 0x772   :  { %6409 = vrot.lane.b32.xlu1 %v6404_v43, %s8275_s22  ;;  %6692 = vrot.lane.b32.xlu0 %v6688_v60, %s8337_s17  ;;  %v6216_v56 = vpop.permute.xlu2 %6215  ;;  %s8356_s22 = smov 17  }
 0x773   :  { %7400 = vst.msk [vmem:[%s10869_s11 + $0x69] sm:$0x1] %vm5787_vm14, %v6216_v56  ;;  %v6515_v56 = vrot.slane %v6512_v3, 2 }
 0x774   :  { %v6059_v10 = vpop.permute.xlu1 %6058  ;;  %v6180_v19 = vpop.permute.xlu0 %6179 }
 0x775   :  { %v6068_v12 = vsel %vm6066_vm7, %v6059_v10, %v6061_v30  ;;  %7398 = vst.msk [vmem:[%s10869_s11 + $0x88] sm:$0x1] %vm5787_vm14, %v6180_v19  ;;  %v6458_v30 = vrot.slane %v6455_v36, 2  ;;  %v6417_v10 = vld [vmem:[#allocation6 + $0x8] sm:$0x7] }
 0x776   :  { %6074 = vst.msk [vmem:[%s10869_s11 + $0x26] sm:$0x1] %vm5787_vm14, %v6068_v12  ;;  %v6422_v2 = vsel %vm5854_vm15, %v6417_v10, %v6421_v5  ;;  %v6518_v12 = vperm.slane %v6515_v56, 0  ;;  %v6425_v45 = vsel %vm444_vm4, %v6417_v10, %v6421_v5  ;;  %v6532_v56 = vld [vmem:[#allocation6 + $0x40] sm:$0x7] }
 0x777   :  { %v6461_v13 = vperm.slane %v6458_v30, 0  ;;  %v6426_v36 = vrot.slane %v6425_v45, 2 }
 0x778   :  { %6690 = vrot.lane.b32.xlu2 %v6687_v18, %s8337_s17  ;;  %v6428_v18 = vperm.slane %v6422_v2, 1 }
 0x779   :  { %v6431_v42 = vperm.slane %v6426_v36, 0  ;;  %v6432_v44 = vperm.slane %v6426_v36, 1 }
 0x77a   :  { %6675 = vrot.lane.b32.xlu1 %v6670_v34, %s8272_s10  ;;  %6711 = vrot.lane.b32.xlu0 %v6707_v7, %s8338_s8  ;;  %v6150_v46 = vpop.permute.xlu2 %6149  ;;  %v6330_v34 = vsel %vm444_vm4, %v10167_v14, %v10163_v25  ;;  %v6427_v25 = vperm.slane %v6422_v2, 0  ;;  %v6535_v2 = vrot.slane %v6532_v56, 7 }
 0x77b   :  { %v6331_v28 = vrot.slane %v6330_v34, 2  ;;  %v6531_v34 = vld [vmem:[#allocation6 + $0x48] sm:$0x7] }
 0x77c   :  { %v6065_v9 = vpop.permute.xlu1 %6064  ;;  %v6199_v26 = vpop.permute.xlu0 %6198 }
 0x77d   :  { %v6069_v6 = vsel %vm6066_vm7, %v6063_v16, %v6065_v9  ;;  %6206 = vst.msk [vmem:[%s10869_s11 + $0x29] sm:$0x1] %vm5787_vm14, %v6199_v26  ;;  %v6516_v16 = vperm.slane %v6512_v3, 0  ;;  %v6329_v26 = vrot.slane %v6328_v11, 1  ;;  %v6337_v8 = vperm.slane %v6331_v28, 1 }
 0x77e   :  { %6075 = vst.msk [vmem:[%s10869_s11 + $0x46] sm:$0x1] %vm5787_vm14, %v6069_v6  ;;  %v6336_v6 = vperm.slane %v6331_v28, 0  ;;  %v6610_v11 = vrot.slane %v6607_v40, 2 }
 0x77f   :  { %v6334_v14 = vperm.slane %v6329_v26, 0 }
 0x780   :  { %6709 = vrot.lane.b32.xlu2 %v6706_v49, %s8338_s8 }
 0x782   :  { %6694 = vrot.lane.b32.xlu1 %v6689_v50, %s8337_s17  ;;  %6340 = vrot.lane.b32.xlu0 %v6333_v33, %s8339_s19  ;;  %v6156_v17 = vpop.permute.xlu2 %6155 }
 0x784   :  { %v6182_v15 = vpop.permute.xlu1 %6181  ;;  %v6218_v53 = vpop.permute.xlu0 %6217 }
 0x785   :  { %7399 = vst.msk [vmem:[%s10869_s11 + $0xa8] sm:$0x1] %vm5787_vm14, %v6182_v15  ;;  %v6335_v15 = vperm.slane %v6329_v26, 1 }
 0x786   :  { %7401 = vst.msk [vmem:[%s10869_s11 + $0x89] sm:$0x1] %vm5787_vm14, %v6218_v53  ;;  %v6423_v53 = vsel %vm441_vm3, %v6417_v10, %v6421_v5 }
 0x788   :  { %6462 = vrot.lane.b32.xlu2 %v6459_v58, %s8340_s26  ;;  %v6627_v58 = vld [vmem:[#allocation6 + $0x20] sm:$0x7] }
 0x78a   :  { %6713 = vrot.lane.b32.xlu1 %v6708_v32, %s8338_s8  ;;  %6464 = vrot.lane.b32.xlu0 %v6460_v4, %s8340_s26  ;;  %v6273_v61 = vpop.permute.xlu2 %6272  ;;  %v6424_v4 = vrot.slane %v6423_v53, 1 }
 0x78b   :  { %7403 = vst.msk [vmem:[%s10869_s11 + $0x6a] sm:$0x1] %vm5787_vm14, %v6273_v61  ;;  %v10287_v61 = vrot.slane %v6627_v58, 7 }
 0x78c   :  { %v6201_v62 = vpop.permute.xlu1 %6200  ;;  %v6152_v22 = vpop.permute.xlu0 %6151  ;;  %v6430_v57 = vperm.slane %v6424_v4, 1 }
 0x78d   :  { %6207 = vst.msk [vmem:[%s10869_s11 + $0x49] sm:$0x1] %vm5787_vm14, %v6201_v62  ;;  %v6161_v51 = vsel %vm277_vm1, %v6150_v46, %v6152_v22  ;;  %v10296_v30 = vsel %vm5854_vm15, %v10281_v37, %v10287_v61  ;;  %v6632_v28 = vsel %vm441_vm3, %v10281_v37, %v10287_v61 }
 0x78e   :  { %6167 = vst.msk [vmem:[%s10869_s11 + $0x8] sm:$0x1] %vm5787_vm14, %v6161_v51  ;;  %v6429_v51 = vperm.slane %v6424_v4, 0  ;;  %v6537_v4 = vsel %vm441_vm3, %v6531_v34, %v6535_v2 }
 0x790   :  { %6481 = vrot.lane.b32.xlu2 %v6478_v20, %s8289_s14  ;;  %v6637_v20 = vperm.slane %v10296_v30, 1 }
 0x792   :  { %6466 = vrot.lane.b32.xlu1 %v6461_v13, %s8340_s26  ;;  %6483 = vrot.lane.b32.xlu0 %v6479_v29, %s8289_s14  ;;  %v6292_v24 = vpop.permute.xlu2 %6291  ;;  %v6569_v13 = vld [vmem:[#allocation6 + $0x40] sm:$0x7]  ;;  %s8345_s26 = smov 98  }
 0x793   :  { %6300 = vst.msk [vmem:[%s10869_s11 + $0xb] sm:$0x1] %vm5787_vm14, %v6292_v24  ;;  %v6573_v47 = vperm.slane %v6569_v13, 0 }
 0x794   :  { %v6220_v55 = vpop.permute.xlu1 %6219  ;;  %v6158_v52 = vpop.permute.xlu0 %6157 }
 0x795   :  { %7402 = vst.msk [vmem:[%s10869_s11 + $0xa9] sm:$0x1] %vm5787_vm14, %v6220_v55  ;;  %v6571_v55 = vrot.slane %v6569_v13, 1 }
 0x798   :  { %6500 = vrot.lane.b32.xlu2 %v6497_v21, %s8341_s25  ;;  %v6574_v21 = vperm.slane %v6571_v55, 0 }
 0x79a   :  { %6485 = vrot.lane.b32.xlu1 %v6480_v63, %s8289_s14  ;;  %6502 = vrot.lane.b32.xlu0 %v6498_v54, %s8341_s25  ;;  %v6311_v35 = vpop.permute.xlu2 %6310  ;;  %v6588_v63 = vld [vmem:[#allocation6 + $0x40] sm:$0x7] }
 0x79b   :  { %7406 = vst.msk [vmem:[%s10869_s11 + $0x6b] sm:$0x1] %vm5787_vm14, %v6311_v35  ;;  %v6592_v0 = vperm.slane %v6588_v63, 0 }
 0x79c   :  { %v6154_v59 = vpop.permute.xlu1 %6153  ;;  %v6275_v48 = vpop.permute.xlu0 %6274 }
 0x79d   :  { %v6162_v31 = vsel %vm277_vm1, %v6154_v59, %v6156_v17  ;;  %7404 = vst.msk [vmem:[%s10869_s11 + $0x8a] sm:$0x1] %vm5787_vm14, %v6275_v48  ;;  %v6572_v59 = vrot.slane %v6569_v13, 2  ;;  %v6590_v48 = vrot.slane %v6588_v63, 1 }
 0x79e   :  { %6168 = vst.msk [vmem:[%s10869_s11 + $0x28] sm:$0x1] %vm5787_vm14, %v6162_v31 }
 0x79f   :  { %v6575_v31 = vperm.slane %v6572_v59, 0 }
 0x7a0   :  { %6519 = vrot.lane.b32.xlu2 %v6516_v16, %s8342_s13  ;;  %v6593_v16 = vperm.slane %v6590_v48, 0 }
 0x7a2   :  { %6504 = vrot.lane.b32.xlu1 %v6499_v27, %s8341_s25  ;;  %6521 = vrot.lane.b32.xlu0 %v6517_v1, %s8342_s13  ;;  %v6244_v43 = vpop.permute.xlu2 %6243  ;;  %s8349_s25 = smov 9  }
 0x7a4   :  { %v6160_v60 = vpop.permute.xlu1 %6159  ;;  %v6294_v39 = vpop.permute.xlu0 %6293 }
 0x7a5   :  { %v6163_v19 = vsel %vm277_vm1, %v6158_v52, %v6160_v60  ;;  %6301 = vst.msk [vmem:[%s10869_s11 + $0x2b] sm:$0x1] %vm5787_vm14, %v6294_v39  ;;  %v6609_v60 = vrot.slane %v6607_v40, 1  ;;  %v6611_v39 = vperm.slane %v6607_v40, 0  ;;  %vm6350_vm1 = vcmask 195584  }
 0x7a6   :  { %6169 = vst.msk [vmem:[%s10869_s11 + $0x48] sm:$0x1] %vm5787_vm14, %v6163_v19 }
 0x7a7   :  { %v6612_v19 = vperm.slane %v6609_v60, 0 }
 0x7a8   :  { %6338 = vrot.lane.b32.xlu2 %v6332_v38, %s8339_s19 }
 0x7aa   :  { %6523 = vrot.lane.b32.xlu1 %v6518_v12, %s8342_s13  ;;  %6435 = vrot.lane.b32.xlu0 %v6428_v18, %s8343_s18  ;;  %v6250_v7 = vpop.permute.xlu2 %6249  ;;  %s8346_s13 = smov 1  }
 0x7ac   :  { %v6277_v46 = vpop.permute.xlu1 %6276  ;;  %v6313_v9 = vpop.permute.xlu0 %6312 }
 0x7ad   :  { %7405 = vst.msk [vmem:[%s10869_s11 + $0xaa] sm:$0x1] %vm5787_vm14, %v6277_v46  ;;  %v6636_v46 = vperm.slane %v10296_v30, 0  ;;  %v6538_v30 = vrot.slane %v6537_v4, 1 }
 0x7ae   :  { %7407 = vst.msk [vmem:[%s10869_s11 + $0x8b] sm:$0x1] %vm5787_vm14, %v6313_v9  ;;  %v6613_v9 = vperm.slane %v6610_v11, 0 }
 0x7af   :  { %v6544_v13 = vperm.slane %v6538_v30, 1 }
 0x7b0   :  { %6433 = vrot.lane.b32.xlu2 %v6427_v25, %s8343_s18  ;;  %v6634_v25 = vsel %vm444_vm4, %v10281_v37, %v10287_v61 }
 0x7b2   :  { %6342 = vrot.lane.b32.xlu1 %v6334_v14, %s8339_s19  ;;  %6346 = vrot.lane.b32.xlu0 %v6336_v6, %s8339_s19  ;;  %v6368_v49 = vpop.permute.xlu2 %6367 }
 0x7b3   :  { %7409 = vst.msk [vmem:[%s10869_s11 + $0x6c] sm:$0x1] %vm5787_vm14, %v6368_v49  ;;  %v6633_v49 = vrot.slane %v6632_v28, 1 }
 0x7b4   :  { %v6296_v50 = vpop.permute.xlu1 %6295  ;;  %v6246_v33 = vpop.permute.xlu0 %6245 }
 0x7b5   :  { %6302 = vst.msk [vmem:[%s10869_s11 + $0x4b] sm:$0x1] %vm5787_vm14, %v6296_v50  ;;  %v6256_v17 = vsel %vm6255_vm0, %v6244_v43, %v6246_v33  ;;  %v6591_v43 = vrot.slane %v6588_v63, 2  ;;  %v6635_v50 = vrot.slane %v6634_v25, 2  ;;  %v6638_v36 = vperm.slane %v6633_v49, 0 }
 0x7b6   :  { %6262 = vst.msk [vmem:[%s10869_s11 + $0xa] sm:$0x1] %vm5787_vm14, %v6256_v17 }
 0x7b7   :  { %v6594_v10 = vperm.slane %v6591_v43, 0  ;;  %v6640_v17 = vperm.slane %v6635_v50, 0  ;;  %v6641_v37 = vperm.slane %v6635_v50, 1  ;;  %v10467_v50 = vld [vmem:[#allocation6 + $0x20] sm:$0x7] }
 0x7b8   :  { %6344 = vrot.lane.b32.xlu2 %v6335_v15, %s8339_s19  ;;  %v6539_v15 = vsel %vm444_vm4, %v6531_v34, %v6535_v2 }
 0x7b9   :  { %v6540_v58 = vrot.slane %v6539_v15, 2 }
 0x7ba   :  { %6348 = vrot.lane.b32.xlu1 %v6337_v8, %s8339_s19  ;;  %6441 = vrot.lane.b32.xlu0 %v6431_v42, %s8343_s18  ;;  %v6387_v32 = vpop.permute.xlu2 %6386  ;;  %s8344_s19 = smov 5  }
 0x7bb   :  { %6395 = vst.msk [vmem:[%s10869_s11 + $0xd] sm:$0x1] %vm5787_vm14, %v6387_v32  ;;  %v6639_v32 = vperm.slane %v6633_v49, 1  ;;  %v6545_v61 = vperm.slane %v6540_v58, 0  ;;  %v6546_v63 = vperm.slane %v6540_v58, 1 }
 0x7bc   :  { %v6315_v62 = vpop.permute.xlu1 %6314  ;;  %v6252_v22 = vpop.permute.xlu0 %6251 }
 0x7bd   :  { %7408 = vst.msk [vmem:[%s10869_s11 + $0xab] sm:$0x1] %vm5787_vm14, %v6315_v62  ;;  %v6759_v62 = vld [vmem:[#allocation6 + $0x10] sm:$0x7] }
 0x7c0   :  { %6439 = vrot.lane.b32.xlu2 %v6430_v57, %s8343_s18 }
 0x7c2   :  { %6437 = vrot.lane.b32.xlu1 %v6429_v51, %s8343_s18  ;;  %6644 = vrot.lane.b32.xlu0 %v6637_v20, %s8344_s19  ;;  %v6406_v29 = vpop.permute.xlu2 %6405  ;;  %v6761_v20 = vrot.slane %v6759_v62, 1 }
 0x7c3   :  { %7412 = vst.msk [vmem:[%s10869_s11 + $0x6d] sm:$0x1] %vm5787_vm14, %v6406_v29  ;;  %v6543_v29 = vperm.slane %v6538_v30, 0 }
 0x7c4   :  { %v6248_v41 = vpop.permute.xlu1 %6247  ;;  %v6370_v24 = vpop.permute.xlu0 %6369 }
 0x7c5   :  { %v6257_v52 = vsel %vm6255_vm0, %v6248_v41, %v6250_v7  ;;  %7410 = vst.msk [vmem:[%s10869_s11 + $0x8c] sm:$0x1] %vm5787_vm14, %v6370_v24  ;;  %v6536_v7 = vsel %vm5854_vm15, %v6531_v34, %v6535_v2  ;;  %v6764_v41 = vperm.slane %v6761_v20, 0  ;;  %v6778_v24 = vld [vmem:[#allocation6 + $0x10] sm:$0x7] }
 0x7c6   :  { %6263 = vst.msk [vmem:[%s10869_s11 + $0x2a] sm:$0x1] %vm5787_vm14, %v6257_v52  ;;  %v6542_v26 = vperm.slane %v6536_v7, 1  ;;  %v6541_v33 = vperm.slane %v6536_v7, 0 }
 0x7c8   :  { %6576 = vrot.lane.b32.xlu2 %v6573_v47, %s8345_s26 }
 0x7ca   :  { %6443 = vrot.lane.b32.xlu1 %v6432_v44, %s8343_s18  ;;  %6578 = vrot.lane.b32.xlu0 %v6574_v21, %s8345_s26  ;;  %v6672_v54 = vpop.permute.xlu2 %6671  ;;  %v6780_v44 = vrot.slane %v6778_v24, 1  ;;  %v6763_v21 = vperm.slane %v6759_v62, 0  ;;  %s8352_s18 = smov 13  }
 0x7cb   :  { %6680 = vst.msk [vmem:[%s10869_s11 + $0x13] sm:$0x1] %vm5787_vm14, %v6672_v54 }
 0x7cc   :  { %v6254_v3 = vpop.permute.xlu1 %6253  ;;  %v6389_v35 = vpop.permute.xlu0 %6388  ;;  %v6783_v54 = vperm.slane %v6780_v44, 0  ;;  %v6892_v44 = vld [vmem:[#allocation6 + $0x38] sm:$0x7] }
 0x7cd   :  { %v6258_v23 = vsel %vm6255_vm0, %v6252_v22, %v6254_v3  ;;  %6396 = vst.msk [vmem:[%s10869_s11 + $0x2d] sm:$0x1] %vm5787_vm14, %v6389_v35  ;;  %v6797_v3 = vld [vmem:[#allocation6 + $0x10] sm:$0x7] }
 0x7ce   :  { %6264 = vst.msk [vmem:[%s10869_s11 + $0x4a] sm:$0x1] %vm5787_vm14, %v6258_v23  ;;  %v6800_v34 = vrot.slane %v6797_v3, 2 }
 0x7d0   :  { %6595 = vrot.lane.b32.xlu2 %v6592_v0, %s8280_s27  ;;  %v6762_v0 = vrot.slane %v6759_v62, 2 }
 0x7d2   :  { %6580 = vrot.lane.b32.xlu1 %v6575_v31, %s8345_s26  ;;  %6597 = vrot.lane.b32.xlu0 %v6593_v16, %s8280_s27  ;;  %v6691_v27 = vpop.permute.xlu2 %6690  ;;  %v6799_v31 = vrot.slane %v6797_v3, 1  ;;  %v6782_v16 = vperm.slane %v6778_v24, 0  ;;  %v6765_v40 = vperm.slane %v6762_v0, 0  ;;  %s8355_s26 = smov 83  }
 0x7d3   :  { %7430 = vst.msk [vmem:[%s10869_s11 + $0x73] sm:$0x1] %vm5787_vm14, %v6691_v27 }
 0x7d4   :  { %v6372_v1 = vpop.permute.xlu1 %6371  ;;  %v6408_v5 = vpop.permute.xlu0 %6407  ;;  %v6802_v27 = vperm.slane %v6799_v31, 0 }
 0x7d5   :  { %7411 = vst.msk [vmem:[%s10869_s11 + $0xac] sm:$0x1] %vm5787_vm14, %v6372_v1  ;;  %v7043_v1 = vld [vmem:[#allocation6 + $0x70] sm:$0x7] }
 0x7d6   :  { %7413 = vst.msk [vmem:[%s10869_s11 + $0x8d] sm:$0x1] %vm5787_vm14, %v6408_v5  ;;  %v7045_v56 = vrot.slane %v7043_v1, 1  ;;  %v7046_v49 = vrot.slane %v7043_v1, 2 }
 0x7d8   :  { %6614 = vrot.lane.b32.xlu2 %v6611_v39, %s8301_s0  ;;  %v6781_v39 = vrot.slane %v6778_v24, 2  ;;  %v7048_v2 = vperm.slane %v7045_v56, 0  ;;  %v7049_v15 = vperm.slane %v7046_v49, 0 }
 0x7da   :  { %6599 = vrot.lane.b32.xlu1 %v6594_v10, %s8280_s27  ;;  %6616 = vrot.lane.b32.xlu0 %v6612_v19, %s8301_s0  ;;  %v6710_v38 = vpop.permute.xlu2 %6709  ;;  %v6801_v10 = vperm.slane %v6797_v3, 0  ;;  %v6784_v19 = vperm.slane %v6781_v39, 0 }
 0x7db   :  { %6718 = vst.msk [vmem:[%s10869_s11 + $0x14] sm:$0x1] %vm5787_vm14, %v6710_v38  ;;  %v7062_v38 = vld [vmem:[#allocation6 + $0x70] sm:$0x7] }
 0x7dc   :  { %v6391_v12 = vpop.permute.xlu1 %6390  ;;  %v6674_v18 = vpop.permute.xlu0 %6673  ;;  %v7064_v7 = vrot.slane %v7062_v38, 1  ;;  %v7065_v4 = vrot.slane %v7062_v38, 2 }
 0x7dd   :  { %6397 = vst.msk [vmem:[%s10869_s11 + $0x4d] sm:$0x1] %vm5787_vm14, %v6391_v12 }
 0x7de   :  { %6681 = vst.msk [vmem:[%s10869_s11 + $0x33] sm:$0x1] %vm5787_vm14, %v6674_v18  ;;  %v7067_v28 = vperm.slane %v7064_v7, 0 }
 0x7e0   :  { %6642 = vrot.lane.b32.xlu2 %v6636_v46, %s8344_s19  ;;  %v7047_v46 = vperm.slane %v7043_v1, 0 }
 0x7e2   :  { %6618 = vrot.lane.b32.xlu1 %v6613_v9, %s8301_s0  ;;  %6549 = vrot.lane.b32.xlu0 %v6542_v26, %s8346_s13  ;;  %v6463_v14 = vpop.permute.xlu2 %6462  ;;  %v6722_v9 = vld [vmem:[#allocation6 + $0x10] sm:$0x7]  ;;  %v6803_v26 = vperm.slane %v6800_v34, 0 }
 0x7e3   :  { %7415 = vst.msk [vmem:[%s10869_s11 + $0x6e] sm:$0x1] %vm5787_vm14, %v6463_v14  ;;  %v10463_v25 = vrot.slane %v6722_v9, 7 }
 0x7e4   :  { %v6410_v6 = vpop.permute.xlu1 %6409  ;;  %v6693_v45 = vpop.permute.xlu0 %6692 }
 0x7e5   :  { %7414 = vst.msk [vmem:[%s10869_s11 + $0xad] sm:$0x1] %vm5787_vm14, %v6410_v6 }
 0x7e6   :  { %7431 = vst.msk [vmem:[%s10869_s11 + $0x93] sm:$0x1] %vm5787_vm14, %v6693_v45 }
 0x7e8   :  { %6547 = vrot.lane.b32.xlu2 %v6541_v33, %s8346_s13 }
 0x7ea   :  { %6646 = vrot.lane.b32.xlu1 %v6638_v36, %s8344_s19  ;;  %6650 = vrot.lane.b32.xlu0 %v6640_v17, %s8344_s19  ;;  %v6482_v53 = vpop.permute.xlu2 %6481  ;;  %v10477_v36 = vsel %vm5854_vm15, %v10467_v50, %v10463_v25  ;;  %v7066_v17 = vperm.slane %v7062_v38, 0  ;;  %v6727_v38 = vsel %vm441_vm3, %v10467_v50, %v10463_v25 }
 0x7eb   :  { %6490 = vst.msk [vmem:[%s10869_s11 + $0xf] sm:$0x1] %vm5787_vm14, %v6482_v53  ;;  %v6732_v53 = vperm.slane %v10477_v36, 1  ;;  %v6728_v7 = vrot.slane %v6727_v38, 1 }
 0x7ec   :  { %v6676_v8 = vpop.permute.xlu1 %6675  ;;  %v6712_v42 = vpop.permute.xlu0 %6711 }
 0x7ed   :  { %6682 = vst.msk [vmem:[%s10869_s11 + $0x53] sm:$0x1] %vm5787_vm14, %v6676_v8  ;;  %v6854_v8 = vld [vmem:[#allocation6 + $0x38] sm:$0x7] }
 0x7ee   :  { %6719 = vst.msk [vmem:[%s10869_s11 + $0x34] sm:$0x1] %vm5787_vm14, %v6712_v42  ;;  %v6858_v62 = vperm.slane %v6854_v8, 0 }
 0x7f0   :  { %6648 = vrot.lane.b32.xlu2 %v6639_v32, %s8344_s19 }
 0x7f2   :  { %6652 = vrot.lane.b32.xlu1 %v6641_v37, %s8344_s19  ;;  %6555 = vrot.lane.b32.xlu0 %v6545_v61, %s8346_s13  ;;  %v6501_v22 = vpop.permute.xlu2 %6500  ;;  %s8347_s19 = smov 106   ;;  %v6856_v37 = vrot.slane %v6854_v8, 1 }
 0x7f3   :  { %7418 = vst.msk [vmem:[%s10869_s11 + $0x6f] sm:$0x1] %vm5787_vm14, %v6501_v22  ;;  %v7068_v22 = vperm.slane %v7065_v4, 0 }
 0x7f4   :  { %v6695_v57 = vpop.permute.xlu1 %6694  ;;  %v6341_v51 = vpop.permute.xlu0 %6340  ;;  %v6859_v30 = vperm.slane %v6856_v37, 0 }
 0x7f5   :  { %7432 = vst.msk [vmem:[%s10869_s11 + $0xb3] sm:$0x1] %vm5787_vm14, %v6695_v57  ;;  %v6873_v57 = vld [vmem:[#allocation6 + $0x38] sm:$0x7] }
 0x7f6   :  { %v6876_v3 = vrot.slane %v6873_v57, 2 }
 0x7f8   :  { %6553 = vrot.lane.b32.xlu2 %v6544_v13, %s8346_s13  ;;  %v6879_v0 = vperm.slane %v6876_v3, 0 }
 0x7fa   :  { %6551 = vrot.lane.b32.xlu1 %v6543_v29, %s8346_s13  ;;  %6768 = vrot.lane.b32.xlu0 %v6764_v41, %s8347_s19  ;;  %v6520_v55 = vpop.permute.xlu2 %6519  ;;  %v6857_v29 = vrot.slane %v6854_v8, 2  ;;  %v6875_v41 = vrot.slane %v6873_v57, 1 }
 0x7fb   :  { %6528 = vst.msk [vmem:[%s10869_s11 + $0x10] sm:$0x1] %vm5787_vm14, %v6520_v55  ;;  %v6877_v55 = vperm.slane %v6873_v57, 0  ;;  %v6948_v57 = vld [vmem:[#allocation6 + $0x60] sm:$0x7] }
 0x7fc   :  { %v6714_v52 = vpop.permute.xlu1 %6713  ;;  %v6465_v47 = vpop.permute.xlu0 %6464 }
 0x7fd   :  { %6720 = vst.msk [vmem:[%s10869_s11 + $0x54] sm:$0x1] %vm5787_vm14, %v6714_v52  ;;  %v6860_v52 = vperm.slane %v6857_v29, 0  ;;  %v6950_v29 = vrot.slane %v6948_v57, 1 }
 0x7fe   :  { %7416 = vst.msk [vmem:[%s10869_s11 + $0x8e] sm:$0x1] %vm5787_vm14, %v6465_v47  ;;  %v6878_v47 = vperm.slane %v6875_v41, 0 }
 0x800   :  { %6766 = vrot.lane.b32.xlu2 %v6763_v21, %s8347_s19 }
 0x802   :  { %6557 = vrot.lane.b32.xlu1 %v6546_v63, %s8346_s13  ;;  %6787 = vrot.lane.b32.xlu0 %v6783_v54, %s8285_s12  ;;  %v6339_v35 = vpop.permute.xlu2 %6338 }
 0x803   :  { %v6351_v59 = vsel %vm6350_vm1, %v6339_v35, %v6341_v51  ;;  %v6894_v35 = vrot.slane %v6892_v44, 1 }
 0x804   :  { %6357 = vst.msk [vmem:[%s10869_s11 + $0xc] sm:$0x1] %vm5787_vm14, %v6351_v59  ;;  %v6467_v48 = vpop.permute.xlu1 %6466  ;;  %v6484_v23 = vpop.permute.xlu0 %6483 }
 0x805   :  { %7417 = vst.msk [vmem:[%s10869_s11 + $0xae] sm:$0x1] %vm5787_vm14, %v6467_v48  ;;  %v6896_v48 = vperm.slane %v6892_v44, 0  ;;  %v6897_v31 = vperm.slane %v6894_v35, 0 }
 0x806   :  { %6491 = vst.msk [vmem:[%s10869_s11 + $0x2f] sm:$0x1] %vm5787_vm14, %v6484_v23  ;;  %v6817_v23 = vld [vmem:[#allocation6 + $0x38] sm:$0x7] }
 0x808   :  { %6785 = vrot.lane.b32.xlu2 %v6782_v16, %s8285_s12  ;;  %v6820_v16 = vrot.slane %v6817_v23, 7 }
 0x80a   :  { %6770 = vrot.lane.b32.xlu1 %v6765_v40, %s8347_s19  ;;  %6806 = vrot.lane.b32.xlu0 %v6802_v27, %s8304_s15  ;;  %v6434_v5 = vpop.permute.xlu2 %6433 }
 0x80c   :  { %v6486_v43 = vpop.permute.xlu1 %6485  ;;  %v6503_v60 = vpop.permute.xlu0 %6502 }
 0x80d   :  { %6492 = vst.msk [vmem:[%s10869_s11 + $0x4f] sm:$0x1] %vm5787_vm14, %v6486_v43  ;;  %v6895_v43 = vrot.slane %v6892_v44, 2 }
 0x80e   :  { %7419 = vst.msk [vmem:[%s10869_s11 + $0x8f] sm:$0x1] %vm5787_vm14, %v6503_v60  ;;  %v6816_v60 = vld [vmem:[#allocation6 + $0x10] sm:$0x7] }
 0x80f   :  { %v6821_v56 = vsel %vm5854_vm15, %v6816_v60, %v6820_v16 }
 0x810   :  { %6804 = vrot.lane.b32.xlu2 %v6801_v10, %s8304_s15  ;;  %v6731_v10 = vperm.slane %v10477_v36, 0  ;;  %v6826_v9 = vperm.slane %v6821_v56, 0 }
 0x812   :  { %6789 = vrot.lane.b32.xlu1 %v6784_v19, %s8285_s12  ;;  %7052 = vrot.lane.b32.xlu0 %v7048_v2, %s8282_s28  ;;  %v6345_v12 = vpop.permute.xlu2 %6344  ;;  %s8348_s12 = smov 87   ;;  %v6898_v19 = vperm.slane %v6895_v43, 0  ;;  %v6827_v2 = vperm.slane %v6821_v56, 1 }
 0x814   :  { %v6505_v18 = vpop.permute.xlu1 %6504  ;;  %v6522_v11 = vpop.permute.xlu0 %6521 }
 0x815   :  { %7420 = vst.msk [vmem:[%s10869_s11 + $0xaf] sm:$0x1] %vm5787_vm14, %v6505_v18 }
 0x816   :  { %6529 = vst.msk [vmem:[%s10869_s11 + $0x30] sm:$0x1] %vm5787_vm14, %v6522_v11 }
 0x818   :  { %7050 = vrot.lane.b32.xlu2 %v7047_v46, %s8282_s28 }
 0x81a   :  { %6808 = vrot.lane.b32.xlu1 %v6803_v26, %s8304_s15  ;;  %7071 = vrot.lane.b32.xlu0 %v7067_v28, %s8348_s12  ;;  %v6440_v14 = vpop.permute.xlu2 %6439  ;;  %v6733_v26 = vperm.slane %v6728_v7, 0 }
 0x81c   :  { %v6524_v6 = vpop.permute.xlu1 %6523  ;;  %v6436_v45 = vpop.permute.xlu0 %6435 }
 0x81d   :  { %6530 = vst.msk [vmem:[%s10869_s11 + $0x50] sm:$0x1] %vm5787_vm14, %v6524_v6  ;;  %v6446_v33 = vsel %vm6445_vm8, %v6434_v5, %v6436_v45 }
 0x81e   :  { %6452 = vst.msk [vmem:[%s10869_s11 + $0xe] sm:$0x1] %vm5787_vm14, %v6446_v33  ;;  %v6822_v33 = vsel %vm441_vm3, %v6816_v60, %v6820_v16 }
 0x81f   :  { %v6823_v8 = vrot.slane %v6822_v33, 1 }
 0x820   :  { %7069 = vrot.lane.b32.xlu2 %v7066_v17, %s8348_s12 }
 0x822   :  { %7054 = vrot.lane.b32.xlu1 %v7049_v15, %s8282_s28  ;;  %6739 = vrot.lane.b32.xlu0 %v6732_v53, %s8349_s25  ;;  %v6577_v42 = vpop.permute.xlu2 %6576  ;;  %v7006_v15 = vld [vmem:[#allocation6 + $0x70] sm:$0x7]  ;;  %s8353_s28 = smov 21  }
 0x823   :  { %6585 = vst.msk [vmem:[%s10869_s11 + $0x11] sm:$0x1] %vm5787_vm14, %v6577_v42  ;;  %v10566_v42 = vld [vmem:[#allocation6 + $0x60] sm:$0x7] }
 0x824   :  { %v6343_v58 = vpop.permute.xlu1 %6342  ;;  %v6347_v32 = vpop.permute.xlu0 %6346 }
 0x825   :  { %v6352_v61 = vsel %vm6350_vm1, %v6343_v58, %v6345_v12  ;;  %v6729_v12 = vsel %vm444_vm4, %v10467_v50, %v10463_v25  ;;  %v6824_v25 = vsel %vm444_vm4, %v6816_v60, %v6820_v16  ;;  %v6734_v50 = vperm.slane %v6728_v7, 1  ;;  %v6912_v60 = vld [vmem:[#allocation6 + $0x60] sm:$0x7] }
 0x826   :  { %6358 = vst.msk [vmem:[%s10869_s11 + $0x2c] sm:$0x1] %vm5787_vm14, %v6352_v61  ;;  %v6730_v46 = vrot.slane %v6729_v12, 2  ;;  %v6825_v49 = vrot.slane %v6824_v25, 2  ;;  %v10568_v58 = vrot.slane %v7006_v15, 7 }
 0x828   :  { %6861 = vrot.lane.b32.xlu2 %v6858_v62, %s8274_s7  ;;  %v6735_v28 = vperm.slane %v6730_v46, 0  ;;  %v6736_v36 = vperm.slane %v6730_v46, 1  ;;  %v6830_v17 = vperm.slane %v6825_v49, 0  ;;  %v10578_v61 = vsel %vm5854_vm15, %v10566_v42, %v10568_v58 }
 0x829   :  { %v6829_v62 = vperm.slane %v6823_v8, 1  ;;  %v7015_v7 = vperm.slane %v10578_v61, 0 }
 0x82a   :  { %7073 = vrot.lane.b32.xlu1 %v7068_v22, %s8348_s12  ;;  %6863 = vrot.lane.b32.xlu0 %v6859_v30, %s8274_s7  ;;  %v6596_v51 = vpop.permute.xlu2 %6595  ;;  %v6828_v22 = vperm.slane %v6823_v8, 0  ;;  %v7016_v30 = vperm.slane %v10578_v61, 1 }
 0x82b   :  { %7424 = vst.msk [vmem:[%s10869_s11 + $0x71] sm:$0x1] %vm5787_vm14, %v6596_v51 }
 0x82c   :  { %v6349_v20 = vpop.permute.xlu1 %6348  ;;  %v6442_v13 = vpop.permute.xlu0 %6441 }
 0x82d   :  { %v6353_v24 = vsel %vm6350_vm1, %v6347_v32, %v6349_v20 }
 0x82e   :  { %6359 = vst.msk [vmem:[%s10869_s11 + $0x4c] sm:$0x1] %vm5787_vm14, %v6353_v24  ;;  %v6952_v24 = vperm.slane %v6948_v57, 0 }
 0x830   :  { %6880 = vrot.lane.b32.xlu2 %v6877_v55, %s8350_s9  ;;  %v6831_v55 = vperm.slane %v6825_v49, 1 }
 0x832   :  { %6865 = vrot.lane.b32.xlu1 %v6860_v52, %s8274_s7  ;;  %6882 = vrot.lane.b32.xlu0 %v6878_v47, %s8350_s9  ;;  %v6615_v21 = vpop.permute.xlu2 %6614  ;;  %s8351_s7 = smov 48   ;;  %v6953_v52 = vperm.slane %v6950_v29, 0  ;;  %v6967_v47 = vld [vmem:[#allocation6 + $0x60] sm:$0x7] }
 0x833   :  { %6623 = vst.msk [vmem:[%s10869_s11 + $0x12] sm:$0x1] %vm5787_vm14, %v6615_v21  ;;  %v6969_v3 = vrot.slane %v6967_v47, 1 }
 0x834   :  { %v6438_v63 = vpop.permute.xlu1 %6437  ;;  %v6645_v54 = vpop.permute.xlu0 %6644 }
 0x835   :  { %v6447_v59 = vsel %vm6445_vm8, %v6438_v63, %v6440_v14  ;;  %v6972_v23 = vperm.slane %v6969_v3, 0 }
 0x836   :  { %6453 = vst.msk [vmem:[%s10869_s11 + $0x2e] sm:$0x1] %vm5787_vm14, %v6447_v59  ;;  %v6971_v59 = vperm.slane %v6967_v47, 0 }
 0x838   :  { %6899 = vrot.lane.b32.xlu2 %v6896_v48, %s8351_s7 }
 0x83a   :  { %6884 = vrot.lane.b32.xlu1 %v6879_v0, %s8350_s9  ;;  %6901 = vrot.lane.b32.xlu0 %v6897_v31, %s8351_s7  ;;  %v6643_v40 = vpop.permute.xlu2 %6642  ;;  %v6986_v0 = vld [vmem:[#allocation6 + $0x60] sm:$0x7] }
 0x83b   :  { %v6655_v27 = vsel %vm6654_vm9, %v6643_v40, %v6645_v54  ;;  %v6951_v54 = vrot.slane %v6948_v57, 2  ;;  %v6990_v43 = vperm.slane %v6986_v0, 0  ;;  %v6989_v12 = vrot.slane %v6986_v0, 2 }
 0x83c   :  { %7427 = vst.msk [vmem:[%s10869_s11 + $0x72] sm:$0x1] %vm5787_vm14, %v6655_v27  ;;  %v6444_v1 = vpop.permute.xlu1 %6443  ;;  %v6579_v5 = vpop.permute.xlu0 %6578  ;;  %v6970_v27 = vrot.slane %v6967_v47, 2 }
 0x83d   :  { %v6448_v39 = vsel %vm6445_vm8, %v6442_v13, %v6444_v1  ;;  %6586 = vst.msk [vmem:[%s10869_s11 + $0x31] sm:$0x1] %vm5787_vm14, %v6579_v5  ;;  %v6954_v48 = vperm.slane %v6951_v54, 0  ;;  %v6988_v1 = vrot.slane %v6986_v0, 1  ;;  %v6992_v46 = vperm.slane %v6989_v12, 0 }
 0x83e   :  { %6454 = vst.msk [vmem:[%s10869_s11 + $0x4e] sm:$0x1] %vm5787_vm14, %v6448_v39  ;;  %v6973_v39 = vperm.slane %v6970_v27, 0 }
 0x83f   :  { %v6991_v56 = vperm.slane %v6988_v1, 0 }
 0x840   :  { %6737 = vrot.lane.b32.xlu2 %v6731_v10, %s8349_s25  ;;  %v6915_v10 = vrot.slane %v6912_v60, 7 }
 0x842   :  { %6903 = vrot.lane.b32.xlu1 %v6898_v19, %s8351_s7  ;;  %6834 = vrot.lane.b32.xlu0 %v6827_v2, %s8352_s18  ;;  %v6548_v18 = vpop.permute.xlu2 %6547 }
 0x844   :  { %v6581_v11 = vpop.permute.xlu1 %6580  ;;  %v6598_v34 = vpop.permute.xlu0 %6597 }
 0x845   :  { %6587 = vst.msk [vmem:[%s10869_s11 + $0x51] sm:$0x1] %vm5787_vm14, %v6581_v11 }
 0x846   :  { %7425 = vst.msk [vmem:[%s10869_s11 + $0x91] sm:$0x1] %vm5787_vm14, %v6598_v34 }
 0x848   :  { %6832 = vrot.lane.b32.xlu2 %v6826_v9, %s8352_s18 }
 0x84a   :  { %6741 = vrot.lane.b32.xlu1 %v6733_v26, %s8349_s25  ;;  %6745 = vrot.lane.b32.xlu0 %v6735_v28, %s8349_s25  ;;  %v6649_v14 = vpop.permute.xlu2 %6648  ;;  %v7011_v26 = vsel %vm441_vm3, %v10566_v42, %v10568_v58  ;;  %v7013_v28 = vsel %vm444_vm4, %v10566_v42, %v10568_v58 }
 0x84b   :  { %v7014_v49 = vrot.slane %v7013_v28, 2 }
 0x84c   :  { %v6600_v6 = vpop.permute.xlu1 %6599  ;;  %v6617_v45 = vpop.permute.xlu0 %6616 }
 0x84d   :  { %7426 = vst.msk [vmem:[%s10869_s11 + $0xb1] sm:$0x1] %vm5787_vm14, %v6600_v6  ;;  %v7020_v61 = vperm.slane %v7014_v49, 1 }
 0x84e   :  { %6624 = vst.msk [vmem:[%s10869_s11 + $0x32] sm:$0x1] %vm5787_vm14, %v6617_v45  ;;  %v7012_v45 = vrot.slane %v7011_v26, 1 }
 0x850   :  { %6743 = vrot.lane.b32.xlu2 %v6734_v50, %s8349_s25  ;;  %v7017_v33 = vperm.slane %v7012_v45, 0 }
 0x852   :  { %6747 = vrot.lane.b32.xlu1 %v6736_v36, %s8349_s25  ;;  %6840 = vrot.lane.b32.xlu0 %v6830_v17, %s8352_s18  ;;  %v6554_v53 = vpop.permute.xlu2 %6553  ;;  %v7019_v36 = vperm.slane %v7014_v49, 0 }
 0x854   :  { %v6619_v32 = vpop.permute.xlu1 %6618  ;;  %v6550_v4 = vpop.permute.xlu0 %6549 }
 0x855   :  { %6625 = vst.msk [vmem:[%s10869_s11 + $0x52] sm:$0x1] %vm5787_vm14, %v6619_v32  ;;  %v6560_v37 = vsel %vm6559_vm10, %v6548_v18, %v6550_v4  ;;  %v6911_v18 = vld [vmem:[#allocation6 + $0x38] sm:$0x7]  ;;  %v7018_v4 = vperm.slane %v7012_v45, 1 }
 0x856   :  { %7421 = vst.msk [vmem:[%s10869_s11 + $0x70] sm:$0x1] %vm5787_vm14, %v6560_v37  ;;  %v6916_v34 = vsel %vm5854_vm15, %v6911_v18, %v6915_v10  ;;  %v6919_v17 = vsel %vm444_vm4, %v6911_v18, %v6915_v10  ;;  %v6917_v37 = vsel %vm441_vm3, %v6911_v18, %v6915_v10 }
 0x857   :  { %v6922_v9 = vperm.slane %v6916_v34, 1  ;;  %v6921_v50 = vperm.slane %v6916_v34, 0  ;;  %v6920_v58 = vrot.slane %v6919_v17, 2 }
 0x858   :  { %6838 = vrot.lane.b32.xlu2 %v6829_v62, %s8352_s18 }
 0x859   :  { %v6925_v62 = vperm.slane %v6920_v58, 0 }
 0x85a   :  { %6836 = vrot.lane.b32.xlu1 %v6828_v22, %s8352_s18  ;;  %7023 = vrot.lane.b32.xlu0 %v7016_v30, %s8353_s28  ;;  %v6767_v51 = vpop.permute.xlu2 %6766  ;;  %v7100_v22 = vld [vmem:[#allocation6 + $0x70] sm:$0x7] }
 0x85b   :  { %6775 = vst.msk [vmem:[%s10869_s11 + $0x15] sm:$0x1] %vm5787_vm14, %v6767_v51  ;;  %v6918_v51 = vrot.slane %v6917_v37, 1 }
 0x85c   :  { %v6647_v20 = vpop.permute.xlu1 %6646  ;;  %v6651_v13 = vpop.permute.xlu0 %6650 }
 0x85d   :  { %v6656_v41 = vsel %vm6654_vm9, %v6647_v20, %v6649_v14 }
 0x85e   :  { %7428 = vst.msk [vmem:[%s10869_s11 + $0x92] sm:$0x1] %vm5787_vm14, %v6656_v41  ;;  %v6924_v41 = vperm.slane %v6918_v51, 1 }
 0x860   :  { %6955 = vrot.lane.b32.xlu2 %v6952_v24, %s8354_s23  ;;  %v6923_v24 = vperm.slane %v6918_v51, 0 }
 0x862   :  { %6842 = vrot.lane.b32.xlu1 %v6831_v55, %s8352_s18  ;;  %6957 = vrot.lane.b32.xlu0 %v6953_v52, %s8354_s23  ;;  %v6786_v44 = vpop.permute.xlu2 %6785 }
 0x863   :  { %7436 = vst.msk [vmem:[%s10869_s11 + $0x75] sm:$0x1] %vm5787_vm14, %v6786_v44 }
 0x864   :  { %v6653_v21 = vpop.permute.xlu1 %6652  ;;  %v6556_v63 = vpop.permute.xlu0 %6555 }
 0x865   :  { %v6657_v35 = vsel %vm6654_vm9, %v6651_v13, %v6653_v21 }
 0x866   :  { %7429 = vst.msk [vmem:[%s10869_s11 + $0xb2] sm:$0x1] %vm5787_vm14, %v6657_v35  ;;  %v6926_v35 = vperm.slane %v6920_v58, 1 }
 0x868   :  { %6974 = vrot.lane.b32.xlu2 %v6971_v59, %s8355_s26 }
 0x86a   :  { %6959 = vrot.lane.b32.xlu1 %v6954_v48, %s8354_s23  ;;  %6976 = vrot.lane.b32.xlu0 %v6972_v23, %s8355_s26  ;;  %v6805_v31 = vpop.permute.xlu2 %6804  ;;  %v7081_v48 = vld [vmem:[#allocation6 + $0x70] sm:$0x7] }
 0x86b   :  { %6813 = vst.msk [vmem:[%s10869_s11 + $0x16] sm:$0x1] %vm5787_vm14, %v6805_v31  ;;  %v7084_v12 = vrot.slane %v7081_v48, 2 }
 0x86c   :  { %v6552_v16 = vpop.permute.xlu1 %6551  ;;  %v6769_v40 = vpop.permute.xlu0 %6768 }
 0x86d   :  { %v6561_v5 = vsel %vm6559_vm10, %v6552_v16, %v6554_v53  ;;  %6776 = vst.msk [vmem:[%s10869_s11 + $0x35] sm:$0x1] %vm5787_vm14, %v6769_v40  ;;  %v7101_v53 = vld [vmem:[#allocation6 + $0x28] sm:$0x7]  ;;  %v7083_v40 = vrot.slane %v7081_v48, 1  ;;  %v7087_v18 = vperm.slane %v7084_v12, 0 }
 0x86e   :  { %7422 = vst.msk [vmem:[%s10869_s11 + $0x90] sm:$0x1] %vm5787_vm14, %v6561_v5  ;;  %v7104_v32 = vrot.slane %v7101_v53, 7 }
 0x86f   :  { %v7086_v5 = vperm.slane %v7083_v40, 0 }
 0x870   :  { %6993 = vrot.lane.b32.xlu2 %v6990_v43, %s8297_s6  ;;  %v7106_v30 = vsel %vm441_vm3, %v7100_v22, %v7104_v32  ;;  %v7108_v52 = vsel %vm444_vm4, %v7100_v22, %v7104_v32  ;;  %v7105_v44 = vsel %vm5854_vm15, %v7100_v22, %v7104_v32  ;;  %vm6749_vm3 = vcmask 72704  }
 0x871   :  { %v7107_v29 = vrot.slane %v7106_v30, 1  ;;  %v7109_v54 = vrot.slane %v7108_v52, 2  ;;  %v7111_v3 = vperm.slane %v7105_v44, 1  ;;  %v7110_v1 = vperm.slane %v7105_v44, 0 }
 0x872   :  { %6978 = vrot.lane.b32.xlu1 %v6973_v39, %s8355_s26  ;;  %6995 = vrot.lane.b32.xlu0 %v6991_v56, %s8297_s6  ;;  %v7051_v19 = vpop.permute.xlu2 %7050  ;;  %v7085_v56 = vperm.slane %v7081_v48, 0  ;;  %vm6844_vm4 = vcmask 105472  }
 0x873   :  { %7059 = vst.msk [vmem:[%s10869_s11 + $0x1b] sm:$0x1] %vm5787_vm14, %v7051_v19  ;;  %v7112_v55 = vperm.slane %v7107_v29, 0  ;;  %v7115_v59 = vperm.slane %v7109_v54, 1  ;;  %v7114_v27 = vperm.slane %v7109_v54, 0  ;;  %v7113_v10 = vperm.slane %v7107_v29, 1 }
 0x874   :  { %v6558_v2 = vpop.permute.xlu1 %6557  ;;  %v6788_v38 = vpop.permute.xlu0 %6787 }
 0x875   :  { %v6562_v11 = vsel %vm6559_vm10, %v6556_v63, %v6558_v2  ;;  %7437 = vst.msk [vmem:[%s10869_s11 + $0x95] sm:$0x1] %vm5787_vm14, %v6788_v38 }
 0x876   :  { %7423 = vst.msk [vmem:[%s10869_s11 + $0xb0] sm:$0x1] %vm5787_vm14, %v6562_v11 }
 0x878   :  { %7021 = vrot.lane.b32.xlu2 %v7015_v7, %s8353_s28 }
 0x87a   :  { %6997 = vrot.lane.b32.xlu1 %v6992_v46, %s8297_s6  ;;  %6929 = vrot.lane.b32.xlu0 %v6922_v9, %s8356_s22  ;;  %v7070_v25 = vpop.permute.xlu2 %7069 }
 0x87b   :  { %7454 = vst.msk [vmem:[%s10869_s11 + $0x7b] sm:$0x1] %vm5787_vm14, %v7070_v25 }
 0x87c   :  { %v6771_v14 = vpop.permute.xlu1 %6770  ;;  %v6807_v6 = vpop.permute.xlu0 %6806 }
 0x87d   :  { %6777 = vst.msk [vmem:[%s10869_s11 + $0x55] sm:$0x1] %vm5787_vm14, %v6771_v14 }
 0x87e   :  { %6814 = vst.msk [vmem:[%s10869_s11 + $0x36] sm:$0x1] %vm5787_vm14, %v6807_v6 }
 0x880   :  { %6927 = vrot.lane.b32.xlu2 %v6921_v50, %s8356_s22 }
 0x882   :  { %7025 = vrot.lane.b32.xlu1 %v7017_v33, %s8353_s28  ;;  %7029 = vrot.lane.b32.xlu0 %v7019_v36, %s8353_s28  ;;  %v6862_v15 = vpop.permute.xlu2 %6861 }
 0x883   :  { %6870 = vst.msk [vmem:[%s10869_s11 + $0x17] sm:$0x1] %vm5787_vm14, %v6862_v15 }
 0x884   :  { %v6790_v8 = vpop.permute.xlu1 %6789  ;;  %v7053_v42 = vpop.permute.xlu0 %7052 }
 0x885   :  { %7438 = vst.msk [vmem:[%s10869_s11 + $0xb5] sm:$0x1] %vm5787_vm14, %v6790_v8 }
 0x886   :  { %7060 = vst.msk [vmem:[%s10869_s11 + $0x3b] sm:$0x1] %vm5787_vm14, %v7053_v42 }
 0x888   :  { %7027 = vrot.lane.b32.xlu2 %v7018_v4, %s8353_s28 }
 0x88a   :  { %7031 = vrot.lane.b32.xlu1 %v7020_v61, %s8353_s28  ;;  %6935 = vrot.lane.b32.xlu0 %v6925_v62, %s8356_s22  ;;  %v6881_v57 = vpop.permute.xlu2 %6880 }
 0x88b   :  { %7442 = vst.msk [vmem:[%s10869_s11 + $0x77] sm:$0x1] %vm5787_vm14, %v6881_v57 }
 0x88c   :  { %v6809_v20 = vpop.permute.xlu1 %6808  ;;  %v7072_v13 = vpop.permute.xlu0 %7071 }
 0x88d   :  { %6815 = vst.msk [vmem:[%s10869_s11 + $0x56] sm:$0x1] %vm5787_vm14, %v6809_v20 }
 0x88e   :  { %7455 = vst.msk [vmem:[%s10869_s11 + $0x9b] sm:$0x1] %vm5787_vm14, %v7072_v13 }
 0x890   :  { %6933 = vrot.lane.b32.xlu2 %v6924_v41, %s8356_s22 }
 0x892   :  { %6931 = vrot.lane.b32.xlu1 %v6923_v24, %s8356_s22  ;;  %7120 = vrot.lane.b32.xlu0 %v7112_v55, %s8357_s2  ;;  %v6900_v47 = vpop.permute.xlu2 %6899 }
 0x893   :  { %6908 = vst.msk [vmem:[%s10869_s11 + $0x18] sm:$0x1] %vm5787_vm14, %v6900_v47 }
 0x894   :  { %v7055_v21 = vpop.permute.xlu1 %7054  ;;  %v6740_v63 = vpop.permute.xlu0 %6739 }
 0x895   :  { %7061 = vst.msk [vmem:[%s10869_s11 + $0x5b] sm:$0x1] %vm5787_vm14, %v7055_v21 }
 0x898   :  { %7118 = vrot.lane.b32.xlu2 %v7111_v3, %s8357_s2 }
 0x89a   :  { %6937 = vrot.lane.b32.xlu1 %v6926_v35, %s8356_s22  ;;  %7126 = vrot.lane.b32.xlu0 %v7115_v59, %s8357_s2  ;;  %v6738_v23 = vpop.permute.xlu2 %6737  ;;  %s8358_s22 = smov 56  }
 0x89b   :  { %v6750_v0 = vsel %vm6749_vm3, %v6738_v23, %v6740_v63 }
 0x89c   :  { %7433 = vst.msk [vmem:[%s10869_s11 + $0x74] sm:$0x1] %vm5787_vm14, %v6750_v0  ;;  %v7074_v31 = vpop.permute.xlu1 %7073  ;;  %v6864_v16 = vpop.permute.xlu0 %6863 }
 0x89d   :  { %7456 = vst.msk [vmem:[%s10869_s11 + $0xbb] sm:$0x1] %vm5787_vm14, %v7074_v31 }
 0x89e   :  { %6871 = vst.msk [vmem:[%s10869_s11 + $0x37] sm:$0x1] %vm5787_vm14, %v6864_v16 }
 0x8a0   :  { %7124 = vrot.lane.b32.xlu2 %v7114_v27, %s8357_s2 }
 0x8a2   :  { %7116 = vrot.lane.b32.xlu1 %v7110_v1, %s8357_s2  ;;  %7090 = vrot.lane.b32.xlu0 %v7086_v5, %s8358_s22  ;;  %v6833_v43 = vpop.permute.xlu2 %6832 }
 0x8a4   :  { %v6866_v60 = vpop.permute.xlu1 %6865  ;;  %v6883_v39 = vpop.permute.xlu0 %6882 }
 0x8a5   :  { %6872 = vst.msk [vmem:[%s10869_s11 + $0x57] sm:$0x1] %vm5787_vm14, %v6866_v60 }
 0x8a6   :  { %7443 = vst.msk [vmem:[%s10869_s11 + $0x97] sm:$0x1] %vm5787_vm14, %v6883_v39 }
 0x8a8   :  { %7088 = vrot.lane.b32.xlu2 %v7085_v56, %s8358_s22 }
 0x8aa   :  { %7122 = vrot.lane.b32.xlu1 %v7113_v10, %s8357_s2  ;;  %v6744_v19 = vpop.permute.xlu2 %6743 }
 0x8ac   :  { %v6885_v2 = vpop.permute.xlu1 %6884  ;;  %v6902_v38 = vpop.permute.xlu0 %6901 }
 0x8ad   :  { %7444 = vst.msk [vmem:[%s10869_s11 + $0xb7] sm:$0x1] %vm5787_vm14, %v6885_v2 }
 0x8ae   :  { %6909 = vst.msk [vmem:[%s10869_s11 + $0x38] sm:$0x1] %vm5787_vm14, %v6902_v38 }
 0x8b2   :  { %7092 = vrot.lane.b32.xlu1 %v7087_v18, %s8358_s22  ;;  %v6839_v11 = vpop.permute.xlu2 %6838 }
 0x8b4   :  { %v6904_v34 = vpop.permute.xlu1 %6903  ;;  %v6835_v7 = vpop.permute.xlu0 %6834 }
 0x8b5   :  { %6910 = vst.msk [vmem:[%s10869_s11 + $0x58] sm:$0x1] %vm5787_vm14, %v6904_v34  ;;  %v6845_v46 = vsel %vm6844_vm4, %v6833_v43, %v6835_v7 }
 0x8b6   :  { %7439 = vst.msk [vmem:[%s10869_s11 + $0x76] sm:$0x1] %vm5787_vm14, %v6845_v46 }
 0x8ba   :  { %v6956_v9 = vpop.permute.xlu2 %6955 }
 0x8bb   :  { %6964 = vst.msk [vmem:[%s10869_s11 + $0x19] sm:$0x1] %vm5787_vm14, %v6956_v9 }
 0x8bc   :  { %v6742_v26 = vpop.permute.xlu1 %6741  ;;  %v6746_v28 = vpop.permute.xlu0 %6745 }
 0x8bd   :  { %v6751_v25 = vsel %vm6749_vm3, %v6742_v26, %v6744_v19 }
 0x8be   :  { %7434 = vst.msk [vmem:[%s10869_s11 + $0x94] sm:$0x1] %vm5787_vm14, %v6751_v25 }
 0x8c2   :  { %v6975_v14 = vpop.permute.xlu2 %6974 }
 0x8c3   :  { %7448 = vst.msk [vmem:[%s10869_s11 + $0x79] sm:$0x1] %vm5787_vm14, %v6975_v14 }
 0x8c4   :  { %v6748_v6 = vpop.permute.xlu1 %6747  ;;  %v6841_v45 = vpop.permute.xlu0 %6840 }
 0x8c5   :  { %v6752_v49 = vsel %vm6749_vm3, %v6746_v28, %v6748_v6 }
 0x8c6   :  { %7435 = vst.msk [vmem:[%s10869_s11 + $0xb4] sm:$0x1] %vm5787_vm14, %v6752_v49 }
 0x8ca   :  { %v6994_v50 = vpop.permute.xlu2 %6993 }
 0x8cb   :  { %7002 = vst.msk [vmem:[%s10869_s11 + $0x1a] sm:$0x1] %vm5787_vm14, %v6994_v50 }
 0x8cc   :  { %v6837_v33 = vpop.permute.xlu1 %6836  ;;  %v7024_v36 = vpop.permute.xlu0 %7023 }
 0x8cd   :  { %v6846_v17 = vsel %vm6844_vm4, %v6837_v33, %v6839_v11 }
 0x8ce   :  { %7440 = vst.msk [vmem:[%s10869_s11 + $0x96] sm:$0x1] %vm5787_vm14, %v6846_v17 }
 0x8d2   :  { %v7022_v15 = vpop.permute.xlu2 %7021 }
 0x8d3   :  { %v7034_v53 = vsel %vm7033_vm11, %v7022_v15, %v7024_v36 }
 0x8d4   :  { %7451 = vst.msk [vmem:[%s10869_s11 + $0x7a] sm:$0x1] %vm5787_vm14, %v7034_v53  ;;  %v6843_v8 = vpop.permute.xlu1 %6842  ;;  %v6958_v42 = vpop.permute.xlu0 %6957 }
 0x8d5   :  { %v6847_v58 = vsel %vm6844_vm4, %v6841_v45, %v6843_v8  ;;  %6965 = vst.msk [vmem:[%s10869_s11 + $0x39] sm:$0x1] %vm5787_vm14, %v6958_v42 }
 0x8d6   :  { %7441 = vst.msk [vmem:[%s10869_s11 + $0xb6] sm:$0x1] %vm5787_vm14, %v6847_v58 }
 0x8da   :  { %v6928_v32 = vpop.permute.xlu2 %6927 }
 0x8dc   :  { %v6960_v4 = vpop.permute.xlu1 %6959  ;;  %v6977_v37 = vpop.permute.xlu0 %6976 }
 0x8dd   :  { %6966 = vst.msk [vmem:[%s10869_s11 + $0x59] sm:$0x1] %vm5787_vm14, %v6960_v4 }
 0x8de   :  { %7449 = vst.msk [vmem:[%s10869_s11 + $0x99] sm:$0x1] %vm5787_vm14, %v6977_v37 }
 0x8e2   :  { %v7028_v61 = vpop.permute.xlu2 %7027 }
 0x8e4   :  { %v6979_v62 = vpop.permute.xlu1 %6978  ;;  %v6996_v22 = vpop.permute.xlu0 %6995 }
 0x8e5   :  { %7450 = vst.msk [vmem:[%s10869_s11 + $0xb9] sm:$0x1] %vm5787_vm14, %v6979_v62 }
 0x8e6   :  { %7003 = vst.msk [vmem:[%s10869_s11 + $0x3a] sm:$0x1] %vm5787_vm14, %v6996_v22 }
 0x8ea   :  { %v6934_v30 = vpop.permute.xlu2 %6933 }
 0x8ec   :  { %v6998_v57 = vpop.permute.xlu1 %6997  ;;  %v6930_v51 = vpop.permute.xlu0 %6929 }
 0x8ed   :  { %7004 = vst.msk [vmem:[%s10869_s11 + $0x5a] sm:$0x1] %vm5787_vm14, %v6998_v57  ;;  %v6939_v20 = vsel %vm10871_vm2, %v6928_v32, %v6930_v51 }
 0x8ee   :  { %7445 = vst.msk [vmem:[%s10869_s11 + $0x78] sm:$0x1] %vm5787_vm14, %v6939_v20 }
 0x8f2   :  { %v7119_v13 = vpop.permute.xlu2 %7118 }
 0x8f4   :  { %v7026_v29 = vpop.permute.xlu1 %7025  ;;  %v7030_v41 = vpop.permute.xlu0 %7029 }
 0x8f5   :  { %v7035_v24 = vsel %vm7033_vm11, %v7026_v29, %v7028_v61 }
 0x8f6   :  { %7452 = vst.msk [vmem:[%s10869_s11 + $0x9a] sm:$0x1] %vm5787_vm14, %v7035_v24 }
 0x8fa   :  { %v7125_v55 = vpop.permute.xlu2 %7124 }
 0x8fc   :  { %v7032_v52 = vpop.permute.xlu1 %7031  ;;  %v6936_v47 = vpop.permute.xlu0 %6935 }
 0x8fd   :  { %v7036_v44 = vsel %vm7033_vm11, %v7030_v41, %v7032_v52 }
 0x8fe   :  { %7453 = vst.msk [vmem:[%s10869_s11 + $0xba] sm:$0x1] %vm5787_vm14, %v7036_v44 }
 0x902   :  { %v7089_v21 = vpop.permute.xlu2 %7088 }
 0x903   :  { %7097 = vst.msk [vmem:[%s10869_s11 + $0x1c] sm:$0x1] %vm5787_vm14, %v7089_v21 }
 0x904   :  { %v6932_v63 = vpop.permute.xlu1 %6931  ;;  %v7121_v54 = vpop.permute.xlu0 %7120 }
 0x905   :  { %v6940_v3 = vsel %vm10872_vm12, %v6932_v63, %v6934_v30 }
 0x906   :  { %7446 = vst.msk [vmem:[%s10869_s11 + $0x98] sm:$0x1] %vm5787_vm14, %v6940_v3 }
 0x90c   :  { %v6938_v35 = vpop.permute.xlu1 %6937  ;;  %v7127_v59 = vpop.permute.xlu0 %7126 }
 0x90d   :  { %v6941_v48 = vsel %vm10873_vm5, %v6936_v47, %v6938_v35  ;;  %v7131_v23 = vsel %vm7128_vm13, %v7125_v55, %v7127_v59 }
 0x90e   :  { %7447 = vst.msk [vmem:[%s10869_s11 + $0xb8] sm:$0x1] %vm5787_vm14, %v6941_v48 }
 0x90f   :  { %7459 = vst.msk [vmem:[%s10869_s11 + $0xbc] sm:$0x1] %vm5787_vm14, %v7131_v23 }
 0x914   :  { %v7117_v0 = vpop.permute.xlu1 %7116  ;;  %v7091_v31 = vpop.permute.xlu0 %7090 }
 0x915   :  { %v7129_v16 = vsel %vm7128_vm13, %v7117_v0, %v7119_v13  ;;  %7098 = vst.msk [vmem:[%s10869_s11 + $0x3c] sm:$0x1] %vm5787_vm14, %v7091_v31 }
 0x916   :  { %7457 = vst.msk [vmem:[%s10869_s11 + $0x7c] sm:$0x1] %vm5787_vm14, %v7129_v16 }
 0x91c   :  { %v7123_v40 = vpop.permute.xlu1 %7122 }
 0x91d   :  { %v7130_v27 = vsel %vm7128_vm13, %v7121_v54, %v7123_v40 }
 0x91e   :  { %7458 = vst.msk [vmem:[%s10869_s11 + $0x9c] sm:$0x1] %vm5787_vm14, %v7130_v27 }
 0x924   :  { %v7093_v1 = vpop.permute.xlu1 %7092 }
 0x925   :  { %7099 = vst.msk [vmem:[%s10869_s11 + $0x5c] sm:$0x1] %vm5787_vm14, %v7093_v1 }
 0x926   :  { %7142 = vsyncpa [#allocation8], 1 }
 0x927   :  { %7143 = vsyncpa [#allocation10], 1 }
 0x928   :  { %7144 = vsyncpa [#allocation13], 1 }
 0x929   :  { %7145 = vsyncpa [#allocation16], 1 }
 0x92a   :  { %7146 = vsyncpa [#allocation19], 1 }
 0x92b   :  { %7147 = vsyncpa [#allocation22], 1 }

</bundles_post_ra>
